<compile_context>
chip_gen: v7x
topology: tpu7x:2x2x1
jax: 0.10.0
libtpu: 0.0.40
codegen_flags: <defaults>
</compile_context>

<pallas_src>
import numpy as np
import jax
import jax.numpy as jnp
from jax.experimental import pallas as pl
from jax.experimental.pallas import tpu as pltpu

_VMEM_LIMIT = 32 * 1024 * 1024   # ~8 MB actually used; well under v7x's 64 MiB physical VMEM


# ----------------------------------------------------------------------------
# Fused whole-network kernel (one image per grid step).
#
# Row layout ("pitch 10"): a spatial grid (P, Q) is stored as rows r = P*10 + Q
# of a 2-D (rows, channels) matrix.  With that pitch, a stride-1 KxK conv is a
# sum over kernel offsets (ki, kj) of  A[off : off+rows, :] @ W[ki,kj]  with
# off = ki*10 + kj  -- contiguous row slices only, no strided access.
# Extra rows at the end are padding so every slice stays in-bounds; the values
# they produce are garbage but are never read by a *valid* downstream position.
# ----------------------------------------------------------------------------
def _pg_fused_kernel(p_ref, w1_ref, b1_ref, w2_ref, b2_ref, w3_ref, b3_ref,
                     wf1_ref, bf1_ref, wf2_ref, bf2_ref, o_ref):
    p = p_ref[0]                                   # (112, 4*kfeat) bf16 conv1 patches
    kfeat = w1_ref.shape[0]                        # 8*8*in_channels (= 256 for C=4)
    w1 = w1_ref[...]                               # (kfeat, 32) bf16, shared by all 4 sub-positions

    # ---- conv1 (8x8 stride 4 -> 20x20x32), produced directly in space-to-depth
    #      form: rows = 10x10 super-positions, 128 channels = (sub a, sub b, 32 ch)
    subs = []
    for s in range(4):                             # s = a*2 + b
        y = jnp.dot(p[:, s * kfeat:(s + 1) * kfeat], w1,
                    preferred_element_type=jnp.float32)          # (112, 32)
        subs.append(jnp.maximum(y + b1_ref[...], 0.0))
    a1 = jnp.concatenate(subs, axis=1).astype(jnp.bfloat16)      # (112, 128), pitch 10

    # ---- conv2 (4x4 stride 2 -> 9x9x64) == 2x2 stride-1 conv on the s2d grid
    acc = jnp.zeros((96, 64), jnp.float32)
    for k, off in enumerate((0, 1, 10, 11)):       # (ki', kj') in {0,1}^2
        acc = acc + jnp.dot(a1[off:off + 96, :], w2_ref[k],
                            preferred_element_type=jnp.float32)
    a2 = jnp.maximum(acc + b2_ref[...], 0.0).astype(jnp.bfloat16)  # (96, 64), 9x9 valid, pitch 10

    # ---- conv3 (3x3 stride 1 -> 7x7x64)
    acc = jnp.zeros((70, 64), jnp.float32)
    for ki in range(3):
        for kj in range(3):
            off = ki * 10 + kj
            acc = acc + jnp.dot(a2[off:off + 70, :], w3_ref[ki * 3 + kj],
                                preferred_element_type=jnp.float32)
    a3 = jnp.maximum(acc + b3_ref[...], 0.0).astype(jnp.bfloat16)  # (70, 64), 7x7 valid, pitch 10

    # ---- fc1 (3136 -> 512) + ReLU, flatten-free: sum over the 49 valid positions
    h = jnp.zeros((1, 512), jnp.float32)
    for u in range(7):
        for v in range(7):
            r = u * 10 + v
            h = h + jnp.dot(a3[r:r + 1, :], wf1_ref[u * 7 + v],
                            preferred_element_type=jnp.float32)
    h = jnp.maximum(h + bf1_ref[...], 0.0)                         # (1, 512)

    # ---- fc2 (512 -> 1) as a lane reduction + sigmoid (EUP exp + approx recip)
    logit = jnp.sum(h * wf2_ref[...], axis=-1, keepdims=True) + bf2_ref[...]   # (1, 1)
    o_ref[0] = pl.reciprocal(1.0 + jnp.exp(-logit), approx=True)


# ----------------------------------------------------------------------------
# Host-side (XLA) prep of the conv1 patch tensor from the raw NCHW input.
# rows r = P*10 + Q (10x10 super-positions, padded to 112); columns =
# (a, b) output sub-position block (4 of them) x (ki, kj, c) patch feature.
# ----------------------------------------------------------------------------
def conv1_patches(x_nchw):
    B, C, H, W = x_nchw.shape
    assert H == 84 and W == 84, "PG's fc layer requires 84x84 inputs (64*7*7 features)"
    x = jnp.transpose(x_nchw, (0, 2, 3, 1))                        # NHWC, once
    cols = []
    for i in range(8):
        for j in range(8):
            cols.append(x[:, i:i + 4 * 20:4, j:j + 4 * 20:4, :])   # (B, 20, 20, C)
    p = jnp.stack(cols, axis=3).reshape(B, 20, 20, 64 * C)         # feature order (ki, kj, c)
    # regroup output positions (oh, ow) = (2P+a, 2Q+b) -> rows (P, Q), blocks (a, b)
    p = p.reshape(B, 10, 2, 10, 2, 64 * C)
    p = jnp.transpose(p, (0, 1, 3, 2, 4, 5)).reshape(B, 100, 4 * 64 * C)
    p = jnp.pad(p, ((0, 0), (0, 12), (0, 0)))                      # rows 100..111 = padding
    return p.astype(jnp.bfloat16)


# ----------------------------------------------------------------------------
# Parameters: deterministic PyTorch-like init (f32), then one-time prep into
# kernel-ready bf16 layouts (done OUTSIDE the jitted forward).
# ----------------------------------------------------------------------------
def init_params(key, in_channels):
    ks = jax.random.split(key, 10)

    def u(k, shape, fan_in):
        bound = 1.0 / np.sqrt(fan_in)
        return jax.random.uniform(k, shape, jnp.float32, -bound, bound)

    return {
        "c1_w": u(ks[0], (32, in_channels, 8, 8), in_channels * 8 * 8),
        "c1_b": u(ks[1], (32,), in_channels * 8 * 8),
        "c2_w": u(ks[2], (64, 32, 4, 4), 32 * 4 * 4),
        "c2_b": u(ks[3], (64,), 32 * 4 * 4),
        "c3_w": u(ks[4], (64, 64, 3, 3), 64 * 3 * 3),
        "c3_b": u(ks[5], (64,), 64 * 3 * 3),
        "fc1_w": u(ks[6], (512, 64 * 7 * 7), 64 * 7 * 7),   # PyTorch (out, in), cols (c, y, x)
        "fc1_b": u(ks[7], (512,), 64 * 7 * 7),
        "fc2_w": u(ks[8], (1, 512), 512),
        "fc2_b": u(ks[9], (1,), 512),
    }


def prepare_params(params):
    c1 = params["c1_w"]                                            # (32, C, 8, 8)
    oc1, C = c1.shape[0], c1.shape[1]
    w1 = jnp.transpose(c1, (2, 3, 1, 0)).reshape(8 * 8 * C, oc1).astype(jnp.bfloat16)

    c2 = params["c2_w"].reshape(64, 32, 2, 2, 2, 2)                # (oc2, c2, ki', a, kj', b)
    w2 = jnp.transpose(c2, (2, 4, 3, 5, 1, 0)).reshape(4, 128, 64).astype(jnp.bfloat16)

    c3 = params["c3_w"]                                            # (64, 64, 3, 3)
    w3 = jnp.transpose(c3, (2, 3, 1, 0)).reshape(9, 64, 64).astype(jnp.bfloat16)

    f1 = params["fc1_w"].reshape(512, 64, 7, 7)                    # (h, c3, u, v)
    wf1 = jnp.transpose(f1, (2, 3, 1, 0)).reshape(49, 64, 512).astype(jnp.bfloat16)

    return {
        "w1": w1, "b1": params["c1_b"].reshape(1, 32).astype(jnp.float32),
        "w2": w2, "b2": params["c2_b"].reshape(1, 64).astype(jnp.float32),
        "w3": w3, "b3": params["c3_b"].reshape(1, 64).astype(jnp.float32),
        "wf1": wf1, "bf1": params["fc1_b"].reshape(1, 512).astype(jnp.float32),
        "wf2": params["fc2_w"].reshape(1, 512).astype(jnp.float32),
        "bf2": params["fc2_b"].reshape(1, 1).astype(jnp.float32),
    }


# ----------------------------------------------------------------------------
# PG.forward: one fused pallas_call over a batch-parallel grid.
# ----------------------------------------------------------------------------
def pg_forward(prep, x):
    B = x.shape[0]
    patches = conv1_patches(x)                                     # (B, 112, 4*kfeat) bf16
    pw = patches.shape[-1]
    kfeat = prep["w1"].shape[0]

    out = pl.pallas_call(
        _pg_fused_kernel,
        out_shape=jax.ShapeDtypeStruct((B, 1, 1), jnp.float32),
        grid=(B,),
        in_specs=[
            pl.BlockSpec((1, 112, pw), lambda i: (i, 0, 0)),       # per-image patch tile (streamed)
            pl.BlockSpec((kfeat, 32), lambda i: (0, 0)),           # resident conv1 weight
            pl.BlockSpec((1, 32), lambda i: (0, 0)),
            pl.BlockSpec((4, 128, 64), lambda i: (0, 0, 0)),       # resident conv2 weight (s2d form)
            pl.BlockSpec((1, 64), lambda i: (0, 0)),
            pl.BlockSpec((9, 64, 64), lambda i: (0, 0, 0)),        # resident conv3 weight
            pl.BlockSpec((1, 64), lambda i: (0, 0)),
            pl.BlockSpec((49, 64, 512), lambda i: (0, 0, 0)),      # resident fc1 weight (3.2 MB bf16)
            pl.BlockSpec((1, 512), lambda i: (0, 0)),
            pl.BlockSpec((1, 512), lambda i: (0, 0)),              # fc2 weight as a row vector
            pl.BlockSpec((1, 1), lambda i: (0, 0)),
        ],
        out_specs=pl.BlockSpec((1, 1, 1), lambda i: (i, 0, 0)),
        compiler_params=pltpu.CompilerParams(
            dimension_semantics=("parallel",),
            vmem_limit_bytes=_VMEM_LIMIT),
    )(patches, prep["w1"], prep["b1"], prep["w2"], prep["b2"],
      prep["w3"], prep["b3"], prep["wf1"], prep["bf1"],
      prep["wf2"], prep["bf2"])
    return out.reshape(B, 1)


# Pure f32 JAX reference (mirrors the PyTorch module exactly) for correctness.
def reference_forward(params, x):
    def conv(x, w, b, stride):
        y = jax.lax.conv_general_dilated(
            x, w, (stride, stride), "VALID",
            dimension_numbers=("NCHW", "OIHW", "NCHW"),
            precision=jax.lax.Precision.HIGHEST)
        return jax.nn.relu(y + b[None, :, None, None])

    h = conv(x, params["c1_w"], params["c1_b"], 4)
    h = conv(h, params["c2_w"], params["c2_b"], 2)
    h = conv(h, params["c3_w"], params["c3_b"], 1)
    flat = h.reshape(x.shape[0], -1)
    h = jax.nn.relu(flat @ params["fc1_w"].T + params["fc1_b"])
    return jax.nn.sigmoid(h @ params["fc2_w"].T + params["fc2_b"])


if __name__ == "__main__":
    key = jax.random.PRNGKey(0)
    pkey, xkey = jax.random.split(key)

    # 84x84 spatial is dictated by the module's fc (64*7*7 input features).
    B, C, H, W = 2, 4, 84, 84
    params = init_params(pkey, C)
    prep = prepare_params(params)
    x = jax.random.uniform(xkey, (B, C, H, W), jnp.float32)

    out = jax.jit(pg_forward)(prep, x)
    out = jax.block_until_ready(out)

    ref = reference_forward(params, x)
    # bf16 MXU inputs + bf16 inter-layer activations vs f32 reference -> bf16-level tolerance.
    np.testing.assert_allclose(np.asarray(out), np.asarray(ref), rtol=2e-2, atol=2e-2)
    assert out.shape == (B, 1)
    print("KERNEL_OK")
</pallas_src>

<mosaic_0001>
module attributes {stable_mosaic.version = 11 : i64} {
  func.func @_pg_fused_kernel(%arg0: i32, %arg1: memref<1x112x1024xbf16, #tpu.memory_space<vmem>>, %arg2: memref<256x32xbf16, #tpu.memory_space<vmem>>, %arg3: memref<1x32xf32, #tpu.memory_space<vmem>>, %arg4: memref<4x128x64xbf16, #tpu.memory_space<vmem>>, %arg5: memref<1x64xf32, #tpu.memory_space<vmem>>, %arg6: memref<9x64x64xbf16, #tpu.memory_space<vmem>>, %arg7: memref<1x64xf32, #tpu.memory_space<vmem>>, %arg8: memref<49x64x512xbf16, #tpu.memory_space<vmem>>, %arg9: memref<1x512xf32, #tpu.memory_space<vmem>>, %arg10: memref<1x512xf32, #tpu.memory_space<vmem>>, %arg11: memref<1x1xf32, #tpu.memory_space<vmem>>, %arg12: memref<1x1x1xf32, #tpu.memory_space<vmem>>) attributes {dimension_semantics = [#tpu.dimension_semantics<parallel>], iteration_bounds = array<i64: 2>, scalar_prefetch = 0 : i64, scratch_operands = 0 : i64, tpu.core_type = #tpu.core_type<tc>, window_params = [{transform_indices = @transform_0, window_bounds = array<i64: 1, 112, 1024>}, {pipeline_mode = #tpu.pipeline_mode<synchronous>, transform_indices = @transform_1, window_bounds = array<i64: 256, 32>}, {pipeline_mode = #tpu.pipeline_mode<synchronous>, transform_indices = @transform_2, window_bounds = array<i64: 1, 32>}, {pipeline_mode = #tpu.pipeline_mode<synchronous>, transform_indices = @transform_3, window_bounds = array<i64: 4, 128, 64>}, {pipeline_mode = #tpu.pipeline_mode<synchronous>, transform_indices = @transform_4, window_bounds = array<i64: 1, 64>}, {pipeline_mode = #tpu.pipeline_mode<synchronous>, transform_indices = @transform_5, window_bounds = array<i64: 9, 64, 64>}, {pipeline_mode = #tpu.pipeline_mode<synchronous>, transform_indices = @transform_6, window_bounds = array<i64: 1, 64>}, {pipeline_mode = #tpu.pipeline_mode<synchronous>, transform_indices = @transform_7, window_bounds = array<i64: 49, 64, 512>}, {pipeline_mode = #tpu.pipeline_mode<synchronous>, transform_indices = @transform_8, window_bounds = array<i64: 1, 512>}, {pipeline_mode = #tpu.pipeline_mode<synchronous>, transform_indices = @transform_9, window_bounds = array<i64: 1, 512>}, {pipeline_mode = #tpu.pipeline_mode<synchronous>, transform_indices = @transform_10, window_bounds = array<i64: 1, 1>}, {transform_indices = @transform_11, window_bounds = array<i64: 1, 1, 1>}]} {
    %c0 = arith.constant 0 : index
    %c0_0 = arith.constant 0 : index
    %c0_1 = arith.constant 0 : index
    %0 = vector.load %arg1[%c0, %c0_0, %c0_1] : memref<1x112x1024xbf16, #tpu.memory_space<vmem>>, vector<1x112x1024xbf16>
    %1 = vector.shape_cast %0 : vector<1x112x1024xbf16> to vector<112x1024xbf16>
    %c0_2 = arith.constant 0 : index
    %c0_3 = arith.constant 0 : index
    %2 = vector.load %arg2[%c0_2, %c0_3] : memref<256x32xbf16, #tpu.memory_space<vmem>>, vector<256x32xbf16>
    %3 = vector.extract_strided_slice %1 {offsets = [0, 0], sizes = [112, 256], strides = [1, 1]} : vector<112x1024xbf16> to vector<112x256xbf16>
    %cst = arith.constant dense<0.000000e+00> : vector<112x32xf32>
    %4 = tpu.matmul %3, %2, %cst {dimension_numbers = #tpu.dot_dimension_numbers<[1], [0], [0], [1], [0, 0, 1, 1], [], []>} : vector<112x256xbf16>, vector<256x32xbf16>, vector<112x32xf32> -> vector<112x32xf32>
    %c0_4 = arith.constant 0 : index
    %c0_5 = arith.constant 0 : index
    %5 = vector.load %arg3[%c0_4, %c0_5] : memref<1x32xf32, #tpu.memory_space<vmem>>, vector<1x32xf32>
    %6 = vector.broadcast %5 : vector<1x32xf32> to vector<112x32xf32>
    %7 = arith.addf %4, %6 : vector<112x32xf32>
    %cst_6 = arith.constant 0.000000e+00 : f32
    %8 = vector.broadcast %cst_6 : f32 to vector<112x32xf32>
    %9 = arith.maximumf %7, %8 : vector<112x32xf32>
    %10 = vector.extract_strided_slice %1 {offsets = [0, 256], sizes = [112, 256], strides = [1, 1]} : vector<112x1024xbf16> to vector<112x256xbf16>
    %cst_7 = arith.constant dense<0.000000e+00> : vector<112x32xf32>
    %11 = tpu.matmul %10, %2, %cst_7 {dimension_numbers = #tpu.dot_dimension_numbers<[1], [0], [0], [1], [0, 0, 1, 1], [], []>} : vector<112x256xbf16>, vector<256x32xbf16>, vector<112x32xf32> -> vector<112x32xf32>
    %c0_8 = arith.constant 0 : index
    %c0_9 = arith.constant 0 : index
    %12 = vector.load %arg3[%c0_8, %c0_9] : memref<1x32xf32, #tpu.memory_space<vmem>>, vector<1x32xf32>
    %13 = vector.broadcast %12 : vector<1x32xf32> to vector<112x32xf32>
    %14 = arith.addf %11, %13 : vector<112x32xf32>
    %cst_10 = arith.constant 0.000000e+00 : f32
    %15 = vector.broadcast %cst_10 : f32 to vector<112x32xf32>
    %16 = arith.maximumf %14, %15 : vector<112x32xf32>
    %17 = vector.extract_strided_slice %1 {offsets = [0, 512], sizes = [112, 256], strides = [1, 1]} : vector<112x1024xbf16> to vector<112x256xbf16>
    %cst_11 = arith.constant dense<0.000000e+00> : vector<112x32xf32>
    %18 = tpu.matmul %17, %2, %cst_11 {dimension_numbers = #tpu.dot_dimension_numbers<[1], [0], [0], [1], [0, 0, 1, 1], [], []>} : vector<112x256xbf16>, vector<256x32xbf16>, vector<112x32xf32> -> vector<112x32xf32>
    %c0_12 = arith.constant 0 : index
    %c0_13 = arith.constant 0 : index
    %19 = vector.load %arg3[%c0_12, %c0_13] : memref<1x32xf32, #tpu.memory_space<vmem>>, vector<1x32xf32>
    %20 = vector.broadcast %19 : vector<1x32xf32> to vector<112x32xf32>
    %21 = arith.addf %18, %20 : vector<112x32xf32>
    %cst_14 = arith.constant 0.000000e+00 : f32
    %22 = vector.broadcast %cst_14 : f32 to vector<112x32xf32>
    %23 = arith.maximumf %21, %22 : vector<112x32xf32>
    %24 = vector.extract_strided_slice %1 {offsets = [0, 768], sizes = [112, 256], strides = [1, 1]} : vector<112x1024xbf16> to vector<112x256xbf16>
    %cst_15 = arith.constant dense<0.000000e+00> : vector<112x32xf32>
    %25 = tpu.matmul %24, %2, %cst_15 {dimension_numbers = #tpu.dot_dimension_numbers<[1], [0], [0], [1], [0, 0, 1, 1], [], []>} : vector<112x256xbf16>, vector<256x32xbf16>, vector<112x32xf32> -> vector<112x32xf32>
    %c0_16 = arith.constant 0 : index
    %c0_17 = arith.constant 0 : index
    %26 = vector.load %arg3[%c0_16, %c0_17] : memref<1x32xf32, #tpu.memory_space<vmem>>, vector<1x32xf32>
    %27 = vector.broadcast %26 : vector<1x32xf32> to vector<112x32xf32>
    %28 = arith.addf %25, %27 : vector<112x32xf32>
    %cst_18 = arith.constant 0.000000e+00 : f32
    %29 = vector.broadcast %cst_18 : f32 to vector<112x32xf32>
    %30 = arith.maximumf %28, %29 : vector<112x32xf32>
    %31 = tpu.concatenate %9, %16, %23, %30 in 1 : vector<112x32xf32>, vector<112x32xf32>, vector<112x32xf32>, vector<112x32xf32> -> vector<112x128xf32>
    %32 = arith.truncf %31 : vector<112x128xf32> to vector<112x128xbf16>
    %cst_19 = arith.constant 0.000000e+00 : f32
    %33 = vector.broadcast %cst_19 : f32 to vector<96x64xf32>
    %34 = vector.extract_strided_slice %32 {offsets = [0, 0], sizes = [96, 128], strides = [1, 1]} : vector<112x128xbf16> to vector<96x128xbf16>
    %c0_20 = arith.constant 0 : index
    %c0_21 = arith.constant 0 : index
    %c0_22 = arith.constant 0 : index
    %35 = vector.load %arg4[%c0_20, %c0_21, %c0_22] : memref<4x128x64xbf16, #tpu.memory_space<vmem>>, vector<1x128x64xbf16>
    %36 = vector.shape_cast %35 : vector<1x128x64xbf16> to vector<128x64xbf16>
    %cst_23 = arith.constant dense<0.000000e+00> : vector<96x64xf32>
    %37 = tpu.matmul %34, %36, %cst_23 {dimension_numbers = #tpu.dot_dimension_numbers<[1], [0], [0], [1], [0, 0, 1, 1], [], []>} : vector<96x128xbf16>, vector<128x64xbf16>, vector<96x64xf32> -> vector<96x64xf32>
    %38 = arith.addf %33, %37 : vector<96x64xf32>
    %39 = vector.extract_strided_slice %32 {offsets = [1, 0], sizes = [96, 128], strides = [1, 1]} : vector<112x128xbf16> to vector<96x128xbf16>
    %c1 = arith.constant 1 : index
    %c0_24 = arith.constant 0 : index
    %c0_25 = arith.constant 0 : index
    %40 = vector.load %arg4[%c1, %c0_24, %c0_25] : memref<4x128x64xbf16, #tpu.memory_space<vmem>>, vector<1x128x64xbf16>
    %41 = vector.shape_cast %40 : vector<1x128x64xbf16> to vector<128x64xbf16>
    %cst_26 = arith.constant dense<0.000000e+00> : vector<96x64xf32>
    %42 = tpu.matmul %39, %41, %cst_26 {dimension_numbers = #tpu.dot_dimension_numbers<[1], [0], [0], [1], [0, 0, 1, 1], [], []>} : vector<96x128xbf16>, vector<128x64xbf16>, vector<96x64xf32> -> vector<96x64xf32>
    %43 = arith.addf %38, %42 : vector<96x64xf32>
    %44 = vector.extract_strided_slice %32 {offsets = [10, 0], sizes = [96, 128], strides = [1, 1]} : vector<112x128xbf16> to vector<96x128xbf16>
    %c2 = arith.constant 2 : index
    %c0_27 = arith.constant 0 : index
    %c0_28 = arith.constant 0 : index
    %45 = vector.load %arg4[%c2, %c0_27, %c0_28] : memref<4x128x64xbf16, #tpu.memory_space<vmem>>, vector<1x128x64xbf16>
    %46 = vector.shape_cast %45 : vector<1x128x64xbf16> to vector<128x64xbf16>
    %cst_29 = arith.constant dense<0.000000e+00> : vector<96x64xf32>
    %47 = tpu.matmul %44, %46, %cst_29 {dimension_numbers = #tpu.dot_dimension_numbers<[1], [0], [0], [1], [0, 0, 1, 1], [], []>} : vector<96x128xbf16>, vector<128x64xbf16>, vector<96x64xf32> -> vector<96x64xf32>
    %48 = arith.addf %43, %47 : vector<96x64xf32>
    %49 = vector.extract_strided_slice %32 {offsets = [11, 0], sizes = [96, 128], strides = [1, 1]} : vector<112x128xbf16> to vector<96x128xbf16>
    %c3 = arith.constant 3 : index
    %c0_30 = arith.constant 0 : index
    %c0_31 = arith.constant 0 : index
    %50 = vector.load %arg4[%c3, %c0_30, %c0_31] : memref<4x128x64xbf16, #tpu.memory_space<vmem>>, vector<1x128x64xbf16>
    %51 = vector.shape_cast %50 : vector<1x128x64xbf16> to vector<128x64xbf16>
    %cst_32 = arith.constant dense<0.000000e+00> : vector<96x64xf32>
    %52 = tpu.matmul %49, %51, %cst_32 {dimension_numbers = #tpu.dot_dimension_numbers<[1], [0], [0], [1], [0, 0, 1, 1], [], []>} : vector<96x128xbf16>, vector<128x64xbf16>, vector<96x64xf32> -> vector<96x64xf32>
    %53 = arith.addf %48, %52 : vector<96x64xf32>
    %c0_33 = arith.constant 0 : index
    %c0_34 = arith.constant 0 : index
    %54 = vector.load %arg5[%c0_33, %c0_34] : memref<1x64xf32, #tpu.memory_space<vmem>>, vector<1x64xf32>
    %55 = vector.broadcast %54 : vector<1x64xf32> to vector<96x64xf32>
    %56 = arith.addf %53, %55 : vector<96x64xf32>
    %cst_35 = arith.constant 0.000000e+00 : f32
    %57 = vector.broadcast %cst_35 : f32 to vector<96x64xf32>
    %58 = arith.maximumf %56, %57 : vector<96x64xf32>
    %59 = arith.truncf %58 : vector<96x64xf32> to vector<96x64xbf16>
    %cst_36 = arith.constant 0.000000e+00 : f32
    %60 = vector.broadcast %cst_36 : f32 to vector<70x64xf32>
    %61 = vector.extract_strided_slice %59 {offsets = [0, 0], sizes = [70, 64], strides = [1, 1]} : vector<96x64xbf16> to vector<70x64xbf16>
    %c0_37 = arith.constant 0 : index
    %c0_38 = arith.constant 0 : index
    %c0_39 = arith.constant 0 : index
    %62 = vector.load %arg6[%c0_37, %c0_38, %c0_39] : memref<9x64x64xbf16, #tpu.memory_space<vmem>>, vector<1x64x64xbf16>
    %63 = vector.shape_cast %62 : vector<1x64x64xbf16> to vector<64x64xbf16>
    %cst_40 = arith.constant dense<0.000000e+00> : vector<70x64xf32>
    %64 = tpu.matmul %61, %63, %cst_40 {dimension_numbers = #tpu.dot_dimension_numbers<[1], [0], [0], [1], [0, 0, 1, 1], [], []>} : vector<70x64xbf16>, vector<64x64xbf16>, vector<70x64xf32> -> vector<70x64xf32>
    %65 = arith.addf %60, %64 : vector<70x64xf32>
    %66 = vector.extract_strided_slice %59 {offsets = [1, 0], sizes = [70, 64], strides = [1, 1]} : vector<96x64xbf16> to vector<70x64xbf16>
    %c1_41 = arith.constant 1 : index
    %c0_42 = arith.constant 0 : index
    %c0_43 = arith.constant 0 : index
    %67 = vector.load %arg6[%c1_41, %c0_42, %c0_43] : memref<9x64x64xbf16, #tpu.memory_space<vmem>>, vector<1x64x64xbf16>
    %68 = vector.shape_cast %67 : vector<1x64x64xbf16> to vector<64x64xbf16>
    %cst_44 = arith.constant dense<0.000000e+00> : vector<70x64xf32>
    %69 = tpu.matmul %66, %68, %cst_44 {dimension_numbers = #tpu.dot_dimension_numbers<[1], [0], [0], [1], [0, 0, 1, 1], [], []>} : vector<70x64xbf16>, vector<64x64xbf16>, vector<70x64xf32> -> vector<70x64xf32>
    %70 = arith.addf %65, %69 : vector<70x64xf32>
    %71 = vector.extract_strided_slice %59 {offsets = [2, 0], sizes = [70, 64], strides = [1, 1]} : vector<96x64xbf16> to vector<70x64xbf16>
    %c2_45 = arith.constant 2 : index
    %c0_46 = arith.constant 0 : index
    %c0_47 = arith.constant 0 : index
    %72 = vector.load %arg6[%c2_45, %c0_46, %c0_47] : memref<9x64x64xbf16, #tpu.memory_space<vmem>>, vector<1x64x64xbf16>
    %73 = vector.shape_cast %72 : vector<1x64x64xbf16> to vector<64x64xbf16>
    %cst_48 = arith.constant dense<0.000000e+00> : vector<70x64xf32>
    %74 = tpu.matmul %71, %73, %cst_48 {dimension_numbers = #tpu.dot_dimension_numbers<[1], [0], [0], [1], [0, 0, 1, 1], [], []>} : vector<70x64xbf16>, vector<64x64xbf16>, vector<70x64xf32> -> vector<70x64xf32>
    %75 = arith.addf %70, %74 : vector<70x64xf32>
    %76 = vector.extract_strided_slice %59 {offsets = [10, 0], sizes = [70, 64], strides = [1, 1]} : vector<96x64xbf16> to vector<70x64xbf16>
    %c3_49 = arith.constant 3 : index
    %c0_50 = arith.constant 0 : index
    %c0_51 = arith.constant 0 : index
    %77 = vector.load %arg6[%c3_49, %c0_50, %c0_51] : memref<9x64x64xbf16, #tpu.memory_space<vmem>>, vector<1x64x64xbf16>
    %78 = vector.shape_cast %77 : vector<1x64x64xbf16> to vector<64x64xbf16>
    %cst_52 = arith.constant dense<0.000000e+00> : vector<70x64xf32>
    %79 = tpu.matmul %76, %78, %cst_52 {dimension_numbers = #tpu.dot_dimension_numbers<[1], [0], [0], [1], [0, 0, 1, 1], [], []>} : vector<70x64xbf16>, vector<64x64xbf16>, vector<70x64xf32> -> vector<70x64xf32>
    %80 = arith.addf %75, %79 : vector<70x64xf32>
    %81 = vector.extract_strided_slice %59 {offsets = [11, 0], sizes = [70, 64], strides = [1, 1]} : vector<96x64xbf16> to vector<70x64xbf16>
    %c4 = arith.constant 4 : index
    %c0_53 = arith.constant 0 : index
    %c0_54 = arith.constant 0 : index
    %82 = vector.load %arg6[%c4, %c0_53, %c0_54] : memref<9x64x64xbf16, #tpu.memory_space<vmem>>, vector<1x64x64xbf16>
    %83 = vector.shape_cast %82 : vector<1x64x64xbf16> to vector<64x64xbf16>
    %cst_55 = arith.constant dense<0.000000e+00> : vector<70x64xf32>
    %84 = tpu.matmul %81, %83, %cst_55 {dimension_numbers = #tpu.dot_dimension_numbers<[1], [0], [0], [1], [0, 0, 1, 1], [], []>} : vector<70x64xbf16>, vector<64x64xbf16>, vector<70x64xf32> -> vector<70x64xf32>
    %85 = arith.addf %80, %84 : vector<70x64xf32>
    %86 = vector.extract_strided_slice %59 {offsets = [12, 0], sizes = [70, 64], strides = [1, 1]} : vector<96x64xbf16> to vector<70x64xbf16>
    %c5 = arith.constant 5 : index
    %c0_56 = arith.constant 0 : index
    %c0_57 = arith.constant 0 : index
    %87 = vector.load %arg6[%c5, %c0_56, %c0_57] : memref<9x64x64xbf16, #tpu.memory_space<vmem>>, vector<1x64x64xbf16>
    %88 = vector.shape_cast %87 : vector<1x64x64xbf16> to vector<64x64xbf16>
    %cst_58 = arith.constant dense<0.000000e+00> : vector<70x64xf32>
    %89 = tpu.matmul %86, %88, %cst_58 {dimension_numbers = #tpu.dot_dimension_numbers<[1], [0], [0], [1], [0, 0, 1, 1], [], []>} : vector<70x64xbf16>, vector<64x64xbf16>, vector<70x64xf32> -> vector<70x64xf32>
    %90 = arith.addf %85, %89 : vector<70x64xf32>
    %91 = vector.extract_strided_slice %59 {offsets = [20, 0], sizes = [70, 64], strides = [1, 1]} : vector<96x64xbf16> to vector<70x64xbf16>
    %c6 = arith.constant 6 : index
    %c0_59 = arith.constant 0 : index
    %c0_60 = arith.constant 0 : index
    %92 = vector.load %arg6[%c6, %c0_59, %c0_60] : memref<9x64x64xbf16, #tpu.memory_space<vmem>>, vector<1x64x64xbf16>
    %93 = vector.shape_cast %92 : vector<1x64x64xbf16> to vector<64x64xbf16>
    %cst_61 = arith.constant dense<0.000000e+00> : vector<70x64xf32>
    %94 = tpu.matmul %91, %93, %cst_61 {dimension_numbers = #tpu.dot_dimension_numbers<[1], [0], [0], [1], [0, 0, 1, 1], [], []>} : vector<70x64xbf16>, vector<64x64xbf16>, vector<70x64xf32> -> vector<70x64xf32>
    %95 = arith.addf %90, %94 : vector<70x64xf32>
    %96 = vector.extract_strided_slice %59 {offsets = [21, 0], sizes = [70, 64], strides = [1, 1]} : vector<96x64xbf16> to vector<70x64xbf16>
    %c7 = arith.constant 7 : index
    %c0_62 = arith.constant 0 : index
    %c0_63 = arith.constant 0 : index
    %97 = vector.load %arg6[%c7, %c0_62, %c0_63] : memref<9x64x64xbf16, #tpu.memory_space<vmem>>, vector<1x64x64xbf16>
    %98 = vector.shape_cast %97 : vector<1x64x64xbf16> to vector<64x64xbf16>
    %cst_64 = arith.constant dense<0.000000e+00> : vector<70x64xf32>
    %99 = tpu.matmul %96, %98, %cst_64 {dimension_numbers = #tpu.dot_dimension_numbers<[1], [0], [0], [1], [0, 0, 1, 1], [], []>} : vector<70x64xbf16>, vector<64x64xbf16>, vector<70x64xf32> -> vector<70x64xf32>
    %100 = arith.addf %95, %99 : vector<70x64xf32>
    %101 = vector.extract_strided_slice %59 {offsets = [22, 0], sizes = [70, 64], strides = [1, 1]} : vector<96x64xbf16> to vector<70x64xbf16>
    %c8 = arith.constant 8 : index
    %c0_65 = arith.constant 0 : index
    %c0_66 = arith.constant 0 : index
    %102 = vector.load %arg6[%c8, %c0_65, %c0_66] : memref<9x64x64xbf16, #tpu.memory_space<vmem>>, vector<1x64x64xbf16>
    %103 = vector.shape_cast %102 : vector<1x64x64xbf16> to vector<64x64xbf16>
    %cst_67 = arith.constant dense<0.000000e+00> : vector<70x64xf32>
    %104 = tpu.matmul %101, %103, %cst_67 {dimension_numbers = #tpu.dot_dimension_numbers<[1], [0], [0], [1], [0, 0, 1, 1], [], []>} : vector<70x64xbf16>, vector<64x64xbf16>, vector<70x64xf32> -> vector<70x64xf32>
    %105 = arith.addf %100, %104 : vector<70x64xf32>
    %c0_68 = arith.constant 0 : index
    %c0_69 = arith.constant 0 : index
    %106 = vector.load %arg7[%c0_68, %c0_69] : memref<1x64xf32, #tpu.memory_space<vmem>>, vector<1x64xf32>
    %107 = vector.broadcast %106 : vector<1x64xf32> to vector<70x64xf32>
    %108 = arith.addf %105, %107 : vector<70x64xf32>
    %cst_70 = arith.constant 0.000000e+00 : f32
    %109 = vector.broadcast %cst_70 : f32 to vector<70x64xf32>
    %110 = arith.maximumf %108, %109 : vector<70x64xf32>
    %111 = arith.truncf %110 : vector<70x64xf32> to vector<70x64xbf16>
    %cst_71 = arith.constant 0.000000e+00 : f32
    %112 = vector.broadcast %cst_71 : f32 to vector<1x512xf32>
    %113 = vector.extract_strided_slice %111 {offsets = [0, 0], sizes = [1, 64], strides = [1, 1]} : vector<70x64xbf16> to vector<1x64xbf16>
    %c0_72 = arith.constant 0 : index
    %c0_73 = arith.constant 0 : index
    %c0_74 = arith.constant 0 : index
    %114 = vector.load %arg8[%c0_72, %c0_73, %c0_74] : memref<49x64x512xbf16, #tpu.memory_space<vmem>>, vector<1x64x512xbf16>
    %115 = vector.shape_cast %114 : vector<1x64x512xbf16> to vector<64x512xbf16>
    %cst_75 = arith.constant dense<0.000000e+00> : vector<1x512xf32>
    %116 = tpu.matmul %113, %115, %cst_75 {dimension_numbers = #tpu.dot_dimension_numbers<[1], [0], [0], [1], [0, 0, 1, 1], [], []>} : vector<1x64xbf16>, vector<64x512xbf16>, vector<1x512xf32> -> vector<1x512xf32>
    %117 = arith.addf %112, %116 : vector<1x512xf32>
    %118 = vector.extract_strided_slice %111 {offsets = [1, 0], sizes = [1, 64], strides = [1, 1]} : vector<70x64xbf16> to vector<1x64xbf16>
    %c1_76 = arith.constant 1 : index
    %c0_77 = arith.constant 0 : index
    %c0_78 = arith.constant 0 : index
    %119 = vector.load %arg8[%c1_76, %c0_77, %c0_78] : memref<49x64x512xbf16, #tpu.memory_space<vmem>>, vector<1x64x512xbf16>
    %120 = vector.shape_cast %119 : vector<1x64x512xbf16> to vector<64x512xbf16>
    %cst_79 = arith.constant dense<0.000000e+00> : vector<1x512xf32>
    %121 = tpu.matmul %118, %120, %cst_79 {dimension_numbers = #tpu.dot_dimension_numbers<[1], [0], [0], [1], [0, 0, 1, 1], [], []>} : vector<1x64xbf16>, vector<64x512xbf16>, vector<1x512xf32> -> vector<1x512xf32>
    %122 = arith.addf %117, %121 : vector<1x512xf32>
    %123 = vector.extract_strided_slice %111 {offsets = [2, 0], sizes = [1, 64], strides = [1, 1]} : vector<70x64xbf16> to vector<1x64xbf16>
    %c2_80 = arith.constant 2 : index
    %c0_81 = arith.constant 0 : index
    %c0_82 = arith.constant 0 : index
    %124 = vector.load %arg8[%c2_80, %c0_81, %c0_82] : memref<49x64x512xbf16, #tpu.memory_space<vmem>>, vector<1x64x512xbf16>
    %125 = vector.shape_cast %124 : vector<1x64x512xbf16> to vector<64x512xbf16>
    %cst_83 = arith.constant dense<0.000000e+00> : vector<1x512xf32>
    %126 = tpu.matmul %123, %125, %cst_83 {dimension_numbers = #tpu.dot_dimension_numbers<[1], [0], [0], [1], [0, 0, 1, 1], [], []>} : vector<1x64xbf16>, vector<64x512xbf16>, vector<1x512xf32> -> vector<1x512xf32>
    %127 = arith.addf %122, %126 : vector<1x512xf32>
    %128 = vector.extract_strided_slice %111 {offsets = [3, 0], sizes = [1, 64], strides = [1, 1]} : vector<70x64xbf16> to vector<1x64xbf16>
    %c3_84 = arith.constant 3 : index
    %c0_85 = arith.constant 0 : index
    %c0_86 = arith.constant 0 : index
    %129 = vector.load %arg8[%c3_84, %c0_85, %c0_86] : memref<49x64x512xbf16, #tpu.memory_space<vmem>>, vector<1x64x512xbf16>
    %130 = vector.shape_cast %129 : vector<1x64x512xbf16> to vector<64x512xbf16>
    %cst_87 = arith.constant dense<0.000000e+00> : vector<1x512xf32>
    %131 = tpu.matmul %128, %130, %cst_87 {dimension_numbers = #tpu.dot_dimension_numbers<[1], [0], [0], [1], [0, 0, 1, 1], [], []>} : vector<1x64xbf16>, vector<64x512xbf16>, vector<1x512xf32> -> vector<1x512xf32>
    %132 = arith.addf %127, %131 : vector<1x512xf32>
    %133 = vector.extract_strided_slice %111 {offsets = [4, 0], sizes = [1, 64], strides = [1, 1]} : vector<70x64xbf16> to vector<1x64xbf16>
    %c4_88 = arith.constant 4 : index
    %c0_89 = arith.constant 0 : index
    %c0_90 = arith.constant 0 : index
    %134 = vector.load %arg8[%c4_88, %c0_89, %c0_90] : memref<49x64x512xbf16, #tpu.memory_space<vmem>>, vector<1x64x512xbf16>
    %135 = vector.shape_cast %134 : vector<1x64x512xbf16> to vector<64x512xbf16>
    %cst_91 = arith.constant dense<0.000000e+00> : vector<1x512xf32>
    %136 = tpu.matmul %133, %135, %cst_91 {dimension_numbers = #tpu.dot_dimension_numbers<[1], [0], [0], [1], [0, 0, 1, 1], [], []>} : vector<1x64xbf16>, vector<64x512xbf16>, vector<1x512xf32> -> vector<1x512xf32>
    %137 = arith.addf %132, %136 : vector<1x512xf32>
    %138 = vector.extract_strided_slice %111 {offsets = [5, 0], sizes = [1, 64], strides = [1, 1]} : vector<70x64xbf16> to vector<1x64xbf16>
    %c5_92 = arith.constant 5 : index
    %c0_93 = arith.constant 0 : index
    %c0_94 = arith.constant 0 : index
    %139 = vector.load %arg8[%c5_92, %c0_93, %c0_94] : memref<49x64x512xbf16, #tpu.memory_space<vmem>>, vector<1x64x512xbf16>
    %140 = vector.shape_cast %139 : vector<1x64x512xbf16> to vector<64x512xbf16>
    %cst_95 = arith.constant dense<0.000000e+00> : vector<1x512xf32>
    %141 = tpu.matmul %138, %140, %cst_95 {dimension_numbers = #tpu.dot_dimension_numbers<[1], [0], [0], [1], [0, 0, 1, 1], [], []>} : vector<1x64xbf16>, vector<64x512xbf16>, vector<1x512xf32> -> vector<1x512xf32>
    %142 = arith.addf %137, %141 : vector<1x512xf32>
    %143 = vector.extract_strided_slice %111 {offsets = [6, 0], sizes = [1, 64], strides = [1, 1]} : vector<70x64xbf16> to vector<1x64xbf16>
    %c6_96 = arith.constant 6 : index
    %c0_97 = arith.constant 0 : index
    %c0_98 = arith.constant 0 : index
    %144 = vector.load %arg8[%c6_96, %c0_97, %c0_98] : memref<49x64x512xbf16, #tpu.memory_space<vmem>>, vector<1x64x512xbf16>
    %145 = vector.shape_cast %144 : vector<1x64x512xbf16> to vector<64x512xbf16>
    %cst_99 = arith.constant dense<0.000000e+00> : vector<1x512xf32>
    %146 = tpu.matmul %143, %145, %cst_99 {dimension_numbers = #tpu.dot_dimension_numbers<[1], [0], [0], [1], [0, 0, 1, 1], [], []>} : vector<1x64xbf16>, vector<64x512xbf16>, vector<1x512xf32> -> vector<1x512xf32>
    %147 = arith.addf %142, %146 : vector<1x512xf32>
    %148 = vector.extract_strided_slice %111 {offsets = [10, 0], sizes = [1, 64], strides = [1, 1]} : vector<70x64xbf16> to vector<1x64xbf16>
    %c7_100 = arith.constant 7 : index
    %c0_101 = arith.constant 0 : index
    %c0_102 = arith.constant 0 : index
    %149 = vector.load %arg8[%c7_100, %c0_101, %c0_102] : memref<49x64x512xbf16, #tpu.memory_space<vmem>>, vector<1x64x512xbf16>
    %150 = vector.shape_cast %149 : vector<1x64x512xbf16> to vector<64x512xbf16>
    %cst_103 = arith.constant dense<0.000000e+00> : vector<1x512xf32>
    %151 = tpu.matmul %148, %150, %cst_103 {dimension_numbers = #tpu.dot_dimension_numbers<[1], [0], [0], [1], [0, 0, 1, 1], [], []>} : vector<1x64xbf16>, vector<64x512xbf16>, vector<1x512xf32> -> vector<1x512xf32>
    %152 = arith.addf %147, %151 : vector<1x512xf32>
    %153 = vector.extract_strided_slice %111 {offsets = [11, 0], sizes = [1, 64], strides = [1, 1]} : vector<70x64xbf16> to vector<1x64xbf16>
    %c8_104 = arith.constant 8 : index
    %c0_105 = arith.constant 0 : index
    %c0_106 = arith.constant 0 : index
    %154 = vector.load %arg8[%c8_104, %c0_105, %c0_106] : memref<49x64x512xbf16, #tpu.memory_space<vmem>>, vector<1x64x512xbf16>
    %155 = vector.shape_cast %154 : vector<1x64x512xbf16> to vector<64x512xbf16>
    %cst_107 = arith.constant dense<0.000000e+00> : vector<1x512xf32>
    %156 = tpu.matmul %153, %155, %cst_107 {dimension_numbers = #tpu.dot_dimension_numbers<[1], [0], [0], [1], [0, 0, 1, 1], [], []>} : vector<1x64xbf16>, vector<64x512xbf16>, vector<1x512xf32> -> vector<1x512xf32>
    %157 = arith.addf %152, %156 : vector<1x512xf32>
    %158 = vector.extract_strided_slice %111 {offsets = [12, 0], sizes = [1, 64], strides = [1, 1]} : vector<70x64xbf16> to vector<1x64xbf16>
    %c9 = arith.constant 9 : index
    %c0_108 = arith.constant 0 : index
    %c0_109 = arith.constant 0 : index
    %159 = vector.load %arg8[%c9, %c0_108, %c0_109] : memref<49x64x512xbf16, #tpu.memory_space<vmem>>, vector<1x64x512xbf16>
    %160 = vector.shape_cast %159 : vector<1x64x512xbf16> to vector<64x512xbf16>
    %cst_110 = arith.constant dense<0.000000e+00> : vector<1x512xf32>
    %161 = tpu.matmul %158, %160, %cst_110 {dimension_numbers = #tpu.dot_dimension_numbers<[1], [0], [0], [1], [0, 0, 1, 1], [], []>} : vector<1x64xbf16>, vector<64x512xbf16>, vector<1x512xf32> -> vector<1x512xf32>
    %162 = arith.addf %157, %161 : vector<1x512xf32>
    %163 = vector.extract_strided_slice %111 {offsets = [13, 0], sizes = [1, 64], strides = [1, 1]} : vector<70x64xbf16> to vector<1x64xbf16>
    %c10 = arith.constant 10 : index
    %c0_111 = arith.constant 0 : index
    %c0_112 = arith.constant 0 : index
    %164 = vector.load %arg8[%c10, %c0_111, %c0_112] : memref<49x64x512xbf16, #tpu.memory_space<vmem>>, vector<1x64x512xbf16>
    %165 = vector.shape_cast %164 : vector<1x64x512xbf16> to vector<64x512xbf16>
    %cst_113 = arith.constant dense<0.000000e+00> : vector<1x512xf32>
    %166 = tpu.matmul %163, %165, %cst_113 {dimension_numbers = #tpu.dot_dimension_numbers<[1], [0], [0], [1], [0, 0, 1, 1], [], []>} : vector<1x64xbf16>, vector<64x512xbf16>, vector<1x512xf32> -> vector<1x512xf32>
    %167 = arith.addf %162, %166 : vector<1x512xf32>
    %168 = vector.extract_strided_slice %111 {offsets = [14, 0], sizes = [1, 64], strides = [1, 1]} : vector<70x64xbf16> to vector<1x64xbf16>
    %c11 = arith.constant 11 : index
    %c0_114 = arith.constant 0 : index
    %c0_115 = arith.constant 0 : index
    %169 = vector.load %arg8[%c11, %c0_114, %c0_115] : memref<49x64x512xbf16, #tpu.memory_space<vmem>>, vector<1x64x512xbf16>
    %170 = vector.shape_cast %169 : vector<1x64x512xbf16> to vector<64x512xbf16>
    %cst_116 = arith.constant dense<0.000000e+00> : vector<1x512xf32>
    %171 = tpu.matmul %168, %170, %cst_116 {dimension_numbers = #tpu.dot_dimension_numbers<[1], [0], [0], [1], [0, 0, 1, 1], [], []>} : vector<1x64xbf16>, vector<64x512xbf16>, vector<1x512xf32> -> vector<1x512xf32>
    %172 = arith.addf %167, %171 : vector<1x512xf32>
    %173 = vector.extract_strided_slice %111 {offsets = [15, 0], sizes = [1, 64], strides = [1, 1]} : vector<70x64xbf16> to vector<1x64xbf16>
    %c12 = arith.constant 12 : index
    %c0_117 = arith.constant 0 : index
    %c0_118 = arith.constant 0 : index
    %174 = vector.load %arg8[%c12, %c0_117, %c0_118] : memref<49x64x512xbf16, #tpu.memory_space<vmem>>, vector<1x64x512xbf16>
    %175 = vector.shape_cast %174 : vector<1x64x512xbf16> to vector<64x512xbf16>
    %cst_119 = arith.constant dense<0.000000e+00> : vector<1x512xf32>
    %176 = tpu.matmul %173, %175, %cst_119 {dimension_numbers = #tpu.dot_dimension_numbers<[1], [0], [0], [1], [0, 0, 1, 1], [], []>} : vector<1x64xbf16>, vector<64x512xbf16>, vector<1x512xf32> -> vector<1x512xf32>
    %177 = arith.addf %172, %176 : vector<1x512xf32>
    %178 = vector.extract_strided_slice %111 {offsets = [16, 0], sizes = [1, 64], strides = [1, 1]} : vector<70x64xbf16> to vector<1x64xbf16>
    %c13 = arith.constant 13 : index
    %c0_120 = arith.constant 0 : index
    %c0_121 = arith.constant 0 : index
    %179 = vector.load %arg8[%c13, %c0_120, %c0_121] : memref<49x64x512xbf16, #tpu.memory_space<vmem>>, vector<1x64x512xbf16>
    %180 = vector.shape_cast %179 : vector<1x64x512xbf16> to vector<64x512xbf16>
    %cst_122 = arith.constant dense<0.000000e+00> : vector<1x512xf32>
    %181 = tpu.matmul %178, %180, %cst_122 {dimension_numbers = #tpu.dot_dimension_numbers<[1], [0], [0], [1], [0, 0, 1, 1], [], []>} : vector<1x64xbf16>, vector<64x512xbf16>, vector<1x512xf32> -> vector<1x512xf32>
    %182 = arith.addf %177, %181 : vector<1x512xf32>
    %183 = vector.extract_strided_slice %111 {offsets = [20, 0], sizes = [1, 64], strides = [1, 1]} : vector<70x64xbf16> to vector<1x64xbf16>
    %c14 = arith.constant 14 : index
    %c0_123 = arith.constant 0 : index
    %c0_124 = arith.constant 0 : index
    %184 = vector.load %arg8[%c14, %c0_123, %c0_124] : memref<49x64x512xbf16, #tpu.memory_space<vmem>>, vector<1x64x512xbf16>
    %185 = vector.shape_cast %184 : vector<1x64x512xbf16> to vector<64x512xbf16>
    %cst_125 = arith.constant dense<0.000000e+00> : vector<1x512xf32>
    %186 = tpu.matmul %183, %185, %cst_125 {dimension_numbers = #tpu.dot_dimension_numbers<[1], [0], [0], [1], [0, 0, 1, 1], [], []>} : vector<1x64xbf16>, vector<64x512xbf16>, vector<1x512xf32> -> vector<1x512xf32>
    %187 = arith.addf %182, %186 : vector<1x512xf32>
    %188 = vector.extract_strided_slice %111 {offsets = [21, 0], sizes = [1, 64], strides = [1, 1]} : vector<70x64xbf16> to vector<1x64xbf16>
    %c15 = arith.constant 15 : index
    %c0_126 = arith.constant 0 : index
    %c0_127 = arith.constant 0 : index
    %189 = vector.load %arg8[%c15, %c0_126, %c0_127] : memref<49x64x512xbf16, #tpu.memory_space<vmem>>, vector<1x64x512xbf16>
    %190 = vector.shape_cast %189 : vector<1x64x512xbf16> to vector<64x512xbf16>
    %cst_128 = arith.constant dense<0.000000e+00> : vector<1x512xf32>
    %191 = tpu.matmul %188, %190, %cst_128 {dimension_numbers = #tpu.dot_dimension_numbers<[1], [0], [0], [1], [0, 0, 1, 1], [], []>} : vector<1x64xbf16>, vector<64x512xbf16>, vector<1x512xf32> -> vector<1x512xf32>
    %192 = arith.addf %187, %191 : vector<1x512xf32>
    %193 = vector.extract_strided_slice %111 {offsets = [22, 0], sizes = [1, 64], strides = [1, 1]} : vector<70x64xbf16> to vector<1x64xbf16>
    %c16 = arith.constant 16 : index
    %c0_129 = arith.constant 0 : index
    %c0_130 = arith.constant 0 : index
    %194 = vector.load %arg8[%c16, %c0_129, %c0_130] : memref<49x64x512xbf16, #tpu.memory_space<vmem>>, vector<1x64x512xbf16>
    %195 = vector.shape_cast %194 : vector<1x64x512xbf16> to vector<64x512xbf16>
    %cst_131 = arith.constant dense<0.000000e+00> : vector<1x512xf32>
    %196 = tpu.matmul %193, %195, %cst_131 {dimension_numbers = #tpu.dot_dimension_numbers<[1], [0], [0], [1], [0, 0, 1, 1], [], []>} : vector<1x64xbf16>, vector<64x512xbf16>, vector<1x512xf32> -> vector<1x512xf32>
    %197 = arith.addf %192, %196 : vector<1x512xf32>
    %198 = vector.extract_strided_slice %111 {offsets = [23, 0], sizes = [1, 64], strides = [1, 1]} : vector<70x64xbf16> to vector<1x64xbf16>
    %c17 = arith.constant 17 : index
    %c0_132 = arith.constant 0 : index
    %c0_133 = arith.constant 0 : index
    %199 = vector.load %arg8[%c17, %c0_132, %c0_133] : memref<49x64x512xbf16, #tpu.memory_space<vmem>>, vector<1x64x512xbf16>
    %200 = vector.shape_cast %199 : vector<1x64x512xbf16> to vector<64x512xbf16>
    %cst_134 = arith.constant dense<0.000000e+00> : vector<1x512xf32>
    %201 = tpu.matmul %198, %200, %cst_134 {dimension_numbers = #tpu.dot_dimension_numbers<[1], [0], [0], [1], [0, 0, 1, 1], [], []>} : vector<1x64xbf16>, vector<64x512xbf16>, vector<1x512xf32> -> vector<1x512xf32>
    %202 = arith.addf %197, %201 : vector<1x512xf32>
    %203 = vector.extract_strided_slice %111 {offsets = [24, 0], sizes = [1, 64], strides = [1, 1]} : vector<70x64xbf16> to vector<1x64xbf16>
    %c18 = arith.constant 18 : index
    %c0_135 = arith.constant 0 : index
    %c0_136 = arith.constant 0 : index
    %204 = vector.load %arg8[%c18, %c0_135, %c0_136] : memref<49x64x512xbf16, #tpu.memory_space<vmem>>, vector<1x64x512xbf16>
    %205 = vector.shape_cast %204 : vector<1x64x512xbf16> to vector<64x512xbf16>
    %cst_137 = arith.constant dense<0.000000e+00> : vector<1x512xf32>
    %206 = tpu.matmul %203, %205, %cst_137 {dimension_numbers = #tpu.dot_dimension_numbers<[1], [0], [0], [1], [0, 0, 1, 1], [], []>} : vector<1x64xbf16>, vector<64x512xbf16>, vector<1x512xf32> -> vector<1x512xf32>
    %207 = arith.addf %202, %206 : vector<1x512xf32>
    %208 = vector.extract_strided_slice %111 {offsets = [25, 0], sizes = [1, 64], strides = [1, 1]} : vector<70x64xbf16> to vector<1x64xbf16>
    %c19 = arith.constant 19 : index
    %c0_138 = arith.constant 0 : index
    %c0_139 = arith.constant 0 : index
    %209 = vector.load %arg8[%c19, %c0_138, %c0_139] : memref<49x64x512xbf16, #tpu.memory_space<vmem>>, vector<1x64x512xbf16>
    %210 = vector.shape_cast %209 : vector<1x64x512xbf16> to vector<64x512xbf16>
    %cst_140 = arith.constant dense<0.000000e+00> : vector<1x512xf32>
    %211 = tpu.matmul %208, %210, %cst_140 {dimension_numbers = #tpu.dot_dimension_numbers<[1], [0], [0], [1], [0, 0, 1, 1], [], []>} : vector<1x64xbf16>, vector<64x512xbf16>, vector<1x512xf32> -> vector<1x512xf32>
    %212 = arith.addf %207, %211 : vector<1x512xf32>
    %213 = vector.extract_strided_slice %111 {offsets = [26, 0], sizes = [1, 64], strides = [1, 1]} : vector<70x64xbf16> to vector<1x64xbf16>
    %c20 = arith.constant 20 : index
    %c0_141 = arith.constant 0 : index
    %c0_142 = arith.constant 0 : index
    %214 = vector.load %arg8[%c20, %c0_141, %c0_142] : memref<49x64x512xbf16, #tpu.memory_space<vmem>>, vector<1x64x512xbf16>
    %215 = vector.shape_cast %214 : vector<1x64x512xbf16> to vector<64x512xbf16>
    %cst_143 = arith.constant dense<0.000000e+00> : vector<1x512xf32>
    %216 = tpu.matmul %213, %215, %cst_143 {dimension_numbers = #tpu.dot_dimension_numbers<[1], [0], [0], [1], [0, 0, 1, 1], [], []>} : vector<1x64xbf16>, vector<64x512xbf16>, vector<1x512xf32> -> vector<1x512xf32>
    %217 = arith.addf %212, %216 : vector<1x512xf32>
    %218 = vector.extract_strided_slice %111 {offsets = [30, 0], sizes = [1, 64], strides = [1, 1]} : vector<70x64xbf16> to vector<1x64xbf16>
    %c21 = arith.constant 21 : index
    %c0_144 = arith.constant 0 : index
    %c0_145 = arith.constant 0 : index
    %219 = vector.load %arg8[%c21, %c0_144, %c0_145] : memref<49x64x512xbf16, #tpu.memory_space<vmem>>, vector<1x64x512xbf16>
    %220 = vector.shape_cast %219 : vector<1x64x512xbf16> to vector<64x512xbf16>
    %cst_146 = arith.constant dense<0.000000e+00> : vector<1x512xf32>
    %221 = tpu.matmul %218, %220, %cst_146 {dimension_numbers = #tpu.dot_dimension_numbers<[1], [0], [0], [1], [0, 0, 1, 1], [], []>} : vector<1x64xbf16>, vector<64x512xbf16>, vector<1x512xf32> -> vector<1x512xf32>
    %222 = arith.addf %217, %221 : vector<1x512xf32>
    %223 = vector.extract_strided_slice %111 {offsets = [31, 0], sizes = [1, 64], strides = [1, 1]} : vector<70x64xbf16> to vector<1x64xbf16>
    %c22 = arith.constant 22 : index
    %c0_147 = arith.constant 0 : index
    %c0_148 = arith.constant 0 : index
    %224 = vector.load %arg8[%c22, %c0_147, %c0_148] : memref<49x64x512xbf16, #tpu.memory_space<vmem>>, vector<1x64x512xbf16>
    %225 = vector.shape_cast %224 : vector<1x64x512xbf16> to vector<64x512xbf16>
    %cst_149 = arith.constant dense<0.000000e+00> : vector<1x512xf32>
    %226 = tpu.matmul %223, %225, %cst_149 {dimension_numbers = #tpu.dot_dimension_numbers<[1], [0], [0], [1], [0, 0, 1, 1], [], []>} : vector<1x64xbf16>, vector<64x512xbf16>, vector<1x512xf32> -> vector<1x512xf32>
    %227 = arith.addf %222, %226 : vector<1x512xf32>
    %228 = vector.extract_strided_slice %111 {offsets = [32, 0], sizes = [1, 64], strides = [1, 1]} : vector<70x64xbf16> to vector<1x64xbf16>
    %c23 = arith.constant 23 : index
    %c0_150 = arith.constant 0 : index
    %c0_151 = arith.constant 0 : index
    %229 = vector.load %arg8[%c23, %c0_150, %c0_151] : memref<49x64x512xbf16, #tpu.memory_space<vmem>>, vector<1x64x512xbf16>
    %230 = vector.shape_cast %229 : vector<1x64x512xbf16> to vector<64x512xbf16>
    %cst_152 = arith.constant dense<0.000000e+00> : vector<1x512xf32>
    %231 = tpu.matmul %228, %230, %cst_152 {dimension_numbers = #tpu.dot_dimension_numbers<[1], [0], [0], [1], [0, 0, 1, 1], [], []>} : vector<1x64xbf16>, vector<64x512xbf16>, vector<1x512xf32> -> vector<1x512xf32>
    %232 = arith.addf %227, %231 : vector<1x512xf32>
    %233 = vector.extract_strided_slice %111 {offsets = [33, 0], sizes = [1, 64], strides = [1, 1]} : vector<70x64xbf16> to vector<1x64xbf16>
    %c24 = arith.constant 24 : index
    %c0_153 = arith.constant 0 : index
    %c0_154 = arith.constant 0 : index
    %234 = vector.load %arg8[%c24, %c0_153, %c0_154] : memref<49x64x512xbf16, #tpu.memory_space<vmem>>, vector<1x64x512xbf16>
    %235 = vector.shape_cast %234 : vector<1x64x512xbf16> to vector<64x512xbf16>
    %cst_155 = arith.constant dense<0.000000e+00> : vector<1x512xf32>
    %236 = tpu.matmul %233, %235, %cst_155 {dimension_numbers = #tpu.dot_dimension_numbers<[1], [0], [0], [1], [0, 0, 1, 1], [], []>} : vector<1x64xbf16>, vector<64x512xbf16>, vector<1x512xf32> -> vector<1x512xf32>
    %237 = arith.addf %232, %236 : vector<1x512xf32>
    %238 = vector.extract_strided_slice %111 {offsets = [34, 0], sizes = [1, 64], strides = [1, 1]} : vector<70x64xbf16> to vector<1x64xbf16>
    %c25 = arith.constant 25 : index
    %c0_156 = arith.constant 0 : index
    %c0_157 = arith.constant 0 : index
    %239 = vector.load %arg8[%c25, %c0_156, %c0_157] : memref<49x64x512xbf16, #tpu.memory_space<vmem>>, vector<1x64x512xbf16>
    %240 = vector.shape_cast %239 : vector<1x64x512xbf16> to vector<64x512xbf16>
    %cst_158 = arith.constant dense<0.000000e+00> : vector<1x512xf32>
    %241 = tpu.matmul %238, %240, %cst_158 {dimension_numbers = #tpu.dot_dimension_numbers<[1], [0], [0], [1], [0, 0, 1, 1], [], []>} : vector<1x64xbf16>, vector<64x512xbf16>, vector<1x512xf32> -> vector<1x512xf32>
    %242 = arith.addf %237, %241 : vector<1x512xf32>
    %243 = vector.extract_strided_slice %111 {offsets = [35, 0], sizes = [1, 64], strides = [1, 1]} : vector<70x64xbf16> to vector<1x64xbf16>
    %c26 = arith.constant 26 : index
    %c0_159 = arith.constant 0 : index
    %c0_160 = arith.constant 0 : index
    %244 = vector.load %arg8[%c26, %c0_159, %c0_160] : memref<49x64x512xbf16, #tpu.memory_space<vmem>>, vector<1x64x512xbf16>
    %245 = vector.shape_cast %244 : vector<1x64x512xbf16> to vector<64x512xbf16>
    %cst_161 = arith.constant dense<0.000000e+00> : vector<1x512xf32>
    %246 = tpu.matmul %243, %245, %cst_161 {dimension_numbers = #tpu.dot_dimension_numbers<[1], [0], [0], [1], [0, 0, 1, 1], [], []>} : vector<1x64xbf16>, vector<64x512xbf16>, vector<1x512xf32> -> vector<1x512xf32>
    %247 = arith.addf %242, %246 : vector<1x512xf32>
    %248 = vector.extract_strided_slice %111 {offsets = [36, 0], sizes = [1, 64], strides = [1, 1]} : vector<70x64xbf16> to vector<1x64xbf16>
    %c27 = arith.constant 27 : index
    %c0_162 = arith.constant 0 : index
    %c0_163 = arith.constant 0 : index
    %249 = vector.load %arg8[%c27, %c0_162, %c0_163] : memref<49x64x512xbf16, #tpu.memory_space<vmem>>, vector<1x64x512xbf16>
    %250 = vector.shape_cast %249 : vector<1x64x512xbf16> to vector<64x512xbf16>
    %cst_164 = arith.constant dense<0.000000e+00> : vector<1x512xf32>
    %251 = tpu.matmul %248, %250, %cst_164 {dimension_numbers = #tpu.dot_dimension_numbers<[1], [0], [0], [1], [0, 0, 1, 1], [], []>} : vector<1x64xbf16>, vector<64x512xbf16>, vector<1x512xf32> -> vector<1x512xf32>
    %252 = arith.addf %247, %251 : vector<1x512xf32>
    %253 = vector.extract_strided_slice %111 {offsets = [40, 0], sizes = [1, 64], strides = [1, 1]} : vector<70x64xbf16> to vector<1x64xbf16>
    %c28 = arith.constant 28 : index
    %c0_165 = arith.constant 0 : index
    %c0_166 = arith.constant 0 : index
    %254 = vector.load %arg8[%c28, %c0_165, %c0_166] : memref<49x64x512xbf16, #tpu.memory_space<vmem>>, vector<1x64x512xbf16>
    %255 = vector.shape_cast %254 : vector<1x64x512xbf16> to vector<64x512xbf16>
    %cst_167 = arith.constant dense<0.000000e+00> : vector<1x512xf32>
    %256 = tpu.matmul %253, %255, %cst_167 {dimension_numbers = #tpu.dot_dimension_numbers<[1], [0], [0], [1], [0, 0, 1, 1], [], []>} : vector<1x64xbf16>, vector<64x512xbf16>, vector<1x512xf32> -> vector<1x512xf32>
    %257 = arith.addf %252, %256 : vector<1x512xf32>
    %258 = vector.extract_strided_slice %111 {offsets = [41, 0], sizes = [1, 64], strides = [1, 1]} : vector<70x64xbf16> to vector<1x64xbf16>
    %c29 = arith.constant 29 : index
    %c0_168 = arith.constant 0 : index
    %c0_169 = arith.constant 0 : index
    %259 = vector.load %arg8[%c29, %c0_168, %c0_169] : memref<49x64x512xbf16, #tpu.memory_space<vmem>>, vector<1x64x512xbf16>
    %260 = vector.shape_cast %259 : vector<1x64x512xbf16> to vector<64x512xbf16>
    %cst_170 = arith.constant dense<0.000000e+00> : vector<1x512xf32>
    %261 = tpu.matmul %258, %260, %cst_170 {dimension_numbers = #tpu.dot_dimension_numbers<[1], [0], [0], [1], [0, 0, 1, 1], [], []>} : vector<1x64xbf16>, vector<64x512xbf16>, vector<1x512xf32> -> vector<1x512xf32>
    %262 = arith.addf %257, %261 : vector<1x512xf32>
    %263 = vector.extract_strided_slice %111 {offsets = [42, 0], sizes = [1, 64], strides = [1, 1]} : vector<70x64xbf16> to vector<1x64xbf16>
    %c30 = arith.constant 30 : index
    %c0_171 = arith.constant 0 : index
    %c0_172 = arith.constant 0 : index
    %264 = vector.load %arg8[%c30, %c0_171, %c0_172] : memref<49x64x512xbf16, #tpu.memory_space<vmem>>, vector<1x64x512xbf16>
    %265 = vector.shape_cast %264 : vector<1x64x512xbf16> to vector<64x512xbf16>
    %cst_173 = arith.constant dense<0.000000e+00> : vector<1x512xf32>
    %266 = tpu.matmul %263, %265, %cst_173 {dimension_numbers = #tpu.dot_dimension_numbers<[1], [0], [0], [1], [0, 0, 1, 1], [], []>} : vector<1x64xbf16>, vector<64x512xbf16>, vector<1x512xf32> -> vector<1x512xf32>
    %267 = arith.addf %262, %266 : vector<1x512xf32>
    %268 = vector.extract_strided_slice %111 {offsets = [43, 0], sizes = [1, 64], strides = [1, 1]} : vector<70x64xbf16> to vector<1x64xbf16>
    %c31 = arith.constant 31 : index
    %c0_174 = arith.constant 0 : index
    %c0_175 = arith.constant 0 : index
    %269 = vector.load %arg8[%c31, %c0_174, %c0_175] : memref<49x64x512xbf16, #tpu.memory_space<vmem>>, vector<1x64x512xbf16>
    %270 = vector.shape_cast %269 : vector<1x64x512xbf16> to vector<64x512xbf16>
    %cst_176 = arith.constant dense<0.000000e+00> : vector<1x512xf32>
    %271 = tpu.matmul %268, %270, %cst_176 {dimension_numbers = #tpu.dot_dimension_numbers<[1], [0], [0], [1], [0, 0, 1, 1], [], []>} : vector<1x64xbf16>, vector<64x512xbf16>, vector<1x512xf32> -> vector<1x512xf32>
    %272 = arith.addf %267, %271 : vector<1x512xf32>
    %273 = vector.extract_strided_slice %111 {offsets = [44, 0], sizes = [1, 64], strides = [1, 1]} : vector<70x64xbf16> to vector<1x64xbf16>
    %c32 = arith.constant 32 : index
    %c0_177 = arith.constant 0 : index
    %c0_178 = arith.constant 0 : index
    %274 = vector.load %arg8[%c32, %c0_177, %c0_178] : memref<49x64x512xbf16, #tpu.memory_space<vmem>>, vector<1x64x512xbf16>
    %275 = vector.shape_cast %274 : vector<1x64x512xbf16> to vector<64x512xbf16>
    %cst_179 = arith.constant dense<0.000000e+00> : vector<1x512xf32>
    %276 = tpu.matmul %273, %275, %cst_179 {dimension_numbers = #tpu.dot_dimension_numbers<[1], [0], [0], [1], [0, 0, 1, 1], [], []>} : vector<1x64xbf16>, vector<64x512xbf16>, vector<1x512xf32> -> vector<1x512xf32>
    %277 = arith.addf %272, %276 : vector<1x512xf32>
    %278 = vector.extract_strided_slice %111 {offsets = [45, 0], sizes = [1, 64], strides = [1, 1]} : vector<70x64xbf16> to vector<1x64xbf16>
    %c33 = arith.constant 33 : index
    %c0_180 = arith.constant 0 : index
    %c0_181 = arith.constant 0 : index
    %279 = vector.load %arg8[%c33, %c0_180, %c0_181] : memref<49x64x512xbf16, #tpu.memory_space<vmem>>, vector<1x64x512xbf16>
    %280 = vector.shape_cast %279 : vector<1x64x512xbf16> to vector<64x512xbf16>
    %cst_182 = arith.constant dense<0.000000e+00> : vector<1x512xf32>
    %281 = tpu.matmul %278, %280, %cst_182 {dimension_numbers = #tpu.dot_dimension_numbers<[1], [0], [0], [1], [0, 0, 1, 1], [], []>} : vector<1x64xbf16>, vector<64x512xbf16>, vector<1x512xf32> -> vector<1x512xf32>
    %282 = arith.addf %277, %281 : vector<1x512xf32>
    %283 = vector.extract_strided_slice %111 {offsets = [46, 0], sizes = [1, 64], strides = [1, 1]} : vector<70x64xbf16> to vector<1x64xbf16>
    %c34 = arith.constant 34 : index
    %c0_183 = arith.constant 0 : index
    %c0_184 = arith.constant 0 : index
    %284 = vector.load %arg8[%c34, %c0_183, %c0_184] : memref<49x64x512xbf16, #tpu.memory_space<vmem>>, vector<1x64x512xbf16>
    %285 = vector.shape_cast %284 : vector<1x64x512xbf16> to vector<64x512xbf16>
    %cst_185 = arith.constant dense<0.000000e+00> : vector<1x512xf32>
    %286 = tpu.matmul %283, %285, %cst_185 {dimension_numbers = #tpu.dot_dimension_numbers<[1], [0], [0], [1], [0, 0, 1, 1], [], []>} : vector<1x64xbf16>, vector<64x512xbf16>, vector<1x512xf32> -> vector<1x512xf32>
    %287 = arith.addf %282, %286 : vector<1x512xf32>
    %288 = vector.extract_strided_slice %111 {offsets = [50, 0], sizes = [1, 64], strides = [1, 1]} : vector<70x64xbf16> to vector<1x64xbf16>
    %c35 = arith.constant 35 : index
    %c0_186 = arith.constant 0 : index
    %c0_187 = arith.constant 0 : index
    %289 = vector.load %arg8[%c35, %c0_186, %c0_187] : memref<49x64x512xbf16, #tpu.memory_space<vmem>>, vector<1x64x512xbf16>
    %290 = vector.shape_cast %289 : vector<1x64x512xbf16> to vector<64x512xbf16>
    %cst_188 = arith.constant dense<0.000000e+00> : vector<1x512xf32>
    %291 = tpu.matmul %288, %290, %cst_188 {dimension_numbers = #tpu.dot_dimension_numbers<[1], [0], [0], [1], [0, 0, 1, 1], [], []>} : vector<1x64xbf16>, vector<64x512xbf16>, vector<1x512xf32> -> vector<1x512xf32>
    %292 = arith.addf %287, %291 : vector<1x512xf32>
    %293 = vector.extract_strided_slice %111 {offsets = [51, 0], sizes = [1, 64], strides = [1, 1]} : vector<70x64xbf16> to vector<1x64xbf16>
    %c36 = arith.constant 36 : index
    %c0_189 = arith.constant 0 : index
    %c0_190 = arith.constant 0 : index
    %294 = vector.load %arg8[%c36, %c0_189, %c0_190] : memref<49x64x512xbf16, #tpu.memory_space<vmem>>, vector<1x64x512xbf16>
    %295 = vector.shape_cast %294 : vector<1x64x512xbf16> to vector<64x512xbf16>
    %cst_191 = arith.constant dense<0.000000e+00> : vector<1x512xf32>
    %296 = tpu.matmul %293, %295, %cst_191 {dimension_numbers = #tpu.dot_dimension_numbers<[1], [0], [0], [1], [0, 0, 1, 1], [], []>} : vector<1x64xbf16>, vector<64x512xbf16>, vector<1x512xf32> -> vector<1x512xf32>
    %297 = arith.addf %292, %296 : vector<1x512xf32>
    %298 = vector.extract_strided_slice %111 {offsets = [52, 0], sizes = [1, 64], strides = [1, 1]} : vector<70x64xbf16> to vector<1x64xbf16>
    %c37 = arith.constant 37 : index
    %c0_192 = arith.constant 0 : index
    %c0_193 = arith.constant 0 : index
    %299 = vector.load %arg8[%c37, %c0_192, %c0_193] : memref<49x64x512xbf16, #tpu.memory_space<vmem>>, vector<1x64x512xbf16>
    %300 = vector.shape_cast %299 : vector<1x64x512xbf16> to vector<64x512xbf16>
    %cst_194 = arith.constant dense<0.000000e+00> : vector<1x512xf32>
    %301 = tpu.matmul %298, %300, %cst_194 {dimension_numbers = #tpu.dot_dimension_numbers<[1], [0], [0], [1], [0, 0, 1, 1], [], []>} : vector<1x64xbf16>, vector<64x512xbf16>, vector<1x512xf32> -> vector<1x512xf32>
    %302 = arith.addf %297, %301 : vector<1x512xf32>
    %303 = vector.extract_strided_slice %111 {offsets = [53, 0], sizes = [1, 64], strides = [1, 1]} : vector<70x64xbf16> to vector<1x64xbf16>
    %c38 = arith.constant 38 : index
    %c0_195 = arith.constant 0 : index
    %c0_196 = arith.constant 0 : index
    %304 = vector.load %arg8[%c38, %c0_195, %c0_196] : memref<49x64x512xbf16, #tpu.memory_space<vmem>>, vector<1x64x512xbf16>
    %305 = vector.shape_cast %304 : vector<1x64x512xbf16> to vector<64x512xbf16>
    %cst_197 = arith.constant dense<0.000000e+00> : vector<1x512xf32>
    %306 = tpu.matmul %303, %305, %cst_197 {dimension_numbers = #tpu.dot_dimension_numbers<[1], [0], [0], [1], [0, 0, 1, 1], [], []>} : vector<1x64xbf16>, vector<64x512xbf16>, vector<1x512xf32> -> vector<1x512xf32>
    %307 = arith.addf %302, %306 : vector<1x512xf32>
    %308 = vector.extract_strided_slice %111 {offsets = [54, 0], sizes = [1, 64], strides = [1, 1]} : vector<70x64xbf16> to vector<1x64xbf16>
    %c39 = arith.constant 39 : index
    %c0_198 = arith.constant 0 : index
    %c0_199 = arith.constant 0 : index
    %309 = vector.load %arg8[%c39, %c0_198, %c0_199] : memref<49x64x512xbf16, #tpu.memory_space<vmem>>, vector<1x64x512xbf16>
    %310 = vector.shape_cast %309 : vector<1x64x512xbf16> to vector<64x512xbf16>
    %cst_200 = arith.constant dense<0.000000e+00> : vector<1x512xf32>
    %311 = tpu.matmul %308, %310, %cst_200 {dimension_numbers = #tpu.dot_dimension_numbers<[1], [0], [0], [1], [0, 0, 1, 1], [], []>} : vector<1x64xbf16>, vector<64x512xbf16>, vector<1x512xf32> -> vector<1x512xf32>
    %312 = arith.addf %307, %311 : vector<1x512xf32>
    %313 = vector.extract_strided_slice %111 {offsets = [55, 0], sizes = [1, 64], strides = [1, 1]} : vector<70x64xbf16> to vector<1x64xbf16>
    %c40 = arith.constant 40 : index
    %c0_201 = arith.constant 0 : index
    %c0_202 = arith.constant 0 : index
    %314 = vector.load %arg8[%c40, %c0_201, %c0_202] : memref<49x64x512xbf16, #tpu.memory_space<vmem>>, vector<1x64x512xbf16>
    %315 = vector.shape_cast %314 : vector<1x64x512xbf16> to vector<64x512xbf16>
    %cst_203 = arith.constant dense<0.000000e+00> : vector<1x512xf32>
    %316 = tpu.matmul %313, %315, %cst_203 {dimension_numbers = #tpu.dot_dimension_numbers<[1], [0], [0], [1], [0, 0, 1, 1], [], []>} : vector<1x64xbf16>, vector<64x512xbf16>, vector<1x512xf32> -> vector<1x512xf32>
    %317 = arith.addf %312, %316 : vector<1x512xf32>
    %318 = vector.extract_strided_slice %111 {offsets = [56, 0], sizes = [1, 64], strides = [1, 1]} : vector<70x64xbf16> to vector<1x64xbf16>
    %c41 = arith.constant 41 : index
    %c0_204 = arith.constant 0 : index
    %c0_205 = arith.constant 0 : index
    %319 = vector.load %arg8[%c41, %c0_204, %c0_205] : memref<49x64x512xbf16, #tpu.memory_space<vmem>>, vector<1x64x512xbf16>
    %320 = vector.shape_cast %319 : vector<1x64x512xbf16> to vector<64x512xbf16>
    %cst_206 = arith.constant dense<0.000000e+00> : vector<1x512xf32>
    %321 = tpu.matmul %318, %320, %cst_206 {dimension_numbers = #tpu.dot_dimension_numbers<[1], [0], [0], [1], [0, 0, 1, 1], [], []>} : vector<1x64xbf16>, vector<64x512xbf16>, vector<1x512xf32> -> vector<1x512xf32>
    %322 = arith.addf %317, %321 : vector<1x512xf32>
    %323 = vector.extract_strided_slice %111 {offsets = [60, 0], sizes = [1, 64], strides = [1, 1]} : vector<70x64xbf16> to vector<1x64xbf16>
    %c42 = arith.constant 42 : index
    %c0_207 = arith.constant 0 : index
    %c0_208 = arith.constant 0 : index
    %324 = vector.load %arg8[%c42, %c0_207, %c0_208] : memref<49x64x512xbf16, #tpu.memory_space<vmem>>, vector<1x64x512xbf16>
    %325 = vector.shape_cast %324 : vector<1x64x512xbf16> to vector<64x512xbf16>
    %cst_209 = arith.constant dense<0.000000e+00> : vector<1x512xf32>
    %326 = tpu.matmul %323, %325, %cst_209 {dimension_numbers = #tpu.dot_dimension_numbers<[1], [0], [0], [1], [0, 0, 1, 1], [], []>} : vector<1x64xbf16>, vector<64x512xbf16>, vector<1x512xf32> -> vector<1x512xf32>
    %327 = arith.addf %322, %326 : vector<1x512xf32>
    %328 = vector.extract_strided_slice %111 {offsets = [61, 0], sizes = [1, 64], strides = [1, 1]} : vector<70x64xbf16> to vector<1x64xbf16>
    %c43 = arith.constant 43 : index
    %c0_210 = arith.constant 0 : index
    %c0_211 = arith.constant 0 : index
    %329 = vector.load %arg8[%c43, %c0_210, %c0_211] : memref<49x64x512xbf16, #tpu.memory_space<vmem>>, vector<1x64x512xbf16>
    %330 = vector.shape_cast %329 : vector<1x64x512xbf16> to vector<64x512xbf16>
    %cst_212 = arith.constant dense<0.000000e+00> : vector<1x512xf32>
    %331 = tpu.matmul %328, %330, %cst_212 {dimension_numbers = #tpu.dot_dimension_numbers<[1], [0], [0], [1], [0, 0, 1, 1], [], []>} : vector<1x64xbf16>, vector<64x512xbf16>, vector<1x512xf32> -> vector<1x512xf32>
    %332 = arith.addf %327, %331 : vector<1x512xf32>
    %333 = vector.extract_strided_slice %111 {offsets = [62, 0], sizes = [1, 64], strides = [1, 1]} : vector<70x64xbf16> to vector<1x64xbf16>
    %c44 = arith.constant 44 : index
    %c0_213 = arith.constant 0 : index
    %c0_214 = arith.constant 0 : index
    %334 = vector.load %arg8[%c44, %c0_213, %c0_214] : memref<49x64x512xbf16, #tpu.memory_space<vmem>>, vector<1x64x512xbf16>
    %335 = vector.shape_cast %334 : vector<1x64x512xbf16> to vector<64x512xbf16>
    %cst_215 = arith.constant dense<0.000000e+00> : vector<1x512xf32>
    %336 = tpu.matmul %333, %335, %cst_215 {dimension_numbers = #tpu.dot_dimension_numbers<[1], [0], [0], [1], [0, 0, 1, 1], [], []>} : vector<1x64xbf16>, vector<64x512xbf16>, vector<1x512xf32> -> vector<1x512xf32>
    %337 = arith.addf %332, %336 : vector<1x512xf32>
    %338 = vector.extract_strided_slice %111 {offsets = [63, 0], sizes = [1, 64], strides = [1, 1]} : vector<70x64xbf16> to vector<1x64xbf16>
    %c45 = arith.constant 45 : index
    %c0_216 = arith.constant 0 : index
    %c0_217 = arith.constant 0 : index
    %339 = vector.load %arg8[%c45, %c0_216, %c0_217] : memref<49x64x512xbf16, #tpu.memory_space<vmem>>, vector<1x64x512xbf16>
    %340 = vector.shape_cast %339 : vector<1x64x512xbf16> to vector<64x512xbf16>
    %cst_218 = arith.constant dense<0.000000e+00> : vector<1x512xf32>
    %341 = tpu.matmul %338, %340, %cst_218 {dimension_numbers = #tpu.dot_dimension_numbers<[1], [0], [0], [1], [0, 0, 1, 1], [], []>} : vector<1x64xbf16>, vector<64x512xbf16>, vector<1x512xf32> -> vector<1x512xf32>
    %342 = arith.addf %337, %341 : vector<1x512xf32>
    %343 = vector.extract_strided_slice %111 {offsets = [64, 0], sizes = [1, 64], strides = [1, 1]} : vector<70x64xbf16> to vector<1x64xbf16>
    %c46 = arith.constant 46 : index
    %c0_219 = arith.constant 0 : index
    %c0_220 = arith.constant 0 : index
    %344 = vector.load %arg8[%c46, %c0_219, %c0_220] : memref<49x64x512xbf16, #tpu.memory_space<vmem>>, vector<1x64x512xbf16>
    %345 = vector.shape_cast %344 : vector<1x64x512xbf16> to vector<64x512xbf16>
    %cst_221 = arith.constant dense<0.000000e+00> : vector<1x512xf32>
    %346 = tpu.matmul %343, %345, %cst_221 {dimension_numbers = #tpu.dot_dimension_numbers<[1], [0], [0], [1], [0, 0, 1, 1], [], []>} : vector<1x64xbf16>, vector<64x512xbf16>, vector<1x512xf32> -> vector<1x512xf32>
    %347 = arith.addf %342, %346 : vector<1x512xf32>
    %348 = vector.extract_strided_slice %111 {offsets = [65, 0], sizes = [1, 64], strides = [1, 1]} : vector<70x64xbf16> to vector<1x64xbf16>
    %c47 = arith.constant 47 : index
    %c0_222 = arith.constant 0 : index
    %c0_223 = arith.constant 0 : index
    %349 = vector.load %arg8[%c47, %c0_222, %c0_223] : memref<49x64x512xbf16, #tpu.memory_space<vmem>>, vector<1x64x512xbf16>
    %350 = vector.shape_cast %349 : vector<1x64x512xbf16> to vector<64x512xbf16>
    %cst_224 = arith.constant dense<0.000000e+00> : vector<1x512xf32>
    %351 = tpu.matmul %348, %350, %cst_224 {dimension_numbers = #tpu.dot_dimension_numbers<[1], [0], [0], [1], [0, 0, 1, 1], [], []>} : vector<1x64xbf16>, vector<64x512xbf16>, vector<1x512xf32> -> vector<1x512xf32>
    %352 = arith.addf %347, %351 : vector<1x512xf32>
    %353 = vector.extract_strided_slice %111 {offsets = [66, 0], sizes = [1, 64], strides = [1, 1]} : vector<70x64xbf16> to vector<1x64xbf16>
    %c48 = arith.constant 48 : index
    %c0_225 = arith.constant 0 : index
    %c0_226 = arith.constant 0 : index
    %354 = vector.load %arg8[%c48, %c0_225, %c0_226] : memref<49x64x512xbf16, #tpu.memory_space<vmem>>, vector<1x64x512xbf16>
    %355 = vector.shape_cast %354 : vector<1x64x512xbf16> to vector<64x512xbf16>
    %cst_227 = arith.constant dense<0.000000e+00> : vector<1x512xf32>
    %356 = tpu.matmul %353, %355, %cst_227 {dimension_numbers = #tpu.dot_dimension_numbers<[1], [0], [0], [1], [0, 0, 1, 1], [], []>} : vector<1x64xbf16>, vector<64x512xbf16>, vector<1x512xf32> -> vector<1x512xf32>
    %357 = arith.addf %352, %356 : vector<1x512xf32>
    %c0_228 = arith.constant 0 : index
    %c0_229 = arith.constant 0 : index
    %358 = vector.load %arg9[%c0_228, %c0_229] : memref<1x512xf32, #tpu.memory_space<vmem>>, vector<1x512xf32>
    %359 = arith.addf %357, %358 : vector<1x512xf32>
    %cst_230 = arith.constant 0.000000e+00 : f32
    %360 = vector.broadcast %cst_230 : f32 to vector<1x512xf32>
    %361 = arith.maximumf %359, %360 : vector<1x512xf32>
    %c0_231 = arith.constant 0 : index
    %c0_232 = arith.constant 0 : index
    %362 = vector.load %arg10[%c0_231, %c0_232] : memref<1x512xf32, #tpu.memory_space<vmem>>, vector<1x512xf32>
    %363 = arith.mulf %361, %362 : vector<1x512xf32>
    %cst_233 = arith.constant dense<0.000000e+00> : vector<1xf32>
    %364 = vector.multi_reduction <add>, %363, %cst_233 [1] : vector<1x512xf32> to vector<1xf32>
    %365 = vector.shape_cast %364 : vector<1xf32> to vector<1x1xf32>
    %c0_234 = arith.constant 0 : index
    %c0_235 = arith.constant 0 : index
    %366 = vector.load %arg11[%c0_234, %c0_235] : memref<1x1xf32, #tpu.memory_space<vmem>>, vector<1x1xf32>
    %367 = arith.addf %365, %366 : vector<1x1xf32>
    %cst_236 = arith.constant 0.000000e+00 : f32
    %368 = vector.broadcast %cst_236 : f32 to vector<1x1xf32>
    %369 = arith.subf %368, %367 : vector<1x1xf32>
    %370 = math.exp %369 : vector<1x1xf32>
    %cst_237 = arith.constant 1.000000e+00 : f32
    %371 = vector.broadcast %cst_237 : f32 to vector<1x1xf32>
    %372 = arith.addf %371, %370 : vector<1x1xf32>
    %373 = tpu.reciprocal %372 {approx = true} : vector<1x1xf32> -> vector<1x1xf32>
    %c0_238 = arith.constant 0 : index
    %c0_239 = arith.constant 0 : index
    %c0_240 = arith.constant 0 : index
    %374 = vector.load %arg12[%c0_238, %c0_239, %c0_240] : memref<1x1x1xf32, #tpu.memory_space<vmem>>, vector<1x1x1xf32>
    %375 = vector.shape_cast %374 : vector<1x1x1xf32> to vector<1x1xf32>
    %376 = vector.shape_cast %373 : vector<1x1xf32> to vector<1x1x1xf32>
    tpu.vector_store %arg12[%c0_238, %c0_239, %c0_240], %376 {strides = array<i32>} : memref<1x1x1xf32, #tpu.memory_space<vmem>>, vector<1x1x1xf32>,
    return
  }
  func.func @transform_0(%arg0: i32) -> (i32, i32, i32) {
    %c0_i32 = arith.constant 0 : i32
    %c0_i32_0 = arith.constant 0 : i32
    %c0_i32_1 = arith.constant 0 : i32
    return %arg0, %c0_i32, %c0_i32_0 : i32, i32, i32
  }
  func.func @transform_1(%arg0: i32) -> (i32, i32) {
    %c0_i32 = arith.constant 0 : i32
    %c0_i32_0 = arith.constant 0 : i32
    %c0_i32_1 = arith.constant 0 : i32
    return %c0_i32, %c0_i32_0 : i32, i32
  }
  func.func @transform_2(%arg0: i32) -> (i32, i32) {
    %c0_i32 = arith.constant 0 : i32
    %c0_i32_0 = arith.constant 0 : i32
    %c0_i32_1 = arith.constant 0 : i32
    return %c0_i32, %c0_i32_0 : i32, i32
  }
  func.func @transform_3(%arg0: i32) -> (i32, i32, i32) {
    %c0_i32 = arith.constant 0 : i32
    %c0_i32_0 = arith.constant 0 : i32
    %c0_i32_1 = arith.constant 0 : i32
    %c0_i32_2 = arith.constant 0 : i32
    return %c0_i32, %c0_i32_0, %c0_i32_1 : i32, i32, i32
  }
  func.func @transform_4(%arg0: i32) -> (i32, i32) {
    %c0_i32 = arith.constant 0 : i32
    %c0_i32_0 = arith.constant 0 : i32
    %c0_i32_1 = arith.constant 0 : i32
    return %c0_i32, %c0_i32_0 : i32, i32
  }
  func.func @transform_5(%arg0: i32) -> (i32, i32, i32) {
    %c0_i32 = arith.constant 0 : i32
    %c0_i32_0 = arith.constant 0 : i32
    %c0_i32_1 = arith.constant 0 : i32
    %c0_i32_2 = arith.constant 0 : i32
    return %c0_i32, %c0_i32_0, %c0_i32_1 : i32, i32, i32
  }
  func.func @transform_6(%arg0: i32) -> (i32, i32) {
    %c0_i32 = arith.constant 0 : i32
    %c0_i32_0 = arith.constant 0 : i32
    %c0_i32_1 = arith.constant 0 : i32
    return %c0_i32, %c0_i32_0 : i32, i32
  }
  func.func @transform_7(%arg0: i32) -> (i32, i32, i32) {
    %c0_i32 = arith.constant 0 : i32
    %c0_i32_0 = arith.constant 0 : i32
    %c0_i32_1 = arith.constant 0 : i32
    %c0_i32_2 = arith.constant 0 : i32
    return %c0_i32, %c0_i32_0, %c0_i32_1 : i32, i32, i32
  }
  func.func @transform_8(%arg0: i32) -> (i32, i32) {
    %c0_i32 = arith.constant 0 : i32
    %c0_i32_0 = arith.constant 0 : i32
    %c0_i32_1 = arith.constant 0 : i32
    return %c0_i32, %c0_i32_0 : i32, i32
  }
  func.func @transform_9(%arg0: i32) -> (i32, i32) {
    %c0_i32 = arith.constant 0 : i32
    %c0_i32_0 = arith.constant 0 : i32
    %c0_i32_1 = arith.constant 0 : i32
    return %c0_i32, %c0_i32_0 : i32, i32
  }
  func.func @transform_10(%arg0: i32) -> (i32, i32) {
    %c0_i32 = arith.constant 0 : i32
    %c0_i32_0 = arith.constant 0 : i32
    %c0_i32_1 = arith.constant 0 : i32
    return %c0_i32, %c0_i32_0 : i32, i32
  }
  func.func @transform_11(%arg0: i32) -> (i32, i32, i32) {
    %c0_i32 = arith.constant 0 : i32
    %c0_i32_0 = arith.constant 0 : i32
    %c0_i32_1 = arith.constant 0 : i32
    return %arg0, %c0_i32, %c0_i32_0 : i32, i32, i32
  }
}

</mosaic_0001>

<bundles_post_ra>
// kernel: pg_forward.1
= control target key start
LH: loop header
LB: loop body
LE: loop exit
PB: predicated region body
PF: predicated region fallthrough
CT: control target
= control target key end

     0   :  { %s17038_s19 = smov 0   ;;  %s20961_s0 = inlined_call_operand.vmem [shape: bf16[2,112,1024], index: 0, kind: input, shape index: {}]   ;;  %s20962_s1 = inlined_call_operand.vmem [shape: bf16[256,32], index: 1, kind: input, shape index: {}]   ;;  %s20963_s2 = inlined_call_operand.vmem [shape: f32[1,32], index: 2, kind: input, shape index: {}]   ;;  %s20964_s3 = inlined_call_operand.vmem [shape: bf16[4,128,64], index: 3, kind: input, shape index: {}]   ;;  %s20965_s4 = inlined_call_operand.vmem [shape: f32[1,64], index: 4, kind: input, shape index: {}]   ;;  %s20966_s5 = inlined_call_operand.vmem [shape: bf16[9,64,64], index: 5, kind: input, shape index: {}]   ;;  %s20967_s6 = inlined_call_operand.vmem [shape: f32[1,64], index: 6, kind: input, shape index: {}]   ;;  %s20968_s7 = inlined_call_operand.vmem [shape: bf16[49,64,512], index: 7, kind: input, shape index: {}]   ;;  %s20969_s8 = inlined_call_operand.vmem [shape: f32[1,512], index: 8, kind: input, shape index: {}]   ;;  %s20970_s9 = inlined_call_operand.vmem [shape: f32[1,512], index: 9, kind: input, shape index: {}]   ;;  %s20971_s10 = inlined_call_operand.<no memory space> [shape: f32[1,1], index: 10, kind: input, shape index: {}]   ;;  %s20972_s11 = inlined_call_operand.vmem [shape: f32[2,1,1], index: 11, kind: output, shape index: {}]  }
   0x1   :  { %v16_v0 = vstv %s20971_s10 }
   0x2   :  { %17 = vst [vmem:[#allocation2] sm:$0x1] %v16_v0 }
   0x3 LB: > { %s12849_s20 = sadd.s32 4294967295, %s16967_s19   ;;  %p12853_p0 = scmp.ge.s32.totalorder %s16967_s19, 1  ;;  %s16967_s19 = sphi %s17038_s19, %s23_s19  }
   0x4   : > { %p339_p1 = scmp.lt.s32.totalorder %s16967_s19, 3 }
   0x6   : > { %p340_p2 = pnand %p12853_p0, %p339_p1 }
   0x7   : > { %v17049_v1 = vld [vmem:[%s20962_s1 + $0x40] sm:$0xff] (!%p340_p2)   ;;  %p377_p3 = scmp.lt.s32.totalorder (!%p340_p2), %s12849_s20, 1  ;;  %v17061_v3 = vld [vmem:[%s20962_s1 + $0x48] sm:$0xff] (!%p340_p2)   ;;  %v17075_v5 = vld [vmem:[%s20962_s1 + $0x50] sm:$0xff] (!%p340_p2)   ;;  %s16969_s10 = smov (!%p340_p2), 32   ;;  %vm1437_vm0 = vcmask (!%p340_p2), 261120  }
   0x8   : > { %343 = sbr.rel (%p340_p2) target bundleno = 2386 (0x952), region = 64  ;;  %v17054_v2 = vld [vmem:[%s20962_s1] sm:$0xff] (!%p340_p2)   ;;  %14807 = vmatprep.subr.bf16.mxu0 (!%p340_p2), %v17049_v1  ;;  %14865 = vmatprep.subr.bf16.mxu1 (!%p340_p2), %v17049_v1  ;;  %v17068_v4 = vld [vmem:[%s20962_s1 + $0x8] sm:$0xff] (!%p340_p2)   ;;  %v17084_v6 = vld [vmem:[%s20962_s1 + $0x10] sm:$0xff] (!%p340_p2)   ;;  %s16970_s14 = smov (!%p340_p2), 96   ;;  %vm1452_vm1 = vcmask (!%p340_p2), 523264  }
   0x9   : > { %14808 = vmatpush3.bf16.msra.mxu0 (!%p340_p2), %v17054_v2  ;;  %14866 = vmatpush3.bf16.msra.mxu1 (!%p340_p2), %v17054_v2  ;;  %v17091_v7 = vld [vmem:[%s20962_s1 + $0x58] sm:$0xff] (!%p340_p2)   ;;  %v17106_v9 = vld [vmem:[%s20962_s1 + $0x60] sm:$0xff] (!%p340_p2)   ;;  %v17123_v11 = vld [vmem:[%s20962_s1 + $0x68] sm:$0xff] (!%p340_p2)   ;;  %s16971_s17 = smov (!%p340_p2), 64   ;;  %vm1467_vm2 = vcmask (!%p340_p2), 785408   ;;  %vm1863_vm3 = vcmask (!%p340_p2), 1042432  }
   0xa   : > { %14809 = vmatprep.subr.bf16.mxu0 (!%p340_p2), %v17061_v3  ;;  %14867 = vmatprep.subr.bf16.mxu1 (!%p340_p2), %v17061_v3  ;;  %v17099_v8 = vld [vmem:[%s20962_s1 + $0x18] sm:$0xff] (!%p340_p2)   ;;  %v17116_v10 = vld [vmem:[%s20962_s1 + $0x20] sm:$0xff] (!%p340_p2)   ;;  %v17136_v18 = vld [vmem:[%s20962_s1 + $0x28] sm:$0xff] (!%p340_p2)   ;;  %vm1522_vm4 = vsmask.f32 (!%p340_p2), 7424  ;;  %vm16973_vm6 = vmmov (!%p340_p2), 0  }
   0xb   : > { %v17143_v19 = vld [vmem:[%s20962_s1 + $0x70] sm:$0xff] (!%p340_p2)   ;;  %v17157_v21 = vld [vmem:[%s20962_s1 + $0x78] sm:$0xff] (!%p340_p2)   ;;  %vm2041_vm5 = vsmask.f32 (!%p340_p2), 2304  ;;  %vm2973_vm7 = vcmask (!%p340_p2), 1041408   ;;  %vm2542_vm8 = vcmask (!%p340_p2), 1046528  }
   0xc   : > { %v17150_v20 = vld [vmem:[%s20962_s1 + $0x30] sm:$0xff] (!%p340_p2)   ;;  %v17164_v22 = vld [vmem:[%s20962_s1 + $0x38] sm:$0xff] (!%p340_p2)   ;;  %vm3253_vm9 = vsmask.f32 (!%p340_p2), 5376  ;;  %vm3114_vm10 = vcmask (!%p340_p2), 1045504   ;;  %vm3404_vm11 = vcmask (!%p340_p2), 1044480  }
   0xd   : > { %14810 = vmatpush3.bf16.msra.mxu0 (!%p340_p2), %v17068_v4  ;;  %14868 = vmatpush3.bf16.msra.mxu1 (!%p340_p2), %v17068_v4  ;;  %vm12783_vm12 = vcmask (!%p340_p2), 1040384   ;;  %vm12800_vm13 = vcmask (!%p340_p2), 0  }
   0xe   : > { %14811 = vmatprep.subr.bf16.mxu0 (!%p340_p2), %v17075_v5  ;;  %14869 = vmatprep.subr.bf16.mxu1 (!%p340_p2), %v17075_v5 }
   0xf   : > { %s20974_s20 = smov (!%p377_p3, %s12849_s20), 1 }
  0x10   : > { %s15576_s15 = smul.u32 448, %s20974_s20  ;;  %s384_s12 = scalar_lea.vmem %s20972_s11, %s20974_s20 }
  0x11   : > { %14812 = vmatpush3.bf16.msra.mxu0 %v17084_v6  ;;  %14870 = vmatpush3.bf16.msra.mxu1 %v17084_v6 }
  0x12   : > { %14813 = vmatprep.subr.bf16.mxu0 %v17091_v7  ;;  %14871 = vmatprep.subr.bf16.mxu1 %v17091_v7  ;;  %s17111_s23 = scalar_lea.vmem %s20961_s0, %s15576_s15 }
  0x13   : > { %v386_v12 = vld [vmem:[%s17111_s23] sm:$0xff]  ;;  %v387_v14 = vld [vmem:[%s17111_s23 + $0x8] sm:$0xff] }
  0x14   : > { %v390_v13 = vld [vmem:[%s17111_s23 + $0x20] sm:$0xff]  ;;  %v391_v16 = vld [vmem:[%s17111_s23 + $0x28] sm:$0xff] }
  0x15   : > { %14814 = vmatpush3.bf16.msra.mxu0 %v17099_v8  ;;  %14872 = vmatpush3.bf16.msra.mxu1 %v17099_v8  ;;  %v12857_v15 = vcombine.high %v386_v12, %v390_v13  ;;  %v12887_v17 = vcombine.high %v387_v14, %v391_v16  ;;  %v394_v23 = vld [vmem:[%s17111_s23 + $0x40] sm:$0xff]  ;;  %v395_v25 = vld [vmem:[%s17111_s23 + $0x48] sm:$0xff]  ;;  %v12856_v27 = vcombine.low %v386_v12, %v390_v13 }
  0x16   : > { %14815 = vmatprep.subr.bf16.mxu0 %v17106_v9  ;;  %14873 = vmatprep.subr.bf16.mxu1 %v17106_v9  ;;  %v398_v24 = vld [vmem:[%s17111_s23 + $0x60] sm:$0xff]  ;;  %v399_v26 = vld [vmem:[%s17111_s23 + $0x68] sm:$0xff]  ;;  %v12886_v28 = vcombine.low %v387_v14, %v391_v16  ;;  %v400_v16 = vld [vmem:[%s17111_s23 + $0x70] sm:$0xff] }
  0x17   : > { %679 = vmatprep.mubr.bf16.mxu0 %v12857_v15  ;;  %852 = vmatprep.mubr.bf16.mxu1 %v12887_v17  ;;  %v12859_v29 = vcombine.high %v394_v23, %v398_v24  ;;  %v12889_v30 = vcombine.high %v395_v25, %v399_v26  ;;  %v402_v31 = vld [vmem:[%s17111_s23 + $0x80] sm:$0xff]  ;;  %v403_v33 = vld [vmem:[%s17111_s23 + $0x88] sm:$0xff]  ;;  %v12858_v35 = vcombine.low %v394_v23, %v398_v24  ;;  %v396_v15 = vld [vmem:[%s17111_s23 + $0x50] sm:$0xff] }
  0x18   : > { %v406_v32 = vld [vmem:[%s17111_s23 + $0xa0] sm:$0xff]  ;;  %v407_v34 = vld [vmem:[%s17111_s23 + $0xa8] sm:$0xff]  ;;  %v12888_v36 = vcombine.low %v395_v25, %v399_v26  ;;  %v397_v17 = vld [vmem:[%s17111_s23 + $0x58] sm:$0xff] }
  0x19   : > { %14816 = vmatpush3.bf16.msra.mxu0 %v17116_v10  ;;  %14874 = vmatpush3.bf16.msra.mxu1 %v17116_v10  ;;  %v12861_v37 = vcombine.high %v402_v31, %v406_v32  ;;  %v12891_v38 = vcombine.high %v403_v33, %v407_v34  ;;  %v410_v39 = vld [vmem:[%s17111_s23 + $0xc0] sm:$0xff]  ;;  %v411_v41 = vld [vmem:[%s17111_s23 + $0xc8] sm:$0xff]  ;;  %v12860_v43 = vcombine.low %v402_v31, %v406_v32  ;;  %v404_v23 = vld [vmem:[%s17111_s23 + $0x90] sm:$0xff] }
  0x1a   : > { %14817 = vmatprep.subr.bf16.mxu0 %v17123_v11  ;;  %14875 = vmatprep.subr.bf16.mxu1 %v17123_v11  ;;  %v414_v40 = vld [vmem:[%s17111_s23 + $0xe0] sm:$0xff]  ;;  %v415_v42 = vld [vmem:[%s17111_s23 + $0xe8] sm:$0xff]  ;;  %v12890_v44 = vcombine.low %v403_v33, %v407_v34  ;;  %v408_v24 = vld [vmem:[%s17111_s23 + $0xb0] sm:$0xff] }
  0x1b   : > { %v12863_v45 = vcombine.high %v410_v39, %v414_v40  ;;  %v12893_v46 = vcombine.high %v411_v41, %v415_v42  ;;  %v418_v47 = vld [vmem:[%s17111_s23 + $0x100] sm:$0xff]  ;;  %v419_v49 = vld [vmem:[%s17111_s23 + $0x108] sm:$0xff]  ;;  %v12862_v51 = vcombine.low %v410_v39, %v414_v40  ;;  %v12892_v52 = vcombine.low %v411_v41, %v415_v42  ;;  %v405_v25 = vld [vmem:[%s17111_s23 + $0x98] sm:$0xff] }
  0x1c   : > { %v422_v48 = vld [vmem:[%s17111_s23 + $0x120] sm:$0xff]  ;;  %v423_v50 = vld [vmem:[%s17111_s23 + $0x128] sm:$0xff]  ;;  %v409_v26 = vld [vmem:[%s17111_s23 + $0xb8] sm:$0xff] }
  0x1d   : > { %14818 = vmatpush3.bf16.msra.mxu0 %v17136_v18  ;;  %14876 = vmatpush3.bf16.msra.mxu1 %v17136_v18  ;;  %v12865_v53 = vcombine.high %v418_v47, %v422_v48  ;;  %v12895_v54 = vcombine.high %v419_v49, %v423_v50  ;;  %v426_v55 = vld [vmem:[%s17111_s23 + $0x140] sm:$0xff]  ;;  %v427_v57 = vld [vmem:[%s17111_s23 + $0x148] sm:$0xff]  ;;  %v12864_v59 = vcombine.low %v418_v47, %v422_v48  ;;  %v412_v31 = vld [vmem:[%s17111_s23 + $0xd0] sm:$0xff] }
  0x1e   : > { %14819 = vmatprep.subr.bf16.mxu0 %v17143_v19  ;;  %14877 = vmatprep.subr.bf16.mxu1 %v17143_v19  ;;  %v430_v56 = vld [vmem:[%s17111_s23 + $0x160] sm:$0xff]  ;;  %v431_v58 = vld [vmem:[%s17111_s23 + $0x168] sm:$0xff]  ;;  %v12894_v60 = vcombine.low %v419_v49, %v423_v50  ;;  %v416_v32 = vld [vmem:[%s17111_s23 + $0xf0] sm:$0xff] }
  0x1f   : > { %v12867_v61 = vcombine.high %v426_v55, %v430_v56  ;;  %v12897_v62 = vcombine.high %v427_v57, %v431_v58  ;;  %v434_v63 = vld [vmem:[%s17111_s23 + $0x180] sm:$0xff]  ;;  %v413_v33 = vld [vmem:[%s17111_s23 + $0xd8] sm:$0xff]  ;;  %v420_v39 = vld [vmem:[%s17111_s23 + $0x110] sm:$0xff] }
  0x20   : > { %v438_v0 = vld [vmem:[%s17111_s23 + $0x1a0] sm:$0xff]  ;;  %v417_v34 = vld [vmem:[%s17111_s23 + $0xf8] sm:$0xff]  ;;  %v424_v40 = vld [vmem:[%s17111_s23 + $0x130] sm:$0xff] }
  0x21   : > { %14820 = vmatpush3.bf16.msra.mxu0 %v17150_v20  ;;  %14878 = vmatpush3.bf16.msra.mxu1 %v17150_v20  ;;  %v421_v41 = vld [vmem:[%s17111_s23 + $0x118] sm:$0xff]  ;;  %v428_v47 = vld [vmem:[%s17111_s23 + $0x150] sm:$0xff] }
  0x22   : > { %14821 = vmatprep.subr.bf16.mxu0 %v17157_v21  ;;  %14879 = vmatprep.subr.bf16.mxu1 %v17157_v21  ;;  %v425_v42 = vld [vmem:[%s17111_s23 + $0x138] sm:$0xff]  ;;  %v432_v48 = vld [vmem:[%s17111_s23 + $0x170] sm:$0xff] }
  0x23   : > { %v429_v49 = vld [vmem:[%s17111_s23 + $0x158] sm:$0xff] }
  0x24   : > { %v433_v50 = vld [vmem:[%s17111_s23 + $0x178] sm:$0xff] }
  0x25   : > { %14822 = vmatpush3.bf16.msra.mxu0 %v17164_v22  ;;  %14880 = vmatpush3.bf16.msra.mxu1 %v17164_v22 }
  0x26   : > { %14923 = vmatprep.subr.bf16.mxu0 %v17049_v1  ;;  %14981 = vmatprep.subr.bf16.mxu1 %v17049_v1  ;;  %v435_v1 = vld [vmem:[%s17111_s23 + $0x188] sm:$0xff] }
  0x28   : > { %680 = vmatmul.mubr.bf16.vlgmr.msra.gmra.mrb[0].mxu0 %v12856_v27  ;;  %853 = vmatmul.mubr.bf16.vlgmr.msra.gmra.mrb[0].mxu1 %v12886_v28  ;;  %v12902_v27 = vcombine.low %v396_v15, %v400_v16 }
  0x29   : > { %14924 = vmatpush3.bf16.msra.mxu0 %v17054_v2  ;;  %14982 = vmatpush3.bf16.msra.mxu1 %v17054_v2  ;;  %v439_v2 = vld [vmem:[%s17111_s23 + $0x1a8] sm:$0xff] }
  0x2a   : > { %687 = vmatprep.mubr.bf16.mxu0 %v12859_v29  ;;  %860 = vmatprep.mubr.bf16.mxu1 %v12889_v30  ;;  %v12898_v12 = vcombine.low %v435_v1, %v439_v2  ;;  %v12905_v29 = vcombine.high %v404_v23, %v408_v24  ;;  %v12919_v30 = vcombine.high %v405_v25, %v409_v26 }
  0x2b   : > { %14925 = vmatprep.subr.bf16.mxu0 %v17061_v3  ;;  %14983 = vmatprep.subr.bf16.mxu1 %v17061_v3  ;;  %v12866_v3 = vcombine.low %v426_v55, %v430_v56  ;;  %v436_v55 = vld [vmem:[%s17111_s23 + $0x190] sm:$0xff] }
  0x2c   : > { %v440_v56 = vld [vmem:[%s17111_s23 + $0x1b0] sm:$0xff] }
  0x2d   : > { %14926 = vmatpush3.bf16.msra.mxu0 %v17068_v4  ;;  %14984 = vmatpush3.bf16.msra.mxu1 %v17068_v4  ;;  %v12896_v4 = vcombine.low %v427_v57, %v431_v58  ;;  %v437_v57 = vld [vmem:[%s17111_s23 + $0x198] sm:$0xff] }
  0x2e   : > { %14927 = vmatprep.subr.bf16.mxu0 %v17075_v5  ;;  %14985 = vmatprep.subr.bf16.mxu1 %v17075_v5  ;;  %v12869_v5 = vcombine.high %v434_v63, %v438_v0  ;;  %v441_v58 = vld [vmem:[%s17111_s23 + $0x1b8] sm:$0xff] }
  0x30   : > { %688 = vmatmul.mubr.bf16.gmra.mrb[4].mxu0 %v12858_v35  ;;  %861 = vmatmul.mubr.bf16.gmra.mrb[4].mxu1 %v12888_v36  ;;  %v12904_v35 = vcombine.low %v404_v23, %v408_v24  ;;  %v12918_v36 = vcombine.low %v405_v25, %v409_v26 }
  0x31   : > { %695 = vmatprep.mubr.bf16.mxu0 %v12861_v37  ;;  %868 = vmatprep.mubr.bf16.mxu1 %v12891_v38  ;;  %v12907_v37 = vcombine.high %v412_v31, %v416_v32  ;;  %v12921_v38 = vcombine.high %v413_v33, %v417_v34 }
  0x32   : > { %14928 = vmatpush3.bf16.msra.mxu0 %v17084_v6  ;;  %14986 = vmatpush3.bf16.msra.mxu1 %v17084_v6  ;;  %v12899_v6 = vcombine.high %v435_v1, %v439_v2  ;;  %v17257_v1 = vld [vmem:[%s20963_s2] ss:$0 sm:$0xff] }
  0x33   : > { %14929 = vmatprep.subr.bf16.mxu0 %v17091_v7  ;;  %14987 = vmatprep.subr.bf16.mxu1 %v17091_v7  ;;  %v388_v7 = vld [vmem:[%s17111_s23 + $0x10] sm:$0xff] }
  0x36   : > { %14930 = vmatpush3.bf16.msra.mxu0 %v17099_v8  ;;  %14988 = vmatpush3.bf16.msra.mxu1 %v17099_v8  ;;  %v392_v8 = vld [vmem:[%s17111_s23 + $0x30] sm:$0xff] }
  0x37   : > { %14931 = vmatprep.subr.bf16.mxu0 %v17106_v9  ;;  %14989 = vmatprep.subr.bf16.mxu1 %v17106_v9  ;;  %v389_v9 = vld [vmem:[%s17111_s23 + $0x18] sm:$0xff]  ;;  %v12901_v13 = vcombine.high %v388_v7, %v392_v8 }
  0x38   : > { %696 = vmatmul.mubr.bf16.gmra.mrb[8].mxu0 %v12860_v43  ;;  %869 = vmatmul.mubr.bf16.gmra.mrb[8].mxu1 %v12890_v44  ;;  %v12906_v43 = vcombine.low %v412_v31, %v416_v32  ;;  %v12920_v44 = vcombine.low %v413_v33, %v417_v34 }
  0x39   : > { %703 = vmatprep.mubr.bf16.mxu0 %v12863_v45  ;;  %876 = vmatprep.mubr.bf16.mxu1 %v12893_v46  ;;  %v12909_v45 = vcombine.high %v420_v39, %v424_v40  ;;  %v12923_v46 = vcombine.high %v421_v41, %v425_v42 }
  0x3a   : > { %14932 = vmatpush3.bf16.msra.mxu0 %v17116_v10  ;;  %14990 = vmatpush3.bf16.msra.mxu1 %v17116_v10  ;;  %v393_v10 = vld [vmem:[%s17111_s23 + $0x38] sm:$0xff] }
  0x3b   : > { %14933 = vmatprep.subr.bf16.mxu0 %v17123_v11  ;;  %14991 = vmatprep.subr.bf16.mxu1 %v17123_v11  ;;  %v12868_v11 = vcombine.low %v434_v63, %v438_v0  ;;  %v12915_v14 = vcombine.high %v389_v9, %v393_v10  ;;  %v12912_v63 = vcombine.low %v436_v55, %v440_v56 }
  0x3c   : > { %v12926_v0 = vcombine.low %v437_v57, %v441_v58 }
  0x3e   : > { %14934 = vmatpush3.bf16.msra.mxu0 %v17136_v18  ;;  %14992 = vmatpush3.bf16.msra.mxu1 %v17136_v18  ;;  %v401_v18 = vld [vmem:[%s17111_s23 + $0x78] sm:$0xff] }
  0x3f   : > { %14935 = vmatprep.subr.bf16.mxu0 %v17143_v19  ;;  %14993 = vmatprep.subr.bf16.mxu1 %v17143_v19  ;;  %v12900_v19 = vcombine.low %v388_v7, %v392_v8  ;;  %v12916_v28 = vcombine.low %v397_v17, %v401_v18 }
  0x40   : > { %704 = vmatmul.mubr.bf16.gmra.mrb[12].mxu0 %v12862_v51  ;;  %877 = vmatmul.mubr.bf16.gmra.mrb[12].mxu1 %v12892_v52  ;;  %v12908_v51 = vcombine.low %v420_v39, %v424_v40  ;;  %v12922_v52 = vcombine.low %v421_v41, %v425_v42  ;;  %v15712_v39 = vld [vmem:[%s20964_s3 + $0x40] sm:$0xff]   ;;  %v15713_v40 = vld [vmem:[%s20964_s3 + $0x48] sm:$0xff]  }
  0x41   : > { %711 = vmatprep.mubr.bf16.mxu0 %v12865_v53  ;;  %884 = vmatprep.mubr.bf16.mxu1 %v12895_v54  ;;  %v12911_v53 = vcombine.high %v428_v47, %v432_v48  ;;  %v12925_v54 = vcombine.high %v429_v49, %v433_v50 }
  0x42   : > { %14936 = vmatpush3.bf16.msra.mxu0 %v17150_v20  ;;  %14994 = vmatpush3.bf16.msra.mxu1 %v17150_v20  ;;  %v12914_v20 = vcombine.low %v389_v9, %v393_v10 }
  0x43   : > { %14937 = vmatprep.subr.bf16.mxu0 %v17157_v21  ;;  %14995 = vmatprep.subr.bf16.mxu1 %v17157_v21  ;;  %v12903_v21 = vcombine.high %v396_v15, %v400_v16 }
  0x46   : > { %14938 = vmatpush3.bf16.msra.mxu0 %v17164_v22  ;;  %14996 = vmatpush3.bf16.msra.mxu1 %v17164_v22  ;;  %v12917_v22 = vcombine.high %v397_v17, %v401_v18 }
  0x47   : > { %15176 = vmatprep.subr.bf16.mxu0 %v15712_v39 }
  0x48   : > { %712 = vmatmul.mubr.bf16.gmra.mrb[16].mxu0 %v12864_v59  ;;  %885 = vmatmul.mubr.bf16.gmra.mrb[16].mxu1 %v12894_v60  ;;  %v12910_v59 = vcombine.low %v428_v47, %v432_v48  ;;  %v12924_v60 = vcombine.low %v429_v49, %v433_v50 }
  0x49   : > { %719 = vmatprep.mubr.bf16.mxu0 %v12867_v61  ;;  %892 = vmatprep.mubr.bf16.mxu1 %v12897_v62  ;;  %v12913_v61 = vcombine.high %v436_v55, %v440_v56  ;;  %v12927_v62 = vcombine.high %v437_v57, %v441_v58 }
  0x50   : > { %720 = vmatmul.mubr.bf16.gmra.mrb[20].mxu0 %v12866_v3  ;;  %893 = vmatmul.mubr.bf16.gmra.mrb[20].mxu1 %v12896_v4 }
  0x51   : > { %727 = vmatprep.mubr.bf16.mxu0 %v12869_v5  ;;  %900 = vmatprep.mubr.bf16.mxu1 %v12899_v6 }
  0x58   : > { %728 = vmatmul.mubr.bf16.gmra.mrb[24].mxu0 %v12868_v11  ;;  %901 = vmatmul.mubr.bf16.gmra.mrb[24].mxu1 %v12898_v12 }
  0x59   : > { %1025 = vmatprep.mubr.bf16.mxu0 %v12901_v13  ;;  %1198 = vmatprep.mubr.bf16.mxu1 %v12915_v14 }
  0x60   : > { %1026 = vmatmul.mubr.bf16.vlgmr.msra.gmra.mrb[28].mxu0 %v12900_v19  ;;  %1199 = vmatmul.mubr.bf16.vlgmr.msra.gmra.mrb[28].mxu1 %v12914_v20 }
  0x61   : > { %1033 = vmatprep.mubr.bf16.mxu0 %v12903_v21  ;;  %1206 = vmatprep.mubr.bf16.mxu1 %v12917_v22 }
  0x62   : > { %15177 = vmatpush3.bf16.msra.mxu0 %v15712_v39 }
  0x63   : > { %15178 = vmatprep.subr.bf16.mxu0 %v15713_v40 }
  0x66   : > { %15179 = vmatpush3.bf16.msra.mxu0 %v15713_v40 }
  0x68   : > { %1034 = vmatmul.mubr.bf16.gmra.mrb[32].mxu0 %v12902_v27  ;;  %1207 = vmatmul.mubr.bf16.gmra.mrb[32].mxu1 %v12916_v28 }
  0x69   : > { %1041 = vmatprep.mubr.bf16.mxu0 %v12905_v29  ;;  %1214 = vmatprep.mubr.bf16.mxu1 %v12919_v30 }
  0x70   : > { %1042 = vmatmul.mubr.bf16.gmra.mrb[36].mxu0 %v12904_v35  ;;  %1215 = vmatmul.mubr.bf16.gmra.mrb[36].mxu1 %v12918_v36 }
  0x71   : > { %1049 = vmatprep.mubr.bf16.mxu0 %v12907_v37  ;;  %1222 = vmatprep.mubr.bf16.mxu1 %v12921_v38 }
  0x78   : > { %1050 = vmatmul.mubr.bf16.gmra.mrb[40].mxu0 %v12906_v43  ;;  %1223 = vmatmul.mubr.bf16.gmra.mrb[40].mxu1 %v12920_v44 }
  0x79   : > { %1057 = vmatprep.mubr.bf16.mxu0 %v12909_v45  ;;  %1230 = vmatprep.mubr.bf16.mxu1 %v12923_v46 }
  0x80   : > { %1058 = vmatmul.mubr.bf16.gmra.mrb[44].mxu0 %v12908_v51  ;;  %1231 = vmatmul.mubr.bf16.gmra.mrb[44].mxu1 %v12922_v52  ;;  %v15714_v51 = vld [vmem:[%s20964_s3 + $0x50] sm:$0xff]  }
  0x81   : > { %1065 = vmatprep.mubr.bf16.mxu0 %v12911_v53  ;;  %1238 = vmatprep.mubr.bf16.mxu1 %v12925_v54 }
  0x82   : > { %15180 = vmatprep.subr.bf16.mxu0 %v15714_v51 }
  0x83   : > { %15181 = vmatpush3.bf16.msra.mxu0 %v15714_v51 }
  0x88   : > { %1066 = vmatmul.mubr.bf16.gmra.mrb[48].mxu0 %v12910_v59  ;;  %1239 = vmatmul.mubr.bf16.gmra.mrb[48].mxu1 %v12924_v60 }
  0x89   : > { %1073 = vmatprep.mubr.bf16.mxu0 %v12913_v61  ;;  %1246 = vmatprep.mubr.bf16.mxu1 %v12927_v62 }
  0x90   : > { %1074 = vmatmul.mubr.bf16.gmra.mrb[52].mxu0 %v12912_v63  ;;  %1247 = vmatmul.mubr.bf16.gmra.mrb[52].mxu1 %v12926_v0 }
  0xfb   : > { %v14823_v2 = vpop.f32.mrb[0].mxu0  ;;  %v14881_v3 = vpop.f32.mrb[0].mxu1 }
  0xfc   : > { %v14824_v4 = vpop.f32.mrb[1].mxu0  ;;  %v14882_v5 = vpop.f32.mrb[1].mxu1 }
  0xfd   : > { %v17259_v6 = vadd.f32 %v14824_v4, %v14823_v2  ;;  %v14883_v7 = vadd.f32 %v14882_v5, %v14881_v3  ;;  %v14826_v8 = vpop.f32.mrb[2].mxu0  ;;  %v14884_v9 = vpop.f32.mrb[2].mxu1 }
  0xfe   : > { %v14827_v10 = vpop.f32.mrb[3].mxu0  ;;  %v14885_v11 = vpop.f32.mrb[3].mxu1 }
  0xff   : > { %v17261_v12 = vadd.f32 %v14827_v10, %v14826_v8  ;;  %v14886_v13 = vadd.f32 %v14885_v11, %v14884_v9  ;;  %v855_v14 = vadd.f32 %v14883_v7, %v17257_v1 }
 0x101   : > { %v858_v15 = vadd.f32 %v14886_v13, %v17257_v1  ;;  %v909_v18 = vmax.f32 %v855_v14, 0.0 }
 0x103   : > { %v14829_v16 = vpop.f32.mrb[4].mxu0  ;;  %v14887_v17 = vpop.f32.mrb[4].mxu1  ;;  %v910_v19 = vmax.f32 %v858_v15, 0.0 }
 0x104   : > { %v14830_v20 = vpop.f32.mrb[5].mxu0  ;;  %v14888_v21 = vpop.f32.mrb[5].mxu1 }
 0x105   : > { %v17265_v22 = vadd.f32 %v14830_v20, %v14829_v16  ;;  %v14889_v23 = vadd.f32 %v14888_v21, %v14887_v17  ;;  %v14832_v24 = vpop.f32.mrb[6].mxu0  ;;  %v14890_v25 = vpop.f32.mrb[6].mxu1  ;;  %v15591_v26 = vpack.i.bf16 %v910_v19, %v909_v18 }
 0x106   : > { %v14833_v27 = vpop.f32.mrb[7].mxu0  ;;  %v14891_v28 = vpop.f32.mrb[7].mxu1 }
 0x107   : > { %v863_v29 = vadd.f32 %v14889_v23, %v17257_v1  ;;  %v17268_v30 = vadd.f32 %v14833_v27, %v14832_v24  ;;  %v14892_v31 = vadd.f32 %v14891_v28, %v14890_v25  ;;  %15592 = vrot.lane.b32.xlu0 %v15591_v26, %s16969_s10 }
 0x109   : > { %v866_v32 = vadd.f32 %v14892_v31, %v17257_v1  ;;  %v911_v35 = vmax.f32 %v863_v29, 0.0 }
 0x10b   : > { %v14835_v33 = vpop.f32.mrb[8].mxu0  ;;  %v14893_v34 = vpop.f32.mrb[8].mxu1  ;;  %v912_v36 = vmax.f32 %v866_v32, 0.0 }
 0x10c   : > { %v14836_v37 = vpop.f32.mrb[9].mxu0  ;;  %v14894_v38 = vpop.f32.mrb[9].mxu1 }
 0x10d   : > { %v17278_v41 = vadd.f32 %v14836_v37, %v14835_v33  ;;  %v14895_v42 = vadd.f32 %v14894_v38, %v14893_v34  ;;  %v14838_v43 = vpop.f32.mrb[10].mxu0  ;;  %v14896_v44 = vpop.f32.mrb[10].mxu1  ;;  %v15596_v45 = vpack.i.bf16 %v912_v36, %v911_v35 }
 0x10e   : > { %v14839_v46 = vpop.f32.mrb[11].mxu0  ;;  %v14897_v47 = vpop.f32.mrb[11].mxu1 }
 0x10f   : > { %v17280_v48 = vadd.f32 %v14839_v46, %v14838_v43  ;;  %v14898_v49 = vadd.f32 %v14897_v47, %v14896_v44  ;;  %15597 = vrot.lane.b32.xlu0 %v15596_v45, %s16969_s10  ;;  %v871_v50 = vadd.f32 %v14895_v42, %v17257_v1 }
 0x111   : > { %v874_v52 = vadd.f32 %v14898_v49, %v17257_v1  ;;  %v913_v55 = vmax.f32 %v871_v50, 0.0 }
 0x113   : > { %v14841_v53 = vpop.f32.mrb[12].mxu0  ;;  %v14899_v54 = vpop.f32.mrb[12].mxu1  ;;  %v914_v56 = vmax.f32 %v874_v52, 0.0 }
 0x114   : > { %v14842_v57 = vpop.f32.mrb[13].mxu0  ;;  %v14900_v58 = vpop.f32.mrb[13].mxu1 }
 0x115   : > { %v17288_v59 = vadd.f32 %v14842_v57, %v14841_v53  ;;  %v14901_v60 = vadd.f32 %v14900_v58, %v14899_v54  ;;  %v14844_v61 = vpop.f32.mrb[14].mxu0  ;;  %v14902_v62 = vpop.f32.mrb[14].mxu1  ;;  %v15601_v63 = vpack.i.bf16 %v914_v56, %v913_v55 }
 0x116   : > { %v14845_v0 = vpop.f32.mrb[15].mxu0  ;;  %v14903_v2 = vpop.f32.mrb[15].mxu1 }
 0x117   : > { %v879_v3 = vadd.f32 %v14901_v60, %v17257_v1  ;;  %v17291_v4 = vadd.f32 %v14845_v0, %v14844_v61  ;;  %v14904_v5 = vadd.f32 %v14903_v2, %v14902_v62  ;;  %15602 = vrot.lane.b32.xlu1 %v15601_v63, %s16969_s10 }
 0x119   : > { %v882_v7 = vadd.f32 %v14904_v5, %v17257_v1  ;;  %v915_v10 = vmax.f32 %v879_v3, 0.0 }
 0x11b   : > { %v14847_v8 = vpop.f32.mrb[16].mxu0  ;;  %v14905_v9 = vpop.f32.mrb[16].mxu1  ;;  %v916_v11 = vmax.f32 %v882_v7, 0.0 }
 0x11c   : > { %v14848_v13 = vpop.f32.mrb[17].mxu0  ;;  %v14906_v14 = vpop.f32.mrb[17].mxu1 }
 0x11d   : > { %v17295_v15 = vadd.f32 %v14848_v13, %v14847_v8  ;;  %v14907_v16 = vadd.f32 %v14906_v14, %v14905_v9  ;;  %v14850_v17 = vpop.f32.mrb[18].mxu0  ;;  %v14908_v18 = vpop.f32.mrb[18].mxu1  ;;  %v17297_v19 = vpack.i.bf16 %v916_v11, %v915_v10 }
 0x11e   : > { %v14851_v20 = vpop.f32.mrb[19].mxu0  ;;  %v14909_v21 = vpop.f32.mrb[19].mxu1 }
 0x11f   : > { %v887_v23 = vadd.f32 %v14907_v16, %v17257_v1  ;;  %v17300_v24 = vadd.f32 %v14851_v20, %v14850_v17  ;;  %v14910_v25 = vadd.f32 %v14909_v21, %v14908_v18 }
 0x121   : > { %v890_v26 = vadd.f32 %v14910_v25, %v17257_v1  ;;  %v917_v29 = vmax.f32 %v887_v23, 0.0 }
 0x123   : > { %v14853_v27 = vpop.f32.mrb[20].mxu0  ;;  %v14911_v28 = vpop.f32.mrb[20].mxu1  ;;  %v918_v31 = vmax.f32 %v890_v26, 0.0  ;;  %v15715_v26 = vld [vmem:[%s20964_s3 + $0x58] sm:$0xff]  }
 0x124   : > { %v14854_v32 = vpop.f32.mrb[21].mxu0  ;;  %v14912_v33 = vpop.f32.mrb[21].mxu1  ;;  %15182 = vmatprep.subr.bf16.mxu0 %v15715_v26 }
 0x125   : > { %v17303_v34 = vadd.f32 %v14854_v32, %v14853_v27  ;;  %v14913_v35 = vadd.f32 %v14912_v33, %v14911_v28  ;;  %v14856_v36 = vpop.f32.mrb[22].mxu0  ;;  %v14914_v37 = vpop.f32.mrb[22].mxu1  ;;  %v17305_v38 = vpack.i.bf16 %v918_v31, %v917_v29  ;;  %15183 = vmatpush3.bf16.msra.mxu0 %v15715_v26  ;;  %v15716_v32 = vld [vmem:[%s20964_s3 + $0x60] sm:$0xff]  }
 0x126   : > { %v14857_v39 = vpop.f32.mrb[23].mxu0  ;;  %v14915_v40 = vpop.f32.mrb[23].mxu1  ;;  %15184 = vmatprep.subr.bf16.mxu0 %v15716_v32 }
 0x127   : > { %v895_v42 = vadd.f32 %v14913_v35, %v17257_v1  ;;  %v17308_v43 = vadd.f32 %v14857_v39, %v14856_v36  ;;  %v14916_v44 = vadd.f32 %v14915_v40, %v14914_v37 }
 0x129   : > { %v898_v45 = vadd.f32 %v14916_v44, %v17257_v1  ;;  %v919_v49 = vmax.f32 %v895_v42, 0.0  ;;  %15185 = vmatpush3.bf16.msra.mxu0 %v15716_v32 }
 0x12b   : > { %v14859_v46 = vpop.f32.mrb[24].mxu0  ;;  %v14917_v47 = vpop.f32.mrb[24].mxu1  ;;  %v920_v50 = vmax.f32 %v898_v45, 0.0 }
 0x12c   : > { %v14860_v51 = vpop.f32.mrb[25].mxu0  ;;  %v14918_v52 = vpop.f32.mrb[25].mxu1 }
 0x12d   : > { %v17311_v53 = vadd.f32 %v14860_v51, %v14859_v46  ;;  %v14919_v54 = vadd.f32 %v14918_v52, %v14917_v47  ;;  %v14862_v55 = vpop.f32.mrb[26].mxu0  ;;  %v14920_v56 = vpop.f32.mrb[26].mxu1  ;;  %v17313_v57 = vpack.i.bf16 %v920_v50, %v919_v49 }
 0x12e   : > { %v14863_v58 = vpop.f32.mrb[27].mxu0  ;;  %v14921_v60 = vpop.f32.mrb[27].mxu1 }
 0x12f   : > { %v903_v61 = vadd.f32 %v14919_v54, %v17257_v1  ;;  %v17316_v62 = vadd.f32 %v14863_v58, %v14862_v55  ;;  %v14922_v63 = vadd.f32 %v14921_v60, %v14920_v56  ;;  %v15717_v58 = vld [vmem:[%s20964_s3 + $0x68] sm:$0xff]  }
 0x130   : > { %15186 = vmatprep.subr.bf16.mxu0 %v15717_v58 }
 0x131   : > { %v906_v0 = vadd.f32 %v14922_v63, %v17257_v1  ;;  %v921_v5 = vmax.f32 %v903_v61, 0.0  ;;  %15187 = vmatpush3.bf16.msra.mxu0 %v15717_v58 }
 0x133   : > { %v14939_v2 = vpop.f32.mrb[28].mxu0  ;;  %v14997_v3 = vpop.f32.mrb[28].mxu1  ;;  %v922_v7 = vmax.f32 %v906_v0, 0.0 }
 0x134   : > { %v14940_v8 = vpop.f32.mrb[29].mxu0  ;;  %v14998_v9 = vpop.f32.mrb[29].mxu1 }
 0x135   : > { %v14941_v10 = vadd.f32 %v14940_v8, %v14939_v2  ;;  %v14999_v11 = vadd.f32 %v14998_v9, %v14997_v3  ;;  %v14942_v13 = vpop.f32.mrb[30].mxu0  ;;  %v15000_v14 = vpop.f32.mrb[30].mxu1  ;;  %v17319_v16 = vpack.i.bf16 %v922_v7, %v921_v5 }
 0x136   : > { %v14943_v17 = vpop.f32.mrb[31].mxu0  ;;  %v15001_v18 = vpop.f32.mrb[31].mxu1 }
 0x137   : > { %v1028_v20 = vadd.f32 %v14941_v10, %v17257_v1  ;;  %v1201_v21 = vadd.f32 %v14999_v11, %v17257_v1  ;;  %v14944_v23 = vadd.f32 %v14943_v17, %v14942_v13  ;;  %v15002_v25 = vadd.f32 %v15001_v18, %v15000_v14  ;;  %v15718_v10 = vld [vmem:[%s20964_s3 + $0x70] sm:$0xff]  }
 0x138   : > { %15188 = vmatprep.subr.bf16.mxu0 %v15718_v10 }
 0x139   : > { %v1031_v27 = vadd.f32 %v14944_v23, %v17257_v1  ;;  %v1204_v28 = vadd.f32 %v15002_v25, %v17257_v1  ;;  %v1255_v29 = vmax.f32 %v1201_v21, 0.0  ;;  %v1082_v31 = vmax.f32 %v1028_v20, 0.0  ;;  %15189 = vmatpush3.bf16.msra.mxu0 %v15718_v10 }
 0x13b   : > { %v14945_v33 = vpop.f32.mrb[32].mxu0  ;;  %v15003_v35 = vpop.f32.mrb[32].mxu1  ;;  %v1256_v36 = vmax.f32 %v1204_v28, 0.0  ;;  %v1083_v37 = vmax.f32 %v1031_v27, 0.0 }
 0x13c   : > { %v14946_v39 = vpop.f32.mrb[33].mxu0  ;;  %v15004_v40 = vpop.f32.mrb[33].mxu1 }
 0x13d   : > { %v14947_v42 = vadd.f32 %v14946_v39, %v14945_v33  ;;  %v15005_v44 = vadd.f32 %v15004_v40, %v15003_v35  ;;  %v14948_v45 = vpop.f32.mrb[34].mxu0  ;;  %v15006_v46 = vpop.f32.mrb[34].mxu1  ;;  %v15611_v47 = vpack.i.bf16 %v1256_v36, %v1255_v29  ;;  %v15606_v49 = vpack.i.bf16 %v1083_v37, %v1082_v31  ;;  %v15719_v29 = vld [vmem:[%s20964_s3 + $0x78] sm:$0xff]  }
 0x13e   : > { %v14949_v50 = vpop.f32.mrb[35].mxu0  ;;  %v15007_v51 = vpop.f32.mrb[35].mxu1  ;;  %15190 = vmatprep.subr.bf16.mxu0 %v15719_v29 }
 0x13f   : > { %v1036_v52 = vadd.f32 %v14947_v42, %v17257_v1  ;;  %v1209_v54 = vadd.f32 %v15005_v44, %v17257_v1  ;;  %v14950_v55 = vadd.f32 %v14949_v50, %v14948_v45  ;;  %v15008_v56 = vadd.f32 %v15007_v51, %v15006_v46  ;;  %15612 = vrot.lane.b32.xlu0 %v15611_v47, %s16970_s14 }
 0x140   : > { %15607 = vrot.lane.b32.xlu1 %v15606_v49, %s16971_s17  ;;  %15191 = vmatpush3.bf16.msra.mxu0 %v15719_v29 }
 0x141   : > { %v1039_v60 = vadd.f32 %v14950_v55, %v17257_v1  ;;  %v1212_v61 = vadd.f32 %v15008_v56, %v17257_v1  ;;  %v1257_v63 = vmax.f32 %v1209_v54, 0.0  ;;  %v1084_v0 = vmax.f32 %v1036_v52, 0.0 }
 0x143   : > { %v14951_v2 = vpop.f32.mrb[36].mxu0  ;;  %v15009_v3 = vpop.f32.mrb[36].mxu1  ;;  %v1258_v5 = vmax.f32 %v1212_v61, 0.0  ;;  %v1085_v7 = vmax.f32 %v1039_v60, 0.0 }
 0x144   : > { %v14952_v8 = vpop.f32.mrb[37].mxu0  ;;  %v15010_v9 = vpop.f32.mrb[37].mxu1 }
 0x145   : > { %v14953_v11 = vadd.f32 %v14952_v8, %v14951_v2  ;;  %v15011_v13 = vadd.f32 %v15010_v9, %v15009_v3  ;;  %v14954_v14 = vpop.f32.mrb[38].mxu0  ;;  %v15012_v17 = vpop.f32.mrb[38].mxu1  ;;  %v15621_v18 = vpack.i.bf16 %v1258_v5, %v1257_v63  ;;  %v15616_v20 = vpack.i.bf16 %v1085_v7, %v1084_v0  ;;  %v17361_v9 = vld [vmem:[%s20964_s3] sm:$0xff]  }
 0x146   : > { %v14955_v21 = vpop.f32.mrb[39].mxu0  ;;  %v15013_v23 = vpop.f32.mrb[39].mxu1  ;;  %15204 = vmatprep.subr.bf16.mxu0 %v17361_v9 }
 0x147   : > { %v1044_v25 = vadd.f32 %v14953_v11, %v17257_v1  ;;  %v1217_v26 = vadd.f32 %v15011_v13, %v17257_v1  ;;  %v14956_v27 = vadd.f32 %v14955_v21, %v14954_v14  ;;  %v15014_v28 = vadd.f32 %v15013_v23, %v15012_v17  ;;  %15622 = vrot.lane.b32.xlu0 %v15621_v18, %s16970_s14 }
 0x148   : > { %15617 = vrot.lane.b32.xlu1 %v15616_v20, %s16971_s17 }
 0x149   : > { %v1047_v31 = vadd.f32 %v14956_v27, %v17257_v1  ;;  %v1220_v32 = vadd.f32 %v15014_v28, %v17257_v1  ;;  %v1259_v33 = vmax.f32 %v1217_v26, 0.0  ;;  %v1086_v35 = vmax.f32 %v1044_v25, 0.0  ;;  %v17369_v25 = vld [vmem:[%s20963_s2] ss:$0 sm:$0xff] }
 0x14b   : > { %v14957_v36 = vpop.f32.mrb[40].mxu0  ;;  %v15015_v37 = vpop.f32.mrb[40].mxu1  ;;  %v1260_v39 = vmax.f32 %v1220_v32, 0.0  ;;  %v1087_v40 = vmax.f32 %v1047_v31, 0.0 }
 0x14c   : > { %v14958_v42 = vpop.f32.mrb[41].mxu0  ;;  %v15016_v44 = vpop.f32.mrb[41].mxu1 }
 0x14d   : > { %v14959_v45 = vadd.f32 %v14958_v42, %v14957_v36  ;;  %v15017_v46 = vadd.f32 %v15016_v44, %v15015_v37  ;;  %v14960_v47 = vpop.f32.mrb[42].mxu0  ;;  %v15018_v49 = vpop.f32.mrb[42].mxu1  ;;  %v15646_v50 = vpack.i.bf16 %v1260_v39, %v1259_v33  ;;  %v15626_v51 = vpack.i.bf16 %v1087_v40, %v1086_v35 }
 0x14e   : > { %v14961_v52 = vpop.f32.mrb[43].mxu0  ;;  %v15019_v54 = vpop.f32.mrb[43].mxu1 }
 0x14f   : > { %v1052_v55 = vadd.f32 %v14959_v45, %v17257_v1  ;;  %v1225_v56 = vadd.f32 %v15017_v46, %v17257_v1  ;;  %v14962_v58 = vadd.f32 %v14961_v52, %v14960_v47  ;;  %v15020_v60 = vadd.f32 %v15019_v54, %v15018_v49  ;;  %15647 = vrot.lane.b32.xlu0 %v15646_v50, %s16970_s14 }
 0x150   : > { %15627 = vrot.lane.b32.xlu1 %v15626_v51, %s16971_s17 }
 0x151   : > { %v1055_v61 = vadd.f32 %v14962_v58, %v17257_v1  ;;  %v1228_v63 = vadd.f32 %v15020_v60, %v17257_v1  ;;  %v1088_v0 = vmax.f32 %v1052_v55, 0.0  ;;  %v1261_v2 = vmax.f32 %v1225_v56, 0.0 }
 0x153   : > { %v14963_v3 = vpop.f32.mrb[44].mxu0  ;;  %v15021_v5 = vpop.f32.mrb[44].mxu1  ;;  %v1089_v7 = vmax.f32 %v1055_v61, 0.0  ;;  %v1262_v8 = vmax.f32 %v1228_v63, 0.0 }
 0x154   : > { %15632 = vrot.lane.b32.xlu1 %v17297_v19, %s16969_s10  ;;  %v14964_v10 = vpop.f32.mrb[45].mxu0  ;;  %v15022_v11 = vpop.f32.mrb[45].mxu1 }
 0x155   : > { %v14965_v13 = vadd.f32 %v14964_v10, %v14963_v3  ;;  %v15023_v14 = vadd.f32 %v15022_v11, %v15021_v5  ;;  %v14966_v17 = vpop.f32.mrb[46].mxu0  ;;  %v15024_v1 = vpop.f32.mrb[46].mxu1  ;;  %v15651_v18 = vpack.i.bf16 %v1089_v7, %v1088_v0  ;;  %v15656_v20 = vpack.i.bf16 %v1262_v8, %v1261_v2 }
 0x156   : > { %v14967_v21 = vpop.f32.mrb[47].mxu0  ;;  %v15025_v23 = vpop.f32.mrb[47].mxu1 }
 0x157   : > { %v1060_v26 = vadd.f32 %v17369_v25, %v14965_v13  ;;  %v1233_v19 = vadd.f32 %v17369_v25, %v15023_v14  ;;  %v14968_v27 = vadd.f32 %v14967_v21, %v14966_v17  ;;  %v15026_v28 = vadd.f32 %v15025_v23, %v15024_v1  ;;  %15652 = vrot.lane.b32.xlu0 %v15651_v18, %s16971_s17 }
 0x158   : > { %15637 = vrot.lane.b32.xlu1 %v17305_v38, %s16969_s10 }
 0x159   : > { %v1063_v29 = vadd.f32 %v17369_v25, %v14968_v27  ;;  %v1236_v31 = vadd.f32 %v17369_v25, %v15026_v28  ;;  %v1263_v32 = vmax.f32 %v1233_v19, 0.0  ;;  %v1090_v37 = vmax.f32 %v1060_v26, 0.0 }
 0x15b   : > { %v14969_v33 = vpop.f32.mrb[48].mxu0  ;;  %v15027_v35 = vpop.f32.mrb[48].mxu1  ;;  %15657 = vrot.lane.b32.xlu0 %v15656_v20, %s16970_s14  ;;  %v1264_v36 = vmax.f32 %v1236_v31, 0.0  ;;  %v1091_v39 = vmax.f32 %v1063_v29, 0.0 }
 0x15c   : > { %15642 = vrot.lane.b32.xlu1 %v17313_v57, %s16969_s10  ;;  %v14970_v40 = vpop.f32.mrb[49].mxu0  ;;  %v15028_v42 = vpop.f32.mrb[49].mxu1 }
 0x15d   : > { %v14971_v44 = vadd.f32 %v14970_v40, %v14969_v33  ;;  %v15029_v45 = vadd.f32 %v15028_v42, %v15027_v35  ;;  %v14972_v38 = vpop.f32.mrb[50].mxu0  ;;  %v15030_v46 = vpop.f32.mrb[50].mxu1  ;;  %v15671_v47 = vpack.i.bf16 %v1264_v36, %v1263_v32  ;;  %v15661_v49 = vpack.i.bf16 %v1091_v39, %v1090_v37 }
 0x15e   : > { %v14973_v50 = vpop.f32.mrb[51].mxu0  ;;  %v15031_v51 = vpop.f32.mrb[51].mxu1  ;;  %v682_v36 = vadd.f32 %v17369_v25, %v17259_v6  ;;  %v685_v39 = vadd.f32 %v17369_v25, %v17261_v12  ;;  %v690_v12 = vadd.f32 %v17369_v25, %v17265_v22 }
 0x15f   : > { %v1068_v52 = vadd.f32 %v17369_v25, %v14971_v44  ;;  %v1241_v54 = vadd.f32 %v17369_v25, %v15029_v45  ;;  %v14974_v55 = vadd.f32 %v14973_v50, %v14972_v38  ;;  %v15032_v56 = vadd.f32 %v15031_v51, %v15030_v46  ;;  %15672 = vrot.lane.b32.xlu0 %v15671_v47, %s16970_s14 }
 0x160   : > { %15662 = vrot.lane.b32.xlu1 %v15661_v49, %s16971_s17  ;;  %v736_v45 = vmax.f32 %v682_v36, 0.0  ;;  %v737_v46 = vmax.f32 %v685_v39, 0.0 }
 0x161   : > { %v1071_v57 = vadd.f32 %v17369_v25, %v14974_v55  ;;  %v1244_v58 = vadd.f32 %v17369_v25, %v15032_v56  ;;  %v1092_v60 = vmax.f32 %v1068_v52, 0.0  ;;  %v1265_v2 = vmax.f32 %v1241_v54, 0.0 }
 0x163   : > { %v14975_v61 = vpop.f32.mrb[52].mxu0  ;;  %v15033_v63 = vpop.f32.mrb[52].mxu1  ;;  %v1093_v0 = vmax.f32 %v1071_v57, 0.0  ;;  %v1266_v3 = vmax.f32 %v1244_v58, 0.0  ;;  %v693_v57 = vadd.f32 %v17369_v25, %v17268_v30 }
 0x164   : > { %15667 = vrot.lane.b32.xlu1 %v17319_v16, %s16969_s10  ;;  %v14976_v5 = vpop.f32.mrb[53].mxu0  ;;  %v15034_v7 = vpop.f32.mrb[53].mxu1 }
 0x165   : > { %v14977_v8 = vadd.f32 %v14976_v5, %v14975_v61  ;;  %v15035_v10 = vadd.f32 %v15034_v7, %v15033_v63  ;;  %v14978_v11 = vpop.f32.mrb[54].mxu0  ;;  %v15036_v13 = vpop.f32.mrb[54].mxu1  ;;  %v15676_v14 = vpack.i.bf16 %v1093_v0, %v1092_v60  ;;  %v15681_v17 = vpack.i.bf16 %v1266_v3, %v1265_v2 }
 0x166   : > { %v14979_v1 = vpop.f32.mrb[55].mxu0  ;;  %v15037_v18 = vpop.f32.mrb[55].mxu1  ;;  %v738_v2 = vmax.f32 %v690_v12, 0.0  ;;  %v739_v7 = vmax.f32 %v693_v57, 0.0 }
 0x167   : > { %v1076_v20 = vadd.f32 %v17369_v25, %v14977_v8  ;;  %v1249_v21 = vadd.f32 %v17369_v25, %v15035_v10  ;;  %v14980_v23 = vadd.f32 %v14979_v1, %v14978_v11  ;;  %v15038_v26 = vadd.f32 %v15037_v18, %v15036_v13  ;;  %15677 = vrot.lane.b32.xlu0 %v15676_v14, %s16971_s17 }
 0x168   : > { %v698_v8 = vadd.f32 %v17369_v25, %v17278_v41  ;;  %v701_v13 = vadd.f32 %v17369_v25, %v17280_v48 }
 0x169   : > { %v1079_v16 = vadd.f32 %v17369_v25, %v14980_v23  ;;  %v1252_v19 = vadd.f32 %v17369_v25, %v15038_v26  ;;  %v1267_v27 = vmax.f32 %v1249_v21, 0.0  ;;  %v1094_v29 = vmax.f32 %v1076_v20, 0.0 }
 0x16a   : > { %v741_v48 = vmax.f32 %v701_v13, 0.0 }
 0x16b   : > { %15682 = vrot.lane.b32.xlu0 %v15681_v17, %s16970_s14  ;;  %v1268_v28 = vmax.f32 %v1252_v19, 0.0  ;;  %v1095_v31 = vmax.f32 %v1079_v16, 0.0 }
 0x16d   : > { %v15691_v32 = vpack.i.bf16 %v1268_v28, %v1267_v27  ;;  %v15686_v33 = vpack.i.bf16 %v1095_v31, %v1094_v29  ;;  %v740_v28 = vmax.f32 %v698_v8, 0.0  ;;  %v17431_v31 = vadd.f32 %v17369_v25, %v17288_v59 }
 0x16f   : > { %15692 = vrot.lane.b32.xlu0 %v15691_v32, %s16970_s14  ;;  %15687 = vrot.lane.b32.xlu1 %v15686_v33, %s16971_s17 }
 0x179   : > { %v15593_v35 = vpop.permute.xlu0 %15592 }
 0x17a   : > { %v15595_v42 = vunpack.i.h.bf16 %v15593_v35  ;;  %v15594_v44 = vunpack.i.l.bf16 %v15593_v35 }
 0x17c   : > { %v1438_v6 = vsel %vm1437_vm0, %v736_v45, %v15594_v44  ;;  %v1439_v54 = vsel %vm1437_vm0, %v737_v46, %v15595_v42 }
 0x181   : > { %v15598_v37 = vpop.permute.xlu0 %15597 }
 0x182   : > { %v15600_v63 = vunpack.i.h.bf16 %v15598_v37  ;;  %v15599_v0 = vunpack.i.l.bf16 %v15598_v37 }
 0x184   : > { %v1440_v18 = vsel %vm1437_vm0, %v738_v2, %v15599_v0  ;;  %v1441_v20 = vsel %vm1437_vm0, %v739_v7, %v15600_v63  ;;  %v16972_v2 = vmov 0.0  }
 0x185   : > { %15288 = vmatprep.subr.bf16.mxu1 %v16972_v2  ;;  %15296 = vmatprep.mubr.msk.bf16.mxu1 %vm16973_vm6, %v16972_v2 }
 0x189   : > { %v17401_v40 = vpop.permute.xlu1 %15602 }
 0x18a   : > { %v15605_v32 = vunpack.i.h.bf16 %v17401_v40  ;;  %v15604_v33 = vunpack.i.l.bf16 %v17401_v40 }
 0x1b1   : > { %v15613_v38 = vpop.permute.xlu0 %15612 }
 0x1b2   : > { %v15615_v47 = vunpack.i.h.bf16 %v15613_v38  ;;  %v15614_v49 = vunpack.i.l.bf16 %v15613_v38  ;;  %v15608_v50 = vpop.permute.xlu1 %15607 }
 0x1b3   : > { %v15610_v51 = vunpack.i.h.bf16 %v15608_v50  ;;  %v15609_v52 = vunpack.i.l.bf16 %v15608_v50  ;;  %v1442_v50 = vsel %vm1437_vm0, %v740_v28, %v15604_v33  ;;  %v717_v28 = vadd.f32 %v17369_v25, %v17300_v24 }
 0x1b5   : > { %v1453_v55 = vsel %vm1452_vm1, %v1438_v6, %v15609_v52  ;;  %v1454_v56 = vsel %vm1452_vm1, %v1439_v54, %v15610_v51  ;;  %v1443_v51 = vsel %vm1437_vm0, %v741_v48, %v15605_v32 }
 0x1b6   : > { %v1468_v58 = vsel %vm1467_vm2, %v1453_v55, %v15614_v49  ;;  %v1469_v60 = vsel %vm1467_vm2, %v1454_v56, %v15615_v47  ;;  %v15744_v56 = vld [vmem:[%s20966_s5 + $0x20] sm:$0xff]  }
 0x1b7   : > { %v17413_v61 = vpack.c.bf16 %v1469_v60, %v1468_v58  ;;  %15289 = vmatpush3.bf16.msra.mxu1 %v15744_v56 }
 0x1b8   : > { %15290 = vmatprep.subr.bf16.mxu1 %v16972_v2 }
 0x1b9   : > { %v15623_v3 = vpop.permute.xlu0 %15622  ;;  %v1524_v5 = vshrl.u32 %v17413_v61, 16  ;;  %v1526_v22 = vshll.u32 %v17413_v61, 16  ;;  %v1864_v39 = vrot.slane %v17413_v61, 5 }
 0x1ba   : > { %v15625_v10 = vunpack.i.h.bf16 %v15623_v3  ;;  %v15624_v30 = vunpack.i.l.bf16 %v15623_v3  ;;  %v15618_v11 = vpop.permute.xlu1 %15617  ;;  %v709_v3 = vadd.f32 %v17369_v25, %v17291_v4 }
 0x1bb   : > { %v15620_v14 = vunpack.i.h.bf16 %v15618_v11  ;;  %v15619_v17 = vunpack.i.l.bf16 %v15618_v11  ;;  %v2042_v1 = vrot.slane %v1524_v5, 5  ;;  %v2043_v21 = vrot.slane %v1526_v22, 6 }
 0x1bc   : > { %v1528_v19 = vrot.slane %v1526_v22, 1  ;;  %v15745_v22 = vld [vmem:[%s20966_s5 + $0x28] sm:$0xff]   ;;  %v742_v11 = vmax.f32 %v17431_v31, 0.0 }
 0x1bd   : > { %v1455_v23 = vsel %vm1452_vm1, %v1440_v18, %v15619_v17  ;;  %v1456_v26 = vsel %vm1452_vm1, %v1441_v20, %v15620_v14  ;;  %v2044_v27 = vor.u32 %v2043_v21, %v2042_v1  ;;  %15291 = vmatpush3.bf16.msra.mxu1 %v15745_v22 }
 0x1be   : > { %v1470_v41 = vsel %vm1467_vm2, %v1455_v23, %v15624_v30  ;;  %v1471_v16 = vsel %vm1467_vm2, %v1456_v26, %v15625_v10  ;;  %v1529_v59 = vor.u32 %v1528_v19, %v1524_v5  ;;  %v743_v23 = vmax.f32 %v709_v3, 0.0  ;;  %v15721_v26 = vld [vmem:[%s20964_s3 + $0x8] sm:$0xff]   ;;  %v15746_v19 = vld [vmem:[%s20966_s5 + $0x30] sm:$0xff]   ;;  %15292 = vmatprep.subr.bf16.mxu1 %v16972_v2 }
 0x1bf   : > { %v17427_v29 = vpack.c.bf16 %v1471_v16, %v1470_v41 }
 0x1c1   : > { %v15648_v35 = vpop.permute.xlu0 %15647  ;;  %v1531_v36 = vshll.u32 %v17427_v29, 16  ;;  %v1535_v37 = vshrl.u32 %v17427_v29, 16  ;;  %v1865_v42 = vrot.slane %v17427_v29, 5  ;;  %15293 = vmatpush3.bf16.msra.mxu1 %v15746_v19 }
 0x1c2   : > { %v15650_v44 = vunpack.i.h.bf16 %v15648_v35  ;;  %v15649_v45 = vunpack.i.l.bf16 %v15648_v35  ;;  %v15628_v38 = vpop.permute.xlu1 %15627  ;;  %15294 = vmatprep.subr.bf16.mxu1 %v16972_v2 }
 0x1c3   : > { %v15630_v46 = vunpack.i.h.bf16 %v15628_v38  ;;  %v15629_v47 = vunpack.i.l.bf16 %v15628_v38  ;;  %v1533_v49 = vrot.slane %v1531_v36, 1  ;;  %v17440_v40 = vsel %vm1863_vm3, %v1864_v39, %v1865_v42 }
 0x1c4   : > { %v2045_v52 = vrot.slane %v1535_v37, 5  ;;  %v2046_v6 = vrot.slane %v1531_v36, 6 }
 0x1c5   : > { %v1457_v54 = vsel %vm1452_vm1, %v1442_v50, %v15629_v47  ;;  %v1458_v12 = vsel %vm1452_vm1, %v1443_v51, %v15630_v46  ;;  %v1534_v55 = vsel %vm1522_vm4, %v1529_v59, %v1533_v49  ;;  %v1537_v4 = vor.u32 %v1535_v37, %v1533_v49  ;;  %v15722_v59 = vld [vmem:[%s20964_s3 + $0x10] sm:$0xff]  }
 0x1c6   : > { %v1472_v57 = vsel %vm1467_vm2, %v1457_v54, %v15649_v45  ;;  %v1473_v58 = vsel %vm1467_vm2, %v1458_v12, %v15650_v44  ;;  %v15633_v60 = vpop.permute.xlu1 %15632  ;;  %15192 = vmatprep.mubr.bf16.mxu0 %v1534_v55  ;;  %v2047_v63 = vor.u32 %v2046_v6, %v2045_v52  ;;  %v745_v50 = vmax.f32 %v717_v28, 0.0 }
 0x1c7   : > { %v17452_v0 = vpack.c.bf16 %v1473_v58, %v1472_v57  ;;  %v15634_v7 = vunpack.i.l.bf16 %v15633_v60  ;;  %v15635_v13 = vunpack.i.h.bf16 %v15633_v60 }
 0x1c8   : > { %v17458_v5 = vsel %vm2041_vm5, %v2044_v27, %v2047_v63  ;;  %v714_v27 = vadd.f32 %v17369_v25, %v17295_v15 }
 0x1c9   : > { %v15653_v8 = vpop.permute.xlu0 %15652  ;;  %v1539_v10 = vshll.u32 %v17452_v0, 16  ;;  %v1543_v30 = vshrl.u32 %v17452_v0, 16  ;;  %v1867_v17 = vrot.slane %v17452_v0, 5  ;;  %v1444_v48 = vsel %vm1437_vm0, %v742_v11, %v15634_v7 }
 0x1ca   : > { %v15638_v14 = vpop.permute.xlu1 %15637  ;;  %v15655_v1 = vunpack.i.h.bf16 %v15653_v8  ;;  %v15654_v18 = vunpack.i.l.bf16 %v15653_v8  ;;  %v1445_v33 = vsel %vm1437_vm0, %v743_v23, %v15635_v13 }
 0x1cb   : > { %v1541_v20 = vrot.slane %v1539_v10, 1  ;;  %v2049_v21 = vrot.slane %v1543_v30, 5  ;;  %v17472_v41 = vsel %vm1863_vm3, %v1865_v42, %v1867_v17  ;;  %v2050_v16 = vrot.slane %v1539_v10, 6 }
 0x1cc   : > { %v1459_v15 = vsel %vm1452_vm1, %v1444_v48, %v15654_v18  ;;  %v1460_v42 = vsel %vm1452_vm1, %v1445_v33, %v15655_v1  ;;  %v15640_v24 = vunpack.i.h.bf16 %v15638_v14  ;;  %v15639_v44 = vunpack.i.l.bf16 %v15638_v14 }
 0x1cd   : > { %v15658_v31 = vpop.permute.xlu0 %15657  ;;  %v1542_v32 = vsel %vm1522_vm4, %v1537_v4, %v1541_v20  ;;  %v2051_v39 = vor.u32 %v2050_v16, %v2049_v21  ;;  %v1545_v60 = vor.u32 %v1543_v30, %v1541_v20  ;;  %v722_v14 = vadd.f32 %v17369_v25, %v17303_v34 }
 0x1ce   : > { %v15660_v35 = vunpack.i.h.bf16 %v15658_v31  ;;  %v15659_v36 = vunpack.i.l.bf16 %v15658_v31  ;;  %v17485_v37 = vpop.permute.xlu1 %15642  ;;  %15193 = vmatmul.mubr.bf16.vlgmr.msra.gmra.mrb[56].mxu0 %v1542_v32  ;;  %v1447_v58 = vsel %vm1437_vm0, %v745_v50, %v15640_v24  ;;  %v725_v20 = vadd.f32 %v17369_v25, %v17308_v43  ;;  %v15725_v24 = vld [vmem:[%s20964_s3 + $0x28] sm:$0xff]  }
 0x1cf   : > { %15205 = vmatpush3.bf16.msra.mxu0 %v17361_v9  ;;  %v17496_v46 = vsel %vm2041_vm5, %v2047_v63, %v2051_v39  ;;  %v744_v9 = vmax.f32 %v714_v27, 0.0  ;;  %v15723_v63 = vld [vmem:[%s20964_s3 + $0x18] sm:$0xff]   ;;  %v730_v21 = vadd.f32 %v17369_v25, %v17311_v53  ;;  %v15645_v34 = vunpack.i.h.bf16 %v17485_v37 }
 0x1d0   : > { %v1474_v45 = vsel %vm1467_vm2, %v1459_v15, %v15659_v36  ;;  %v1475_v38 = vsel %vm1467_vm2, %v1460_v42, %v15660_v35  ;;  %15206 = vmatprep.subr.bf16.mxu0 %v15721_v26  ;;  %v746_v15 = vmax.f32 %v722_v14, 0.0 }
 0x1d1   : > { %v17498_v47 = vpack.c.bf16 %v1475_v38, %v1474_v45  ;;  %v15673_v49 = vpop.permute.xlu0 %15672  ;;  %v1446_v57 = vsel %vm1437_vm0, %v744_v9, %v15639_v44  ;;  %v748_v42 = vmax.f32 %v730_v21, 0.0 }
 0x1d2   : > { %v15675_v51 = vunpack.i.h.bf16 %v15673_v49  ;;  %v15674_v52 = vunpack.i.l.bf16 %v15673_v49  ;;  %v15663_v6 = vpop.permute.xlu1 %15662 }
 0x1d3   : > { %v15665_v54 = vunpack.i.h.bf16 %v15663_v6  ;;  %v15664_v12 = vunpack.i.l.bf16 %v15663_v6  ;;  %v1547_v55 = vshll.u32 %v17498_v47, 16  ;;  %15207 = vmatpush3.bf16.msra.mxu0 %v15721_v26  ;;  %v1551_v56 = vshrl.u32 %v17498_v47, 16 }
 0x1d4   : > { %15208 = vmatprep.subr.bf16.mxu0 %v15722_v59  ;;  %v1869_v3 = vrot.slane %v17498_v47, 5  ;;  %v15644_v26 = vunpack.i.l.bf16 %v17485_v37  ;;  %v747_v37 = vmax.f32 %v725_v20, 0.0 }
 0x1d5   : > { %v1461_v22 = vsel %vm1452_vm1, %v1446_v57, %v15664_v12  ;;  %v1462_v7 = vsel %vm1452_vm1, %v1447_v58, %v15665_v54  ;;  %v1549_v8 = vrot.slane %v1547_v55, 1  ;;  %v2053_v10 = vrot.slane %v1551_v56, 5 }
 0x1d6   : > { %v1476_v11 = vsel %vm1467_vm2, %v1461_v22, %v15674_v52  ;;  %v1477_v13 = vsel %vm1467_vm2, %v1462_v7, %v15675_v51  ;;  %v17514_v4 = vsel %vm1863_vm3, %v1867_v17, %v1869_v3  ;;  %v2054_v30 = vrot.slane %v1547_v55, 6  ;;  %v15724_v17 = vld [vmem:[%s20964_s3 + $0x20] sm:$0xff]   ;;  %v15668_v43 = vpop.permute.xlu1 %15667 }
 0x1d7   : > { %v17518_v1 = vpack.c.bf16 %v1477_v13, %v1476_v11  ;;  %v1550_v18 = vsel %vm1522_vm4, %v1545_v60, %v1549_v8  ;;  %15209 = vmatpush3.bf16.msra.mxu0 %v15722_v59  ;;  %v1553_v48 = vor.u32 %v1551_v56, %v1549_v8  ;;  %v15669_v45 = vunpack.i.l.bf16 %v15668_v43  ;;  %v15726_v56 = vld [vmem:[%s20964_s3 + $0x30] sm:$0xff]  }
 0x1d8   : > { %15196 = vmatprep.mubr.bf16.mxu0 %v1550_v18  ;;  %15210 = vmatprep.subr.bf16.mxu0 %v15723_v63  ;;  %v2055_v23 = vor.u32 %v2054_v30, %v2053_v10  ;;  %v1448_v9 = vsel %vm1437_vm0, %v746_v15, %v15644_v26  ;;  %v1449_v50 = vsel %vm1437_vm0, %v747_v37, %v15645_v34  ;;  %v15670_v6 = vunpack.i.h.bf16 %v15668_v43 }
 0x1d9   : > { %v15678_v16 = vpop.permute.xlu0 %15677  ;;  %v1555_v19 = vshll.u32 %v17518_v1, 16  ;;  %v1559_v27 = vshrl.u32 %v17518_v1, 16  ;;  %v1871_v53 = vrot.slane %v17518_v1, 5  ;;  %v1450_v58 = vsel %vm1437_vm0, %v748_v42, %v15669_v45 }
 0x1da   : > { %v15680_v28 = vunpack.i.h.bf16 %v15678_v16  ;;  %v17534_v31 = vsel %vm2041_vm5, %v2051_v39, %v2055_v23  ;;  %v15679_v32 = vunpack.i.l.bf16 %v15678_v16  ;;  %v733_v39 = vadd.f32 %v17369_v25, %v17316_v62 }
 0x1db   : > { %v1557_v33 = vrot.slane %v1555_v19, 1  ;;  %15211 = vmatpush3.bf16.msra.mxu0 %v15723_v63  ;;  %v2057_v35 = vrot.slane %v1559_v27, 5  ;;  %v2058_v36 = vrot.slane %v1555_v19, 6  ;;  %v17540_v44 = vsel %vm1863_vm3, %v1869_v3, %v1871_v53 }
 0x1dc   : > { %15212 = vmatprep.subr.bf16.mxu0 %v15724_v17  ;;  %v1463_v54 = vsel %vm1452_vm1, %v1448_v9, %v15679_v32  ;;  %v1464_v12 = vsel %vm1452_vm1, %v1449_v50, %v15680_v28  ;;  %v749_v57 = vmax.f32 %v733_v39, 0.0  ;;  %v15728_v32 = vld [vmem:[%s20964_s3 + $0x80] sm:$0xff]   ;;  %v15729_v9 = vld [vmem:[%s20964_s3 + $0x88] sm:$0xff]  }
 0x1dd   : > { %v15683_v38 = vpop.permute.xlu0 %15682  ;;  %v1558_v59 = vsel %vm1522_vm4, %v1553_v48, %v1557_v33  ;;  %v2059_v49 = vor.u32 %v2058_v36, %v2057_v35  ;;  %v1561_v21 = vor.u32 %v1559_v27, %v1557_v33  ;;  %v15736_v50 = vld [vmem:[%s20964_s3 + $0xc0] sm:$0xff]  }
 0x1de   : > { %v15685_v51 = vunpack.i.h.bf16 %v15683_v38  ;;  %v15684_v52 = vunpack.i.l.bf16 %v15683_v38  ;;  %15197 = vmatmul.mubr.bf16.gmra.mrb[60].mxu0 %v1558_v59  ;;  %v1451_v11 = vsel %vm1437_vm0, %v749_v57, %v15670_v6  ;;  %v15743_v6 = vld [vmem:[%s20964_s3 + $0xf8] sm:$0xff]  }
 0x1df   : > { %15213 = vmatpush3.bf16.msra.mxu0 %v15724_v17  ;;  %v17550_v62 = vsel %vm2041_vm5, %v2055_v23, %v2059_v49  ;;  %v15727_v17 = vld [vmem:[%s20964_s3 + $0x38] sm:$0xff]  }
 0x1e0   : > { %v1478_v25 = vsel %vm1467_vm2, %v1463_v54, %v15684_v52  ;;  %v1479_v55 = vsel %vm1467_vm2, %v1464_v12, %v15685_v51  ;;  %15214 = vmatprep.subr.bf16.mxu0 %v15725_v24  ;;  %v15738_v51 = vld [vmem:[%s20964_s3 + $0xd0] sm:$0xff]   ;;  %v15739_v52 = vld [vmem:[%s20964_s3 + $0xd8] sm:$0xff]   ;;  %v15747_v54 = vld [vmem:[%s20966_s5 + $0x60] sm:$0xff]  }
 0x1e1   : > { %v1487_v60 = vpack.c.bf16 %v1479_v55, %v1478_v25  ;;  %v15693_v63 = vpop.permute.xlu0 %15692  ;;  %v15688_v3 = vpop.permute.xlu1 %15687  ;;  %v15751_v12 = vld [vmem:[%s20966_s5 + $0x78] sm:$0xff]  }
 0x1e2   : > { %v15695_v22 = vunpack.i.h.bf16 %v15693_v63  ;;  %v15694_v7 = vunpack.i.l.bf16 %v15693_v63  ;;  %v15690_v8 = vunpack.i.h.bf16 %v15688_v3  ;;  %v15689_v10 = vunpack.i.l.bf16 %v15688_v3 }
 0x1e3   : > { %v1563_v13 = vshll.u32 %v1487_v60, 16  ;;  %15215 = vmatpush3.bf16.msra.mxu0 %v15725_v24  ;;  %v1567_v30 = vshrl.u32 %v1487_v60, 16  ;;  %v1873_v14 = vrot.slane %v1487_v60, 5 }
 0x1e4   : > { %v1465_v18 = vsel %vm1452_vm1, %v1450_v58, %v15689_v10  ;;  %v1466_v20 = vsel %vm1452_vm1, %v1451_v11, %v15690_v8  ;;  %15216 = vmatprep.subr.bf16.mxu0 %v15726_v56 }
 0x1e5   : > { %v1480_v23 = vsel %vm1467_vm2, %v1465_v18, %v15694_v7  ;;  %v1481_v34 = vsel %vm1467_vm2, %v1466_v20, %v15695_v22  ;;  %v1565_v26 = vrot.slane %v1563_v13, 1  ;;  %v17567_v16 = vsel %vm1863_vm3, %v1871_v53, %v1873_v14 }
 0x1e6   : > { %v1488_v19 = vpack.c.bf16 %v1481_v34, %v1480_v23  ;;  %v2061_v43 = vrot.slane %v1567_v30, 5  ;;  %v2062_v28 = vrot.slane %v1563_v13, 6 }
 0x1e7   : > { %v1566_v48 = vsel %vm1522_vm4, %v1561_v21, %v1565_v26  ;;  %15217 = vmatpush3.bf16.msra.mxu0 %v15726_v56  ;;  %v1569_v15 = vor.u32 %v1567_v30, %v1565_v26 }
 0x1e8   : > { %15200 = vmatprep.mubr.bf16.mxu0 %v1566_v48  ;;  %v1571_v27 = vshll.u32 %v1488_v19, 16  ;;  %15218 = vmatprep.subr.bf16.mxu0 %v15727_v17  ;;  %v1875_v33 = vrot.slane %v1488_v19, 5  ;;  %v2063_v35 = vor.u32 %v2062_v28, %v2061_v43  ;;  %v2065_v36 = vshrl.u32 %v1488_v19, 16  ;;  %v15755_v43 = vld [vmem:[%s20966_s5 + $0xa0] sm:$0xff]  }
 0x1ea   : > { %v1573_v37 = vrot.slane %v1571_v27, 1  ;;  %v1876_v53 = vsel %vm1863_vm3, %v1873_v14, %v1875_v33  ;;  %v17575_v42 = vsel %vm2041_vm5, %v2059_v49, %v2063_v35  ;;  %v2067_v24 = vrot.slane %v2065_v36, 5  ;;  %v15730_v49 = vld [vmem:[%s20964_s3 + $0x90] sm:$0xff]  }
 0x1eb   : > { %15219 = vmatpush3.bf16.msra.mxu0 %v15727_v17  ;;  %v2068_v39 = vrot.slane %v1571_v27, 6 }
 0x1ec   : > { %v1574_v45 = vsel %vm1522_vm4, %v1569_v15, %v1573_v37  ;;  %15232 = vmatprep.subr.bf16.mxu0 %v15728_v32 }
 0x1ed   : > { %15201 = vmatmul.mubr.bf16.gmra.mrb[64].mxu0 %v1574_v45  ;;  %v2069_v38 = vor.u32 %v2068_v39, %v2067_v24 }
 0x1ee   : > { %15220 = vmatprep.mubr.bf16.mxu0 %v17413_v61  ;;  %v15731_v61 = vld [vmem:[%s20964_s3 + $0x98] sm:$0xff]  }
 0x1ef   : > { %v17580_v59 = vsel %vm2041_vm5, %v2063_v35, %v2069_v38 }
 0x1f5   : > { %15221 = vmatmul.mubr.bf16.vlgmr.msra.gmra.mrb[56].mxu0 %v17427_v29  ;;  %v15732_v29 = vld [vmem:[%s20964_s3 + $0xa0] sm:$0xff]  }
 0x1f6   : > { %15233 = vmatpush3.bf16.msra.mxu0 %v15728_v32  ;;  %15224 = vmatprep.mubr.bf16.mxu0 %v17452_v0  ;;  %v15733_v0 = vld [vmem:[%s20964_s3 + $0xa8] sm:$0xff]  }
 0x1f7   : > { %15234 = vmatprep.subr.bf16.mxu0 %v15729_v9 }
 0x1fa   : > { %15235 = vmatpush3.bf16.msra.mxu0 %v15729_v9 }
 0x1fb   : > { %15236 = vmatprep.subr.bf16.mxu0 %v15730_v49 }
 0x1fd   : > { %15225 = vmatmul.mubr.bf16.gmra.mrb[60].mxu0 %v17498_v47  ;;  %v15734_v47 = vld [vmem:[%s20964_s3 + $0xb0] sm:$0xff]  }
 0x1fe   : > { %15237 = vmatpush3.bf16.msra.mxu0 %v15730_v49  ;;  %15228 = vmatprep.mubr.bf16.mxu0 %v17518_v1  ;;  %v15735_v1 = vld [vmem:[%s20964_s3 + $0xb8] sm:$0xff]  }
 0x1ff   : > { %15238 = vmatprep.subr.bf16.mxu0 %v15731_v61 }
 0x202   : > { %15239 = vmatpush3.bf16.msra.mxu0 %v15731_v61 }
 0x203   : > { %15240 = vmatprep.subr.bf16.mxu0 %v15732_v29 }
 0x205   : > { %15229 = vmatmul.mubr.bf16.gmra.mrb[64].mxu0 %v1487_v60 }
 0x206   : > { %15241 = vmatpush3.bf16.msra.mxu0 %v15732_v29  ;;  %15248 = vmatprep.mubr.bf16.mxu0 %v17440_v40  ;;  %v15737_v40 = vld [vmem:[%s20964_s3 + $0xc8] sm:$0xff]  }
 0x207   : > { %15242 = vmatprep.subr.bf16.mxu0 %v15733_v0  ;;  %v15756_v29 = vld [vmem:[%s20966_s5 + $0xa8] sm:$0xff]  }
 0x20a   : > { %15243 = vmatpush3.bf16.msra.mxu0 %v15733_v0 }
 0x20b   : > { %15244 = vmatprep.subr.bf16.mxu0 %v15734_v47 }
 0x20e   : > { %15245 = vmatpush3.bf16.msra.mxu0 %v15734_v47 }
 0x20f   : > { %15246 = vmatprep.subr.bf16.mxu0 %v15735_v1 }
 0x212   : > { %15247 = vmatpush3.bf16.msra.mxu0 %v15735_v1 }
 0x213   : > { %15260 = vmatprep.subr.bf16.mxu0 %v15736_v50 }
 0x215   : > { %15249 = vmatmul.mubr.bf16.vlgmr.msra.gmra.mrb[56].mxu0 %v17472_v41  ;;  %v15740_v41 = vld [vmem:[%s20964_s3 + $0xe0] sm:$0xff]  }
 0x216   : > { %15252 = vmatprep.mubr.bf16.mxu0 %v17514_v4  ;;  %15261 = vmatpush3.bf16.msra.mxu0 %v15736_v50  ;;  %v15741_v4 = vld [vmem:[%s20964_s3 + $0xe8] sm:$0xff]  }
 0x217   : > { %15262 = vmatprep.subr.bf16.mxu0 %v15737_v40 }
 0x21a   : > { %15263 = vmatpush3.bf16.msra.mxu0 %v15737_v40 }
 0x21b   : > { %15264 = vmatprep.subr.bf16.mxu0 %v15738_v51 }
 0x21d   : > { %15253 = vmatmul.mubr.bf16.gmra.mrb[60].mxu0 %v17540_v44  ;;  %v15742_v44 = vld [vmem:[%s20964_s3 + $0xf0] sm:$0xff]  }
 0x21e   : > { %15256 = vmatprep.mubr.bf16.mxu0 %v17567_v16  ;;  %15265 = vmatpush3.bf16.msra.mxu0 %v15738_v51 }
 0x21f   : > { %15266 = vmatprep.subr.bf16.mxu0 %v15739_v52 }
 0x222   : > { %15267 = vmatpush3.bf16.msra.mxu0 %v15739_v52 }
 0x223   : > { %15268 = vmatprep.subr.bf16.mxu0 %v15740_v41 }
 0x225   : > { %15257 = vmatmul.mubr.bf16.gmra.mrb[64].mxu0 %v1876_v53 }
 0x226   : > { %15269 = vmatpush3.bf16.msra.mxu0 %v15740_v41  ;;  %15276 = vmatprep.mubr.bf16.mxu0 %v17458_v5  ;;  %v15748_v5 = vld [vmem:[%s20966_s5 + $0x68] sm:$0xff]  }
 0x227   : > { %15270 = vmatprep.subr.bf16.mxu0 %v15741_v4 }
 0x22a   : > { %15271 = vmatpush3.bf16.msra.mxu0 %v15741_v4 }
 0x22b   : > { %15272 = vmatprep.subr.bf16.mxu0 %v15742_v44 }
 0x22e   : > { %15273 = vmatpush3.bf16.msra.mxu0 %v15742_v44 }
 0x22f   : > { %15274 = vmatprep.subr.bf16.mxu0 %v15743_v6 }
 0x232   : > { %15275 = vmatpush3.bf16.msra.mxu0 %v15743_v6 }
 0x233   : > { %15372 = vmatprep.subr.bf16.mxu0 %v16972_v2 }
 0x235   : > { %15277 = vmatmul.mubr.bf16.vlgmr.msra.gmra.mrb[56].mxu0 %v17496_v46  ;;  %v15750_v46 = vld [vmem:[%s20966_s5 + $0x70] sm:$0xff]  }
 0x236   : > { %15280 = vmatprep.mubr.bf16.mxu0 %v17534_v31  ;;  %15373 = vmatpush3.bf16.msra.mxu0 %v15747_v54  ;;  %v15749_v31 = vld [vmem:[%s20966_s5 + $0x38] sm:$0xff]  }
 0x237   : > { %15374 = vmatprep.subr.bf16.mxu0 %v16972_v2  ;;  %15295 = vmatpush3.bf16.msra.mxu1 %v15749_v31 }
 0x238   : > { %15316 = vmatprep.subr.bf16.mxu1 %v16972_v2 }
 0x23a   : > { %15375 = vmatpush3.bf16.msra.mxu0 %v15748_v5 }
 0x23b   : > { %15376 = vmatprep.subr.bf16.mxu0 %v16972_v2 }
 0x23d   : > { %15281 = vmatmul.mubr.bf16.gmra.mrb[60].mxu0 %v17550_v62  ;;  %v17670_v62 = vld [vmem:[%s20965_s4] ss:$0 sm:$0xff] }
 0x23e   : > { %15284 = vmatprep.mubr.bf16.mxu0 %v17575_v42  ;;  %15377 = vmatpush3.bf16.msra.mxu0 %v15750_v46 }
 0x23f   : > { %15378 = vmatprep.subr.bf16.mxu0 %v16972_v2 }
 0x242   : > { %15379 = vmatpush3.bf16.msra.mxu0 %v15751_v12 }
 0x243   : > { %15428 = vmatprep.subr.bf16.mxu0 %v16972_v2 }
 0x245   : > { %15285 = vmatmul.mubr.bf16.gmra.mrb[64].mxu0 %v17580_v59  ;;  %v15752_v59 = vld [vmem:[%s20966_s5] sm:$0xff]  }
 0x246   : > { %15380 = vmatprep.mubr.msk.bf16.mxu0 %vm16973_vm6, %v16972_v2 }
 0x308   : > { %v15278_v25 = vpop.f32.mrb[56].mxu0 }
 0x309   : > { %v2227_v55 = vadd.f32 %v15278_v25, %v17670_v62  ;;  %v2159_v56 = vpop.f32.mrb[57].mxu0 }
 0x30a   : > { %v2225_v57 = vadd.f32 %v17670_v62, %v2159_v56  ;;  %v15279_v58 = vpop.f32.mrb[58].mxu0 }
 0x30b   : > { %v2228_v60 = vadd.f32 %v15279_v58, %v17670_v62  ;;  %v2162_v63 = vpop.f32.mrb[59].mxu0  ;;  %v2239_v22 = vmax.f32 %v2227_v55, 0.0  ;;  %v15753_v55 = vld [vmem:[%s20966_s5 + $0x8] sm:$0xff]  }
 0x30c   : > { %v2226_v3 = vadd.f32 %v17670_v62, %v2162_v63  ;;  %v2237_v8 = vmax.f32 %v2225_v57, 0.0 }
 0x30d   : > { %v2240_v7 = vmax.f32 %v2228_v60, 0.0 }
 0x30e   : > { %v2238_v10 = vmax.f32 %v2226_v3, 0.0  ;;  %v15757_v3 = vld [vmem:[%s20966_s5 + $0xb0] sm:$0xff]  }
 0x30f   : > { %v17676_v11 = vpack.c.bf16 %v2240_v7, %v2239_v22 }
 0x310   : > { %v17678_v13 = vpack.c.bf16 %v2238_v10, %v2237_v8  ;;  %v15282_v30 = vpop.f32.mrb[60].mxu0 }
 0x311   : > { %v2231_v14 = vadd.f32 %v15282_v30, %v17670_v62  ;;  %v2175_v18 = vpop.f32.mrb[61].mxu0  ;;  %v2682_v20 = vrot.slane %v17676_v11, 5  ;;  %v17683_v21 = vshll.u32 %v17676_v11, 16  ;;  %v17686_v17 = vshrl.u32 %v17676_v11, 16 }
 0x312   : > { %v2229_v23 = vadd.f32 %v17670_v62, %v2175_v18  ;;  %v15283_v34 = vpop.f32.mrb[62].mxu0  ;;  %v2681_v26 = vrot.slane %v17678_v13, 5  ;;  %v2273_v16 = vshrl.u32 %v17678_v13, 16  ;;  %v2275_v19 = vshll.u32 %v17678_v13, 16 }
 0x313   : > { %v2243_v28 = vmax.f32 %v2231_v14, 0.0  ;;  %v2232_v48 = vadd.f32 %v15283_v34, %v17670_v62  ;;  %v2178_v27 = vpop.f32.mrb[63].mxu0  ;;  %v2282_v32 = vrot.slane %v17683_v21, 1  ;;  %v2974_v33 = vrot.slane %v17678_v13, 6 }
 0x314   : > { %v2241_v35 = vmax.f32 %v2229_v23, 0.0  ;;  %v2230_v36 = vadd.f32 %v17670_v62, %v2178_v27  ;;  %v2683_v15 = vsel %vm1863_vm3, %v2681_v26, %v2682_v20  ;;  %v2277_v37 = vrot.slane %v2275_v19, 1 }
 0x315   : > { %v2244_v53 = vmax.f32 %v2232_v48, 0.0  ;;  %15381 = vmatmul.mubr.msk.bf16.vlgmr.msra.gmra.mrb[68].mxu0 %vm1452_vm1, %v2683_v15  ;;  %v2286_v42 = vor.u32 %v17686_v17, %v2282_v32  ;;  %v2975_v24 = vrot.slane %v17676_v11, 6  ;;  %v3254_v39 = vrot.slane %v17686_v17, 2 }
 0x316   : > { %v2242_v45 = vmax.f32 %v2230_v36, 0.0  ;;  %v2278_v38 = vor.u32 %v2277_v37, %v2273_v16  ;;  %15384 = vmatprep.mubr.msk.bf16.mxu0 %vm16973_vm6, %v16972_v2  ;;  %15429 = vmatpush3.bf16.msra.mxu0 %v15755_v43  ;;  %v3255_v9 = vrot.slane %v17683_v21, 3  ;;  %v2543_v49 = vrot.slane %v17678_v13, 1 }
 0x317   : > { %v17713_v61 = vpack.c.bf16 %v2244_v53, %v2243_v28  ;;  %15430 = vmatprep.subr.bf16.mxu0 %v16972_v2  ;;  %v17720_v0 = vsel %vm2973_vm7, %v2974_v33, %v2975_v24  ;;  %v2544_v47 = vrot.slane %v17676_v11, 1  ;;  %v17723_v1 = vrot.slane %v2273_v16, 5  ;;  %v15754_v16 = vld [vmem:[%s20966_s5 + $0x10] sm:$0xff]   ;;  %v15759_v28 = vld [vmem:[%s20966_s5 + $0xb8] sm:$0xff]  }
 0x318   : > { %v17725_v50 = vpack.c.bf16 %v2242_v45, %v2241_v35  ;;  %v15286_v40 = vpop.f32.mrb[64].mxu0  ;;  %v2283_v51 = vsel %vm1522_vm4, %v2278_v38, %v2282_v32  ;;  %v17728_v52 = vor.u32 %v3255_v9, %v3254_v39  ;;  %v17730_v41 = vrot.slane %v2275_v19, 6  ;;  %v15758_v38 = vld [vmem:[%s20966_s5 + $0x18] sm:$0xff]  }
 0x319   : > { %v2235_v4 = vadd.f32 %v15286_v40, %v17670_v62  ;;  %v2191_v44 = vpop.f32.mrb[65].mxu0  ;;  %15297 = vmatmul.mubr.msk.bf16.vlgmr.msra.gmra.mrb[56].mxu1 %vm1452_vm1, %v2283_v51  ;;  %v2686_v6 = vrot.slane %v17713_v61, 5  ;;  %v17736_v54 = vshll.u32 %v17713_v61, 16  ;;  %v17739_v5 = vshrl.u32 %v17713_v61, 16 }
 0x31a   : > { %v2233_v46 = vadd.f32 %v17670_v62, %v2191_v44  ;;  %v15287_v31 = vpop.f32.mrb[66].mxu0  ;;  %15317 = vmatpush3.bf16.msra.mxu1 %v15752_v59  ;;  %v2684_v12 = vrot.slane %v17725_v50, 5  ;;  %15300 = vmatprep.mubr.msk.bf16.mxu1 %vm16973_vm6, %v16972_v2  ;;  %v17746_v25 = vshll.u32 %v17725_v50, 16  ;;  %v17752_v56 = vshrl.u32 %v17725_v50, 16 }
 0x31b   : > { %v2247_v57 = vmax.f32 %v2235_v4, 0.0  ;;  %v2236_v58 = vadd.f32 %v15287_v31, %v17670_v62  ;;  %v2194_v60 = vpop.f32.mrb[67].mxu0  ;;  %15318 = vmatprep.subr.bf16.mxu1 %v16972_v2  ;;  %v2298_v63 = vrot.slane %v17736_v54, 1  ;;  %15431 = vmatpush3.bf16.msra.mxu0 %v15756_v29  ;;  %v2977_v22 = vrot.slane %v17725_v50, 6 }
 0x31c   : > { %v2245_v7 = vmax.f32 %v2233_v46, 0.0  ;;  %v2234_v8 = vadd.f32 %v17670_v62, %v2194_v60  ;;  %v2685_v10 = vsel %vm1863_vm3, %v2682_v20, %v2684_v12  ;;  %v2290_v30 = vrot.slane %v17746_v25, 1  ;;  %15432 = vmatprep.subr.bf16.mxu0 %v16972_v2 }
 0x31d   : > { %v2248_v14 = vmax.f32 %v2236_v58, 0.0  ;;  %15385 = vmatmul.mubr.msk.bf16.gmra.mrb[72].mxu0 %vm1452_vm1, %v2685_v10  ;;  %v2687_v18 = vsel %vm1863_vm3, %v2684_v12, %v2686_v6  ;;  %v2302_v23 = vor.u32 %v17739_v5, %v2298_v63  ;;  %v17773_v34 = vsel %vm2973_vm7, %v2975_v24, %v2977_v22 }
 0x31e   : > { %v2246_v62 = vmax.f32 %v2234_v8, 0.0  ;;  %v2291_v26 = vsel %vm1522_vm4, %v2286_v42, %v2290_v30  ;;  %15319 = vmatpush3.bf16.msra.mxu1 %v15753_v55  ;;  %15388 = vmatprep.mubr.msk.bf16.mxu0 %vm16973_vm6, %v16972_v2  ;;  %v2294_v20 = vor.u32 %v17752_v56, %v2290_v30  ;;  %v2979_v19 = vrot.slane %v17713_v61, 6 }
 0x31f   : > { %v17783_v43 = vpack.c.bf16 %v2248_v14, %v2247_v57  ;;  %15320 = vmatprep.subr.bf16.mxu1 %v16972_v2  ;;  %15433 = vmatpush3.bf16.msra.mxu0 %v15757_v3  ;;  %v3257_v48 = vrot.slane %v17752_v56, 2  ;;  %v3258_v27 = vrot.slane %v17746_v25, 3  ;;  %v17794_v32 = vsel %vm2542_vm8, %v2543_v49, %v2544_v47 }
 0x320   : > { %v17796_v33 = vpack.c.bf16 %v2246_v62, %v2245_v7  ;;  %v2299_v35 = vsel %vm1522_vm4, %v2294_v20, %v2298_v63  ;;  %15434 = vmatprep.subr.bf16.mxu0 %v16972_v2  ;;  %v17801_v36 = vsel %vm2973_vm7, %v2977_v22, %v2979_v19  ;;  %v3261_v15 = vrot.slane %v17739_v5, 2 }
 0x321   : > { %15301 = vmatmul.mubr.msk.bf16.gmra.mrb[60].mxu1 %vm1452_vm1, %v2291_v26  ;;  %v2983_v37 = vrot.slane %v17783_v43, 6  ;;  %v3259_v53 = vor.u32 %v3258_v27, %v3257_v48  ;;  %v3262_v42 = vrot.slane %v17736_v54, 3  ;;  %v2546_v24 = vrot.slane %v17725_v50, 1 }
 0x322   : > { %15304 = vmatprep.mubr.msk.bf16.mxu1 %vm16973_vm6, %v16972_v2  ;;  %v2688_v39 = vrot.slane %v17796_v33, 5  ;;  %15321 = vmatpush3.bf16.msra.mxu1 %v15754_v16  ;;  %v17812_v45 = vshll.u32 %v17796_v33, 16  ;;  %v17818_v59 = vshrl.u32 %v17796_v33, 16  ;;  %v2981_v9 = vrot.slane %v17796_v33, 6 }
 0x323   : > { %15322 = vmatprep.subr.bf16.mxu1 %v16972_v2  ;;  %15435 = vmatpush3.bf16.msra.mxu0 %v15759_v28  ;;  %v17824_v49 = vsel %vm3253_vm9, %v17728_v52, %v3259_v53  ;;  %v3263_v29 = vor.u32 %v3262_v42, %v3261_v15  ;;  %v17829_v40 = vsel %vm2542_vm8, %v2544_v47, %v2546_v24  ;;  %v2548_v51 = vrot.slane %v17713_v61, 1 }
 0x324   : > { %v2689_v4 = vsel %vm1863_vm3, %v2686_v6, %v2688_v39  ;;  %v2306_v44 = vrot.slane %v17812_v45, 1  ;;  %v17839_v46 = vsel %vm2973_vm7, %v2979_v19, %v2981_v9  ;;  %15484 = vmatprep.subr.bf16.mxu0 %v16972_v2  ;;  %v17843_v52 = vsel %vm2973_vm7, %v2981_v9, %v2983_v37 }
 0x325   : > { %15389 = vmatmul.mubr.msk.bf16.gmra.mrb[76].mxu0 %vm1452_vm1, %v2687_v18  ;;  %v17847_v47 = vsel %vm3253_vm9, %v3259_v53, %v3263_v29  ;;  %v3265_v31 = vrot.slane %v17818_v59, 2  ;;  %v3266_v12 = vrot.slane %v17812_v45, 3  ;;  %v17852_v6 = vsel %vm2542_vm8, %v2546_v24, %v2548_v51 }
 0x326   : > { %15392 = vmatprep.mubr.msk.bf16.mxu0 %vm16973_vm6, %v16972_v2  ;;  %v2307_v55 = vsel %vm1522_vm4, %v2302_v23, %v2306_v44  ;;  %15323 = vmatpush3.bf16.msra.mxu1 %v15758_v38  ;;  %v2839_v57 = vshll.u32 %v17783_v43, 16  ;;  %v3269_v58 = vshrl.u32 %v17783_v43, 16  ;;  %v2550_v63 = vrot.slane %v17796_v33, 1 }
 0x327   : > { %15344 = vmatprep.subr.bf16.mxu1 %v16972_v2  ;;  %v3267_v60 = vor.u32 %v3266_v12, %v3265_v31  ;;  %v2821_v3 = vor.u32 %v17730_v41, %v17723_v1  ;;  %v2822_v22 = vrot.slane %v17686_v17, 5  ;;  %v2823_v10 = vrot.slane %v17683_v21, 6 }
 0x328   : > { %v3271_v7 = vrot.slane %v3269_v58, 2  ;;  %v3272_v8 = vrot.slane %v2839_v57, 3  ;;  %v2826_v30 = vrot.slane %v17752_v56, 5  ;;  %v17875_v18 = vsel %vm2542_vm8, %v2548_v51, %v2550_v63 }
 0x329   : > { %15305 = vmatmul.mubr.msk.bf16.gmra.mrb[64].mxu1 %vm1452_vm1, %v2299_v35  ;;  %v17870_v14 = vsel %vm3253_vm9, %v3263_v29, %v3267_v60  ;;  %v2827_v1 = vrot.slane %v17746_v25, 6  ;;  %v2830_v17 = vrot.slane %v17739_v5, 5  ;;  %v2824_v41 = vor.u32 %v2823_v10, %v2822_v22 }
 0x32a   : > { %15308 = vmatprep.mubr.msk.bf16.mxu1 %vm16973_vm6, %v16972_v2  ;;  %v17881_v21 = vor.u32 %v3272_v8, %v3271_v7  ;;  %v2831_v56 = vrot.slane %v17736_v54, 6  ;;  %v2834_v23 = vrot.slane %v17818_v59, 5  ;;  %v2835_v26 = vrot.slane %v17812_v45, 6  ;;  %v15763_v7 = vld [vmem:[%s20966_s5 + $0xe0] sm:$0xff]   ;;  %v15764_v45 = vld [vmem:[%s20966_s5 + $0xe8] sm:$0xff]  }
 0x32b   : > { %v2828_v62 = vor.u32 %v2827_v1, %v2826_v30  ;;  %v2841_v20 = vrot.slane %v2839_v57, 6  ;;  %v3115_v16 = vrot.slane %v17676_v11, 2  ;;  %v17892_v5 = vsel %vm2041_vm5, %v2821_v3, %v2824_v41 }
 0x32c   : > { %v17889_v25 = vsel %vm3253_vm9, %v3267_v60, %v17881_v21  ;;  %v2832_v19 = vor.u32 %v2831_v56, %v2830_v17  ;;  %v3116_v28 = vrot.slane %v17725_v50, 2  ;;  %v2836_v48 = vor.u32 %v2835_v26, %v2834_v23 }
 0x32d   : > { %15393 = vmatmul.mubr.msk.bf16.gmra.mrb[80].mxu0 %vm1452_vm1, %v2689_v4  ;;  %v17897_v54 = vsel %vm2041_vm5, %v2824_v41, %v2828_v62  ;;  %v3118_v27 = vrot.slane %v17713_v61, 2  ;;  %v3120_v35 = vrot.slane %v17796_v33, 2  ;;  %v3122_v53 = vrot.slane %v17783_v43, 2 }
 0x32e   : > { %15396 = vmatprep.mubr.msk.bf16.mxu0 %vm16973_vm6, %v16972_v2  ;;  %v17904_v15 = vsel %vm2041_vm5, %v2828_v62, %v2832_v19  ;;  %v17907_v37 = vsel %vm3114_vm10, %v3115_v16, %v3116_v28  ;;  %v3405_v42 = vrot.slane %v17676_v11, 3  ;;  %v17912_v24 = vsel %vm2041_vm5, %v2832_v19, %v2836_v48 }
 0x32f   : > { %v17915_v38 = vsel %vm2041_vm5, %v2836_v48, %v2841_v20  ;;  %v17918_v9 = vsel %vm3114_vm10, %v3116_v28, %v3118_v27  ;;  %v17921_v29 = vsel %vm3114_vm10, %v3118_v27, %v3120_v35  ;;  %v17926_v51 = vsel %vm3114_vm10, %v3120_v35, %v3122_v53 }
 0x330   : > { %v3406_v4 = vrot.slane %v17725_v50, 3  ;;  %v3408_v31 = vrot.slane %v17713_v61, 3  ;;  %v3410_v12 = vrot.slane %v17796_v33, 3  ;;  %v3412_v57 = vrot.slane %v17783_v43, 3 }
 0x331   : > { %15309 = vmatmul.mubr.msk.bf16.gmra.mrb[68].mxu1 %vm1452_vm1, %v2307_v55  ;;  %v2310_v55 = vor.u32 %v17818_v59, %v2306_v44  ;;  %v15765_v59 = vld [vmem:[%s20966_s5 + $0xf0] sm:$0xff]   ;;  %v15767_v44 = vld [vmem:[%s20966_s5 + $0xf8] sm:$0xff]  }
 0x332   : > { %15312 = vmatprep.mubr.msk.bf16.mxu1 %vm16973_vm6, %v16972_v2  ;;  %v17936_v58 = vsel %vm3404_vm11, %v3405_v42, %v3406_v4  ;;  %v17939_v60 = vsel %vm3404_vm11, %v3406_v4, %v3408_v31  ;;  %v17942_v3 = vsel %vm3404_vm11, %v3408_v31, %v3410_v12  ;;  %v17947_v22 = vsel %vm3404_vm11, %v3410_v12, %v3412_v57 }
 0x335   : > { %15397 = vmatmul.mubr.msk.bf16.gmra.mrb[84].mxu0 %vm1452_vm1, %v2688_v39  ;;  %v15760_v39 = vld [vmem:[%s20966_s5 + $0x40] sm:$0xff]  }
 0x336   : > { %15436 = vmatprep.mubr.msk.bf16.mxu0 %vm16973_vm6, %v16972_v2 }
 0x339   : > { %15313 = vmatmul.mubr.msk.bf16.gmra.mrb[72].mxu1 %vm1452_vm1, %v2310_v55 }
 0x33a   : > { %15324 = vmatprep.mubr.msk.bf16.mxu1 %vm16973_vm6, %v16972_v2 }
 0x33d   : > { %15437 = vmatmul.mubr.msk.bf16.vlgmr.msra.gmra.mrb[88].mxu0 %vm1452_vm1, %v17720_v0  ;;  %v15761_v0 = vld [vmem:[%s20966_s5 + $0x48] sm:$0xff]  }
 0x33e   : > { %15440 = vmatprep.mubr.msk.bf16.mxu0 %vm16973_vm6, %v16972_v2  ;;  %15485 = vmatpush3.bf16.msra.mxu0 %v15763_v7 }
 0x33f   : > { %15486 = vmatprep.subr.bf16.mxu0 %v16972_v2 }
 0x341   : > { %15325 = vmatmul.mubr.msk.bf16.vlgmr.msra.gmra.mrb[76].mxu1 %vm1452_vm1, %v17678_v13  ;;  %v15762_v13 = vld [vmem:[%s20966_s5 + $0x50] sm:$0xff]  }
 0x342   : > { %15345 = vmatpush3.bf16.msra.mxu1 %v15760_v39  ;;  %15328 = vmatprep.mubr.msk.bf16.mxu1 %vm16973_vm6, %v16972_v2 }
 0x343   : > { %15346 = vmatprep.subr.bf16.mxu1 %v16972_v2  ;;  %15487 = vmatpush3.bf16.msra.mxu0 %v15764_v45 }
 0x344   : > { %15488 = vmatprep.subr.bf16.mxu0 %v16972_v2 }
 0x345   : > { %15441 = vmatmul.mubr.msk.bf16.gmra.mrb[92].mxu0 %vm1452_vm1, %v17773_v34  ;;  %v15766_v34 = vld [vmem:[%s20966_s5 + $0x58] sm:$0xff]  }
 0x346   : > { %15347 = vmatpush3.bf16.msra.mxu1 %v15761_v0  ;;  %15444 = vmatprep.mubr.msk.bf16.mxu0 %vm16973_vm6, %v16972_v2 }
 0x347   : > { %15348 = vmatprep.subr.bf16.mxu1 %v16972_v2  ;;  %15489 = vmatpush3.bf16.msra.mxu0 %v15765_v59 }
 0x348   : > { %15490 = vmatprep.subr.bf16.mxu0 %v16972_v2 }
 0x349   : > { %15329 = vmatmul.mubr.msk.bf16.gmra.mrb[80].mxu1 %vm1452_vm1, %v17676_v11  ;;  %v15768_v11 = vld [vmem:[%s20966_s5 + $0x80] sm:$0xff]  }
 0x34a   : > { %15332 = vmatprep.mubr.msk.bf16.mxu1 %vm16973_vm6, %v16972_v2  ;;  %15349 = vmatpush3.bf16.msra.mxu1 %v15762_v13 }
 0x34b   : > { %15350 = vmatprep.subr.bf16.mxu1 %v16972_v2  ;;  %15491 = vmatpush3.bf16.msra.mxu0 %v15767_v44  ;;  %v15780_v44 = vld [vmem:[%s20968_s7 + $0x80] ss:$16 sps:$4 sm:$0xff]  }
 0x34d   : > { %15445 = vmatmul.mubr.msk.bf16.gmra.mrb[96].mxu0 %vm1452_vm1, %v17801_v36  ;;  %v15772_v36 = vld [vmem:[%s20966_s5 + $0xc0] sm:$0xff]  }
 0x34e   : > { %15448 = vmatprep.mubr.msk.bf16.mxu0 %vm16973_vm6, %v16972_v2  ;;  %15351 = vmatpush3.bf16.msra.mxu1 %v15766_v34  ;;  %v15782_v34 = vld [vmem:[%s20968_s7 + $0x84] ss:$16 sps:$4 sm:$0xff]  }
 0x34f   : > { %15400 = vmatprep.subr.bf16.mxu1 %v16972_v2  ;;  %3683 = vmatprep.subr.bf16.mxu0 %v15782_v34 }
 0x351   : > { %15333 = vmatmul.mubr.msk.bf16.gmra.mrb[84].mxu1 %vm1452_vm1, %v17725_v50  ;;  %v15770_v50 = vld [vmem:[%s20966_s5 + $0x90] sm:$0xff]  }
 0x352   : > { %15336 = vmatprep.mubr.msk.bf16.mxu1 %vm16973_vm6, %v16972_v2 }
 0x355   : > { %15449 = vmatmul.mubr.msk.bf16.gmra.mrb[100].mxu0 %vm1452_vm1, %v17839_v46  ;;  %v15776_v46 = vld [vmem:[%s20966_s5 + $0x100] sm:$0xff]  }
 0x356   : > { %15452 = vmatprep.mubr.msk.bf16.mxu0 %vm16973_vm6, %v16972_v2 }
 0x359   : > { %15337 = vmatmul.mubr.msk.bf16.gmra.mrb[88].mxu1 %vm1452_vm1, %v17713_v61  ;;  %v15769_v61 = vld [vmem:[%s20966_s5 + $0x88] sm:$0xff]  }
 0x35a   : > { %15340 = vmatprep.mubr.msk.bf16.mxu1 %vm16973_vm6, %v16972_v2 }
 0x35d   : > { %15453 = vmatmul.mubr.msk.bf16.gmra.mrb[104].mxu0 %vm1452_vm1, %v17843_v52  ;;  %v15777_v52 = vld [vmem:[%s20966_s5 + $0x108] sm:$0xff]  }
 0x35e   : > { %15492 = vmatprep.mubr.msk.bf16.mxu0 %vm16973_vm6, %v16972_v2 }
 0x361   : > { %15341 = vmatmul.mubr.msk.bf16.gmra.mrb[92].mxu1 %vm1452_vm1, %v17796_v33  ;;  %v15773_v33 = vld [vmem:[%s20966_s5 + $0xc8] sm:$0xff]  }
 0x362   : > { %15352 = vmatprep.mubr.msk.bf16.mxu1 %vm16973_vm6, %v16972_v2 }
 0x365   : > { %15493 = vmatmul.mubr.msk.bf16.vlgmr.msra.gmra.mrb[108].mxu0 %vm1452_vm1, %v17824_v49  ;;  %v15774_v49 = vld [vmem:[%s20966_s5 + $0xd0] sm:$0xff]  }
 0x366   : > { %15496 = vmatprep.mubr.msk.bf16.mxu0 %vm16973_vm6, %v16972_v2  ;;  %3684 = vmatpush1.bf16.msra.mxu0 %v15780_v44 }
 0x369   : > { %15353 = vmatmul.mubr.msk.bf16.vlgmr.msra.gmra.mrb[96].mxu1 %vm1452_vm1, %v17794_v32  ;;  %v15771_v32 = vld [vmem:[%s20966_s5 + $0x98] sm:$0xff]  }
 0x36a   : > { %15401 = vmatpush3.bf16.msra.mxu1 %v15768_v11  ;;  %15356 = vmatprep.mubr.msk.bf16.mxu1 %vm16973_vm6, %v16972_v2 }
 0x36b   : > { %15402 = vmatprep.subr.bf16.mxu1 %v16972_v2 }
 0x36d   : > { %15497 = vmatmul.mubr.msk.bf16.gmra.mrb[112].mxu0 %vm1452_vm1, %v17847_v47  ;;  %v15778_v47 = vld [vmem:[%s20966_s5 + $0x110] sm:$0xff]  }
 0x36e   : > { %15403 = vmatpush3.bf16.msra.mxu1 %v15769_v61  ;;  %15500 = vmatprep.mubr.msk.bf16.mxu0 %vm16973_vm6, %v16972_v2 }
 0x36f   : > { %15404 = vmatprep.subr.bf16.mxu1 %v16972_v2 }
 0x371   : > { %15357 = vmatmul.mubr.msk.bf16.gmra.mrb[100].mxu1 %vm1452_vm1, %v17829_v40  ;;  %v15775_v40 = vld [vmem:[%s20966_s5 + $0xd8] sm:$0xff]  }
 0x372   : > { %15360 = vmatprep.mubr.msk.bf16.mxu1 %vm16973_vm6, %v16972_v2  ;;  %15405 = vmatpush3.bf16.msra.mxu1 %v15770_v50 }
 0x373   : > { %15406 = vmatprep.subr.bf16.mxu1 %v16972_v2 }
 0x375   : > { %15501 = vmatmul.mubr.msk.bf16.gmra.mrb[116].mxu0 %vm1452_vm1, %v17870_v14 }
 0x376   : > { %15504 = vmatprep.mubr.msk.bf16.mxu0 %vm16973_vm6, %v16972_v2  ;;  %15407 = vmatpush3.bf16.msra.mxu1 %v15771_v32 }
 0x377   : > { %15456 = vmatprep.subr.bf16.mxu1 %v16972_v2 }
 0x379   : > { %15361 = vmatmul.mubr.msk.bf16.gmra.mrb[104].mxu1 %vm1452_vm1, %v17852_v6  ;;  %v15779_v6 = vld [vmem:[%s20966_s5 + $0x118] sm:$0xff]  }
 0x37a   : > { %15364 = vmatprep.mubr.msk.bf16.mxu1 %vm16973_vm6, %v16972_v2 }
 0x37d   : > { %15505 = vmatmul.mubr.msk.bf16.gmra.mrb[120].mxu0 %vm1452_vm1, %v17889_v25 }
 0x37e   : > { %15508 = vmatprep.mubr.msk.bf16.mxu0 %vm16973_vm6, %v16972_v2 }
 0x381   : > { %15365 = vmatmul.mubr.msk.bf16.gmra.mrb[108].mxu1 %vm1452_vm1, %v17875_v18 }
 0x382   : > { %15368 = vmatprep.mubr.msk.bf16.mxu1 %vm16973_vm6, %v16972_v2 }
 0x385   : > { %15509 = vmatmul.mubr.msk.bf16.gmra.mrb[124].mxu0 %vm1452_vm1, %v17881_v21 }
 0x389   : > { %15369 = vmatmul.mubr.msk.bf16.gmra.mrb[112].mxu1 %vm1452_vm1, %v2550_v63 }
 0x38a   : > { %15408 = vmatprep.mubr.msk.bf16.mxu1 %vm16973_vm6, %v16972_v2 }
 0x391   : > { %15409 = vmatmul.mubr.msk.bf16.vlgmr.msra.gmra.mrb[116].mxu1 %vm1452_vm1, %v17892_v5 }
 0x392   : > { %15457 = vmatpush3.bf16.msra.mxu1 %v15772_v36  ;;  %15412 = vmatprep.mubr.msk.bf16.mxu1 %vm16973_vm6, %v16972_v2 }
 0x393   : > { %15458 = vmatprep.subr.bf16.mxu1 %v16972_v2 }
 0x396   : > { %15459 = vmatpush3.bf16.msra.mxu1 %v15773_v33 }
 0x397   : > { %15460 = vmatprep.subr.bf16.mxu1 %v16972_v2 }
 0x399   : > { %15413 = vmatmul.mubr.msk.bf16.gmra.mrb[120].mxu1 %vm1452_vm1, %v17897_v54 }
 0x39a   : > { %15416 = vmatprep.mubr.msk.bf16.mxu1 %vm16973_vm6, %v16972_v2  ;;  %15461 = vmatpush3.bf16.msra.mxu1 %v15774_v49 }
 0x39b   : > { %15462 = vmatprep.subr.bf16.mxu1 %v16972_v2 }
 0x39e   : > { %15463 = vmatpush3.bf16.msra.mxu1 %v15775_v40  ;;  %v15783_v40 = vld [vmem:[%s20968_s7 + $0x88] ss:$16 sps:$4 sm:$0xff]  }
 0x39f   : > { %15512 = vmatprep.subr.bf16.mxu1 %v16972_v2 }
 0x3a1   : > { %15417 = vmatmul.mubr.msk.bf16.gmra.mrb[124].mxu1 %vm1452_vm1, %v17904_v15 }
 0x3a2   : > { %15420 = vmatprep.mubr.msk.bf16.mxu1 %vm16973_vm6, %v16972_v2 }
 0x3a9   : > { %15421 = vmatmul.mubr.msk.bf16.gmra.mrb[128].mxu1 %vm1452_vm1, %v17912_v24 }
 0x3aa   : > { %15424 = vmatprep.mubr.msk.bf16.mxu1 %vm16973_vm6, %v16972_v2 }
 0x3b1   : > { %15425 = vmatmul.mubr.msk.bf16.gmra.mrb[132].mxu1 %vm1452_vm1, %v17915_v38 }
 0x3b2   : > { %15464 = vmatprep.mubr.msk.bf16.mxu1 %vm16973_vm6, %v16972_v2 }
 0x3b9   : > { %15465 = vmatmul.mubr.msk.bf16.vlgmr.msra.gmra.mrb[136].mxu1 %vm1452_vm1, %v17907_v37 }
 0x3ba   : > { %15513 = vmatpush3.bf16.msra.mxu1 %v15776_v46  ;;  %15468 = vmatprep.mubr.msk.bf16.mxu1 %vm16973_vm6, %v16972_v2  ;;  %v15785_v46 = vld [vmem:[%s20968_s7 + $0x8c] ss:$16 sps:$4 sm:$0xff]  }
 0x3bb   : > { %15514 = vmatprep.subr.bf16.mxu1 %v16972_v2 }
 0x3be   : > { %15515 = vmatpush3.bf16.msra.mxu1 %v15777_v52 }
 0x3bf   : > { %15516 = vmatprep.subr.bf16.mxu1 %v16972_v2 }
 0x3c1   : > { %15469 = vmatmul.mubr.msk.bf16.gmra.mrb[140].mxu1 %vm1452_vm1, %v17918_v9 }
 0x3c2   : > { %15472 = vmatprep.mubr.msk.bf16.mxu1 %vm16973_vm6, %v16972_v2  ;;  %15517 = vmatpush3.bf16.msra.mxu1 %v15778_v47 }
 0x3c3   : > { %15518 = vmatprep.subr.bf16.mxu1 %v16972_v2 }
 0x3c6   : > { %15519 = vmatpush3.bf16.msra.mxu1 %v15779_v6 }
 0x3c7   : > { %3724 = vmatprep.subr.bf16.mxu1 %v15785_v46 }
 0x3c9   : > { %15473 = vmatmul.mubr.msk.bf16.gmra.mrb[144].mxu1 %vm1452_vm1, %v17921_v29 }
 0x3ca   : > { %15476 = vmatprep.mubr.msk.bf16.mxu1 %vm16973_vm6, %v16972_v2 }
 0x3d1   : > { %15477 = vmatmul.mubr.msk.bf16.gmra.mrb[148].mxu1 %vm1452_vm1, %v17926_v51 }
 0x3d2   : > { %15480 = vmatprep.mubr.msk.bf16.mxu1 %vm16973_vm6, %v16972_v2 }
 0x3d9   : > { %15481 = vmatmul.mubr.msk.bf16.gmra.mrb[152].mxu1 %vm1452_vm1, %v3122_v53 }
 0x3da   : > { %15520 = vmatprep.mubr.msk.bf16.mxu1 %vm16973_vm6, %v16972_v2 }
 0x3e1   : > { %15521 = vmatmul.mubr.msk.bf16.vlgmr.msra.gmra.mrb[156].mxu1 %vm1452_vm1, %v17936_v58 }
 0x3e2   : > { %15524 = vmatprep.mubr.msk.bf16.mxu1 %vm16973_vm6, %v16972_v2  ;;  %3725 = vmatpush1.bf16.msra.mxu1 %v15783_v40 }
 0x3e8   : > { %v18162_v63 = vpop.f32.mrb[68].mxu0 }
 0x3e9   : > { %v15382_v8 = vpop.f32.mrb[69].mxu0  ;;  %15525 = vmatmul.mubr.msk.bf16.gmra.mrb[160].mxu1 %vm1452_vm1, %v17939_v60 }
 0x3ea   : > { %v18166_v10 = vpop.f32.mrb[70].mxu0  ;;  %15528 = vmatprep.mubr.msk.bf16.mxu1 %vm16973_vm6, %v16972_v2  ;;  %v15786_v8 = vld [vmem:[%s20968_s7 + $0xa0] ss:$16 sps:$4 sm:$0xff]  }
 0x3eb   : > { %v15383_v30 = vpop.f32.mrb[71].mxu0 }
 0x3ec   : > { %v2384_v14 = vpop.f32.mrb[56].mxu1  ;;  %v15788_v30 = vld [vmem:[%s20968_s7 + $0xa4] ss:$16 sps:$4 sm:$0xff]  }
 0x3ed   : > { %v15298_v18 = vpop.f32.mrb[57].mxu1  ;;  %3685 = vmatprep.subr.bf16.mxu0 %v15788_v30  ;;  %v15803_v30 = vld [vmem:[%s20968_s7 + $0xec] ss:$16 sps:$4 sm:$0xff]  }
 0x3ee   : > { %v2387_v1 = vpop.f32.mrb[58].mxu1  ;;  %3686 = vmatpush1.bf16.msra.mxu0 %v15786_v8  ;;  %v15801_v8 = vld [vmem:[%s20968_s7 + $0xe8] ss:$16 sps:$4 sm:$0xff]  }
 0x3ef   : > { %v15299_v17 = vpop.f32.mrb[59].mxu1 }
 0x3f0   : > { %v18170_v21 = vpop.f32.mrb[72].mxu0 }
 0x3f1   : > { %v15386_v41 = vpop.f32.mrb[73].mxu0  ;;  %15529 = vmatmul.mubr.msk.bf16.gmra.mrb[164].mxu1 %vm1452_vm1, %v17942_v3 }
 0x3f2   : > { %v18174_v56 = vpop.f32.mrb[74].mxu0  ;;  %15532 = vmatprep.mubr.msk.bf16.mxu1 %vm16973_vm6, %v16972_v2 }
 0x3f3   : > { %v15387_v23 = vpop.f32.mrb[75].mxu0 }
 0x3f4   : > { %v2392_v62 = vpop.f32.mrb[60].mxu1 }
 0x3f5   : > { %v15302_v26 = vpop.f32.mrb[61].mxu1 }
 0x3f6   : > { %v2395_v20 = vpop.f32.mrb[62].mxu1 }
 0x3f7   : > { %v15303_v16 = vpop.f32.mrb[63].mxu1 }
 0x3f8   : > { %v18178_v25 = vpop.f32.mrb[76].mxu0 }
 0x3f9   : > { %v15390_v5 = vpop.f32.mrb[77].mxu0  ;;  %15533 = vmatmul.mubr.msk.bf16.gmra.mrb[168].mxu1 %vm1452_vm1, %v17947_v22 }
 0x3fa   : > { %v18182_v19 = vpop.f32.mrb[78].mxu0  ;;  %15536 = vmatprep.mubr.msk.bf16.mxu1 %vm16973_vm6, %v16972_v2  ;;  %v15789_v5 = vld [vmem:[%s20968_s7 + $0xa8] ss:$16 sps:$4 sm:$0xff]  }
 0x3fb   : > { %v15391_v28 = vpop.f32.mrb[79].mxu0 }
 0x3fc   : > { %v2400_v54 = vpop.f32.mrb[64].mxu1  ;;  %v15791_v28 = vld [vmem:[%s20968_s7 + $0xac] ss:$16 sps:$4 sm:$0xff]  }
 0x3fd   : > { %v15306_v48 = vpop.f32.mrb[65].mxu1  ;;  %3726 = vmatprep.subr.bf16.mxu1 %v15791_v28 }
 0x3fe   : > { %v2403_v27 = vpop.f32.mrb[66].mxu1  ;;  %3727 = vmatpush1.bf16.msra.mxu1 %v15789_v5 }
 0x3ff   : > { %v15307_v35 = vpop.f32.mrb[67].mxu1 }
 0x400   : > { %v18186_v15 = vpop.f32.mrb[80].mxu0 }
 0x401   : > { %v15394_v37 = vpop.f32.mrb[81].mxu0  ;;  %15537 = vmatmul.mubr.msk.bf16.gmra.mrb[172].mxu1 %vm1452_vm1, %v3412_v57 }
 0x402   : > { %v18191_v53 = vpop.f32.mrb[82].mxu0 }
 0x403   : > { %v15395_v42 = vpop.f32.mrb[83].mxu0 }
 0x404   : > { %v18193_v24 = vpop.f32.mrb[68].mxu1 }
 0x405   : > { %v15310_v38 = vpop.f32.mrb[69].mxu1 }
 0x406   : > { %v18195_v9 = vpop.f32.mrb[70].mxu1 }
 0x407   : > { %v15311_v2 = vpop.f32.mrb[71].mxu1 }
 0x408   : > { %v18197_v29 = vpop.f32.mrb[84].mxu0  ;;  %v15792_v2 = vld [vmem:[%s20968_s7 + $0xc0] ss:$16 sps:$4 sm:$0xff]  }
 0x409   : > { %v15398_v51 = vpop.f32.mrb[85].mxu0 }
 0x40a   : > { %v2798_v4 = vpop.f32.mrb[86].mxu0  ;;  %v15794_v51 = vld [vmem:[%s20968_s7 + $0xc4] ss:$16 sps:$4 sm:$0xff]  }
 0x40b   : > { %v15399_v31 = vpop.f32.mrb[87].mxu0  ;;  %3687 = vmatprep.subr.bf16.mxu0 %v15794_v51 }
 0x40c   : > { %v18199_v12 = vpop.f32.mrb[72].mxu1  ;;  %3688 = vmatpush1.bf16.msra.mxu0 %v15792_v2 }
 0x40d   : > { %v15314_v58 = vpop.f32.mrb[73].mxu1 }
 0x40e   : > { %v2419_v43 = vpop.f32.mrb[74].mxu1 }
 0x40f   : > { %v15315_v60 = vpop.f32.mrb[75].mxu1  ;;  %v15797_v43 = vld [vmem:[%s20968_s7 + $0xcc] ss:$16 sps:$4 sm:$0xff]  }
 0x410   : > { %v18201_v57 = vpop.f32.mrb[88].mxu0  ;;  %3728 = vmatprep.subr.bf16.mxu1 %v15797_v43 }
 0x411   : > { %v15438_v3 = vpop.f32.mrb[89].mxu0 }
 0x412   : > { %v18203_v22 = vpop.f32.mrb[90].mxu0 }
 0x413   : > { %v15439_v55 = vpop.f32.mrb[91].mxu0 }
 0x414   : > { %v2490_v7 = vpop.f32.mrb[76].mxu1 }
 0x415   : > { %v18205_v39 = vadd.f32 %v2490_v7, %v2384_v14  ;;  %v15326_v45 = vpop.f32.mrb[77].mxu1 }
 0x416   : > { %v2493_v0 = vpop.f32.mrb[78].mxu1 }
 0x417   : > { %v18207_v59 = vadd.f32 %v2493_v0, %v2387_v1  ;;  %v15327_v13 = vpop.f32.mrb[79].mxu1 }
 0x418   : > { %v18215_v11 = vpop.f32.mrb[92].mxu0 }
 0x419   : > { %v15442_v61 = vpop.f32.mrb[93].mxu0 }
 0x41a   : > { %v18217_v50 = vpop.f32.mrb[94].mxu0 }
 0x41b   : > { %v15443_v32 = vpop.f32.mrb[95].mxu0 }
 0x41c   : > { %v2498_v36 = vpop.f32.mrb[80].mxu1 }
 0x41d   : > { %v18219_v33 = vadd.f32 %v2498_v36, %v2392_v62  ;;  %v15330_v49 = vpop.f32.mrb[81].mxu1 }
 0x41e   : > { %v2501_v52 = vpop.f32.mrb[82].mxu1 }
 0x41f   : > { %v18227_v47 = vadd.f32 %v2501_v52, %v2395_v20  ;;  %v15331_v6 = vpop.f32.mrb[83].mxu1  ;;  %v15798_v52 = vld [vmem:[%s20968_s7 + $0xe0] ss:$16 sps:$4 sm:$0xff]  }
 0x420   : > { %v18235_v14 = vpop.f32.mrb[96].mxu0 }
 0x421   : > { %v15446_v18 = vpop.f32.mrb[97].mxu0 }
 0x422   : > { %v18237_v1 = vpop.f32.mrb[98].mxu0 }
 0x423   : > { %v15447_v17 = vpop.f32.mrb[99].mxu0 }
 0x424   : > { %v2506_v41 = vpop.f32.mrb[84].mxu1 }
 0x425   : > { %v18239_v23 = vadd.f32 %v2506_v41, %v2400_v54  ;;  %v15334_v62 = vpop.f32.mrb[85].mxu1 }
 0x426   : > { %v2509_v26 = vpop.f32.mrb[86].mxu1 }
 0x427   : > { %v18241_v20 = vadd.f32 %v2509_v26, %v2403_v27  ;;  %v15335_v16 = vpop.f32.mrb[87].mxu1 }
 0x428   : > { %v18249_v48 = vpop.f32.mrb[100].mxu0 }
 0x429   : > { %v15450_v35 = vpop.f32.mrb[101].mxu0 }
 0x42a   : > { %v18251_v37 = vpop.f32.mrb[102].mxu0 }
 0x42b   : > { %v15451_v54 = vpop.f32.mrb[103].mxu0 }
 0x42c   : > { %v2514_v42 = vpop.f32.mrb[88].mxu1 }
 0x42d   : > { %v18254_v27 = vadd.f32 %v2514_v42, %v18193_v24  ;;  %v15338_v38 = vpop.f32.mrb[89].mxu1  ;;  %v15795_v24 = vld [vmem:[%s20968_s7 + $0xc8] ss:$16 sps:$4 sm:$0xff]   ;;  %v16974_v42 = vmov 0  }
 0x42e   : > { %v2517_v4 = vpop.f32.mrb[90].mxu1  ;;  %3729 = vmatpush1.bf16.msra.mxu1 %v15795_v24  ;;  %3715 = vmatprep.mubr.bf16.mxu0 %v16974_v42 }
 0x42f   : > { %v18263_v31 = vadd.f32 %v2517_v4, %v18195_v9  ;;  %v15339_v58 = vpop.f32.mrb[91].mxu1  ;;  %3730 = vmatprep.subr.bf16.mxu1 %v15803_v30  ;;  %3756 = vmatprep.mubr.bf16.mxu1 %v16974_v42 }
 0x430   : > { %v18271_v60 = vpop.f32.mrb[104].mxu0 }
 0x431   : > { %v15454_v3 = vpop.f32.mrb[105].mxu0 }
 0x432   : > { %v3093_v55 = vpop.f32.mrb[106].mxu0  ;;  %3731 = vmatpush1.bf16.msra.mxu1 %v15801_v8 }
 0x433   : > { %v15455_v7 = vpop.f32.mrb[107].mxu0 }
 0x434   : > { %v2522_v9 = vpop.f32.mrb[92].mxu1 }
 0x435   : > { %v18274_v45 = vadd.f32 %v2522_v9, %v18199_v12  ;;  %v15342_v0 = vpop.f32.mrb[93].mxu1  ;;  %v15800_v12 = vld [vmem:[%s20968_s7 + $0xe4] ss:$16 sps:$4 sm:$0xff]  }
 0x436   : > { %v2525_v13 = vpop.f32.mrb[94].mxu1  ;;  %3689 = vmatprep.subr.bf16.mxu0 %v15800_v12 }
 0x437   : > { %v15343_v44 = vpop.f32.mrb[95].mxu1  ;;  %3690 = vmatpush1.bf16.msra.mxu0 %v15798_v52 }
 0x438   : > { %v18276_v34 = vpop.f32.mrb[108].mxu0 }
 0x439   : > { %v15494_v61 = vpop.f32.mrb[109].mxu0 }
 0x43a   : > { %v18278_v32 = vpop.f32.mrb[110].mxu0 }
 0x43b   : > { %v15495_v36 = vpop.f32.mrb[111].mxu0 }
 0x43c   : > { %v2625_v49 = vpop.f32.mrb[96].mxu1 }
 0x43d   : > { %v2663_v40 = vadd.f32 %v2625_v49, %v18205_v39  ;;  %v15354_v46 = vpop.f32.mrb[97].mxu1 }
 0x43e   : > { %v2628_v6 = vpop.f32.mrb[98].mxu1 }
 0x43f   : > { %v2664_v39 = vadd.f32 %v2628_v6, %v18207_v59  ;;  %v15355_v18 = vpop.f32.mrb[99].mxu1  ;;  %v2801_v17 = vadd.f32 %v18162_v63, %v2663_v40  ;;  %v15806_v63 = vld [vmem:[%s20968_s7 + $0x4] ss:$16 sps:$4 sm:$0xff]  }
 0x440   : > { %v18295_v41 = vpop.f32.mrb[112].mxu0  ;;  %3847 = vmatprep.subr.bf16.mxu0 %v15806_v63 }
 0x441   : > { %v15498_v62 = vpop.f32.mrb[113].mxu0  ;;  %v2802_v26 = vadd.f32 %v18166_v10, %v2664_v39  ;;  %v15809_v10 = vld [vmem:[%s20968_s7 + $0xc] ss:$16 sps:$4 sm:$0xff]  }
 0x442   : > { %v18298_v16 = vpop.f32.mrb[114].mxu0  ;;  %3888 = vmatprep.subr.bf16.mxu1 %v15809_v10 }
 0x443   : > { %v15499_v5 = vpop.f32.mrb[115].mxu0 }
 0x444   : > { %v2633_v28 = vpop.f32.mrb[100].mxu1 }
 0x445   : > { %v2665_v35 = vadd.f32 %v2633_v28, %v18219_v33  ;;  %v15358_v54 = vpop.f32.mrb[101].mxu1 }
 0x446   : > { %v2636_v59 = vpop.f32.mrb[102].mxu1 }
 0x447   : > { %v2666_v38 = vadd.f32 %v2636_v59, %v18227_v47  ;;  %v15359_v2 = vpop.f32.mrb[103].mxu1  ;;  %v2803_v33 = vadd.f32 %v18170_v21, %v2665_v35 }
 0x448   : > { %v18311_v51 = vpop.f32.mrb[116].mxu0 }
 0x449   : > { %v15502_v4 = vpop.f32.mrb[117].mxu0  ;;  %v2804_v58 = vadd.f32 %v18174_v56, %v2666_v38 }
 0x44a   : > { %v18314_v24 = vpop.f32.mrb[118].mxu0 }
 0x44b   : > { %v15503_v43 = vpop.f32.mrb[119].mxu0 }
 0x44c   : > { %v2641_v3 = vpop.f32.mrb[104].mxu1 }
 0x44d   : > { %v2667_v55 = vadd.f32 %v2641_v3, %v18239_v23  ;;  %v15362_v7 = vpop.f32.mrb[105].mxu1 }
 0x44e   : > { %v2644_v9 = vpop.f32.mrb[106].mxu1 }
 0x44f   : > { %v2668_v47 = vadd.f32 %v2644_v9, %v18241_v20  ;;  %v15363_v0 = vpop.f32.mrb[107].mxu1  ;;  %v2805_v21 = vadd.f32 %v18178_v25, %v2667_v55 }
 0x450   : > { %v18319_v13 = vpop.f32.mrb[120].mxu0 }
 0x451   : > { %v15506_v44 = vpop.f32.mrb[121].mxu0  ;;  %v2806_v61 = vadd.f32 %v18182_v19, %v2668_v47 }
 0x452   : > { %v18322_v36 = vpop.f32.mrb[122].mxu0 }
 0x453   : > { %v15507_v56 = vpop.f32.mrb[123].mxu0 }
 0x454   : > { %v2649_v49 = vpop.f32.mrb[108].mxu1 }
 0x455   : > { %v2669_v40 = vadd.f32 %v2649_v49, %v18254_v27  ;;  %v15366_v46 = vpop.f32.mrb[109].mxu1 }
 0x456   : > { %v2652_v23 = vpop.f32.mrb[110].mxu1 }
 0x457   : > { %v2670_v52 = vadd.f32 %v2652_v23, %v18263_v31  ;;  %v15367_v12 = vpop.f32.mrb[111].mxu1  ;;  %v2807_v20 = vadd.f32 %v18186_v15, %v2669_v40 }
 0x458   : > { %v18327_v6 = vpop.f32.mrb[124].mxu0 }
 0x459   : > { %v15510_v25 = vpop.f32.mrb[125].mxu0  ;;  %v2808_v8 = vadd.f32 %v18191_v53, %v2670_v52 }
 0x45a   : > { %v3383_v30 = vpop.f32.mrb[126].mxu0 }
 0x45b   : > { %v15511_v19 = vpop.f32.mrb[127].mxu0 }
 0x45c   : > { %v2657_v39 = vpop.f32.mrb[112].mxu1 }
 0x45d   : > { %v2671_v18 = vadd.f32 %v2657_v39, %v18274_v45  ;;  %v15370_v62 = vpop.f32.mrb[113].mxu1 }
 0x45e   : > { %v2660_v5 = vpop.f32.mrb[114].mxu1 }
 0x45f   : > { %v15371_v27 = vpop.f32.mrb[115].mxu1  ;;  %v2809_v28 = vadd.f32 %v18197_v29, %v2671_v18 }
 0x464   : > { %v2916_v35 = vpop.f32.mrb[116].mxu1 }
 0x465   : > { %v2954_v31 = vadd.f32 %v2916_v35, %v2801_v17  ;;  %v15410_v54 = vpop.f32.mrb[117].mxu1 }
 0x466   : > { %v2919_v63 = vpop.f32.mrb[118].mxu1 }
 0x467   : > { %v2955_v15 = vadd.f32 %v2919_v63, %v2802_v26  ;;  %v15411_v59 = vpop.f32.mrb[119].mxu1  ;;  %v3096_v10 = vadd.f32 %v18201_v57, %v2954_v31 }
 0x469   : > { %v3097_v53 = vadd.f32 %v18203_v22, %v2955_v15 }
 0x46c   : > { %v2924_v38 = vpop.f32.mrb[120].mxu1 }
 0x46d   : > { %v2956_v2 = vadd.f32 %v2924_v38, %v2803_v33  ;;  %v15414_v4 = vpop.f32.mrb[121].mxu1 }
 0x46e   : > { %v2927_v43 = vpop.f32.mrb[122].mxu1 }
 0x46f   : > { %v2957_v45 = vadd.f32 %v2927_v43, %v2804_v58  ;;  %v15415_v3 = vpop.f32.mrb[123].mxu1  ;;  %v3098_v55 = vadd.f32 %v18215_v11, %v2956_v2 }
 0x471   : > { %v3099_v29 = vadd.f32 %v18217_v50, %v2957_v45 }
 0x474   : > { %v2932_v7 = vpop.f32.mrb[124].mxu1 }
 0x475   : > { %v2958_v17 = vadd.f32 %v2932_v7, %v2805_v21  ;;  %v15418_v9 = vpop.f32.mrb[125].mxu1 }
 0x476   : > { %v2935_v47 = vpop.f32.mrb[126].mxu1 }
 0x477   : > { %v2959_v26 = vadd.f32 %v2935_v47, %v2806_v61  ;;  %v15419_v0 = vpop.f32.mrb[127].mxu1  ;;  %v3100_v57 = vadd.f32 %v18235_v14, %v2958_v17  ;;  %v18361_v17 = vld [vmem:[%s20967_s6] ss:$0 sm:$0xff] }
 0x479   : > { %v3101_v22 = vadd.f32 %v18237_v1, %v2959_v26 }
 0x47c   : > { %v2940_v44 = vpop.f32.mrb[128].mxu1 }
 0x47d   : > { %v2960_v33 = vadd.f32 %v2940_v44, %v2807_v20  ;;  %v15422_v56 = vpop.f32.mrb[129].mxu1 }
 0x47e   : > { %v2943_v49 = vpop.f32.mrb[130].mxu1 }
 0x47f   : > { %v2961_v58 = vadd.f32 %v2943_v49, %v2808_v8  ;;  %v15423_v40 = vpop.f32.mrb[131].mxu1  ;;  %v3102_v11 = vadd.f32 %v18249_v48, %v2960_v33 }
 0x480   : > { %v15804_v40 = vld [vmem:[%s20968_s7] ss:$16 sps:$4 sm:$0xff]  }
 0x481   : > { %v3103_v50 = vadd.f32 %v18251_v37, %v2961_v58 }
 0x484   : > { %v2948_v46 = vpop.f32.mrb[132].mxu1 }
 0x485   : > { %v2962_v21 = vadd.f32 %v2948_v46, %v2809_v28  ;;  %v15426_v23 = vpop.f32.mrb[133].mxu1 }
 0x486   : > { %v2951_v52 = vpop.f32.mrb[134].mxu1 }
 0x487   : > { %v15427_v61 = vpop.f32.mrb[135].mxu1  ;;  %v3104_v12 = vadd.f32 %v18271_v60, %v2962_v21  ;;  %v15812_v52 = vld [vmem:[%s20968_s7 + $0x24] ss:$16 sps:$4 sm:$0xff]  }
 0x488   : > { %v15815_v61 = vld [vmem:[%s20968_s7 + $0x2c] ss:$16 sps:$4 sm:$0xff]  }
 0x48c   : > { %v3197_v14 = vpop.f32.mrb[136].mxu1 }
 0x48d   : > { %v3235_v25 = vadd.f32 %v3197_v14, %v3096_v10  ;;  %v15466_v1 = vpop.f32.mrb[137].mxu1  ;;  %v15810_v14 = vld [vmem:[%s20968_s7 + $0x20] ss:$16 sps:$4 sm:$0xff]  }
 0x48e   : > { %v3200_v30 = vpop.f32.mrb[138].mxu1 }
 0x48f   : > { %v3236_v20 = vadd.f32 %v3200_v30, %v3097_v53  ;;  %v15467_v19 = vpop.f32.mrb[139].mxu1  ;;  %v3386_v8 = vadd.f32 %v18276_v34, %v3235_v25  ;;  %v15813_v25 = vld [vmem:[%s20968_s7 + $0x28] ss:$16 sps:$4 sm:$0xff]  }
 0x490   : > { %v15821_v19 = vld [vmem:[%s20968_s7 + $0x4c] ss:$16 sps:$4 sm:$0xff]  }
 0x491   : > { %v3387_v39 = vadd.f32 %v18278_v32, %v3236_v20  ;;  %v15818_v20 = vld [vmem:[%s20968_s7 + $0x44] ss:$16 sps:$4 sm:$0xff]  }
 0x494   : > { %v3205_v48 = vpop.f32.mrb[140].mxu1 }
 0x495   : > { %v3237_v18 = vadd.f32 %v3205_v48, %v3098_v55  ;;  %v15470_v37 = vpop.f32.mrb[141].mxu1 }
 0x496   : > { %v3208_v62 = vpop.f32.mrb[142].mxu1 }
 0x497   : > { %v3238_v5 = vadd.f32 %v3208_v62, %v3099_v29  ;;  %v15471_v27 = vpop.f32.mrb[143].mxu1  ;;  %v3388_v28 = vadd.f32 %v18295_v41, %v3237_v18  ;;  %v15816_v62 = vld [vmem:[%s20968_s7 + $0x40] ss:$16 sps:$4 sm:$0xff]  }
 0x499   : > { %v3389_v60 = vadd.f32 %v18298_v16, %v3238_v5  ;;  %v15819_v5 = vld [vmem:[%s20968_s7 + $0x48] ss:$16 sps:$4 sm:$0xff]  }
 0x49c   : > { %v3213_v35 = vpop.f32.mrb[144].mxu1 }
 0x49d   : > { %v3239_v31 = vadd.f32 %v3213_v35, %v3100_v57  ;;  %v15474_v54 = vpop.f32.mrb[145].mxu1  ;;  %v15824_v35 = vld [vmem:[%s20968_s7 + $0x64] ss:$16 sps:$4 sm:$0xff]  }
 0x49e   : > { %v3216_v63 = vpop.f32.mrb[146].mxu1 }
 0x49f   : > { %v3240_v15 = vadd.f32 %v3216_v63, %v3101_v22  ;;  %v15475_v59 = vpop.f32.mrb[147].mxu1  ;;  %v3390_v34 = vadd.f32 %v18311_v51, %v3239_v31  ;;  %v15827_v31 = vld [vmem:[%s20968_s7 + $0x6c] ss:$16 sps:$4 sm:$0xff]   ;;  %v15822_v63 = vld [vmem:[%s20968_s7 + $0x60] ss:$16 sps:$4 sm:$0xff]  }
 0x4a1   : > { %v18347_v32 = vadd.f32 %v18314_v24, %v3240_v15  ;;  %v15825_v15 = vld [vmem:[%s20968_s7 + $0x68] ss:$16 sps:$4 sm:$0xff]  }
 0x4a4   : > { %v3221_v10 = vpop.f32.mrb[148].mxu1 }
 0x4a5   : > { %v3241_v53 = vadd.f32 %v3221_v10, %v3102_v11  ;;  %v15478_v38 = vpop.f32.mrb[149].mxu1  ;;  %v15807_v11 = vld [vmem:[%s20968_s7 + $0x8] ss:$16 sps:$4 sm:$0xff]   ;;  %v15833_v10 = vld [vmem:[%s20968_s7 + $0x10c] ss:$16 sps:$4 sm:$0xff]  }
 0x4a6   : > { %v3224_v2 = vpop.f32.mrb[150].mxu1 }
 0x4a7   : > { %v3242_v4 = vadd.f32 %v3224_v2, %v3103_v50  ;;  %v15479_v43 = vpop.f32.mrb[151].mxu1  ;;  %v18350_v41 = vadd.f32 %v18319_v13, %v3241_v53 }
 0x4a9   : > { %v18353_v16 = vadd.f32 %v18322_v36, %v3242_v4 }
 0x4ac   : > { %v3229_v45 = vpop.f32.mrb[152].mxu1 }
 0x4ad   : > { %v3243_v3 = vadd.f32 %v3229_v45, %v3104_v12  ;;  %v15482_v55 = vpop.f32.mrb[153].mxu1  ;;  %v15828_v45 = vld [vmem:[%s20968_s7 + $0x100] ss:$16 sps:$4 sm:$0xff]  }
 0x4ae   : > { %v3232_v29 = vpop.f32.mrb[154].mxu1 }
 0x4af   : > { %v15483_v51 = vpop.f32.mrb[155].mxu1  ;;  %v18356_v24 = vadd.f32 %v18327_v6, %v3243_v3  ;;  %v15831_v3 = vld [vmem:[%s20968_s7 + $0x108] ss:$16 sps:$4 sm:$0xff]  }
 0x4b4   : > { %v3487_v7 = vpop.f32.mrb[156].mxu1 }
 0x4b5   : > { %v3525_v9 = vadd.f32 %v3487_v7, %v3386_v8  ;;  %v15522_v13 = vpop.f32.mrb[157].mxu1  ;;  %v15839_v7 = vld [vmem:[%s20968_s7 + $0x12c] ss:$16 sps:$4 sm:$0xff]  }
 0x4b6   : > { %v3490_v47 = vpop.f32.mrb[158].mxu1  ;;  %v15837_v13 = vld [vmem:[%s20968_s7 + $0x128] ss:$16 sps:$4 sm:$0xff]  }
 0x4b7   : > { %v3541_v36 = vadd.f32 %v18361_v17, %v3525_v9  ;;  %v3526_v26 = vadd.f32 %v3490_v47, %v3387_v39  ;;  %v15523_v0 = vpop.f32.mrb[159].mxu1 }
 0x4b8   : > { %v15845_v0 = vld [vmem:[%s20968_s7 + $0x14c] ss:$16 sps:$4 sm:$0xff]  }
 0x4b9   : > { %v3542_v57 = vadd.f32 %v18361_v17, %v3526_v26  ;;  %v3550_v22 = vmax.f32 %v3541_v36, 0.0  ;;  %v15842_v26 = vld [vmem:[%s20968_s7 + $0x144] ss:$16 sps:$4 sm:$0xff]  }
 0x4bb   : > { %v3551_v44 = vmax.f32 %v3542_v57, 0.0 }
 0x4bc   : > { %v3495_v33 = vpop.f32.mrb[160].mxu1 }
 0x4bd   : > { %v18365_v6 = vpack.c.bf16 %v3551_v44, %v3550_v22  ;;  %v3527_v56 = vadd.f32 %v3495_v33, %v3388_v28  ;;  %v15526_v49 = vpop.f32.mrb[161].mxu1 }
 0x4be   : > { %v3498_v58 = vpop.f32.mrb[162].mxu1  ;;  %v15840_v49 = vld [vmem:[%s20968_s7 + $0x140] ss:$16 sps:$4 sm:$0xff]  }
 0x4bf   : > { %v3543_v50 = vadd.f32 %v18361_v17, %v3527_v56  ;;  %v3528_v46 = vadd.f32 %v3498_v58, %v3389_v60  ;;  %v15527_v21 = vpop.f32.mrb[163].mxu1  ;;  %v18375_v23 = vshrl.u32 %v18365_v6, 16  ;;  %v15843_v58 = vld [vmem:[%s20968_s7 + $0x148] ss:$16 sps:$4 sm:$0xff]  }
 0x4c0   : > { %v15849_v21 = vld [vmem:[%s20968_s7 + $0x168] ss:$16 sps:$4 sm:$0xff]  }
 0x4c1   : > { %v3544_v12 = vadd.f32 %v18361_v17, %v3528_v46  ;;  %13187 = vmatmul.mubr.msk.bf16.vlgmr.msra.gmra.mrb[128].mxu0 %vm1452_vm1, %v18375_v23  ;;  %13188 = vmatmul.mubr.msk.bf16.vlgmr.msra.gmra.mrb[176].mxu1 %vm1452_vm1, %v18375_v23  ;;  %v3552_v1 = vmax.f32 %v3543_v50, 0.0  ;;  %v15846_v46 = vld [vmem:[%s20968_s7 + $0x160] ss:$16 sps:$4 sm:$0xff]  }
 0x4c2   : > { %3848 = vmatpush1.bf16.msra.mxu0 %v15804_v40  ;;  %3889 = vmatpush1.bf16.msra.mxu1 %v15807_v11  ;;  %v15848_v11 = vld [vmem:[%s20968_s7 + $0x164] ss:$16 sps:$4 sm:$0xff]  }
 0x4c3   : > { %v3553_v30 = vmax.f32 %v3544_v12, 0.0  ;;  %3849 = vmatprep.subr.bf16.mxu0 %v15812_v52  ;;  %3890 = vmatprep.subr.bf16.mxu1 %v15815_v61  ;;  %v15854_v52 = vld [vmem:[%s20968_s7 + $0x184] ss:$16 sps:$4 sm:$0xff]   ;;  %v15852_v61 = vld [vmem:[%s20968_s7 + $0x180] ss:$16 sps:$4 sm:$0xff]  }
 0x4c4   : > { %v3503_v8 = vpop.f32.mrb[164].mxu1  ;;  %3879 = vmatprep.mubr.bf16.mxu0 %v16974_v42  ;;  %3920 = vmatprep.mubr.bf16.mxu1 %v16974_v42  ;;  %v15855_v12 = vld [vmem:[%s20968_s7 + $0x188] ss:$16 sps:$4 sm:$0xff]  }
 0x4c5   : > { %v18402_v39 = vpack.c.bf16 %v3553_v30, %v3552_v1  ;;  %v3529_v48 = vadd.f32 %v3503_v8, %v3390_v34  ;;  %v15530_v18 = vpop.f32.mrb[165].mxu1  ;;  %v15863_v1 = vld [vmem:[%s20968_s7 + $0x1ac] ss:$16 sps:$4 sm:$0xff]   ;;  %v15858_v30 = vld [vmem:[%s20968_s7 + $0x1a0] ss:$16 sps:$4 sm:$0xff]  }
 0x4c6   : > { %3850 = vmatpush1.bf16.msra.mxu0 %v15810_v14  ;;  %3891 = vmatpush1.bf16.msra.mxu1 %v15813_v25  ;;  %v3506_v37 = vpop.f32.mrb[166].mxu1  ;;  %v3947_v14 = vrot.slane %v18365_v6, 1  ;;  %v15860_v25 = vld [vmem:[%s20968_s7 + $0x1a4] ss:$16 sps:$4 sm:$0xff]   ;;  %v15869_v8 = vld [vmem:[%s20968_s7 + $0x1cc] ss:$16 sps:$4 sm:$0xff]  }
 0x4c7   : > { %v3545_v27 = vadd.f32 %v18361_v17, %v3529_v48  ;;  %v3530_v28 = vadd.f32 %v3506_v37, %v18347_v32  ;;  %v15531_v60 = vpop.f32.mrb[167].mxu1  ;;  %3851 = vmatprep.subr.bf16.mxu0 %v15818_v20  ;;  %3892 = vmatprep.subr.bf16.mxu1 %v15821_v19  ;;  %v15830_v32 = vld [vmem:[%s20968_s7 + $0x104] ss:$16 sps:$4 sm:$0xff]   ;;  %v15861_v20 = vld [vmem:[%s20968_s7 + $0x1a8] ss:$16 sps:$4 sm:$0xff]  }
 0x4c8   : > { %v15866_v19 = vld [vmem:[%s20968_s7 + $0x1c4] ss:$16 sps:$4 sm:$0xff]   ;;  %v15864_v48 = vld [vmem:[%s20968_s7 + $0x1c0] ss:$16 sps:$4 sm:$0xff]   ;;  %v15867_v18 = vld [vmem:[%s20968_s7 + $0x1c8] ss:$16 sps:$4 sm:$0xff]  }
 0x4c9   : > { %v3546_v54 = vadd.f32 %v18361_v17, %v3530_v28  ;;  %v3554_v59 = vmax.f32 %v3545_v27, 0.0  ;;  %v15872_v37 = vld [vmem:[%s20968_s7 + $0x1e4] ss:$16 sps:$4 sm:$0xff]   ;;  %v15873_v27 = vld [vmem:[%s20968_s7 + $0x1e8] ss:$16 sps:$4 sm:$0xff]  }
 0x4ca   : > { %3852 = vmatpush1.bf16.msra.mxu0 %v15816_v62  ;;  %3893 = vmatpush1.bf16.msra.mxu1 %v15819_v5  ;;  %v15875_v62 = vld [vmem:[%s20968_s7 + $0x1ec] ss:$16 sps:$4 sm:$0xff]   ;;  %v15870_v5 = vld [vmem:[%s20968_s7 + $0x1e0] ss:$16 sps:$4 sm:$0xff]   ;;  %v15878_v28 = vld [vmem:[%s20968_s7 + $0x204] ss:$16 sps:$4 sm:$0xff]  }
 0x4cb   : > { %v3555_v34 = vmax.f32 %v3546_v54, 0.0  ;;  %3853 = vmatprep.subr.bf16.mxu0 %v15824_v35  ;;  %3894 = vmatprep.subr.bf16.mxu1 %v15827_v31  ;;  %v15881_v60 = vld [vmem:[%s20968_s7 + $0x20c] ss:$16 sps:$4 sm:$0xff]   ;;  %v15876_v35 = vld [vmem:[%s20968_s7 + $0x200] ss:$16 sps:$4 sm:$0xff]   ;;  %v4134_v54 = vrot.slane %v18375_v23, 1 }
 0x4cc   : > { %v3511_v53 = vpop.f32.mrb[168].mxu1  ;;  %v15879_v31 = vld [vmem:[%s20968_s7 + $0x208] ss:$16 sps:$4 sm:$0xff]  }
 0x4cd   : > { %v18431_v38 = vpack.c.bf16 %v3555_v34, %v3554_v59  ;;  %v3531_v2 = vadd.f32 %v3511_v53, %v18350_v41  ;;  %v15534_v4 = vpop.f32.mrb[169].mxu1  ;;  %v15836_v41 = vld [vmem:[%s20968_s7 + $0x124] ss:$16 sps:$4 sm:$0xff]   ;;  %v15882_v59 = vld [vmem:[%s20968_s7 + $0x220] ss:$16 sps:$4 sm:$0xff]  }
 0x4ce   : > { %3854 = vmatpush1.bf16.msra.mxu0 %v15822_v63  ;;  %3895 = vmatpush1.bf16.msra.mxu1 %v15825_v15  ;;  %v3514_v43 = vpop.f32.mrb[170].mxu1  ;;  %v15884_v63 = vld [vmem:[%s20968_s7 + $0x224] ss:$16 sps:$4 sm:$0xff]   ;;  %v15887_v15 = vld [vmem:[%s20968_s7 + $0x22c] ss:$16 sps:$4 sm:$0xff]  }
 0x4cf   : > { %v3547_v55 = vadd.f32 %v18361_v17, %v3531_v2  ;;  %v3532_v29 = vadd.f32 %v3514_v43, %v18353_v16  ;;  %v15535_v51 = vpop.f32.mrb[171].mxu1  ;;  %4031 = vmatprep.subr.bf16.mxu0 %v15830_v32  ;;  %4072 = vmatprep.subr.bf16.mxu1 %v15833_v10  ;;  %v15834_v16 = vld [vmem:[%s20968_s7 + $0x120] ss:$16 sps:$4 sm:$0xff]   ;;  %v15885_v34 = vld [vmem:[%s20968_s7 + $0x228] ss:$16 sps:$4 sm:$0xff]  }
 0x4d0   : > { %v15890_v32 = vld [vmem:[%s20968_s7 + $0x244] ss:$16 sps:$4 sm:$0xff]   ;;  %v15893_v10 = vld [vmem:[%s20968_s7 + $0x24c] ss:$16 sps:$4 sm:$0xff]   ;;  %v15888_v53 = vld [vmem:[%s20968_s7 + $0x240] ss:$16 sps:$4 sm:$0xff]  }
 0x4d1   : > { %v3548_v9 = vadd.f32 %v18361_v17, %v3532_v29  ;;  %13205 = vmatmul.mubr.msk.bf16.vlgmr.msra.gmra.mrb[132].mxu0 %vm1452_vm1, %v18365_v6  ;;  %13206 = vmatmul.mubr.msk.bf16.vlgmr.msra.gmra.mrb[180].mxu1 %vm1452_vm1, %v18365_v6  ;;  %v3556_v47 = vmax.f32 %v3547_v55, 0.0  ;;  %v15891_v2 = vld [vmem:[%s20968_s7 + $0x248] ss:$16 sps:$4 sm:$0xff]   ;;  %v15896_v4 = vld [vmem:[%s20968_s7 + $0x264] ss:$16 sps:$4 sm:$0xff]  }
 0x4d2   : > { %4032 = vmatpush1.bf16.msra.mxu0 %v15828_v45  ;;  %4073 = vmatpush1.bf16.msra.mxu1 %v15831_v3  ;;  %v15899_v43 = vld [vmem:[%s20968_s7 + $0x26c] ss:$16 sps:$4 sm:$0xff]   ;;  %v15894_v45 = vld [vmem:[%s20968_s7 + $0x260] ss:$16 sps:$4 sm:$0xff]   ;;  %v15897_v3 = vld [vmem:[%s20968_s7 + $0x268] ss:$16 sps:$4 sm:$0xff]  }
 0x4d3   : > { %v3557_v36 = vmax.f32 %v3548_v9, 0.0  ;;  %4033 = vmatprep.subr.bf16.mxu0 %v15836_v41  ;;  %4074 = vmatprep.subr.bf16.mxu1 %v15839_v7  ;;  %v15902_v55 = vld [vmem:[%s20968_s7 + $0x284] ss:$16 sps:$4 sm:$0xff]   ;;  %v15905_v29 = vld [vmem:[%s20968_s7 + $0x28c] ss:$16 sps:$4 sm:$0xff]   ;;  %v4321_v7 = vrot.slane %v18365_v6, 2 }
 0x4d4   : > { %v3519_v57 = vpop.f32.mrb[172].mxu1  ;;  %4063 = vmatprep.mubr.bf16.mxu0 %v16974_v42  ;;  %4104 = vmatprep.mubr.bf16.mxu1 %v16974_v42  ;;  %v15900_v51 = vld [vmem:[%s20968_s7 + $0x280] ss:$16 sps:$4 sm:$0xff]   ;;  %v15903_v41 = vld [vmem:[%s20968_s7 + $0x288] ss:$16 sps:$4 sm:$0xff]  }
 0x4d5   : > { %v18467_v22 = vpack.c.bf16 %v3557_v36, %v3556_v47  ;;  %v3533_v44 = vadd.f32 %v3519_v57, %v18356_v24  ;;  %v15538_v33 = vpop.f32.mrb[173].mxu1  ;;  %v15851_v24 = vld [vmem:[%s20968_s7 + $0x16c] ss:$16 sps:$4 sm:$0xff]   ;;  %v15908_v9 = vld [vmem:[%s20968_s7 + $0x2a4] ss:$16 sps:$4 sm:$0xff]  }
 0x4d6   : > { %4034 = vmatpush1.bf16.msra.mxu0 %v15834_v16  ;;  %4075 = vmatpush1.bf16.msra.mxu1 %v15837_v13  ;;  %v3522_v56 = vpop.f32.mrb[174].mxu1  ;;  %v15911_v16 = vld [vmem:[%s20968_s7 + $0x2ac] ss:$16 sps:$4 sm:$0xff]   ;;  %v15906_v13 = vld [vmem:[%s20968_s7 + $0x2a0] ss:$16 sps:$4 sm:$0xff]  }
 0x4d7   : > { %v15539_v40 = vpop.f32.mrb[175].mxu1  ;;  %4035 = vmatprep.subr.bf16.mxu0 %v15842_v26  ;;  %4076 = vmatprep.subr.bf16.mxu1 %v15845_v0  ;;  %v18483_v50 = vadd.f32 %v18361_v17, %v3533_v44  ;;  %v15857_v17 = vld [vmem:[%s20968_s7 + $0x18c] ss:$16 sps:$4 sm:$0xff]   ;;  %v15909_v47 = vld [vmem:[%s20968_s7 + $0x2a8] ss:$16 sps:$4 sm:$0xff]  }
 0x4d8   : > { %v15914_v36 = vld [vmem:[%s20968_s7 + $0x2c4] ss:$16 sps:$4 sm:$0xff]   ;;  %v15917_v26 = vld [vmem:[%s20968_s7 + $0x2cc] ss:$16 sps:$4 sm:$0xff]   ;;  %v15912_v0 = vld [vmem:[%s20968_s7 + $0x2c0] ss:$16 sps:$4 sm:$0xff]  }
 0x4d9   : > { %v15915_v57 = vld [vmem:[%s20968_s7 + $0x2c8] ss:$16 sps:$4 sm:$0xff]   ;;  %v15920_v44 = vld [vmem:[%s20968_s7 + $0x2e4] ss:$16 sps:$4 sm:$0xff]   ;;  %v15923_v33 = vld [vmem:[%s20968_s7 + $0x2ec] ss:$16 sps:$4 sm:$0xff]  }
 0x4da   : > { %4036 = vmatpush1.bf16.msra.mxu0 %v15840_v49  ;;  %4077 = vmatpush1.bf16.msra.mxu1 %v15843_v58  ;;  %v15918_v56 = vld [vmem:[%s20968_s7 + $0x2e0] ss:$16 sps:$4 sm:$0xff]   ;;  %v15921_v49 = vld [vmem:[%s20968_s7 + $0x2e8] ss:$16 sps:$4 sm:$0xff]   ;;  %v15926_v58 = vld [vmem:[%s20968_s7 + $0x304] ss:$16 sps:$4 sm:$0xff]  }
 0x4db   : > { %4037 = vmatprep.subr.bf16.mxu0 %v15848_v11  ;;  %4078 = vmatprep.subr.bf16.mxu1 %v15851_v24  ;;  %v15929_v40 = vld [vmem:[%s20968_s7 + $0x30c] ss:$16 sps:$4 sm:$0xff]   ;;  %v15924_v11 = vld [vmem:[%s20968_s7 + $0x300] ss:$16 sps:$4 sm:$0xff]   ;;  %v15927_v24 = vld [vmem:[%s20968_s7 + $0x308] ss:$16 sps:$4 sm:$0xff]  }
 0x4de   : > { %4038 = vmatpush1.bf16.msra.mxu0 %v15846_v46  ;;  %4079 = vmatpush1.bf16.msra.mxu1 %v15849_v21  ;;  %v4508_v46 = vrot.slane %v18375_v23, 2  ;;  %v15932_v21 = vld [vmem:[%s20968_s7 + $0x324] ss:$16 sps:$4 sm:$0xff]  }
 0x4df   : > { %4218 = vmatprep.subr.bf16.mxu0 %v15854_v52  ;;  %4259 = vmatprep.subr.bf16.mxu1 %v15857_v17  ;;  %v15935_v52 = vld [vmem:[%s20968_s7 + $0x32c] ss:$16 sps:$4 sm:$0xff]   ;;  %v15930_v17 = vld [vmem:[%s20968_s7 + $0x320] ss:$16 sps:$4 sm:$0xff]  }
 0x4e1   : > { %13239 = vmatmul.mubr.msk.bf16.vlgmr.msra.gmra.mrb[136].mxu0 %vm1452_vm1, %v3947_v14  ;;  %13240 = vmatmul.mubr.msk.bf16.vlgmr.msra.gmra.mrb[184].mxu1 %vm1452_vm1, %v3947_v14  ;;  %v15941_v14 = vld [vmem:[%s20968_s7 + $0x34c] ss:$16 sps:$4 sm:$0xff]  }
 0x4e2   : > { %4219 = vmatpush1.bf16.msra.mxu0 %v15852_v61  ;;  %4260 = vmatpush1.bf16.msra.mxu1 %v15855_v12  ;;  %v15933_v61 = vld [vmem:[%s20968_s7 + $0x328] ss:$16 sps:$4 sm:$0xff]   ;;  %v15938_v12 = vld [vmem:[%s20968_s7 + $0x344] ss:$16 sps:$4 sm:$0xff]  }
 0x4e3   : > { %4220 = vmatprep.subr.bf16.mxu0 %v15860_v25  ;;  %4261 = vmatprep.subr.bf16.mxu1 %v15863_v1  ;;  %v15936_v25 = vld [vmem:[%s20968_s7 + $0x340] ss:$16 sps:$4 sm:$0xff]   ;;  %v15939_v1 = vld [vmem:[%s20968_s7 + $0x348] ss:$16 sps:$4 sm:$0xff]  }
 0x4e4   : > { %4250 = vmatprep.mubr.bf16.mxu0 %v16974_v42  ;;  %4291 = vmatprep.mubr.bf16.mxu1 %v16974_v42 }
 0x4e6   : > { %4221 = vmatpush1.bf16.msra.mxu0 %v15858_v30  ;;  %4262 = vmatpush1.bf16.msra.mxu1 %v15861_v20  ;;  %v15944_v30 = vld [vmem:[%s20968_s7 + $0x364] ss:$16 sps:$4 sm:$0xff]   ;;  %v15947_v20 = vld [vmem:[%s20968_s7 + $0x36c] ss:$16 sps:$4 sm:$0xff]  }
 0x4e7   : > { %4222 = vmatprep.subr.bf16.mxu0 %v15866_v19  ;;  %4263 = vmatprep.subr.bf16.mxu1 %v15869_v8  ;;  %v15942_v19 = vld [vmem:[%s20968_s7 + $0x360] ss:$16 sps:$4 sm:$0xff]   ;;  %v15945_v8 = vld [vmem:[%s20968_s7 + $0x368] ss:$16 sps:$4 sm:$0xff]  }
 0x4ea   : > { %4223 = vmatpush1.bf16.msra.mxu0 %v15864_v48  ;;  %4264 = vmatpush1.bf16.msra.mxu1 %v15867_v18  ;;  %v15950_v48 = vld [vmem:[%s20968_s7 + $0x384] ss:$16 sps:$4 sm:$0xff]   ;;  %v15953_v18 = vld [vmem:[%s20968_s7 + $0x38c] ss:$16 sps:$4 sm:$0xff]  }
 0x4eb   : > { %4224 = vmatprep.subr.bf16.mxu0 %v15872_v37  ;;  %4265 = vmatprep.subr.bf16.mxu1 %v15875_v62  ;;  %v15948_v37 = vld [vmem:[%s20968_s7 + $0x380] ss:$16 sps:$4 sm:$0xff]   ;;  %v15951_v62 = vld [vmem:[%s20968_s7 + $0x388] ss:$16 sps:$4 sm:$0xff]  }
 0x4ee   : > { %4225 = vmatpush1.bf16.msra.mxu0 %v15870_v5  ;;  %4266 = vmatpush1.bf16.msra.mxu1 %v15873_v27  ;;  %v4695_v5 = vrot.slane %v18365_v6, 3  ;;  %v15956_v27 = vld [vmem:[%s20968_s7 + $0x3a4] ss:$16 sps:$4 sm:$0xff]  }
 0x4ef   : > { %4405 = vmatprep.subr.bf16.mxu0 %v15878_v28  ;;  %4446 = vmatprep.subr.bf16.mxu1 %v15881_v60  ;;  %v15959_v28 = vld [vmem:[%s20968_s7 + $0x3ac] ss:$16 sps:$4 sm:$0xff]   ;;  %v15954_v60 = vld [vmem:[%s20968_s7 + $0x3a0] ss:$16 sps:$4 sm:$0xff]  }
 0x4f1   : > { %13273 = vmatmul.mubr.msk.bf16.vlgmr.msra.gmra.mrb[140].mxu0 %vm1452_vm1, %v4134_v54  ;;  %13274 = vmatmul.mubr.msk.bf16.vlgmr.msra.gmra.mrb[188].mxu1 %vm1452_vm1, %v4134_v54  ;;  %v15965_v54 = vld [vmem:[%s20968_s7 + $0x3cc] ss:$16 sps:$4 sm:$0xff]  }
 0x4f2   : > { %4406 = vmatpush1.bf16.msra.mxu0 %v15876_v35  ;;  %4447 = vmatpush1.bf16.msra.mxu1 %v15879_v31  ;;  %v15957_v35 = vld [vmem:[%s20968_s7 + $0x3a8] ss:$16 sps:$4 sm:$0xff]   ;;  %v15962_v31 = vld [vmem:[%s20968_s7 + $0x3c4] ss:$16 sps:$4 sm:$0xff]  }
 0x4f3   : > { %4407 = vmatprep.subr.bf16.mxu0 %v15884_v63  ;;  %4448 = vmatprep.subr.bf16.mxu1 %v15887_v15  ;;  %v15960_v63 = vld [vmem:[%s20968_s7 + $0x3c0] ss:$16 sps:$4 sm:$0xff]   ;;  %v15963_v15 = vld [vmem:[%s20968_s7 + $0x3c8] ss:$16 sps:$4 sm:$0xff]  }
 0x4f4   : > { %4437 = vmatprep.mubr.bf16.mxu0 %v16974_v42  ;;  %4478 = vmatprep.mubr.bf16.mxu1 %v16974_v42 }
 0x4f6   : > { %4408 = vmatpush1.bf16.msra.mxu0 %v15882_v59  ;;  %4449 = vmatpush1.bf16.msra.mxu1 %v15885_v34  ;;  %v15968_v59 = vld [vmem:[%s20968_s7 + $0x3e4] ss:$16 sps:$4 sm:$0xff]   ;;  %v15971_v34 = vld [vmem:[%s20968_s7 + $0x3ec] ss:$16 sps:$4 sm:$0xff]  }
 0x4f7   : > { %4409 = vmatprep.subr.bf16.mxu0 %v15890_v32  ;;  %4450 = vmatprep.subr.bf16.mxu1 %v15893_v10  ;;  %v15966_v32 = vld [vmem:[%s20968_s7 + $0x3e0] ss:$16 sps:$4 sm:$0xff]   ;;  %v15969_v10 = vld [vmem:[%s20968_s7 + $0x3e8] ss:$16 sps:$4 sm:$0xff]  }
 0x4fa   : > { %4410 = vmatpush1.bf16.msra.mxu0 %v15888_v53  ;;  %4451 = vmatpush1.bf16.msra.mxu1 %v15891_v2  ;;  %v15974_v53 = vld [vmem:[%s20968_s7 + $0x404] ss:$16 sps:$4 sm:$0xff]   ;;  %v15977_v2 = vld [vmem:[%s20968_s7 + $0x40c] ss:$16 sps:$4 sm:$0xff]  }
 0x4fb   : > { %4411 = vmatprep.subr.bf16.mxu0 %v15896_v4  ;;  %4452 = vmatprep.subr.bf16.mxu1 %v15899_v43  ;;  %v15972_v4 = vld [vmem:[%s20968_s7 + $0x400] ss:$16 sps:$4 sm:$0xff]   ;;  %v15975_v43 = vld [vmem:[%s20968_s7 + $0x408] ss:$16 sps:$4 sm:$0xff]  }
 0x4fe   : > { %4412 = vmatpush1.bf16.msra.mxu0 %v15894_v45  ;;  %4453 = vmatpush1.bf16.msra.mxu1 %v15897_v3  ;;  %v4882_v45 = vrot.slane %v18365_v6, 5  ;;  %v15980_v3 = vld [vmem:[%s20968_s7 + $0x424] ss:$16 sps:$4 sm:$0xff]  }
 0x4ff   : > { %4592 = vmatprep.subr.bf16.mxu0 %v15902_v55  ;;  %4633 = vmatprep.subr.bf16.mxu1 %v15905_v29  ;;  %v15983_v55 = vld [vmem:[%s20968_s7 + $0x42c] ss:$16 sps:$4 sm:$0xff]   ;;  %v15978_v29 = vld [vmem:[%s20968_s7 + $0x420] ss:$16 sps:$4 sm:$0xff]  }
 0x501   : > { %13307 = vmatmul.mubr.msk.bf16.vlgmr.msra.gmra.mrb[144].mxu0 %vm1452_vm1, %v4321_v7  ;;  %13308 = vmatmul.mubr.msk.bf16.vlgmr.msra.gmra.mrb[192].mxu1 %vm1452_vm1, %v4321_v7  ;;  %v15989_v7 = vld [vmem:[%s20968_s7 + $0x44c] ss:$16 sps:$4 sm:$0xff]  }
 0x502   : > { %4593 = vmatpush1.bf16.msra.mxu0 %v15900_v51  ;;  %4634 = vmatpush1.bf16.msra.mxu1 %v15903_v41  ;;  %v15981_v51 = vld [vmem:[%s20968_s7 + $0x428] ss:$16 sps:$4 sm:$0xff]   ;;  %v15986_v41 = vld [vmem:[%s20968_s7 + $0x444] ss:$16 sps:$4 sm:$0xff]  }
 0x503   : > { %4594 = vmatprep.subr.bf16.mxu0 %v15908_v9  ;;  %4635 = vmatprep.subr.bf16.mxu1 %v15911_v16  ;;  %v15984_v9 = vld [vmem:[%s20968_s7 + $0x440] ss:$16 sps:$4 sm:$0xff]   ;;  %v15987_v16 = vld [vmem:[%s20968_s7 + $0x448] ss:$16 sps:$4 sm:$0xff]  }
 0x504   : > { %4624 = vmatprep.mubr.bf16.mxu0 %v16974_v42  ;;  %4665 = vmatprep.mubr.bf16.mxu1 %v16974_v42 }
 0x506   : > { %4595 = vmatpush1.bf16.msra.mxu0 %v15906_v13  ;;  %4636 = vmatpush1.bf16.msra.mxu1 %v15909_v47  ;;  %v15992_v13 = vld [vmem:[%s20968_s7 + $0x464] ss:$16 sps:$4 sm:$0xff]   ;;  %v15995_v47 = vld [vmem:[%s20968_s7 + $0x46c] ss:$16 sps:$4 sm:$0xff]  }
 0x507   : > { %4596 = vmatprep.subr.bf16.mxu0 %v15914_v36  ;;  %4637 = vmatprep.subr.bf16.mxu1 %v15917_v26  ;;  %v15990_v36 = vld [vmem:[%s20968_s7 + $0x460] ss:$16 sps:$4 sm:$0xff]   ;;  %v15993_v26 = vld [vmem:[%s20968_s7 + $0x468] ss:$16 sps:$4 sm:$0xff]  }
 0x50a   : > { %4597 = vmatpush1.bf16.msra.mxu0 %v15912_v0  ;;  %4638 = vmatpush1.bf16.msra.mxu1 %v15915_v57  ;;  %v15998_v0 = vld [vmem:[%s20968_s7 + $0x484] ss:$16 sps:$4 sm:$0xff]   ;;  %v16001_v57 = vld [vmem:[%s20968_s7 + $0x48c] ss:$16 sps:$4 sm:$0xff]  }
 0x50b   : > { %4598 = vmatprep.subr.bf16.mxu0 %v15920_v44  ;;  %4639 = vmatprep.subr.bf16.mxu1 %v15923_v33  ;;  %v15996_v44 = vld [vmem:[%s20968_s7 + $0x480] ss:$16 sps:$4 sm:$0xff]   ;;  %v15999_v33 = vld [vmem:[%s20968_s7 + $0x488] ss:$16 sps:$4 sm:$0xff]  }
 0x50e   : > { %4599 = vmatpush1.bf16.msra.mxu0 %v15918_v56  ;;  %4640 = vmatpush1.bf16.msra.mxu1 %v15921_v49  ;;  %v5069_v56 = vrot.slane %v18375_v23, 5  ;;  %v16004_v49 = vld [vmem:[%s20968_s7 + $0x4a4] ss:$16 sps:$4 sm:$0xff]  }
 0x50f   : > { %4779 = vmatprep.subr.bf16.mxu0 %v15926_v58  ;;  %4820 = vmatprep.subr.bf16.mxu1 %v15929_v40  ;;  %v16007_v58 = vld [vmem:[%s20968_s7 + $0x4ac] ss:$16 sps:$4 sm:$0xff]   ;;  %v16002_v40 = vld [vmem:[%s20968_s7 + $0x4a0] ss:$16 sps:$4 sm:$0xff]  }
 0x511   : > { %13341 = vmatmul.mubr.msk.bf16.vlgmr.msra.gmra.mrb[148].mxu0 %vm1452_vm1, %v4508_v46  ;;  %13342 = vmatmul.mubr.msk.bf16.vlgmr.msra.gmra.mrb[196].mxu1 %vm1452_vm1, %v4508_v46  ;;  %v16013_v46 = vld [vmem:[%s20968_s7 + $0x4cc] ss:$16 sps:$4 sm:$0xff]  }
 0x512   : > { %4780 = vmatpush1.bf16.msra.mxu0 %v15924_v11  ;;  %4821 = vmatpush1.bf16.msra.mxu1 %v15927_v24  ;;  %v16005_v11 = vld [vmem:[%s20968_s7 + $0x4a8] ss:$16 sps:$4 sm:$0xff]   ;;  %v16010_v24 = vld [vmem:[%s20968_s7 + $0x4c4] ss:$16 sps:$4 sm:$0xff]  }
 0x513   : > { %4781 = vmatprep.subr.bf16.mxu0 %v15932_v21  ;;  %4822 = vmatprep.subr.bf16.mxu1 %v15935_v52  ;;  %v16008_v21 = vld [vmem:[%s20968_s7 + $0x4c0] ss:$16 sps:$4 sm:$0xff]   ;;  %v16011_v52 = vld [vmem:[%s20968_s7 + $0x4c8] ss:$16 sps:$4 sm:$0xff]  }
 0x514   : > { %4811 = vmatprep.mubr.bf16.mxu0 %v16974_v42  ;;  %4852 = vmatprep.mubr.bf16.mxu1 %v16974_v42 }
 0x516   : > { %4782 = vmatpush1.bf16.msra.mxu0 %v15930_v17  ;;  %4823 = vmatpush1.bf16.msra.mxu1 %v15933_v61  ;;  %v16016_v17 = vld [vmem:[%s20968_s7 + $0x4e4] ss:$16 sps:$4 sm:$0xff]   ;;  %v16019_v61 = vld [vmem:[%s20968_s7 + $0x4ec] ss:$16 sps:$4 sm:$0xff]  }
 0x517   : > { %4783 = vmatprep.subr.bf16.mxu0 %v15938_v12  ;;  %4824 = vmatprep.subr.bf16.mxu1 %v15941_v14  ;;  %v16014_v12 = vld [vmem:[%s20968_s7 + $0x4e0] ss:$16 sps:$4 sm:$0xff]   ;;  %v16017_v14 = vld [vmem:[%s20968_s7 + $0x4e8] ss:$16 sps:$4 sm:$0xff]  }
 0x51a   : > { %4784 = vmatpush1.bf16.msra.mxu0 %v15936_v25  ;;  %4825 = vmatpush1.bf16.msra.mxu1 %v15939_v1  ;;  %v16022_v25 = vld [vmem:[%s20968_s7 + $0x504] ss:$16 sps:$4 sm:$0xff]   ;;  %v16025_v1 = vld [vmem:[%s20968_s7 + $0x50c] ss:$16 sps:$4 sm:$0xff]  }
 0x51b   : > { %4785 = vmatprep.subr.bf16.mxu0 %v15944_v30  ;;  %4826 = vmatprep.subr.bf16.mxu1 %v15947_v20  ;;  %v16020_v30 = vld [vmem:[%s20968_s7 + $0x500] ss:$16 sps:$4 sm:$0xff]   ;;  %v16023_v20 = vld [vmem:[%s20968_s7 + $0x508] ss:$16 sps:$4 sm:$0xff]  }
 0x51e   : > { %4786 = vmatpush1.bf16.msra.mxu0 %v15942_v19  ;;  %4827 = vmatpush1.bf16.msra.mxu1 %v15945_v8  ;;  %v5256_v19 = vrot.slane %v18365_v6, 6  ;;  %v16028_v8 = vld [vmem:[%s20968_s7 + $0x524] ss:$16 sps:$4 sm:$0xff]  }
 0x51f   : > { %4966 = vmatprep.subr.bf16.mxu0 %v15950_v48  ;;  %5007 = vmatprep.subr.bf16.mxu1 %v15953_v18  ;;  %v16031_v48 = vld [vmem:[%s20968_s7 + $0x52c] ss:$16 sps:$4 sm:$0xff]   ;;  %v16026_v18 = vld [vmem:[%s20968_s7 + $0x520] ss:$16 sps:$4 sm:$0xff]  }
 0x521   : > { %13375 = vmatmul.mubr.msk.bf16.vlgmr.msra.gmra.mrb[152].mxu0 %vm1452_vm1, %v4695_v5  ;;  %13376 = vmatmul.mubr.msk.bf16.vlgmr.msra.gmra.mrb[200].mxu1 %vm1452_vm1, %v4695_v5  ;;  %v16037_v5 = vld [vmem:[%s20968_s7 + $0x54c] ss:$16 sps:$4 sm:$0xff]  }
 0x522   : > { %4967 = vmatpush1.bf16.msra.mxu0 %v15948_v37  ;;  %5008 = vmatpush1.bf16.msra.mxu1 %v15951_v62  ;;  %v16029_v37 = vld [vmem:[%s20968_s7 + $0x528] ss:$16 sps:$4 sm:$0xff]   ;;  %v16034_v62 = vld [vmem:[%s20968_s7 + $0x544] ss:$16 sps:$4 sm:$0xff]  }
 0x523   : > { %4968 = vmatprep.subr.bf16.mxu0 %v15956_v27  ;;  %5009 = vmatprep.subr.bf16.mxu1 %v15959_v28  ;;  %v16032_v27 = vld [vmem:[%s20968_s7 + $0x540] ss:$16 sps:$4 sm:$0xff]   ;;  %v16035_v28 = vld [vmem:[%s20968_s7 + $0x548] ss:$16 sps:$4 sm:$0xff]  }
 0x524   : > { %4998 = vmatprep.mubr.bf16.mxu0 %v16974_v42  ;;  %5039 = vmatprep.mubr.bf16.mxu1 %v16974_v42 }
 0x526   : > { %4969 = vmatpush1.bf16.msra.mxu0 %v15954_v60  ;;  %5010 = vmatpush1.bf16.msra.mxu1 %v15957_v35  ;;  %v16040_v60 = vld [vmem:[%s20968_s7 + $0x564] ss:$16 sps:$4 sm:$0xff]   ;;  %v16043_v35 = vld [vmem:[%s20968_s7 + $0x56c] ss:$16 sps:$4 sm:$0xff]  }
 0x527   : > { %4970 = vmatprep.subr.bf16.mxu0 %v15962_v31  ;;  %5011 = vmatprep.subr.bf16.mxu1 %v15965_v54  ;;  %v16038_v31 = vld [vmem:[%s20968_s7 + $0x560] ss:$16 sps:$4 sm:$0xff]   ;;  %v16041_v54 = vld [vmem:[%s20968_s7 + $0x568] ss:$16 sps:$4 sm:$0xff]  }
 0x52a   : > { %4971 = vmatpush1.bf16.msra.mxu0 %v15960_v63  ;;  %5012 = vmatpush1.bf16.msra.mxu1 %v15963_v15  ;;  %v16046_v63 = vld [vmem:[%s20968_s7 + $0x584] ss:$16 sps:$4 sm:$0xff]   ;;  %v16049_v15 = vld [vmem:[%s20968_s7 + $0x58c] ss:$16 sps:$4 sm:$0xff]  }
 0x52b   : > { %4972 = vmatprep.subr.bf16.mxu0 %v15968_v59  ;;  %5013 = vmatprep.subr.bf16.mxu1 %v15971_v34  ;;  %v16044_v59 = vld [vmem:[%s20968_s7 + $0x580] ss:$16 sps:$4 sm:$0xff]   ;;  %v16047_v34 = vld [vmem:[%s20968_s7 + $0x588] ss:$16 sps:$4 sm:$0xff]  }
 0x52e   : > { %4973 = vmatpush1.bf16.msra.mxu0 %v15966_v32  ;;  %5014 = vmatpush1.bf16.msra.mxu1 %v15969_v10  ;;  %v5443_v32 = vrot.slane %v18375_v23, 6  ;;  %v16052_v10 = vld [vmem:[%s20968_s7 + $0x5a4] ss:$16 sps:$4 sm:$0xff]  }
 0x52f   : > { %5153 = vmatprep.subr.bf16.mxu0 %v15974_v53  ;;  %5194 = vmatprep.subr.bf16.mxu1 %v15977_v2  ;;  %v16055_v53 = vld [vmem:[%s20968_s7 + $0x5ac] ss:$16 sps:$4 sm:$0xff]   ;;  %v16050_v2 = vld [vmem:[%s20968_s7 + $0x5a0] ss:$16 sps:$4 sm:$0xff]  }
 0x531   : > { %13409 = vmatmul.mubr.msk.bf16.vlgmr.msra.gmra.mrb[156].mxu0 %vm1452_vm1, %v4882_v45  ;;  %13410 = vmatmul.mubr.msk.bf16.vlgmr.msra.gmra.mrb[204].mxu1 %vm1452_vm1, %v4882_v45  ;;  %v16061_v45 = vld [vmem:[%s20968_s7 + $0x5cc] ss:$16 sps:$4 sm:$0xff]  }
 0x532   : > { %5154 = vmatpush1.bf16.msra.mxu0 %v15972_v4  ;;  %5195 = vmatpush1.bf16.msra.mxu1 %v15975_v43  ;;  %v16053_v4 = vld [vmem:[%s20968_s7 + $0x5a8] ss:$16 sps:$4 sm:$0xff]   ;;  %v16058_v43 = vld [vmem:[%s20968_s7 + $0x5c4] ss:$16 sps:$4 sm:$0xff]  }
 0x533   : > { %5155 = vmatprep.subr.bf16.mxu0 %v15980_v3  ;;  %5196 = vmatprep.subr.bf16.mxu1 %v15983_v55  ;;  %v16056_v3 = vld [vmem:[%s20968_s7 + $0x5c0] ss:$16 sps:$4 sm:$0xff]   ;;  %v16059_v55 = vld [vmem:[%s20968_s7 + $0x5c8] ss:$16 sps:$4 sm:$0xff]  }
 0x534   : > { %5185 = vmatprep.mubr.bf16.mxu0 %v16974_v42  ;;  %5226 = vmatprep.mubr.bf16.mxu1 %v16974_v42 }
 0x536   : > { %5156 = vmatpush1.bf16.msra.mxu0 %v15978_v29  ;;  %5197 = vmatpush1.bf16.msra.mxu1 %v15981_v51  ;;  %v16064_v29 = vld [vmem:[%s20968_s7 + $0x5e4] ss:$16 sps:$4 sm:$0xff]   ;;  %v16067_v51 = vld [vmem:[%s20968_s7 + $0x5ec] ss:$16 sps:$4 sm:$0xff]  }
 0x537   : > { %5157 = vmatprep.subr.bf16.mxu0 %v15986_v41  ;;  %5198 = vmatprep.subr.bf16.mxu1 %v15989_v7  ;;  %v16062_v41 = vld [vmem:[%s20968_s7 + $0x5e0] ss:$16 sps:$4 sm:$0xff]   ;;  %v16065_v7 = vld [vmem:[%s20968_s7 + $0x5e8] ss:$16 sps:$4 sm:$0xff]  }
 0x53a   : > { %5158 = vmatpush1.bf16.msra.mxu0 %v15984_v9  ;;  %5199 = vmatpush1.bf16.msra.mxu1 %v15987_v16  ;;  %v16070_v9 = vld [vmem:[%s20968_s7 + $0x604] ss:$16 sps:$4 sm:$0xff]   ;;  %v16073_v16 = vld [vmem:[%s20968_s7 + $0x60c] ss:$16 sps:$4 sm:$0xff]  }
 0x53b   : > { %5159 = vmatprep.subr.bf16.mxu0 %v15992_v13  ;;  %5200 = vmatprep.subr.bf16.mxu1 %v15995_v47  ;;  %v16068_v13 = vld [vmem:[%s20968_s7 + $0x600] ss:$16 sps:$4 sm:$0xff]   ;;  %v16071_v47 = vld [vmem:[%s20968_s7 + $0x608] ss:$16 sps:$4 sm:$0xff]  }
 0x53e   : > { %5160 = vmatpush1.bf16.msra.mxu0 %v15990_v36  ;;  %5201 = vmatpush1.bf16.msra.mxu1 %v15993_v26  ;;  %v5630_v36 = vrot.slane %v18365_v6, 7  ;;  %v16076_v26 = vld [vmem:[%s20968_s7 + $0x624] ss:$16 sps:$4 sm:$0xff]   ;;  %v16074_v6 = vld [vmem:[%s20968_s7 + $0x620] ss:$16 sps:$4 sm:$0xff]  }
 0x53f   : > { %5340 = vmatprep.subr.bf16.mxu0 %v15998_v0  ;;  %5381 = vmatprep.subr.bf16.mxu1 %v16001_v57  ;;  %v16079_v0 = vld [vmem:[%s20968_s7 + $0x62c] ss:$16 sps:$4 sm:$0xff]   ;;  %v16077_v57 = vld [vmem:[%s20968_s7 + $0x628] ss:$16 sps:$4 sm:$0xff]  }
 0x541   : > { %13443 = vmatmul.mubr.msk.bf16.vlgmr.msra.gmra.mrb[160].mxu0 %vm1452_vm1, %v5069_v56  ;;  %13444 = vmatmul.mubr.msk.bf16.vlgmr.msra.gmra.mrb[208].mxu1 %vm1452_vm1, %v5069_v56  ;;  %v16080_v56 = vld [vmem:[%s20968_s7 + $0x640] ss:$16 sps:$4 sm:$0xff]  }
 0x542   : > { %5341 = vmatpush1.bf16.msra.mxu0 %v15996_v44  ;;  %5382 = vmatpush1.bf16.msra.mxu1 %v15999_v33  ;;  %v16082_v44 = vld [vmem:[%s20968_s7 + $0x644] ss:$16 sps:$4 sm:$0xff]   ;;  %v16085_v33 = vld [vmem:[%s20968_s7 + $0x64c] ss:$16 sps:$4 sm:$0xff]  }
 0x543   : > { %5342 = vmatprep.subr.bf16.mxu0 %v16004_v49  ;;  %5383 = vmatprep.subr.bf16.mxu1 %v16007_v58  ;;  %v16083_v49 = vld [vmem:[%s20968_s7 + $0x648] ss:$16 sps:$4 sm:$0xff]   ;;  %v16088_v58 = vld [vmem:[%s20968_s7 + $0x664] ss:$16 sps:$4 sm:$0xff]  }
 0x544   : > { %5372 = vmatprep.mubr.bf16.mxu0 %v16974_v42  ;;  %5413 = vmatprep.mubr.bf16.mxu1 %v16974_v42 }
 0x546   : > { %5343 = vmatpush1.bf16.msra.mxu0 %v16002_v40  ;;  %5384 = vmatpush1.bf16.msra.mxu1 %v16005_v11  ;;  %v16091_v40 = vld [vmem:[%s20968_s7 + $0x66c] ss:$16 sps:$4 sm:$0xff]   ;;  %v16086_v11 = vld [vmem:[%s20968_s7 + $0x660] ss:$16 sps:$4 sm:$0xff]  }
 0x547   : > { %5344 = vmatprep.subr.bf16.mxu0 %v16010_v24  ;;  %5385 = vmatprep.subr.bf16.mxu1 %v16013_v46  ;;  %v16089_v24 = vld [vmem:[%s20968_s7 + $0x668] ss:$16 sps:$4 sm:$0xff]   ;;  %v16094_v46 = vld [vmem:[%s20968_s7 + $0x684] ss:$16 sps:$4 sm:$0xff]  }
 0x54a   : > { %5345 = vmatpush1.bf16.msra.mxu0 %v16008_v21  ;;  %5386 = vmatpush1.bf16.msra.mxu1 %v16011_v52  ;;  %v16097_v21 = vld [vmem:[%s20968_s7 + $0x68c] ss:$16 sps:$4 sm:$0xff]   ;;  %v16092_v52 = vld [vmem:[%s20968_s7 + $0x680] ss:$16 sps:$4 sm:$0xff]  }
 0x54b   : > { %5346 = vmatprep.subr.bf16.mxu0 %v16016_v17  ;;  %5387 = vmatprep.subr.bf16.mxu1 %v16019_v61  ;;  %v16095_v17 = vld [vmem:[%s20968_s7 + $0x688] ss:$16 sps:$4 sm:$0xff]   ;;  %v5817_v61 = vrot.slane %v18375_v23, 7  ;;  %v16098_v23 = vld [vmem:[%s20968_s7 + $0x6a0] ss:$16 sps:$4 sm:$0xff]  }
 0x54e   : > { %5347 = vmatpush1.bf16.msra.mxu0 %v16014_v12  ;;  %5388 = vmatpush1.bf16.msra.mxu1 %v16017_v14  ;;  %v16100_v12 = vld [vmem:[%s20968_s7 + $0x6a4] ss:$16 sps:$4 sm:$0xff]   ;;  %v16103_v14 = vld [vmem:[%s20968_s7 + $0x6ac] ss:$16 sps:$4 sm:$0xff]  }
 0x54f   : > { %5527 = vmatprep.subr.bf16.mxu0 %v16022_v25  ;;  %5568 = vmatprep.subr.bf16.mxu1 %v16025_v1  ;;  %v16101_v25 = vld [vmem:[%s20968_s7 + $0x6a8] ss:$16 sps:$4 sm:$0xff]   ;;  %v16106_v1 = vld [vmem:[%s20968_s7 + $0x6c4] ss:$16 sps:$4 sm:$0xff]  }
 0x551   : > { %13477 = vmatmul.mubr.msk.bf16.vlgmr.msra.gmra.mrb[164].mxu0 %vm1452_vm1, %v5256_v19  ;;  %13478 = vmatmul.mubr.msk.bf16.vlgmr.msra.gmra.mrb[212].mxu1 %vm1452_vm1, %v5256_v19  ;;  %v16107_v19 = vld [vmem:[%s20968_s7 + $0x6c8] ss:$16 sps:$4 sm:$0xff]  }
 0x552   : > { %5528 = vmatpush1.bf16.msra.mxu0 %v16020_v30  ;;  %5569 = vmatpush1.bf16.msra.mxu1 %v16023_v20  ;;  %v16109_v30 = vld [vmem:[%s20968_s7 + $0x6cc] ss:$16 sps:$4 sm:$0xff]   ;;  %v16104_v20 = vld [vmem:[%s20968_s7 + $0x6c0] ss:$16 sps:$4 sm:$0xff]  }
 0x553   : > { %5529 = vmatprep.subr.bf16.mxu0 %v16028_v8  ;;  %5570 = vmatprep.subr.bf16.mxu1 %v16031_v48  ;;  %v16112_v8 = vld [vmem:[%s20968_s7 + $0x6e4] ss:$16 sps:$4 sm:$0xff]   ;;  %v16115_v48 = vld [vmem:[%s20968_s7 + $0x6ec] ss:$16 sps:$4 sm:$0xff]  }
 0x554   : > { %5559 = vmatprep.mubr.bf16.mxu0 %v16974_v42  ;;  %5600 = vmatprep.mubr.bf16.mxu1 %v16974_v42 }
 0x556   : > { %5530 = vmatpush1.bf16.msra.mxu0 %v16026_v18  ;;  %5571 = vmatpush1.bf16.msra.mxu1 %v16029_v37  ;;  %v16110_v18 = vld [vmem:[%s20968_s7 + $0x6e0] ss:$16 sps:$4 sm:$0xff]   ;;  %v16113_v37 = vld [vmem:[%s20968_s7 + $0x6e8] ss:$16 sps:$4 sm:$0xff]  }
 0x557   : > { %5531 = vmatprep.subr.bf16.mxu0 %v16034_v62  ;;  %5572 = vmatprep.subr.bf16.mxu1 %v16037_v5  ;;  %v16118_v62 = vld [vmem:[%s20968_s7 + $0x704] ss:$16 sps:$4 sm:$0xff]   ;;  %v16121_v5 = vld [vmem:[%s20968_s7 + $0x70c] ss:$16 sps:$4 sm:$0xff]  }
 0x55a   : > { %5532 = vmatpush1.bf16.msra.mxu0 %v16032_v27  ;;  %5573 = vmatpush1.bf16.msra.mxu1 %v16035_v28  ;;  %v16116_v27 = vld [vmem:[%s20968_s7 + $0x700] ss:$16 sps:$4 sm:$0xff]   ;;  %v16119_v28 = vld [vmem:[%s20968_s7 + $0x708] ss:$16 sps:$4 sm:$0xff]  }
 0x55b   : > { %5533 = vmatprep.subr.bf16.mxu0 %v16040_v60  ;;  %5574 = vmatprep.subr.bf16.mxu1 %v16043_v35  ;;  %v16124_v60 = vld [vmem:[%s20968_s7 + $0x724] ss:$16 sps:$4 sm:$0xff]   ;;  %v16127_v35 = vld [vmem:[%s20968_s7 + $0x72c] ss:$16 sps:$4 sm:$0xff]  }
 0x55e   : > { %5534 = vmatpush1.bf16.msra.mxu0 %v16038_v31  ;;  %5575 = vmatpush1.bf16.msra.mxu1 %v16041_v54  ;;  %v16122_v31 = vld [vmem:[%s20968_s7 + $0x720] ss:$16 sps:$4 sm:$0xff]   ;;  %v16125_v54 = vld [vmem:[%s20968_s7 + $0x728] ss:$16 sps:$4 sm:$0xff]  }
 0x55f   : > { %5714 = vmatprep.subr.bf16.mxu0 %v16046_v63  ;;  %5755 = vmatprep.subr.bf16.mxu1 %v16049_v15  ;;  %v16130_v63 = vld [vmem:[%s20968_s7 + $0x744] ss:$16 sps:$4 sm:$0xff]   ;;  %v16133_v15 = vld [vmem:[%s20968_s7 + $0x74c] ss:$16 sps:$4 sm:$0xff]  }
 0x561   : > { %13511 = vmatmul.mubr.msk.bf16.vlgmr.msra.gmra.mrb[168].mxu0 %vm1452_vm1, %v5443_v32  ;;  %13512 = vmatmul.mubr.msk.bf16.vlgmr.msra.gmra.mrb[216].mxu1 %vm1452_vm1, %v5443_v32 }
 0x562   : > { %5715 = vmatpush1.bf16.msra.mxu0 %v16044_v59  ;;  %5756 = vmatpush1.bf16.msra.mxu1 %v16047_v34 }
 0x563   : > { %5716 = vmatprep.subr.bf16.mxu0 %v16052_v10  ;;  %5757 = vmatprep.subr.bf16.mxu1 %v16055_v53 }
 0x564   : > { %5746 = vmatprep.mubr.bf16.mxu0 %v16974_v42  ;;  %5787 = vmatprep.mubr.bf16.mxu1 %v16974_v42 }
 0x566   : > { %5717 = vmatpush1.bf16.msra.mxu0 %v16050_v2  ;;  %5758 = vmatpush1.bf16.msra.mxu1 %v16053_v4  ;;  %v16128_v4 = vld [vmem:[%s20968_s7 + $0x740] ss:$16 sps:$4 sm:$0xff]  }
 0x567   : > { %5718 = vmatprep.subr.bf16.mxu0 %v16058_v43  ;;  %5759 = vmatprep.subr.bf16.mxu1 %v16061_v45  ;;  %v16131_v43 = vld [vmem:[%s20968_s7 + $0x748] ss:$16 sps:$4 sm:$0xff]  }
 0x56a   : > { %5719 = vmatpush1.bf16.msra.mxu0 %v16056_v3  ;;  %5760 = vmatpush1.bf16.msra.mxu1 %v16059_v55  ;;  %v16136_v55 = vld [vmem:[%s20968_s7 + $0x764] ss:$16 sps:$4 sm:$0xff]  }
 0x56b   : > { %5720 = vmatprep.subr.bf16.mxu0 %v16064_v29  ;;  %5761 = vmatprep.subr.bf16.mxu1 %v16067_v51  ;;  %v16139_v29 = vld [vmem:[%s20968_s7 + $0x76c] ss:$16 sps:$4 sm:$0xff]   ;;  %v16134_v51 = vld [vmem:[%s20968_s7 + $0x760] ss:$16 sps:$4 sm:$0xff]  }
 0x56e   : > { %5721 = vmatpush1.bf16.msra.mxu0 %v16062_v41  ;;  %5762 = vmatpush1.bf16.msra.mxu1 %v16065_v7  ;;  %v16137_v41 = vld [vmem:[%s20968_s7 + $0x768] ss:$16 sps:$4 sm:$0xff]   ;;  %v16142_v7 = vld [vmem:[%s20968_s7 + $0x784] ss:$16 sps:$4 sm:$0xff]  }
 0x56f   : > { %5901 = vmatprep.subr.bf16.mxu0 %v16070_v9  ;;  %5942 = vmatprep.subr.bf16.mxu1 %v16073_v16  ;;  %v16145_v9 = vld [vmem:[%s20968_s7 + $0x78c] ss:$16 sps:$4 sm:$0xff]   ;;  %v16140_v16 = vld [vmem:[%s20968_s7 + $0x780] ss:$16 sps:$4 sm:$0xff]  }
 0x571   : > { %13545 = vmatmul.mubr.msk.bf16.vlgmr.msra.gmra.mrb[172].mxu0 %vm1452_vm1, %v5630_v36  ;;  %13546 = vmatmul.mubr.msk.bf16.vlgmr.msra.gmra.mrb[220].mxu1 %vm1452_vm1, %v5630_v36  ;;  %v16148_v36 = vld [vmem:[%s20968_s7 + $0x7a4] ss:$16 sps:$4 sm:$0xff]  }
 0x572   : > { %5902 = vmatpush1.bf16.msra.mxu0 %v16068_v13  ;;  %5943 = vmatpush1.bf16.msra.mxu1 %v16071_v47  ;;  %v16143_v13 = vld [vmem:[%s20968_s7 + $0x788] ss:$16 sps:$4 sm:$0xff]   ;;  %v6191_v47 = vrot.slane %v18402_v39, 2 }
 0x573   : > { %5903 = vmatprep.subr.bf16.mxu0 %v16076_v26  ;;  %5944 = vmatprep.subr.bf16.mxu1 %v16079_v0  ;;  %v16151_v26 = vld [vmem:[%s20968_s7 + $0x7ac] ss:$16 sps:$4 sm:$0xff]   ;;  %v16146_v0 = vld [vmem:[%s20968_s7 + $0x7a0] ss:$16 sps:$4 sm:$0xff]  }
 0x574   : > { %5933 = vmatprep.mubr.bf16.mxu0 %v16974_v42  ;;  %5974 = vmatprep.mubr.bf16.mxu1 %v16974_v42 }
 0x576   : > { %5904 = vmatpush1.bf16.msra.mxu0 %v16074_v6  ;;  %5945 = vmatpush1.bf16.msra.mxu1 %v16077_v57  ;;  %v16149_v6 = vld [vmem:[%s20968_s7 + $0x7a8] ss:$16 sps:$4 sm:$0xff]   ;;  %v16154_v57 = vld [vmem:[%s20968_s7 + $0x7c4] ss:$16 sps:$4 sm:$0xff]  }
 0x577   : > { %5905 = vmatprep.subr.bf16.mxu0 %v16082_v44  ;;  %5946 = vmatprep.subr.bf16.mxu1 %v16085_v33  ;;  %v16157_v44 = vld [vmem:[%s20968_s7 + $0x7cc] ss:$16 sps:$4 sm:$0xff]  }
 0x57a   : > { %5906 = vmatpush1.bf16.msra.mxu0 %v16080_v56  ;;  %5947 = vmatpush1.bf16.msra.mxu1 %v16083_v49 }
 0x57b   : > { %5907 = vmatprep.subr.bf16.mxu0 %v16088_v58  ;;  %5948 = vmatprep.subr.bf16.mxu1 %v16091_v40 }
 0x57e   : > { %5908 = vmatpush1.bf16.msra.mxu0 %v16086_v11  ;;  %5949 = vmatpush1.bf16.msra.mxu1 %v16089_v24 }
 0x57f   : > { %6087 = vmatprep.subr.bf16.mxu0 %v16094_v46  ;;  %6128 = vmatprep.subr.bf16.mxu1 %v16097_v21 }
 0x581   : > { %13579 = vmatmul.mubr.msk.bf16.vlgmr.msra.gmra.mrb[176].mxu0 %vm1452_vm1, %v5817_v61  ;;  %13580 = vmatmul.mubr.msk.bf16.vlgmr.msra.gmra.mrb[224].mxu1 %vm1452_vm1, %v5817_v61  ;;  %v16155_v61 = vld [vmem:[%s20968_s7 + $0x7c8] ss:$16 sps:$4 sm:$0xff]  }
 0x582   : > { %6088 = vmatpush1.bf16.msra.mxu0 %v16092_v52  ;;  %6129 = vmatpush1.bf16.msra.mxu1 %v16095_v17  ;;  %v16152_v17 = vld [vmem:[%s20968_s7 + $0x7c0] ss:$16 sps:$4 sm:$0xff]  }
 0x583   : > { %6089 = vmatprep.subr.bf16.mxu0 %v16100_v12  ;;  %6130 = vmatprep.subr.bf16.mxu1 %v16103_v14 }
 0x584   : > { %6119 = vmatprep.mubr.bf16.mxu0 %v16974_v42  ;;  %6160 = vmatprep.mubr.bf16.mxu1 %v16974_v42 }
 0x586   : > { %6090 = vmatpush1.bf16.msra.mxu0 %v16098_v23  ;;  %6131 = vmatpush1.bf16.msra.mxu1 %v16101_v25  ;;  %v16160_v23 = vld [vmem:[%s20968_s7 + $0x7e4] ss:$16 sps:$4 sm:$0xff]   ;;  %v16163_v25 = vld [vmem:[%s20968_s7 + $0x7ec] ss:$16 sps:$4 sm:$0xff]  }
 0x587   : > { %6091 = vmatprep.subr.bf16.mxu0 %v16106_v1  ;;  %6132 = vmatprep.subr.bf16.mxu1 %v16109_v30  ;;  %v16158_v1 = vld [vmem:[%s20968_s7 + $0x7e0] ss:$16 sps:$4 sm:$0xff]   ;;  %v16161_v30 = vld [vmem:[%s20968_s7 + $0x7e8] ss:$16 sps:$4 sm:$0xff]  }
 0x58a   : > { %6092 = vmatpush1.bf16.msra.mxu0 %v16104_v20  ;;  %6133 = vmatpush1.bf16.msra.mxu1 %v16107_v19  ;;  %v19182_v20 = vshrl.u32 %v18402_v39, 16  ;;  %v16166_v19 = vld [vmem:[%s20968_s7 + $0x804] ss:$16 sps:$4 sm:$0xff]  }
 0x58b   : > { %6093 = vmatprep.subr.bf16.mxu0 %v16112_v8  ;;  %6134 = vmatprep.subr.bf16.mxu1 %v16115_v48  ;;  %v16169_v8 = vld [vmem:[%s20968_s7 + $0x80c] ss:$16 sps:$4 sm:$0xff]   ;;  %v16164_v48 = vld [vmem:[%s20968_s7 + $0x800] ss:$16 sps:$4 sm:$0xff]  }
 0x58e   : > { %6094 = vmatpush1.bf16.msra.mxu0 %v16110_v18  ;;  %6135 = vmatpush1.bf16.msra.mxu1 %v16113_v37  ;;  %v16167_v18 = vld [vmem:[%s20968_s7 + $0x808] ss:$16 sps:$4 sm:$0xff]   ;;  %v6380_v37 = vrot.slane %v19182_v20, 2 }
 0x58f   : > { %6275 = vmatprep.subr.bf16.mxu0 %v16118_v62  ;;  %6316 = vmatprep.subr.bf16.mxu1 %v16121_v5  ;;  %v16172_v62 = vld [vmem:[%s20968_s7 + $0x824] ss:$16 sps:$4 sm:$0xff]   ;;  %v16175_v5 = vld [vmem:[%s20968_s7 + $0x82c] ss:$16 sps:$4 sm:$0xff]  }
 0x591   : > { %13613 = vmatmul.mubr.msk.bf16.vlgmr.msra.gmra.mrb[180].mxu0 %vm1452_vm1, %v18402_v39  ;;  %13614 = vmatmul.mubr.msk.bf16.vlgmr.msra.gmra.mrb[228].mxu1 %vm1452_vm1, %v18402_v39 }
 0x592   : > { %6276 = vmatpush1.bf16.msra.mxu0 %v16116_v27  ;;  %6317 = vmatpush1.bf16.msra.mxu1 %v16119_v28  ;;  %v16170_v27 = vld [vmem:[%s20968_s7 + $0x820] ss:$16 sps:$4 sm:$0xff]   ;;  %v16173_v28 = vld [vmem:[%s20968_s7 + $0x828] ss:$16 sps:$4 sm:$0xff]  }
 0x593   : > { %6277 = vmatprep.subr.bf16.mxu0 %v16124_v60  ;;  %6318 = vmatprep.subr.bf16.mxu1 %v16127_v35  ;;  %v16178_v60 = vld [vmem:[%s20968_s7 + $0x844] ss:$16 sps:$4 sm:$0xff]   ;;  %v16181_v35 = vld [vmem:[%s20968_s7 + $0x84c] ss:$16 sps:$4 sm:$0xff]  }
 0x594   : > { %v3717_v59 = vpop.f32.mrb[128].mxu0  ;;  %v3758_v34 = vpop.f32.mrb[176].mxu1  ;;  %6307 = vmatprep.mubr.bf16.mxu0 %v16974_v42  ;;  %6348 = vmatprep.mubr.bf16.mxu1 %v16974_v42 }
 0x595   : > { %v3719_v32 = vpop.f32.mrb[129].mxu0  ;;  %v3760_v10 = vpop.f32.mrb[177].mxu1 }
 0x596   : > { %6278 = vmatpush1.bf16.msra.mxu0 %v16122_v31  ;;  %6319 = vmatpush1.bf16.msra.mxu1 %v16125_v54  ;;  %v3721_v53 = vpop.f32.mrb[130].mxu0  ;;  %v3762_v2 = vpop.f32.mrb[178].mxu1 }
 0x597   : > { %v3722_v45 = vpop.f32.mrb[131].mxu0  ;;  %v3763_v3 = vpop.f32.mrb[179].mxu1  ;;  %6279 = vmatprep.subr.bf16.mxu0 %v16130_v63  ;;  %6320 = vmatprep.subr.bf16.mxu1 %v16133_v15 }
 0x59a   : > { %6280 = vmatpush1.bf16.msra.mxu0 %v16128_v4  ;;  %6321 = vmatpush1.bf16.msra.mxu1 %v16131_v43  ;;  %v16176_v4 = vld [vmem:[%s20968_s7 + $0x840] ss:$16 sps:$4 sm:$0xff]   ;;  %v16179_v43 = vld [vmem:[%s20968_s7 + $0x848] ss:$16 sps:$4 sm:$0xff]  }
 0x59b   : > { %6281 = vmatprep.subr.bf16.mxu0 %v16136_v55  ;;  %6322 = vmatprep.subr.bf16.mxu1 %v16139_v29  ;;  %v16184_v55 = vld [vmem:[%s20968_s7 + $0x864] ss:$16 sps:$4 sm:$0xff]   ;;  %v16187_v29 = vld [vmem:[%s20968_s7 + $0x86c] ss:$16 sps:$4 sm:$0xff]  }
 0x59e   : > { %6282 = vmatpush1.bf16.msra.mxu0 %v16134_v51  ;;  %6323 = vmatpush1.bf16.msra.mxu1 %v16137_v41  ;;  %v16182_v51 = vld [vmem:[%s20968_s7 + $0x860] ss:$16 sps:$4 sm:$0xff]   ;;  %v16185_v41 = vld [vmem:[%s20968_s7 + $0x868] ss:$16 sps:$4 sm:$0xff]  }
 0x59f   : > { %6464 = vmatprep.subr.bf16.mxu0 %v16142_v7  ;;  %6505 = vmatprep.subr.bf16.mxu1 %v16145_v9  ;;  %v16190_v7 = vld [vmem:[%s20968_s7 + $0x884] ss:$16 sps:$4 sm:$0xff]   ;;  %v16193_v9 = vld [vmem:[%s20968_s7 + $0x88c] ss:$16 sps:$4 sm:$0xff]  }
 0x5a1   : > { %13647 = vmatmul.mubr.msk.bf16.vlgmr.msra.gmra.mrb[184].mxu0 %vm1452_vm1, %v6191_v47  ;;  %13648 = vmatmul.mubr.msk.bf16.vlgmr.msra.gmra.mrb[232].mxu1 %vm1452_vm1, %v6191_v47  ;;  %v6567_v47 = vrot.slane %v18402_v39, 3 }
 0x5a2   : > { %6465 = vmatpush1.bf16.msra.mxu0 %v16140_v16  ;;  %6506 = vmatpush1.bf16.msra.mxu1 %v16143_v13  ;;  %v16188_v16 = vld [vmem:[%s20968_s7 + $0x880] ss:$16 sps:$4 sm:$0xff]   ;;  %v16191_v13 = vld [vmem:[%s20968_s7 + $0x888] ss:$16 sps:$4 sm:$0xff]  }
 0x5a3   : > { %6466 = vmatprep.subr.bf16.mxu0 %v16148_v36  ;;  %6507 = vmatprep.subr.bf16.mxu1 %v16151_v26  ;;  %v16196_v36 = vld [vmem:[%s20968_s7 + $0x8a4] ss:$16 sps:$4 sm:$0xff]   ;;  %v16199_v26 = vld [vmem:[%s20968_s7 + $0x8ac] ss:$16 sps:$4 sm:$0xff]  }
 0x5a4   : > { %v3881_v33 = vpop.f32.mrb[132].mxu0  ;;  %v3922_v56 = vpop.f32.mrb[180].mxu1  ;;  %6496 = vmatprep.mubr.bf16.mxu0 %v16974_v42  ;;  %6537 = vmatprep.mubr.bf16.mxu1 %v16974_v42 }
 0x5a5   : > { %v3882_v49 = vadd.f32 %v3881_v33, %v3717_v59  ;;  %v3923_v58 = vadd.f32 %v3922_v56, %v3758_v34  ;;  %v3883_v40 = vpop.f32.mrb[133].mxu0  ;;  %v3924_v11 = vpop.f32.mrb[181].mxu1 }
 0x5a6   : > { %v3884_v24 = vadd.f32 %v3883_v40, %v3719_v32  ;;  %v3925_v46 = vadd.f32 %v3924_v11, %v3760_v10  ;;  %v3885_v21 = vpop.f32.mrb[134].mxu0  ;;  %v3926_v52 = vpop.f32.mrb[182].mxu1  ;;  %6467 = vmatpush1.bf16.msra.mxu0 %v16146_v0  ;;  %6508 = vmatpush1.bf16.msra.mxu1 %v16149_v6  ;;  %v16194_v0 = vld [vmem:[%s20968_s7 + $0x8a0] ss:$16 sps:$4 sm:$0xff]   ;;  %v16197_v6 = vld [vmem:[%s20968_s7 + $0x8a8] ss:$16 sps:$4 sm:$0xff]  }
 0x5a7   : > { %v3886_v12 = vpop.f32.mrb[135].mxu0  ;;  %v3927_v14 = vpop.f32.mrb[183].mxu1  ;;  %6468 = vmatprep.subr.bf16.mxu0 %v16154_v57  ;;  %6509 = vmatprep.subr.bf16.mxu1 %v16157_v44  ;;  %v16202_v57 = vld [vmem:[%s20968_s7 + $0x8c4] ss:$16 sps:$4 sm:$0xff]   ;;  %v16205_v44 = vld [vmem:[%s20968_s7 + $0x8cc] ss:$16 sps:$4 sm:$0xff]  }
 0x5aa   : > { %6469 = vmatpush1.bf16.msra.mxu0 %v16152_v17  ;;  %6510 = vmatpush1.bf16.msra.mxu1 %v16155_v61  ;;  %v16200_v17 = vld [vmem:[%s20968_s7 + $0x8c0] ss:$16 sps:$4 sm:$0xff]   ;;  %v16203_v61 = vld [vmem:[%s20968_s7 + $0x8c8] ss:$16 sps:$4 sm:$0xff]  }
 0x5ab   : > { %6470 = vmatprep.subr.bf16.mxu0 %v16160_v23  ;;  %6511 = vmatprep.subr.bf16.mxu1 %v16163_v25  ;;  %v16208_v23 = vld [vmem:[%s20968_s7 + $0x8e4] ss:$16 sps:$4 sm:$0xff]   ;;  %v16211_v25 = vld [vmem:[%s20968_s7 + $0x8ec] ss:$16 sps:$4 sm:$0xff]  }
 0x5ae   : > { %6471 = vmatpush1.bf16.msra.mxu0 %v16158_v1  ;;  %6512 = vmatpush1.bf16.msra.mxu1 %v16161_v30  ;;  %v16206_v1 = vld [vmem:[%s20968_s7 + $0x8e0] ss:$16 sps:$4 sm:$0xff]   ;;  %v16209_v30 = vld [vmem:[%s20968_s7 + $0x8e8] ss:$16 sps:$4 sm:$0xff]  }
 0x5af   : > { %6651 = vmatprep.subr.bf16.mxu0 %v16166_v19  ;;  %6692 = vmatprep.subr.bf16.mxu1 %v16169_v8  ;;  %v16214_v19 = vld [vmem:[%s20968_s7 + $0x904] ss:$16 sps:$4 sm:$0xff]   ;;  %v16217_v8 = vld [vmem:[%s20968_s7 + $0x90c] ss:$16 sps:$4 sm:$0xff]  }
 0x5b1   : > { %13681 = vmatmul.mubr.msk.bf16.vlgmr.msra.gmra.mrb[188].mxu0 %vm1452_vm1, %v6380_v37  ;;  %13682 = vmatmul.mubr.msk.bf16.vlgmr.msra.gmra.mrb[236].mxu1 %vm1452_vm1, %v6380_v37  ;;  %v6754_v37 = vrot.slane %v19182_v20, 3 }
 0x5b2   : > { %6652 = vmatpush1.bf16.msra.mxu0 %v16164_v48  ;;  %6693 = vmatpush1.bf16.msra.mxu1 %v16167_v18  ;;  %v16212_v48 = vld [vmem:[%s20968_s7 + $0x900] ss:$16 sps:$4 sm:$0xff]   ;;  %v16215_v18 = vld [vmem:[%s20968_s7 + $0x908] ss:$16 sps:$4 sm:$0xff]  }
 0x5b3   : > { %6653 = vmatprep.subr.bf16.mxu0 %v16172_v62  ;;  %6694 = vmatprep.subr.bf16.mxu1 %v16175_v5  ;;  %v16220_v62 = vld [vmem:[%s20968_s7 + $0x924] ss:$16 sps:$4 sm:$0xff]   ;;  %v16223_v5 = vld [vmem:[%s20968_s7 + $0x92c] ss:$16 sps:$4 sm:$0xff]  }
 0x5b4   : > { %v4065_v31 = vpop.f32.mrb[136].mxu0  ;;  %v4106_v54 = vpop.f32.mrb[184].mxu1  ;;  %6683 = vmatprep.mubr.bf16.mxu0 %v16974_v42  ;;  %6724 = vmatprep.mubr.bf16.mxu1 %v16974_v42 }
 0x5b5   : > { %v4113_v63 = vadd.f32 %v4065_v31, %v3882_v49  ;;  %v4115_v15 = vadd.f32 %v4106_v54, %v3923_v58  ;;  %v4067_v59 = vpop.f32.mrb[137].mxu0  ;;  %v4108_v34 = vpop.f32.mrb[185].mxu1 }
 0x5b6   : > { %v4114_v32 = vadd.f32 %v4067_v59, %v3884_v24  ;;  %v4116_v10 = vadd.f32 %v4108_v34, %v3925_v46  ;;  %v4069_v53 = vpop.f32.mrb[138].mxu0  ;;  %v4110_v2 = vpop.f32.mrb[186].mxu1  ;;  %6654 = vmatpush1.bf16.msra.mxu0 %v16170_v27  ;;  %6695 = vmatpush1.bf16.msra.mxu1 %v16173_v28  ;;  %v16218_v27 = vld [vmem:[%s20968_s7 + $0x920] ss:$16 sps:$4 sm:$0xff]   ;;  %v16221_v28 = vld [vmem:[%s20968_s7 + $0x928] ss:$16 sps:$4 sm:$0xff]  }
 0x5b7   : > { %v4070_v45 = vpop.f32.mrb[139].mxu0  ;;  %v4111_v3 = vpop.f32.mrb[187].mxu1  ;;  %6655 = vmatprep.subr.bf16.mxu0 %v16178_v60  ;;  %6696 = vmatprep.subr.bf16.mxu1 %v16181_v35  ;;  %v16226_v60 = vld [vmem:[%s20968_s7 + $0x944] ss:$16 sps:$4 sm:$0xff]   ;;  %v16229_v35 = vld [vmem:[%s20968_s7 + $0x94c] ss:$16 sps:$4 sm:$0xff]  }
 0x5ba   : > { %6656 = vmatpush1.bf16.msra.mxu0 %v16176_v4  ;;  %6697 = vmatpush1.bf16.msra.mxu1 %v16179_v43  ;;  %v16224_v4 = vld [vmem:[%s20968_s7 + $0x940] ss:$16 sps:$4 sm:$0xff]   ;;  %v16227_v43 = vld [vmem:[%s20968_s7 + $0x948] ss:$16 sps:$4 sm:$0xff]  }
 0x5bb   : > { %6657 = vmatprep.subr.bf16.mxu0 %v16184_v55  ;;  %6698 = vmatprep.subr.bf16.mxu1 %v16187_v29  ;;  %v16232_v55 = vld [vmem:[%s20968_s7 + $0x964] ss:$16 sps:$4 sm:$0xff]   ;;  %v16235_v29 = vld [vmem:[%s20968_s7 + $0x96c] ss:$16 sps:$4 sm:$0xff]  }
 0x5be   : > { %6658 = vmatpush1.bf16.msra.mxu0 %v16182_v51  ;;  %6699 = vmatpush1.bf16.msra.mxu1 %v16185_v41  ;;  %v16230_v51 = vld [vmem:[%s20968_s7 + $0x960] ss:$16 sps:$4 sm:$0xff]   ;;  %v16233_v41 = vld [vmem:[%s20968_s7 + $0x968] ss:$16 sps:$4 sm:$0xff]  }
 0x5bf   : > { %6838 = vmatprep.subr.bf16.mxu0 %v16190_v7  ;;  %6879 = vmatprep.subr.bf16.mxu1 %v16193_v9  ;;  %v16238_v7 = vld [vmem:[%s20968_s7 + $0x984] ss:$16 sps:$4 sm:$0xff]   ;;  %v16241_v9 = vld [vmem:[%s20968_s7 + $0x98c] ss:$16 sps:$4 sm:$0xff]  }
 0x5c1   : > { %13715 = vmatmul.mubr.msk.bf16.vlgmr.msra.gmra.mrb[192].mxu0 %vm1452_vm1, %v6567_v47  ;;  %13716 = vmatmul.mubr.msk.bf16.vlgmr.msra.gmra.mrb[240].mxu1 %vm1452_vm1, %v6567_v47  ;;  %v6941_v47 = vrot.slane %v18402_v39, 4 }
 0x5c2   : > { %6839 = vmatpush1.bf16.msra.mxu0 %v16188_v16  ;;  %6880 = vmatpush1.bf16.msra.mxu1 %v16191_v13  ;;  %v16236_v16 = vld [vmem:[%s20968_s7 + $0x980] ss:$16 sps:$4 sm:$0xff]   ;;  %v16239_v13 = vld [vmem:[%s20968_s7 + $0x988] ss:$16 sps:$4 sm:$0xff]  }
 0x5c3   : > { %6840 = vmatprep.subr.bf16.mxu0 %v16196_v36  ;;  %6881 = vmatprep.subr.bf16.mxu1 %v16199_v26  ;;  %v16244_v36 = vld [vmem:[%s20968_s7 + $0x9a4] ss:$16 sps:$4 sm:$0xff]   ;;  %v16247_v26 = vld [vmem:[%s20968_s7 + $0x9ac] ss:$16 sps:$4 sm:$0xff]  }
 0x5c4   : > { %v4252_v33 = vpop.f32.mrb[140].mxu0  ;;  %v4293_v56 = vpop.f32.mrb[188].mxu1  ;;  %6870 = vmatprep.mubr.bf16.mxu0 %v16974_v42  ;;  %6911 = vmatprep.mubr.bf16.mxu1 %v16974_v42 }
 0x5c5   : > { %v4300_v49 = vadd.f32 %v4252_v33, %v4113_v63  ;;  %v4302_v58 = vadd.f32 %v4293_v56, %v4115_v15  ;;  %v4254_v40 = vpop.f32.mrb[141].mxu0  ;;  %v4295_v11 = vpop.f32.mrb[189].mxu1 }
 0x5c6   : > { %v4301_v24 = vadd.f32 %v4254_v40, %v4114_v32  ;;  %v4303_v46 = vadd.f32 %v4295_v11, %v4116_v10  ;;  %v4256_v21 = vpop.f32.mrb[142].mxu0  ;;  %v4297_v52 = vpop.f32.mrb[190].mxu1  ;;  %6841 = vmatpush1.bf16.msra.mxu0 %v16194_v0  ;;  %6882 = vmatpush1.bf16.msra.mxu1 %v16197_v6  ;;  %v16242_v0 = vld [vmem:[%s20968_s7 + $0x9a0] ss:$16 sps:$4 sm:$0xff]   ;;  %v16245_v6 = vld [vmem:[%s20968_s7 + $0x9a8] ss:$16 sps:$4 sm:$0xff]  }
 0x5c7   : > { %v4257_v12 = vpop.f32.mrb[143].mxu0  ;;  %v4298_v14 = vpop.f32.mrb[191].mxu1  ;;  %6842 = vmatprep.subr.bf16.mxu0 %v16202_v57  ;;  %6883 = vmatprep.subr.bf16.mxu1 %v16205_v44  ;;  %v16250_v57 = vld [vmem:[%s20968_s7 + $0x9c4] ss:$16 sps:$4 sm:$0xff]   ;;  %v16253_v44 = vld [vmem:[%s20968_s7 + $0x9cc] ss:$16 sps:$4 sm:$0xff]  }
 0x5ca   : > { %6843 = vmatpush1.bf16.msra.mxu0 %v16200_v17  ;;  %6884 = vmatpush1.bf16.msra.mxu1 %v16203_v61  ;;  %v16248_v17 = vld [vmem:[%s20968_s7 + $0x9c0] ss:$16 sps:$4 sm:$0xff]   ;;  %v16251_v61 = vld [vmem:[%s20968_s7 + $0x9c8] ss:$16 sps:$4 sm:$0xff]  }
 0x5cb   : > { %6844 = vmatprep.subr.bf16.mxu0 %v16208_v23  ;;  %6885 = vmatprep.subr.bf16.mxu1 %v16211_v25  ;;  %v16256_v23 = vld [vmem:[%s20968_s7 + $0x9e4] ss:$16 sps:$4 sm:$0xff]   ;;  %v16259_v25 = vld [vmem:[%s20968_s7 + $0x9ec] ss:$16 sps:$4 sm:$0xff]  }
 0x5ce   : > { %6845 = vmatpush1.bf16.msra.mxu0 %v16206_v1  ;;  %6886 = vmatpush1.bf16.msra.mxu1 %v16209_v30  ;;  %v16254_v1 = vld [vmem:[%s20968_s7 + $0x9e0] ss:$16 sps:$4 sm:$0xff]   ;;  %v16257_v30 = vld [vmem:[%s20968_s7 + $0x9e8] ss:$16 sps:$4 sm:$0xff]  }
 0x5cf   : > { %7025 = vmatprep.subr.bf16.mxu0 %v16214_v19  ;;  %7066 = vmatprep.subr.bf16.mxu1 %v16217_v8  ;;  %v16262_v19 = vld [vmem:[%s20968_s7 + $0xa04] ss:$16 sps:$4 sm:$0xff]   ;;  %v16265_v8 = vld [vmem:[%s20968_s7 + $0xa0c] ss:$16 sps:$4 sm:$0xff]  }
 0x5d1   : > { %13749 = vmatmul.mubr.msk.bf16.vlgmr.msra.gmra.mrb[196].mxu0 %vm1452_vm1, %v6754_v37  ;;  %13750 = vmatmul.mubr.msk.bf16.vlgmr.msra.gmra.mrb[244].mxu1 %vm1452_vm1, %v6754_v37  ;;  %v7128_v37 = vrot.slane %v19182_v20, 4 }
 0x5d2   : > { %7026 = vmatpush1.bf16.msra.mxu0 %v16212_v48  ;;  %7067 = vmatpush1.bf16.msra.mxu1 %v16215_v18  ;;  %v16260_v48 = vld [vmem:[%s20968_s7 + $0xa00] ss:$16 sps:$4 sm:$0xff]   ;;  %v16263_v18 = vld [vmem:[%s20968_s7 + $0xa08] ss:$16 sps:$4 sm:$0xff]  }
 0x5d3   : > { %7027 = vmatprep.subr.bf16.mxu0 %v16220_v62  ;;  %7068 = vmatprep.subr.bf16.mxu1 %v16223_v5  ;;  %v16268_v62 = vld [vmem:[%s20968_s7 + $0xa24] ss:$16 sps:$4 sm:$0xff]   ;;  %v16271_v5 = vld [vmem:[%s20968_s7 + $0xa2c] ss:$16 sps:$4 sm:$0xff]  }
 0x5d4   : > { %v4439_v31 = vpop.f32.mrb[144].mxu0  ;;  %v4480_v54 = vpop.f32.mrb[192].mxu1  ;;  %7057 = vmatprep.mubr.bf16.mxu0 %v16974_v42  ;;  %7098 = vmatprep.mubr.bf16.mxu1 %v16974_v42 }
 0x5d5   : > { %v4487_v63 = vadd.f32 %v4439_v31, %v4300_v49  ;;  %v4489_v15 = vadd.f32 %v4480_v54, %v4302_v58  ;;  %v4441_v59 = vpop.f32.mrb[145].mxu0  ;;  %v4482_v34 = vpop.f32.mrb[193].mxu1 }
 0x5d6   : > { %v4488_v32 = vadd.f32 %v4441_v59, %v4301_v24  ;;  %v4490_v10 = vadd.f32 %v4482_v34, %v4303_v46  ;;  %v4443_v53 = vpop.f32.mrb[146].mxu0  ;;  %v4484_v2 = vpop.f32.mrb[194].mxu1  ;;  %7028 = vmatpush1.bf16.msra.mxu0 %v16218_v27  ;;  %7069 = vmatpush1.bf16.msra.mxu1 %v16221_v28  ;;  %v16266_v27 = vld [vmem:[%s20968_s7 + $0xa20] ss:$16 sps:$4 sm:$0xff]   ;;  %v16269_v28 = vld [vmem:[%s20968_s7 + $0xa28] ss:$16 sps:$4 sm:$0xff]  }
 0x5d7   : > { %v4444_v45 = vpop.f32.mrb[147].mxu0  ;;  %v4485_v3 = vpop.f32.mrb[195].mxu1  ;;  %7029 = vmatprep.subr.bf16.mxu0 %v16226_v60  ;;  %7070 = vmatprep.subr.bf16.mxu1 %v16229_v35  ;;  %v16274_v60 = vld [vmem:[%s20968_s7 + $0xa44] ss:$16 sps:$4 sm:$0xff]   ;;  %v16277_v35 = vld [vmem:[%s20968_s7 + $0xa4c] ss:$16 sps:$4 sm:$0xff]  }
 0x5da   : > { %7030 = vmatpush1.bf16.msra.mxu0 %v16224_v4  ;;  %7071 = vmatpush1.bf16.msra.mxu1 %v16227_v43  ;;  %v16272_v4 = vld [vmem:[%s20968_s7 + $0xa40] ss:$16 sps:$4 sm:$0xff]   ;;  %v16275_v43 = vld [vmem:[%s20968_s7 + $0xa48] ss:$16 sps:$4 sm:$0xff]  }
 0x5db   : > { %7031 = vmatprep.subr.bf16.mxu0 %v16232_v55  ;;  %7072 = vmatprep.subr.bf16.mxu1 %v16235_v29  ;;  %v16280_v55 = vld [vmem:[%s20968_s7 + $0xa64] ss:$16 sps:$4 sm:$0xff]   ;;  %v16283_v29 = vld [vmem:[%s20968_s7 + $0xa6c] ss:$16 sps:$4 sm:$0xff]  }
 0x5de   : > { %7032 = vmatpush1.bf16.msra.mxu0 %v16230_v51  ;;  %7073 = vmatpush1.bf16.msra.mxu1 %v16233_v41  ;;  %v16278_v51 = vld [vmem:[%s20968_s7 + $0xa60] ss:$16 sps:$4 sm:$0xff]   ;;  %v16281_v41 = vld [vmem:[%s20968_s7 + $0xa68] ss:$16 sps:$4 sm:$0xff]  }
 0x5df   : > { %7212 = vmatprep.subr.bf16.mxu0 %v16238_v7  ;;  %7253 = vmatprep.subr.bf16.mxu1 %v16241_v9  ;;  %v16286_v7 = vld [vmem:[%s20968_s7 + $0xa84] ss:$16 sps:$4 sm:$0xff]   ;;  %v16289_v9 = vld [vmem:[%s20968_s7 + $0xa8c] ss:$16 sps:$4 sm:$0xff]  }
 0x5e1   : > { %13783 = vmatmul.mubr.msk.bf16.vlgmr.msra.gmra.mrb[200].mxu0 %vm1452_vm1, %v6941_v47  ;;  %13784 = vmatmul.mubr.msk.bf16.vlgmr.msra.gmra.mrb[248].mxu1 %vm1452_vm1, %v6941_v47  ;;  %v7315_v47 = vrot.slane %v18402_v39, 5 }
 0x5e2   : > { %7213 = vmatpush1.bf16.msra.mxu0 %v16236_v16  ;;  %7254 = vmatpush1.bf16.msra.mxu1 %v16239_v13  ;;  %v16284_v16 = vld [vmem:[%s20968_s7 + $0xa80] ss:$16 sps:$4 sm:$0xff]   ;;  %v16287_v13 = vld [vmem:[%s20968_s7 + $0xa88] ss:$16 sps:$4 sm:$0xff]  }
 0x5e3   : > { %7214 = vmatprep.subr.bf16.mxu0 %v16244_v36  ;;  %7255 = vmatprep.subr.bf16.mxu1 %v16247_v26  ;;  %v16292_v36 = vld [vmem:[%s20968_s7 + $0xaa4] ss:$16 sps:$4 sm:$0xff]   ;;  %v16295_v26 = vld [vmem:[%s20968_s7 + $0xaac] ss:$16 sps:$4 sm:$0xff]  }
 0x5e4   : > { %v4626_v33 = vpop.f32.mrb[148].mxu0  ;;  %v4667_v56 = vpop.f32.mrb[196].mxu1  ;;  %7244 = vmatprep.mubr.bf16.mxu0 %v16974_v42  ;;  %7285 = vmatprep.mubr.bf16.mxu1 %v16974_v42 }
 0x5e5   : > { %v4674_v49 = vadd.f32 %v4626_v33, %v4487_v63  ;;  %v4676_v58 = vadd.f32 %v4667_v56, %v4489_v15  ;;  %v4628_v40 = vpop.f32.mrb[149].mxu0  ;;  %v4669_v11 = vpop.f32.mrb[197].mxu1 }
 0x5e6   : > { %v4675_v24 = vadd.f32 %v4628_v40, %v4488_v32  ;;  %v4677_v46 = vadd.f32 %v4669_v11, %v4490_v10  ;;  %v4630_v21 = vpop.f32.mrb[150].mxu0  ;;  %v4671_v52 = vpop.f32.mrb[198].mxu1  ;;  %7215 = vmatpush1.bf16.msra.mxu0 %v16242_v0  ;;  %7256 = vmatpush1.bf16.msra.mxu1 %v16245_v6  ;;  %v16290_v0 = vld [vmem:[%s20968_s7 + $0xaa0] ss:$16 sps:$4 sm:$0xff]   ;;  %v16293_v6 = vld [vmem:[%s20968_s7 + $0xaa8] ss:$16 sps:$4 sm:$0xff]  }
 0x5e7   : > { %v4631_v12 = vpop.f32.mrb[151].mxu0  ;;  %v4672_v14 = vpop.f32.mrb[199].mxu1  ;;  %7216 = vmatprep.subr.bf16.mxu0 %v16250_v57  ;;  %7257 = vmatprep.subr.bf16.mxu1 %v16253_v44  ;;  %v16298_v57 = vld [vmem:[%s20968_s7 + $0xac4] ss:$16 sps:$4 sm:$0xff]   ;;  %v16301_v44 = vld [vmem:[%s20968_s7 + $0xacc] ss:$16 sps:$4 sm:$0xff]  }
 0x5ea   : > { %7217 = vmatpush1.bf16.msra.mxu0 %v16248_v17  ;;  %7258 = vmatpush1.bf16.msra.mxu1 %v16251_v61  ;;  %v16296_v17 = vld [vmem:[%s20968_s7 + $0xac0] ss:$16 sps:$4 sm:$0xff]   ;;  %v16299_v61 = vld [vmem:[%s20968_s7 + $0xac8] ss:$16 sps:$4 sm:$0xff]  }
 0x5eb   : > { %7218 = vmatprep.subr.bf16.mxu0 %v16256_v23  ;;  %7259 = vmatprep.subr.bf16.mxu1 %v16259_v25  ;;  %v16304_v23 = vld [vmem:[%s20968_s7 + $0xae4] ss:$16 sps:$4 sm:$0xff]   ;;  %v16307_v25 = vld [vmem:[%s20968_s7 + $0xaec] ss:$16 sps:$4 sm:$0xff]  }
 0x5ee   : > { %7219 = vmatpush1.bf16.msra.mxu0 %v16254_v1  ;;  %7260 = vmatpush1.bf16.msra.mxu1 %v16257_v30  ;;  %v16302_v1 = vld [vmem:[%s20968_s7 + $0xae0] ss:$16 sps:$4 sm:$0xff]   ;;  %v16305_v30 = vld [vmem:[%s20968_s7 + $0xae8] ss:$16 sps:$4 sm:$0xff]  }
 0x5ef   : > { %7399 = vmatprep.subr.bf16.mxu0 %v16262_v19  ;;  %7440 = vmatprep.subr.bf16.mxu1 %v16265_v8  ;;  %v16310_v19 = vld [vmem:[%s20968_s7 + $0xb04] ss:$16 sps:$4 sm:$0xff]   ;;  %v16313_v8 = vld [vmem:[%s20968_s7 + $0xb0c] ss:$16 sps:$4 sm:$0xff]  }
 0x5f1   : > { %13817 = vmatmul.mubr.msk.bf16.vlgmr.msra.gmra.mrb[204].mxu0 %vm1452_vm1, %v7128_v37  ;;  %13818 = vmatmul.mubr.msk.bf16.vlgmr.msra.gmra.mrb[252].mxu1 %vm1452_vm1, %v7128_v37  ;;  %v7502_v37 = vrot.slane %v18402_v39, 7  ;;  %v16314_v39 = vld [vmem:[%s20968_s7 + $0xb20] ss:$16 sps:$4 sm:$0xff]  }
 0x5f2   : > { %7400 = vmatpush1.bf16.msra.mxu0 %v16260_v48  ;;  %7441 = vmatpush1.bf16.msra.mxu1 %v16263_v18  ;;  %v16308_v48 = vld [vmem:[%s20968_s7 + $0xb00] ss:$16 sps:$4 sm:$0xff]   ;;  %v16311_v18 = vld [vmem:[%s20968_s7 + $0xb08] ss:$16 sps:$4 sm:$0xff]  }
 0x5f3   : > { %7401 = vmatprep.subr.bf16.mxu0 %v16268_v62  ;;  %7442 = vmatprep.subr.bf16.mxu1 %v16271_v5  ;;  %v16316_v62 = vld [vmem:[%s20968_s7 + $0xb24] ss:$16 sps:$4 sm:$0xff]   ;;  %v16319_v5 = vld [vmem:[%s20968_s7 + $0xb2c] ss:$16 sps:$4 sm:$0xff]  }
 0x5f4   : > { %v4813_v31 = vpop.f32.mrb[152].mxu0  ;;  %v4854_v54 = vpop.f32.mrb[200].mxu1  ;;  %7431 = vmatprep.mubr.bf16.mxu0 %v16974_v42  ;;  %7472 = vmatprep.mubr.bf16.mxu1 %v16974_v42 }
 0x5f5   : > { %v4861_v63 = vadd.f32 %v4813_v31, %v4674_v49  ;;  %v4863_v15 = vadd.f32 %v4854_v54, %v4676_v58  ;;  %v4815_v59 = vpop.f32.mrb[153].mxu0  ;;  %v4856_v34 = vpop.f32.mrb[201].mxu1 }
 0x5f6   : > { %v4862_v32 = vadd.f32 %v4815_v59, %v4675_v24  ;;  %v4864_v10 = vadd.f32 %v4856_v34, %v4677_v46  ;;  %v4817_v53 = vpop.f32.mrb[154].mxu0  ;;  %v4858_v2 = vpop.f32.mrb[202].mxu1  ;;  %7402 = vmatpush1.bf16.msra.mxu0 %v16266_v27  ;;  %7443 = vmatpush1.bf16.msra.mxu1 %v16269_v28  ;;  %v16317_v27 = vld [vmem:[%s20968_s7 + $0xb28] ss:$16 sps:$4 sm:$0xff]   ;;  %v16322_v28 = vld [vmem:[%s20968_s7 + $0xb44] ss:$16 sps:$4 sm:$0xff]  }
 0x5f7   : > { %v4818_v45 = vpop.f32.mrb[155].mxu0  ;;  %v4859_v3 = vpop.f32.mrb[203].mxu1  ;;  %7403 = vmatprep.subr.bf16.mxu0 %v16274_v60  ;;  %7444 = vmatprep.subr.bf16.mxu1 %v16277_v35  ;;  %v16325_v60 = vld [vmem:[%s20968_s7 + $0xb4c] ss:$16 sps:$4 sm:$0xff]   ;;  %v16320_v2 = vld [vmem:[%s20968_s7 + $0xb40] ss:$16 sps:$4 sm:$0xff]  }
 0x5f8   : > { %v16328_v3 = vld [vmem:[%s20968_s7 + $0xb64] ss:$16 sps:$4 sm:$0xff]  }
 0x5fa   : > { %7404 = vmatpush1.bf16.msra.mxu0 %v16272_v4  ;;  %7445 = vmatpush1.bf16.msra.mxu1 %v16275_v43  ;;  %v16323_v4 = vld [vmem:[%s20968_s7 + $0xb48] ss:$16 sps:$4 sm:$0xff]  }
 0x5fb   : > { %7405 = vmatprep.subr.bf16.mxu0 %v16280_v55  ;;  %7446 = vmatprep.subr.bf16.mxu1 %v16283_v29  ;;  %v16331_v55 = vld [vmem:[%s20968_s7 + $0xb6c] ss:$16 sps:$4 sm:$0xff]   ;;  %v16326_v29 = vld [vmem:[%s20968_s7 + $0xb60] ss:$16 sps:$4 sm:$0xff]  }
 0x5fe   : > { %7406 = vmatpush1.bf16.msra.mxu0 %v16278_v51  ;;  %7447 = vmatpush1.bf16.msra.mxu1 %v16281_v41  ;;  %v16329_v51 = vld [vmem:[%s20968_s7 + $0xb68] ss:$16 sps:$4 sm:$0xff]   ;;  %v16334_v41 = vld [vmem:[%s20968_s7 + $0xb84] ss:$16 sps:$4 sm:$0xff]  }
 0x5ff   : > { %7586 = vmatprep.subr.bf16.mxu0 %v16286_v7  ;;  %7627 = vmatprep.subr.bf16.mxu1 %v16289_v9  ;;  %v16337_v7 = vld [vmem:[%s20968_s7 + $0xb8c] ss:$16 sps:$4 sm:$0xff]   ;;  %v16332_v9 = vld [vmem:[%s20968_s7 + $0xb80] ss:$16 sps:$4 sm:$0xff]  }
 0x601   : > { %13851 = vmatmul.mubr.msk.bf16.vlgmr.msra.gmra.mrb[208].mxu0 %vm1452_vm1, %v7315_v47  ;;  %13852 = vmatmul.mubr.msk.bf16.vlgmr.msra.gmra.mrb[0].mxu1 %vm1452_vm1, %v7315_v47  ;;  %v16340_v47 = vld [vmem:[%s20968_s7 + $0xba4] ss:$16 sps:$4 sm:$0xff]  }
 0x602   : > { %7587 = vmatpush1.bf16.msra.mxu0 %v16284_v16  ;;  %7628 = vmatpush1.bf16.msra.mxu1 %v16287_v13  ;;  %v16335_v16 = vld [vmem:[%s20968_s7 + $0xb88] ss:$16 sps:$4 sm:$0xff]   ;;  %v7689_v13 = vrot.slane %v19182_v20, 7  ;;  %v16338_v20 = vld [vmem:[%s20968_s7 + $0xba0] ss:$16 sps:$4 sm:$0xff]  }
 0x603   : > { %7588 = vmatprep.subr.bf16.mxu0 %v16292_v36  ;;  %7629 = vmatprep.subr.bf16.mxu1 %v16295_v26  ;;  %v16343_v36 = vld [vmem:[%s20968_s7 + $0xbac] ss:$16 sps:$4 sm:$0xff]   ;;  %v16341_v26 = vld [vmem:[%s20968_s7 + $0xba8] ss:$16 sps:$4 sm:$0xff]  }
 0x604   : > { %v5000_v33 = vpop.f32.mrb[156].mxu0  ;;  %v5041_v56 = vpop.f32.mrb[204].mxu1  ;;  %7618 = vmatprep.mubr.bf16.mxu0 %v16974_v42  ;;  %7659 = vmatprep.mubr.bf16.mxu1 %v16974_v42 }
 0x605   : > { %v5048_v49 = vadd.f32 %v5000_v33, %v4861_v63  ;;  %v5050_v58 = vadd.f32 %v5041_v56, %v4863_v15  ;;  %v5002_v40 = vpop.f32.mrb[157].mxu0  ;;  %v5043_v11 = vpop.f32.mrb[205].mxu1 }
 0x606   : > { %v5049_v24 = vadd.f32 %v5002_v40, %v4862_v32  ;;  %v5051_v46 = vadd.f32 %v5043_v11, %v4864_v10  ;;  %v5004_v21 = vpop.f32.mrb[158].mxu0  ;;  %v5045_v52 = vpop.f32.mrb[206].mxu1  ;;  %7589 = vmatpush1.bf16.msra.mxu0 %v16290_v0  ;;  %7630 = vmatpush1.bf16.msra.mxu1 %v16293_v6  ;;  %v16346_v0 = vld [vmem:[%s20968_s7 + $0xbc4] ss:$16 sps:$4 sm:$0xff]   ;;  %v16349_v6 = vld [vmem:[%s20968_s7 + $0xbcc] ss:$16 sps:$4 sm:$0xff]  }
 0x607   : > { %v5005_v12 = vpop.f32.mrb[159].mxu0  ;;  %v5046_v14 = vpop.f32.mrb[207].mxu1  ;;  %7590 = vmatprep.subr.bf16.mxu0 %v16298_v57  ;;  %7631 = vmatprep.subr.bf16.mxu1 %v16301_v44  ;;  %v16344_v21 = vld [vmem:[%s20968_s7 + $0xbc0] ss:$16 sps:$4 sm:$0xff]   ;;  %v16347_v52 = vld [vmem:[%s20968_s7 + $0xbc8] ss:$16 sps:$4 sm:$0xff]  }
 0x608   : > { %v16352_v12 = vld [vmem:[%s20968_s7 + $0xbe4] ss:$16 sps:$4 sm:$0xff]   ;;  %v16355_v14 = vld [vmem:[%s20968_s7 + $0xbec] ss:$16 sps:$4 sm:$0xff]  }
 0x60a   : > { %7591 = vmatpush1.bf16.msra.mxu0 %v16296_v17  ;;  %7632 = vmatpush1.bf16.msra.mxu1 %v16299_v61 }
 0x60b   : > { %7592 = vmatprep.subr.bf16.mxu0 %v16304_v23  ;;  %7633 = vmatprep.subr.bf16.mxu1 %v16307_v25  ;;  %v16350_v23 = vld [vmem:[%s20968_s7 + $0xbe0] ss:$16 sps:$4 sm:$0xff]   ;;  %v16353_v25 = vld [vmem:[%s20968_s7 + $0xbe8] ss:$16 sps:$4 sm:$0xff]  }
 0x60e   : > { %7593 = vmatpush1.bf16.msra.mxu0 %v16302_v1  ;;  %7634 = vmatpush1.bf16.msra.mxu1 %v16305_v30  ;;  %v16358_v1 = vld [vmem:[%s20968_s7 + $0xc04] ss:$16 sps:$4 sm:$0xff]   ;;  %v16361_v30 = vld [vmem:[%s20968_s7 + $0xc0c] ss:$16 sps:$4 sm:$0xff]  }
 0x60f   : > { %7773 = vmatprep.subr.bf16.mxu0 %v16310_v19  ;;  %7814 = vmatprep.subr.bf16.mxu1 %v16313_v8  ;;  %v16356_v19 = vld [vmem:[%s20968_s7 + $0xc00] ss:$16 sps:$4 sm:$0xff]   ;;  %v16359_v8 = vld [vmem:[%s20968_s7 + $0xc08] ss:$16 sps:$4 sm:$0xff]  }
 0x611   : > { %13885 = vmatmul.mubr.msk.bf16.vlgmr.msra.gmra.mrb[212].mxu0 %vm1452_vm1, %v7502_v37  ;;  %13886 = vmatmul.mubr.msk.bf16.vlgmr.msra.gmra.mrb[4].mxu1 %vm1452_vm1, %v7502_v37  ;;  %v16362_v37 = vld [vmem:[%s20968_s7 + $0xc20] ss:$16 sps:$4 sm:$0xff]  }
 0x612   : > { %7774 = vmatpush1.bf16.msra.mxu0 %v16308_v48  ;;  %7815 = vmatpush1.bf16.msra.mxu1 %v16311_v18  ;;  %v16364_v48 = vld [vmem:[%s20968_s7 + $0xc24] ss:$16 sps:$4 sm:$0xff]   ;;  %v16367_v18 = vld [vmem:[%s20968_s7 + $0xc2c] ss:$16 sps:$4 sm:$0xff]  }
 0x613   : > { %7775 = vmatprep.subr.bf16.mxu0 %v16316_v62  ;;  %7816 = vmatprep.subr.bf16.mxu1 %v16319_v5  ;;  %v16365_v62 = vld [vmem:[%s20968_s7 + $0xc28] ss:$16 sps:$4 sm:$0xff]   ;;  %v16370_v5 = vld [vmem:[%s20968_s7 + $0xc44] ss:$16 sps:$4 sm:$0xff]  }
 0x614   : > { %v5187_v35 = vpop.f32.mrb[160].mxu0  ;;  %v5228_v31 = vpop.f32.mrb[208].mxu1  ;;  %7805 = vmatprep.mubr.bf16.mxu0 %v16974_v42  ;;  %7846 = vmatprep.mubr.bf16.mxu1 %v16974_v42 }
 0x615   : > { %v5235_v54 = vadd.f32 %v5187_v35, %v5048_v49  ;;  %v5237_v63 = vadd.f32 %v5228_v31, %v5050_v58  ;;  %v5189_v15 = vpop.f32.mrb[161].mxu0  ;;  %v5230_v59 = vpop.f32.mrb[209].mxu1 }
 0x616   : > { %v5236_v34 = vadd.f32 %v5189_v15, %v5049_v24  ;;  %v5238_v32 = vadd.f32 %v5230_v59, %v5051_v46  ;;  %v5191_v10 = vpop.f32.mrb[162].mxu0  ;;  %v5232_v53 = vpop.f32.mrb[210].mxu1  ;;  %7776 = vmatpush1.bf16.msra.mxu0 %v16314_v39  ;;  %7817 = vmatpush1.bf16.msra.mxu1 %v16317_v27  ;;  %v16373_v39 = vld [vmem:[%s20968_s7 + $0xc4c] ss:$16 sps:$4 sm:$0xff]  }
 0x617   : > { %v5192_v43 = vpop.f32.mrb[163].mxu0  ;;  %v5233_v45 = vpop.f32.mrb[211].mxu1  ;;  %7777 = vmatprep.subr.bf16.mxu0 %v16322_v28  ;;  %7818 = vmatprep.subr.bf16.mxu1 %v16325_v60  ;;  %v16371_v10 = vld [vmem:[%s20968_s7 + $0xc48] ss:$16 sps:$4 sm:$0xff]  }
 0x618   : > { %v16379_v43 = vld [vmem:[%s20968_s7 + $0xc6c] ss:$16 sps:$4 sm:$0xff]   ;;  %v16374_v45 = vld [vmem:[%s20968_s7 + $0xc60] ss:$16 sps:$4 sm:$0xff]  }
 0x61a   : > { %7778 = vmatpush1.bf16.msra.mxu0 %v16320_v2  ;;  %7819 = vmatpush1.bf16.msra.mxu1 %v16323_v4  ;;  %v16376_v4 = vld [vmem:[%s20968_s7 + $0xc64] ss:$16 sps:$4 sm:$0xff]  }
 0x61b   : > { %7779 = vmatprep.subr.bf16.mxu0 %v16328_v3  ;;  %7820 = vmatprep.subr.bf16.mxu1 %v16331_v55  ;;  %v16377_v3 = vld [vmem:[%s20968_s7 + $0xc68] ss:$16 sps:$4 sm:$0xff]   ;;  %v16382_v55 = vld [vmem:[%s20968_s7 + $0xc84] ss:$16 sps:$4 sm:$0xff]  }
 0x61e   : > { %7780 = vmatpush1.bf16.msra.mxu0 %v16326_v29  ;;  %7821 = vmatpush1.bf16.msra.mxu1 %v16329_v51  ;;  %v16385_v29 = vld [vmem:[%s20968_s7 + $0xc8c] ss:$16 sps:$4 sm:$0xff]   ;;  %v16380_v51 = vld [vmem:[%s20968_s7 + $0xc80] ss:$16 sps:$4 sm:$0xff]  }
 0x61f   : > { %7959 = vmatprep.subr.bf16.mxu0 %v16334_v41  ;;  %8000 = vmatprep.subr.bf16.mxu1 %v16337_v7  ;;  %v16383_v41 = vld [vmem:[%s20968_s7 + $0xc88] ss:$16 sps:$4 sm:$0xff]   ;;  %v19675_v7 = vshrl.u32 %v18431_v38, 16 }
 0x621   : > { %13919 = vmatmul.mubr.msk.bf16.vlgmr.msra.gmra.mrb[216].mxu0 %vm1452_vm1, %v7689_v13  ;;  %13920 = vmatmul.mubr.msk.bf16.vlgmr.msra.gmra.mrb[8].mxu1 %vm1452_vm1, %v7689_v13  ;;  %v16386_v13 = vld [vmem:[%s20968_s7 + $0xca0] ss:$16 sps:$4 sm:$0xff]  }
 0x622   : > { %7960 = vmatpush1.bf16.msra.mxu0 %v16332_v9  ;;  %8001 = vmatpush1.bf16.msra.mxu1 %v16335_v16  ;;  %v16388_v9 = vld [vmem:[%s20968_s7 + $0xca4] ss:$16 sps:$4 sm:$0xff]   ;;  %v16391_v16 = vld [vmem:[%s20968_s7 + $0xcac] ss:$16 sps:$4 sm:$0xff]  }
 0x623   : > { %7961 = vmatprep.subr.bf16.mxu0 %v16340_v47  ;;  %8002 = vmatprep.subr.bf16.mxu1 %v16343_v36  ;;  %v16389_v47 = vld [vmem:[%s20968_s7 + $0xca8] ss:$16 sps:$4 sm:$0xff]   ;;  %v16394_v36 = vld [vmem:[%s20968_s7 + $0xcc4] ss:$16 sps:$4 sm:$0xff]  }
 0x624   : > { %v5374_v57 = vpop.f32.mrb[164].mxu0  ;;  %v5415_v44 = vpop.f32.mrb[212].mxu1  ;;  %7991 = vmatprep.mubr.bf16.mxu0 %v16974_v42  ;;  %8032 = vmatprep.mubr.bf16.mxu1 %v16974_v42 }
 0x625   : > { %v5422_v33 = vadd.f32 %v5374_v57, %v5235_v54  ;;  %v5424_v56 = vadd.f32 %v5415_v44, %v5237_v63  ;;  %v5376_v49 = vpop.f32.mrb[165].mxu0  ;;  %v5417_v58 = vpop.f32.mrb[213].mxu1 }
 0x626   : > { %v5423_v40 = vadd.f32 %v5376_v49, %v5236_v34  ;;  %v5425_v11 = vadd.f32 %v5417_v58, %v5238_v32  ;;  %v5378_v24 = vpop.f32.mrb[166].mxu0  ;;  %v5419_v46 = vpop.f32.mrb[214].mxu1  ;;  %7962 = vmatpush1.bf16.msra.mxu0 %v16338_v20  ;;  %8003 = vmatpush1.bf16.msra.mxu1 %v16341_v26  ;;  %v16368_v32 = vld [vmem:[%s20968_s7 + $0xc40] ss:$16 sps:$4 sm:$0xff]   ;;  %v16397_v20 = vld [vmem:[%s20968_s7 + $0xccc] ss:$16 sps:$4 sm:$0xff]  }
 0x627   : > { %v5379_v17 = vpop.f32.mrb[167].mxu0  ;;  %v5420_v61 = vpop.f32.mrb[215].mxu1  ;;  %7963 = vmatprep.subr.bf16.mxu0 %v16346_v0  ;;  %8004 = vmatprep.subr.bf16.mxu1 %v16349_v6  ;;  %v16395_v24 = vld [vmem:[%s20968_s7 + $0xcc8] ss:$16 sps:$4 sm:$0xff]  }
 0x628   : > { %v16403_v17 = vld [vmem:[%s20968_s7 + $0xcec] ss:$16 sps:$4 sm:$0xff]   ;;  %v16398_v61 = vld [vmem:[%s20968_s7 + $0xce0] ss:$16 sps:$4 sm:$0xff]  }
 0x62a   : > { %7964 = vmatpush1.bf16.msra.mxu0 %v16344_v21  ;;  %8005 = vmatpush1.bf16.msra.mxu1 %v16347_v52  ;;  %v16400_v52 = vld [vmem:[%s20968_s7 + $0xce4] ss:$16 sps:$4 sm:$0xff]  }
 0x62b   : > { %7965 = vmatprep.subr.bf16.mxu0 %v16352_v12  ;;  %8006 = vmatprep.subr.bf16.mxu1 %v16355_v14  ;;  %v16401_v12 = vld [vmem:[%s20968_s7 + $0xce8] ss:$16 sps:$4 sm:$0xff]   ;;  %v16406_v14 = vld [vmem:[%s20968_s7 + $0xd04] ss:$16 sps:$4 sm:$0xff]  }
 0x62e   : > { %7966 = vmatpush1.bf16.msra.mxu0 %v16350_v23  ;;  %8007 = vmatpush1.bf16.msra.mxu1 %v16353_v25  ;;  %v16409_v23 = vld [vmem:[%s20968_s7 + $0xd0c] ss:$16 sps:$4 sm:$0xff]   ;;  %v16404_v25 = vld [vmem:[%s20968_s7 + $0xd00] ss:$16 sps:$4 sm:$0xff]  }
 0x62f   : > { %8147 = vmatprep.subr.bf16.mxu0 %v16358_v1  ;;  %8188 = vmatprep.subr.bf16.mxu1 %v16361_v30  ;;  %v16407_v1 = vld [vmem:[%s20968_s7 + $0xd08] ss:$16 sps:$4 sm:$0xff]   ;;  %v8251_v30 = vrot.slane %v18431_v38, 1 }
 0x631   : > { %13953 = vmatmul.mubr.msk.bf16.vlgmr.msra.gmra.mrb[220].mxu0 %vm1452_vm1, %v18431_v38  ;;  %13954 = vmatmul.mubr.msk.bf16.vlgmr.msra.gmra.mrb[12].mxu1 %vm1452_vm1, %v18431_v38 }
 0x632   : > { %8148 = vmatpush1.bf16.msra.mxu0 %v16356_v19  ;;  %8189 = vmatpush1.bf16.msra.mxu1 %v16359_v8  ;;  %v16412_v19 = vld [vmem:[%s20968_s7 + $0xd24] ss:$16 sps:$4 sm:$0xff]   ;;  %v16415_v8 = vld [vmem:[%s20968_s7 + $0xd2c] ss:$16 sps:$4 sm:$0xff]  }
 0x633   : > { %8149 = vmatprep.subr.bf16.mxu0 %v16364_v48  ;;  %8190 = vmatprep.subr.bf16.mxu1 %v16367_v18  ;;  %v16410_v48 = vld [vmem:[%s20968_s7 + $0xd20] ss:$16 sps:$4 sm:$0xff]   ;;  %v16413_v18 = vld [vmem:[%s20968_s7 + $0xd28] ss:$16 sps:$4 sm:$0xff]  }
 0x634   : > { %v5561_v27 = vpop.f32.mrb[168].mxu0  ;;  %v5602_v28 = vpop.f32.mrb[216].mxu1  ;;  %8179 = vmatprep.mubr.bf16.mxu0 %v16974_v42  ;;  %8220 = vmatprep.mubr.bf16.mxu1 %v16974_v42 }
 0x635   : > { %v5609_v60 = vadd.f32 %v5561_v27, %v5422_v33  ;;  %v5611_v35 = vadd.f32 %v5602_v28, %v5424_v56  ;;  %v5563_v31 = vpop.f32.mrb[169].mxu0  ;;  %v5604_v54 = vpop.f32.mrb[217].mxu1 }
 0x636   : > { %v5610_v63 = vadd.f32 %v5563_v31, %v5423_v40  ;;  %v5612_v15 = vadd.f32 %v5604_v54, %v5425_v11  ;;  %v5565_v59 = vpop.f32.mrb[170].mxu0  ;;  %v5606_v34 = vpop.f32.mrb[218].mxu1  ;;  %8150 = vmatpush1.bf16.msra.mxu0 %v16362_v37  ;;  %8191 = vmatpush1.bf16.msra.mxu1 %v16365_v62  ;;  %v16392_v11 = vld [vmem:[%s20968_s7 + $0xcc0] ss:$16 sps:$4 sm:$0xff]   ;;  %v16418_v37 = vld [vmem:[%s20968_s7 + $0xd44] ss:$16 sps:$4 sm:$0xff]  }
 0x637   : > { %v5566_v53 = vpop.f32.mrb[171].mxu0  ;;  %v5607_v2 = vpop.f32.mrb[219].mxu1  ;;  %8151 = vmatprep.subr.bf16.mxu0 %v16370_v5  ;;  %8192 = vmatprep.subr.bf16.mxu1 %v16373_v39  ;;  %v16421_v62 = vld [vmem:[%s20968_s7 + $0xd4c] ss:$16 sps:$4 sm:$0xff]   ;;  %v16416_v59 = vld [vmem:[%s20968_s7 + $0xd40] ss:$16 sps:$4 sm:$0xff]  }
 0x638   : > { %v16419_v34 = vld [vmem:[%s20968_s7 + $0xd48] ss:$16 sps:$4 sm:$0xff]   ;;  %v16424_v53 = vld [vmem:[%s20968_s7 + $0xd64] ss:$16 sps:$4 sm:$0xff]   ;;  %v16427_v2 = vld [vmem:[%s20968_s7 + $0xd6c] ss:$16 sps:$4 sm:$0xff]  }
 0x63a   : > { %8152 = vmatpush1.bf16.msra.mxu0 %v16368_v32  ;;  %8193 = vmatpush1.bf16.msra.mxu1 %v16371_v10 }
 0x63b   : > { %8153 = vmatprep.subr.bf16.mxu0 %v16376_v4  ;;  %8194 = vmatprep.subr.bf16.mxu1 %v16379_v43  ;;  %v16422_v4 = vld [vmem:[%s20968_s7 + $0xd60] ss:$16 sps:$4 sm:$0xff]   ;;  %v16425_v43 = vld [vmem:[%s20968_s7 + $0xd68] ss:$16 sps:$4 sm:$0xff]  }
 0x63e   : > { %8154 = vmatpush1.bf16.msra.mxu0 %v16374_v45  ;;  %8195 = vmatpush1.bf16.msra.mxu1 %v16377_v3  ;;  %v16430_v45 = vld [vmem:[%s20968_s7 + $0xd84] ss:$16 sps:$4 sm:$0xff]   ;;  %v16433_v3 = vld [vmem:[%s20968_s7 + $0xd8c] ss:$16 sps:$4 sm:$0xff]  }
 0x63f   : > { %8335 = vmatprep.subr.bf16.mxu0 %v16382_v55  ;;  %8376 = vmatprep.subr.bf16.mxu1 %v16385_v29  ;;  %v16428_v55 = vld [vmem:[%s20968_s7 + $0xd80] ss:$16 sps:$4 sm:$0xff]   ;;  %v16431_v29 = vld [vmem:[%s20968_s7 + $0xd88] ss:$16 sps:$4 sm:$0xff]  }
 0x641   : > { %13987 = vmatmul.mubr.msk.bf16.vlgmr.msra.gmra.mrb[224].mxu0 %vm1452_vm1, %v19675_v7  ;;  %13988 = vmatmul.mubr.msk.bf16.vlgmr.msra.gmra.mrb[16].mxu1 %vm1452_vm1, %v19675_v7 }
 0x642   : > { %8336 = vmatpush1.bf16.msra.mxu0 %v16380_v51  ;;  %8377 = vmatpush1.bf16.msra.mxu1 %v16383_v41  ;;  %v8438_v51 = vrot.slane %v19675_v7, 1  ;;  %v16436_v41 = vld [vmem:[%s20968_s7 + $0xda4] ss:$16 sps:$4 sm:$0xff]  }
 0x643   : > { %8337 = vmatprep.subr.bf16.mxu0 %v16388_v9  ;;  %8378 = vmatprep.subr.bf16.mxu1 %v16391_v16  ;;  %v16439_v9 = vld [vmem:[%s20968_s7 + $0xdac] ss:$16 sps:$4 sm:$0xff]   ;;  %v16434_v16 = vld [vmem:[%s20968_s7 + $0xda0] ss:$16 sps:$4 sm:$0xff]  }
 0x644   : > { %v5748_v26 = vpop.f32.mrb[172].mxu0  ;;  %v5789_v0 = vpop.f32.mrb[220].mxu1  ;;  %8367 = vmatprep.mubr.bf16.mxu0 %v16974_v42  ;;  %8408 = vmatprep.mubr.bf16.mxu1 %v16974_v42 }
 0x645   : > { %v5796_v6 = vadd.f32 %v5748_v26, %v5609_v60  ;;  %v5798_v57 = vadd.f32 %v5789_v0, %v5611_v35  ;;  %v5750_v44 = vpop.f32.mrb[173].mxu0  ;;  %v5791_v33 = vpop.f32.mrb[221].mxu1 }
 0x646   : > { %v5797_v56 = vadd.f32 %v5750_v44, %v5610_v63  ;;  %v5799_v49 = vadd.f32 %v5791_v33, %v5612_v15  ;;  %v5752_v58 = vpop.f32.mrb[174].mxu0  ;;  %v5793_v40 = vpop.f32.mrb[222].mxu1  ;;  %8338 = vmatpush1.bf16.msra.mxu0 %v16386_v13  ;;  %8379 = vmatpush1.bf16.msra.mxu1 %v16389_v47  ;;  %v16437_v13 = vld [vmem:[%s20968_s7 + $0xda8] ss:$16 sps:$4 sm:$0xff]   ;;  %v16442_v47 = vld [vmem:[%s20968_s7 + $0xdc4] ss:$16 sps:$4 sm:$0xff]  }
 0x647   : > { %v5753_v46 = vpop.f32.mrb[175].mxu0  ;;  %v5794_v21 = vpop.f32.mrb[223].mxu1  ;;  %8339 = vmatprep.subr.bf16.mxu0 %v16394_v36  ;;  %8380 = vmatprep.subr.bf16.mxu1 %v16397_v20  ;;  %v16445_v36 = vld [vmem:[%s20968_s7 + $0xdcc] ss:$16 sps:$4 sm:$0xff]   ;;  %v16440_v40 = vld [vmem:[%s20968_s7 + $0xdc0] ss:$16 sps:$4 sm:$0xff]  }
 0x648   : > { %v16448_v21 = vld [vmem:[%s20968_s7 + $0xde4] ss:$16 sps:$4 sm:$0xff]  }
 0x64a   : > { %8340 = vmatpush1.bf16.msra.mxu0 %v16392_v11  ;;  %8381 = vmatpush1.bf16.msra.mxu1 %v16395_v24  ;;  %v16443_v11 = vld [vmem:[%s20968_s7 + $0xdc8] ss:$16 sps:$4 sm:$0xff]  }
 0x64b   : > { %8341 = vmatprep.subr.bf16.mxu0 %v16400_v52  ;;  %8382 = vmatprep.subr.bf16.mxu1 %v16403_v17  ;;  %v16451_v52 = vld [vmem:[%s20968_s7 + $0xdec] ss:$16 sps:$4 sm:$0xff]   ;;  %v16446_v17 = vld [vmem:[%s20968_s7 + $0xde0] ss:$16 sps:$4 sm:$0xff]  }
 0x64e   : > { %8342 = vmatpush1.bf16.msra.mxu0 %v16398_v61  ;;  %8383 = vmatpush1.bf16.msra.mxu1 %v16401_v12  ;;  %v16449_v61 = vld [vmem:[%s20968_s7 + $0xde8] ss:$16 sps:$4 sm:$0xff]   ;;  %v16454_v12 = vld [vmem:[%s20968_s7 + $0xe04] ss:$16 sps:$4 sm:$0xff]  }
 0x64f   : > { %8522 = vmatprep.subr.bf16.mxu0 %v16406_v14  ;;  %8563 = vmatprep.subr.bf16.mxu1 %v16409_v23  ;;  %v16457_v14 = vld [vmem:[%s20968_s7 + $0xe0c] ss:$16 sps:$4 sm:$0xff]   ;;  %v16452_v23 = vld [vmem:[%s20968_s7 + $0xe00] ss:$16 sps:$4 sm:$0xff]  }
 0x651   : > { %14021 = vmatmul.mubr.msk.bf16.vlgmr.msra.gmra.mrb[228].mxu0 %vm1452_vm1, %v8251_v30  ;;  %14022 = vmatmul.mubr.msk.bf16.vlgmr.msra.gmra.mrb[20].mxu1 %vm1452_vm1, %v8251_v30  ;;  %v16460_v30 = vld [vmem:[%s20968_s7 + $0xe24] ss:$16 sps:$4 sm:$0xff]  }
 0x652   : > { %8523 = vmatpush1.bf16.msra.mxu0 %v16404_v25  ;;  %8564 = vmatpush1.bf16.msra.mxu1 %v16407_v1  ;;  %v16455_v25 = vld [vmem:[%s20968_s7 + $0xe08] ss:$16 sps:$4 sm:$0xff]   ;;  %v8625_v1 = vrot.slane %v18431_v38, 2 }
 0x653   : > { %8524 = vmatprep.subr.bf16.mxu0 %v16412_v19  ;;  %8565 = vmatprep.subr.bf16.mxu1 %v16415_v8  ;;  %v16463_v19 = vld [vmem:[%s20968_s7 + $0xe2c] ss:$16 sps:$4 sm:$0xff]   ;;  %v16458_v8 = vld [vmem:[%s20968_s7 + $0xe20] ss:$16 sps:$4 sm:$0xff]  }
 0x654   : > { %v5935_v5 = vpop.f32.mrb[176].mxu0  ;;  %v5976_v39 = vpop.f32.mrb[224].mxu1  ;;  %8554 = vmatprep.mubr.bf16.mxu0 %v16974_v42  ;;  %8595 = vmatprep.mubr.bf16.mxu1 %v16974_v42 }
 0x655   : > { %v5983_v27 = vadd.f32 %v5935_v5, %v5796_v6  ;;  %v5985_v28 = vadd.f32 %v5976_v39, %v5798_v57  ;;  %v5937_v60 = vpop.f32.mrb[177].mxu0  ;;  %v5978_v35 = vpop.f32.mrb[225].mxu1 }
 0x656   : > { %v5984_v31 = vadd.f32 %v5937_v60, %v5797_v56  ;;  %v5986_v54 = vadd.f32 %v5978_v35, %v5799_v49  ;;  %v5939_v63 = vpop.f32.mrb[178].mxu0  ;;  %v5980_v15 = vpop.f32.mrb[226].mxu1  ;;  %8525 = vmatpush1.bf16.msra.mxu0 %v16410_v48  ;;  %8566 = vmatpush1.bf16.msra.mxu1 %v16413_v18  ;;  %v16461_v48 = vld [vmem:[%s20968_s7 + $0xe28] ss:$16 sps:$4 sm:$0xff]   ;;  %v16466_v18 = vld [vmem:[%s20968_s7 + $0xe44] ss:$16 sps:$4 sm:$0xff]  }
 0x657   : > { %v5940_v32 = vpop.f32.mrb[179].mxu0  ;;  %v5981_v10 = vpop.f32.mrb[227].mxu1  ;;  %8526 = vmatprep.subr.bf16.mxu0 %v16418_v37  ;;  %8567 = vmatprep.subr.bf16.mxu1 %v16421_v62  ;;  %v16469_v37 = vld [vmem:[%s20968_s7 + $0xe4c] ss:$16 sps:$4 sm:$0xff]   ;;  %v16464_v15 = vld [vmem:[%s20968_s7 + $0xe40] ss:$16 sps:$4 sm:$0xff]  }
 0x658   : > { %v16472_v10 = vld [vmem:[%s20968_s7 + $0xe64] ss:$16 sps:$4 sm:$0xff]  }
 0x65a   : > { %8527 = vmatpush1.bf16.msra.mxu0 %v16416_v59  ;;  %8568 = vmatpush1.bf16.msra.mxu1 %v16419_v34  ;;  %v16467_v59 = vld [vmem:[%s20968_s7 + $0xe48] ss:$16 sps:$4 sm:$0xff]  }
 0x65b   : > { %8528 = vmatprep.subr.bf16.mxu0 %v16424_v53  ;;  %8569 = vmatprep.subr.bf16.mxu1 %v16427_v2  ;;  %v16475_v53 = vld [vmem:[%s20968_s7 + $0xe6c] ss:$16 sps:$4 sm:$0xff]   ;;  %v16470_v2 = vld [vmem:[%s20968_s7 + $0xe60] ss:$16 sps:$4 sm:$0xff]  }
 0x65e   : > { %8529 = vmatpush1.bf16.msra.mxu0 %v16422_v4  ;;  %8570 = vmatpush1.bf16.msra.mxu1 %v16425_v43  ;;  %v16473_v4 = vld [vmem:[%s20968_s7 + $0xe68] ss:$16 sps:$4 sm:$0xff]   ;;  %v16478_v43 = vld [vmem:[%s20968_s7 + $0xe84] ss:$16 sps:$4 sm:$0xff]  }
 0x65f   : > { %8709 = vmatprep.subr.bf16.mxu0 %v16430_v45  ;;  %8750 = vmatprep.subr.bf16.mxu1 %v16433_v3  ;;  %v16481_v45 = vld [vmem:[%s20968_s7 + $0xe8c] ss:$16 sps:$4 sm:$0xff]   ;;  %v16476_v3 = vld [vmem:[%s20968_s7 + $0xe80] ss:$16 sps:$4 sm:$0xff]  }
 0x661   : > { %14055 = vmatmul.mubr.msk.bf16.vlgmr.msra.gmra.mrb[232].mxu0 %vm1452_vm1, %v8438_v51  ;;  %14056 = vmatmul.mubr.msk.bf16.vlgmr.msra.gmra.mrb[24].mxu1 %vm1452_vm1, %v8438_v51  ;;  %v16484_v51 = vld [vmem:[%s20968_s7 + $0xea4] ss:$16 sps:$4 sm:$0xff]  }
 0x662   : > { %8710 = vmatpush1.bf16.msra.mxu0 %v16428_v55  ;;  %8751 = vmatpush1.bf16.msra.mxu1 %v16431_v29  ;;  %v16479_v55 = vld [vmem:[%s20968_s7 + $0xe88] ss:$16 sps:$4 sm:$0xff]   ;;  %v8812_v29 = vrot.slane %v18431_v38, 4 }
 0x663   : > { %8711 = vmatprep.subr.bf16.mxu0 %v16436_v41  ;;  %8752 = vmatprep.subr.bf16.mxu1 %v16439_v9  ;;  %v16487_v41 = vld [vmem:[%s20968_s7 + $0xeac] ss:$16 sps:$4 sm:$0xff]   ;;  %v16482_v9 = vld [vmem:[%s20968_s7 + $0xea0] ss:$16 sps:$4 sm:$0xff]  }
 0x664   : > { %v6121_v20 = vpop.f32.mrb[180].mxu0  ;;  %v6162_v26 = vpop.f32.mrb[228].mxu1  ;;  %8741 = vmatprep.mubr.bf16.mxu0 %v16974_v42  ;;  %8782 = vmatprep.mubr.bf16.mxu1 %v16974_v42 }
 0x665   : > { %v6169_v0 = vadd.f32 %v6121_v20, %v5983_v27  ;;  %v6171_v6 = vadd.f32 %v6162_v26, %v5985_v28  ;;  %v6123_v57 = vpop.f32.mrb[181].mxu0  ;;  %v6164_v44 = vpop.f32.mrb[229].mxu1 }
 0x666   : > { %v6170_v33 = vadd.f32 %v6123_v57, %v5984_v31  ;;  %v6172_v56 = vadd.f32 %v6164_v44, %v5986_v54  ;;  %v6125_v49 = vpop.f32.mrb[182].mxu0  ;;  %v6166_v58 = vpop.f32.mrb[230].mxu1  ;;  %8712 = vmatpush1.bf16.msra.mxu0 %v16434_v16  ;;  %8753 = vmatpush1.bf16.msra.mxu1 %v16437_v13  ;;  %v16485_v16 = vld [vmem:[%s20968_s7 + $0xea8] ss:$16 sps:$4 sm:$0xff]   ;;  %v16490_v13 = vld [vmem:[%s20968_s7 + $0xec4] ss:$16 sps:$4 sm:$0xff]  }
 0x667   : > { %v6126_v24 = vpop.f32.mrb[183].mxu0  ;;  %v6167_v46 = vpop.f32.mrb[231].mxu1  ;;  %8713 = vmatprep.subr.bf16.mxu0 %v16442_v47  ;;  %8754 = vmatprep.subr.bf16.mxu1 %v16445_v36  ;;  %v16493_v47 = vld [vmem:[%s20968_s7 + $0xecc] ss:$16 sps:$4 sm:$0xff]   ;;  %v16488_v58 = vld [vmem:[%s20968_s7 + $0xec0] ss:$16 sps:$4 sm:$0xff]  }
 0x668   : > { %v16496_v46 = vld [vmem:[%s20968_s7 + $0xee4] ss:$16 sps:$4 sm:$0xff]  }
 0x66a   : > { %8714 = vmatpush1.bf16.msra.mxu0 %v16440_v40  ;;  %8755 = vmatpush1.bf16.msra.mxu1 %v16443_v11  ;;  %v16491_v40 = vld [vmem:[%s20968_s7 + $0xec8] ss:$16 sps:$4 sm:$0xff]  }
 0x66b   : > { %8715 = vmatprep.subr.bf16.mxu0 %v16448_v21  ;;  %8756 = vmatprep.subr.bf16.mxu1 %v16451_v52  ;;  %v16499_v21 = vld [vmem:[%s20968_s7 + $0xeec] ss:$16 sps:$4 sm:$0xff]   ;;  %v16494_v52 = vld [vmem:[%s20968_s7 + $0xee0] ss:$16 sps:$4 sm:$0xff]  }
 0x66e   : > { %8716 = vmatpush1.bf16.msra.mxu0 %v16446_v17  ;;  %8757 = vmatpush1.bf16.msra.mxu1 %v16449_v61  ;;  %v16497_v17 = vld [vmem:[%s20968_s7 + $0xee8] ss:$16 sps:$4 sm:$0xff]   ;;  %v16502_v61 = vld [vmem:[%s20968_s7 + $0xf04] ss:$16 sps:$4 sm:$0xff]  }
 0x66f   : > { %8896 = vmatprep.subr.bf16.mxu0 %v16454_v12  ;;  %8937 = vmatprep.subr.bf16.mxu1 %v16457_v14  ;;  %v16505_v12 = vld [vmem:[%s20968_s7 + $0xf0c] ss:$16 sps:$4 sm:$0xff]   ;;  %v16500_v14 = vld [vmem:[%s20968_s7 + $0xf00] ss:$16 sps:$4 sm:$0xff]  }
 0x671   : > { %14089 = vmatmul.mubr.msk.bf16.vlgmr.msra.gmra.mrb[236].mxu0 %vm1452_vm1, %v8625_v1  ;;  %14090 = vmatmul.mubr.msk.bf16.vlgmr.msra.gmra.mrb[28].mxu1 %vm1452_vm1, %v8625_v1  ;;  %v16508_v1 = vld [vmem:[%s20968_s7 + $0xf24] ss:$16 sps:$4 sm:$0xff]  }
 0x672   : > { %8897 = vmatpush1.bf16.msra.mxu0 %v16452_v23  ;;  %8938 = vmatpush1.bf16.msra.mxu1 %v16455_v25  ;;  %v16503_v23 = vld [vmem:[%s20968_s7 + $0xf08] ss:$16 sps:$4 sm:$0xff]   ;;  %v8999_v25 = vrot.slane %v19675_v7, 4 }
 0x673   : > { %8898 = vmatprep.subr.bf16.mxu0 %v16460_v30  ;;  %8939 = vmatprep.subr.bf16.mxu1 %v16463_v19  ;;  %v16511_v30 = vld [vmem:[%s20968_s7 + $0xf2c] ss:$16 sps:$4 sm:$0xff]   ;;  %v16506_v19 = vld [vmem:[%s20968_s7 + $0xf20] ss:$16 sps:$4 sm:$0xff]  }
 0x674   : > { %v6309_v62 = vpop.f32.mrb[184].mxu0  ;;  %v6350_v5 = vpop.f32.mrb[232].mxu1  ;;  %8928 = vmatprep.mubr.bf16.mxu0 %v16974_v42  ;;  %8969 = vmatprep.mubr.bf16.mxu1 %v16974_v42 }
 0x675   : > { %v6357_v39 = vadd.f32 %v6309_v62, %v6169_v0  ;;  %v6359_v27 = vadd.f32 %v6350_v5, %v6171_v6  ;;  %v6311_v28 = vpop.f32.mrb[185].mxu0  ;;  %v6352_v60 = vpop.f32.mrb[233].mxu1 }
 0x676   : > { %v6358_v35 = vadd.f32 %v6311_v28, %v6170_v33  ;;  %v6360_v31 = vadd.f32 %v6352_v60, %v6172_v56  ;;  %v6313_v54 = vpop.f32.mrb[186].mxu0  ;;  %v6354_v63 = vpop.f32.mrb[234].mxu1  ;;  %8899 = vmatpush1.bf16.msra.mxu0 %v16458_v8  ;;  %8940 = vmatpush1.bf16.msra.mxu1 %v16461_v48  ;;  %v16509_v8 = vld [vmem:[%s20968_s7 + $0xf28] ss:$16 sps:$4 sm:$0xff]   ;;  %v16514_v48 = vld [vmem:[%s20968_s7 + $0xf44] ss:$16 sps:$4 sm:$0xff]  }
 0x677   : > { %v6314_v34 = vpop.f32.mrb[187].mxu0  ;;  %v6355_v32 = vpop.f32.mrb[235].mxu1  ;;  %8900 = vmatprep.subr.bf16.mxu0 %v16466_v18  ;;  %8941 = vmatprep.subr.bf16.mxu1 %v16469_v37  ;;  %v16517_v18 = vld [vmem:[%s20968_s7 + $0xf4c] ss:$16 sps:$4 sm:$0xff]   ;;  %v16512_v63 = vld [vmem:[%s20968_s7 + $0xf40] ss:$16 sps:$4 sm:$0xff]  }
 0x678   : > { %v16520_v32 = vld [vmem:[%s20968_s7 + $0xf64] ss:$16 sps:$4 sm:$0xff]  }
 0x67a   : > { %8901 = vmatpush1.bf16.msra.mxu0 %v16464_v15  ;;  %8942 = vmatpush1.bf16.msra.mxu1 %v16467_v59  ;;  %v16515_v15 = vld [vmem:[%s20968_s7 + $0xf48] ss:$16 sps:$4 sm:$0xff]  }
 0x67b   : > { %8902 = vmatprep.subr.bf16.mxu0 %v16472_v10  ;;  %8943 = vmatprep.subr.bf16.mxu1 %v16475_v53  ;;  %v16523_v10 = vld [vmem:[%s20968_s7 + $0xf6c] ss:$16 sps:$4 sm:$0xff]   ;;  %v16518_v53 = vld [vmem:[%s20968_s7 + $0xf60] ss:$16 sps:$4 sm:$0xff]  }
 0x67e   : > { %8903 = vmatpush1.bf16.msra.mxu0 %v16470_v2  ;;  %8944 = vmatpush1.bf16.msra.mxu1 %v16473_v4  ;;  %v16521_v2 = vld [vmem:[%s20968_s7 + $0xf68] ss:$16 sps:$4 sm:$0xff]   ;;  %v16526_v4 = vld [vmem:[%s20968_s7 + $0xf84] ss:$16 sps:$4 sm:$0xff]  }
 0x67f   : > { %9083 = vmatprep.subr.bf16.mxu0 %v16478_v43  ;;  %9124 = vmatprep.subr.bf16.mxu1 %v16481_v45  ;;  %v16529_v43 = vld [vmem:[%s20968_s7 + $0xf8c] ss:$16 sps:$4 sm:$0xff]   ;;  %v16524_v45 = vld [vmem:[%s20968_s7 + $0xf80] ss:$16 sps:$4 sm:$0xff]  }
 0x681   : > { %14123 = vmatmul.mubr.msk.bf16.vlgmr.msra.gmra.mrb[240].mxu0 %vm1452_vm1, %v8812_v29  ;;  %14124 = vmatmul.mubr.msk.bf16.vlgmr.msra.gmra.mrb[32].mxu1 %vm1452_vm1, %v8812_v29  ;;  %v16532_v29 = vld [vmem:[%s20968_s7 + $0xfa4] ss:$16 sps:$4 sm:$0xff]  }
 0x682   : > { %9084 = vmatpush1.bf16.msra.mxu0 %v16476_v3  ;;  %9125 = vmatpush1.bf16.msra.mxu1 %v16479_v55  ;;  %v16527_v3 = vld [vmem:[%s20968_s7 + $0xf88] ss:$16 sps:$4 sm:$0xff]   ;;  %v9186_v55 = vrot.slane %v18431_v38, 5 }
 0x683   : > { %9085 = vmatprep.subr.bf16.mxu0 %v16484_v51  ;;  %9126 = vmatprep.subr.bf16.mxu1 %v16487_v41  ;;  %v16535_v51 = vld [vmem:[%s20968_s7 + $0xfac] ss:$16 sps:$4 sm:$0xff]   ;;  %v16530_v41 = vld [vmem:[%s20968_s7 + $0xfa0] ss:$16 sps:$4 sm:$0xff]  }
 0x684   : > { %v6498_v36 = vpop.f32.mrb[188].mxu0  ;;  %v6539_v20 = vpop.f32.mrb[236].mxu1  ;;  %9115 = vmatprep.mubr.bf16.mxu0 %v16974_v42  ;;  %9156 = vmatprep.mubr.bf16.mxu1 %v16974_v42 }
 0x685   : > { %v6546_v26 = vadd.f32 %v6498_v36, %v6357_v39  ;;  %v6548_v0 = vadd.f32 %v6539_v20, %v6359_v27  ;;  %v6500_v6 = vpop.f32.mrb[189].mxu0  ;;  %v6541_v57 = vpop.f32.mrb[237].mxu1 }
 0x686   : > { %v6547_v44 = vadd.f32 %v6500_v6, %v6358_v35  ;;  %v6549_v33 = vadd.f32 %v6541_v57, %v6360_v31  ;;  %v6502_v56 = vpop.f32.mrb[190].mxu0  ;;  %v6543_v49 = vpop.f32.mrb[238].mxu1  ;;  %9086 = vmatpush1.bf16.msra.mxu0 %v16482_v9  ;;  %9127 = vmatpush1.bf16.msra.mxu1 %v16485_v16  ;;  %v16533_v9 = vld [vmem:[%s20968_s7 + $0xfa8] ss:$16 sps:$4 sm:$0xff]   ;;  %v16538_v16 = vld [vmem:[%s20968_s7 + $0xfc4] ss:$16 sps:$4 sm:$0xff]  }
 0x687   : > { %v6503_v11 = vpop.f32.mrb[191].mxu0  ;;  %v6544_v24 = vpop.f32.mrb[239].mxu1  ;;  %9087 = vmatprep.subr.bf16.mxu0 %v16490_v13  ;;  %9128 = vmatprep.subr.bf16.mxu1 %v16493_v47  ;;  %v16541_v13 = vld [vmem:[%s20968_s7 + $0xfcc] ss:$16 sps:$4 sm:$0xff]   ;;  %v16536_v49 = vld [vmem:[%s20968_s7 + $0xfc0] ss:$16 sps:$4 sm:$0xff]  }
 0x688   : > { %v16544_v24 = vld [vmem:[%s20968_s7 + $0xfe4] ss:$16 sps:$4 sm:$0xff]  }
 0x68a   : > { %9088 = vmatpush1.bf16.msra.mxu0 %v16488_v58  ;;  %9129 = vmatpush1.bf16.msra.mxu1 %v16491_v40  ;;  %v16539_v58 = vld [vmem:[%s20968_s7 + $0xfc8] ss:$16 sps:$4 sm:$0xff]  }
 0x68b   : > { %9089 = vmatprep.subr.bf16.mxu0 %v16496_v46  ;;  %9130 = vmatprep.subr.bf16.mxu1 %v16499_v21  ;;  %v16547_v46 = vld [vmem:[%s20968_s7 + $0xfec] ss:$16 sps:$4 sm:$0xff]   ;;  %v16542_v21 = vld [vmem:[%s20968_s7 + $0xfe0] ss:$16 sps:$4 sm:$0xff]  }
 0x68e   : > { %9090 = vmatpush1.bf16.msra.mxu0 %v16494_v52  ;;  %9131 = vmatpush1.bf16.msra.mxu1 %v16497_v17  ;;  %v16545_v52 = vld [vmem:[%s20968_s7 + $0xfe8] ss:$16 sps:$4 sm:$0xff]   ;;  %v16550_v17 = vld [vmem:[%s20968_s7 + $0x1004] ss:$16 sps:$4 sm:$0xff]  }
 0x68f   : > { %9270 = vmatprep.subr.bf16.mxu0 %v16502_v61  ;;  %9311 = vmatprep.subr.bf16.mxu1 %v16505_v12  ;;  %v16553_v61 = vld [vmem:[%s20968_s7 + $0x100c] ss:$16 sps:$4 sm:$0xff]   ;;  %v16548_v12 = vld [vmem:[%s20968_s7 + $0x1000] ss:$16 sps:$4 sm:$0xff]  }
 0x691   : > { %14157 = vmatmul.mubr.msk.bf16.vlgmr.msra.gmra.mrb[244].mxu0 %vm1452_vm1, %v8999_v25  ;;  %14158 = vmatmul.mubr.msk.bf16.vlgmr.msra.gmra.mrb[36].mxu1 %vm1452_vm1, %v8999_v25  ;;  %v16556_v25 = vld [vmem:[%s20968_s7 + $0x1024] ss:$16 sps:$4 sm:$0xff]  }
 0x692   : > { %9271 = vmatpush1.bf16.msra.mxu0 %v16500_v14  ;;  %9312 = vmatpush1.bf16.msra.mxu1 %v16503_v23  ;;  %v16551_v14 = vld [vmem:[%s20968_s7 + $0x1008] ss:$16 sps:$4 sm:$0xff]   ;;  %v9373_v23 = vrot.slane %v19675_v7, 5 }
 0x693   : > { %9272 = vmatprep.subr.bf16.mxu0 %v16508_v1  ;;  %9313 = vmatprep.subr.bf16.mxu1 %v16511_v30  ;;  %v16559_v1 = vld [vmem:[%s20968_s7 + $0x102c] ss:$16 sps:$4 sm:$0xff]   ;;  %v16554_v30 = vld [vmem:[%s20968_s7 + $0x1020] ss:$16 sps:$4 sm:$0xff]  }
 0x694   : > { %v6685_v37 = vpop.f32.mrb[192].mxu0  ;;  %v6726_v62 = vpop.f32.mrb[240].mxu1  ;;  %9302 = vmatprep.mubr.bf16.mxu0 %v16974_v42  ;;  %9343 = vmatprep.mubr.bf16.mxu1 %v16974_v42 }
 0x695   : > { %v6733_v5 = vadd.f32 %v6685_v37, %v6546_v26  ;;  %v6735_v39 = vadd.f32 %v6726_v62, %v6548_v0  ;;  %v6687_v27 = vpop.f32.mrb[193].mxu0  ;;  %v6728_v28 = vpop.f32.mrb[241].mxu1 }
 0x696   : > { %v6734_v60 = vadd.f32 %v6687_v27, %v6547_v44  ;;  %v6736_v35 = vadd.f32 %v6728_v28, %v6549_v33  ;;  %v6689_v31 = vpop.f32.mrb[194].mxu0  ;;  %v6730_v54 = vpop.f32.mrb[242].mxu1  ;;  %9273 = vmatpush1.bf16.msra.mxu0 %v16506_v19  ;;  %9314 = vmatpush1.bf16.msra.mxu1 %v16509_v8  ;;  %v16557_v19 = vld [vmem:[%s20968_s7 + $0x1028] ss:$16 sps:$4 sm:$0xff]   ;;  %v16562_v8 = vld [vmem:[%s20968_s7 + $0x1044] ss:$16 sps:$4 sm:$0xff]  }
 0x697   : > { %v6690_v59 = vpop.f32.mrb[195].mxu0  ;;  %v6731_v34 = vpop.f32.mrb[243].mxu1  ;;  %9274 = vmatprep.subr.bf16.mxu0 %v16514_v48  ;;  %9315 = vmatprep.subr.bf16.mxu1 %v16517_v18  ;;  %v16565_v48 = vld [vmem:[%s20968_s7 + $0x104c] ss:$16 sps:$4 sm:$0xff]   ;;  %v16560_v54 = vld [vmem:[%s20968_s7 + $0x1040] ss:$16 sps:$4 sm:$0xff]  }
 0x698   : > { %v16568_v34 = vld [vmem:[%s20968_s7 + $0x1064] ss:$16 sps:$4 sm:$0xff]  }
 0x69a   : > { %9275 = vmatpush1.bf16.msra.mxu0 %v16512_v63  ;;  %9316 = vmatpush1.bf16.msra.mxu1 %v16515_v15  ;;  %v16563_v63 = vld [vmem:[%s20968_s7 + $0x1048] ss:$16 sps:$4 sm:$0xff]  }
 0x69b   : > { %9276 = vmatprep.subr.bf16.mxu0 %v16520_v32  ;;  %9317 = vmatprep.subr.bf16.mxu1 %v16523_v10  ;;  %v16571_v32 = vld [vmem:[%s20968_s7 + $0x106c] ss:$16 sps:$4 sm:$0xff]   ;;  %v16566_v10 = vld [vmem:[%s20968_s7 + $0x1060] ss:$16 sps:$4 sm:$0xff]  }
 0x69e   : > { %9277 = vmatpush1.bf16.msra.mxu0 %v16518_v53  ;;  %9318 = vmatpush1.bf16.msra.mxu1 %v16521_v2  ;;  %v16569_v53 = vld [vmem:[%s20968_s7 + $0x1068] ss:$16 sps:$4 sm:$0xff]   ;;  %v16574_v2 = vld [vmem:[%s20968_s7 + $0x1084] ss:$16 sps:$4 sm:$0xff]  }
 0x69f   : > { %9457 = vmatprep.subr.bf16.mxu0 %v16526_v4  ;;  %9498 = vmatprep.subr.bf16.mxu1 %v16529_v43  ;;  %v16577_v4 = vld [vmem:[%s20968_s7 + $0x108c] ss:$16 sps:$4 sm:$0xff]   ;;  %v16572_v43 = vld [vmem:[%s20968_s7 + $0x1080] ss:$16 sps:$4 sm:$0xff]  }
 0x6a1   : > { %14191 = vmatmul.mubr.msk.bf16.vlgmr.msra.gmra.mrb[248].mxu0 %vm1452_vm1, %v9186_v55  ;;  %14192 = vmatmul.mubr.msk.bf16.vlgmr.msra.gmra.mrb[40].mxu1 %vm1452_vm1, %v9186_v55  ;;  %v16580_v55 = vld [vmem:[%s20968_s7 + $0x10a4] ss:$16 sps:$4 sm:$0xff]  }
 0x6a2   : > { %9458 = vmatpush1.bf16.msra.mxu0 %v16524_v45  ;;  %9499 = vmatpush1.bf16.msra.mxu1 %v16527_v3  ;;  %v16575_v45 = vld [vmem:[%s20968_s7 + $0x1088] ss:$16 sps:$4 sm:$0xff]   ;;  %v9560_v3 = vrot.slane %v18431_v38, 6 }
 0x6a3   : > { %9459 = vmatprep.subr.bf16.mxu0 %v16532_v29  ;;  %9500 = vmatprep.subr.bf16.mxu1 %v16535_v51  ;;  %v16583_v29 = vld [vmem:[%s20968_s7 + $0x10ac] ss:$16 sps:$4 sm:$0xff]   ;;  %v16578_v51 = vld [vmem:[%s20968_s7 + $0x10a0] ss:$16 sps:$4 sm:$0xff]  }
 0x6a4   : > { %v6872_v47 = vpop.f32.mrb[196].mxu0  ;;  %v6913_v36 = vpop.f32.mrb[244].mxu1  ;;  %9489 = vmatprep.mubr.bf16.mxu0 %v16974_v42  ;;  %9530 = vmatprep.mubr.bf16.mxu1 %v16974_v42 }
 0x6a5   : > { %v6920_v20 = vadd.f32 %v6872_v47, %v6733_v5  ;;  %v6922_v26 = vadd.f32 %v6913_v36, %v6735_v39  ;;  %v6874_v0 = vpop.f32.mrb[197].mxu0  ;;  %v6915_v6 = vpop.f32.mrb[245].mxu1 }
 0x6a6   : > { %v6921_v57 = vadd.f32 %v6874_v0, %v6734_v60  ;;  %v6923_v44 = vadd.f32 %v6915_v6, %v6736_v35  ;;  %v6876_v33 = vpop.f32.mrb[198].mxu0  ;;  %v6917_v56 = vpop.f32.mrb[246].mxu1  ;;  %9460 = vmatpush1.bf16.msra.mxu0 %v16530_v41  ;;  %9501 = vmatpush1.bf16.msra.mxu1 %v16533_v9  ;;  %v16581_v41 = vld [vmem:[%s20968_s7 + $0x10a8] ss:$16 sps:$4 sm:$0xff]   ;;  %v16586_v9 = vld [vmem:[%s20968_s7 + $0x10c4] ss:$16 sps:$4 sm:$0xff]  }
 0x6a7   : > { %v6877_v40 = vpop.f32.mrb[199].mxu0  ;;  %v6918_v11 = vpop.f32.mrb[247].mxu1  ;;  %9461 = vmatprep.subr.bf16.mxu0 %v16538_v16  ;;  %9502 = vmatprep.subr.bf16.mxu1 %v16541_v13  ;;  %v16589_v16 = vld [vmem:[%s20968_s7 + $0x10cc] ss:$16 sps:$4 sm:$0xff]   ;;  %v16584_v56 = vld [vmem:[%s20968_s7 + $0x10c0] ss:$16 sps:$4 sm:$0xff]  }
 0x6a8   : > { %v16592_v11 = vld [vmem:[%s20968_s7 + $0x10e4] ss:$16 sps:$4 sm:$0xff]  }
 0x6aa   : > { %9462 = vmatpush1.bf16.msra.mxu0 %v16536_v49  ;;  %9503 = vmatpush1.bf16.msra.mxu1 %v16539_v58  ;;  %v16587_v49 = vld [vmem:[%s20968_s7 + $0x10c8] ss:$16 sps:$4 sm:$0xff]  }
 0x6ab   : > { %9463 = vmatprep.subr.bf16.mxu0 %v16544_v24  ;;  %9504 = vmatprep.subr.bf16.mxu1 %v16547_v46  ;;  %v16595_v24 = vld [vmem:[%s20968_s7 + $0x10ec] ss:$16 sps:$4 sm:$0xff]   ;;  %v16590_v46 = vld [vmem:[%s20968_s7 + $0x10e0] ss:$16 sps:$4 sm:$0xff]  }
 0x6ae   : > { %9464 = vmatpush1.bf16.msra.mxu0 %v16542_v21  ;;  %9505 = vmatpush1.bf16.msra.mxu1 %v16545_v52  ;;  %v16593_v21 = vld [vmem:[%s20968_s7 + $0x10e8] ss:$16 sps:$4 sm:$0xff]   ;;  %v16598_v52 = vld [vmem:[%s20968_s7 + $0x1104] ss:$16 sps:$4 sm:$0xff]  }
 0x6af   : > { %9644 = vmatprep.subr.bf16.mxu0 %v16550_v17  ;;  %9685 = vmatprep.subr.bf16.mxu1 %v16553_v61  ;;  %v16601_v17 = vld [vmem:[%s20968_s7 + $0x110c] ss:$16 sps:$4 sm:$0xff]   ;;  %v16596_v61 = vld [vmem:[%s20968_s7 + $0x1100] ss:$16 sps:$4 sm:$0xff]  }
 0x6b1   : > { %14225 = vmatmul.mubr.msk.bf16.vlgmr.msra.gmra.mrb[252].mxu0 %vm1452_vm1, %v9373_v23  ;;  %14226 = vmatmul.mubr.msk.bf16.vlgmr.msra.gmra.mrb[44].mxu1 %vm1452_vm1, %v9373_v23  ;;  %v16604_v23 = vld [vmem:[%s20968_s7 + $0x1124] ss:$16 sps:$4 sm:$0xff]  }
 0x6b2   : > { %9645 = vmatpush1.bf16.msra.mxu0 %v16548_v12  ;;  %9686 = vmatpush1.bf16.msra.mxu1 %v16551_v14  ;;  %v16599_v12 = vld [vmem:[%s20968_s7 + $0x1108] ss:$16 sps:$4 sm:$0xff]   ;;  %v9747_v14 = vrot.slane %v19675_v7, 6  ;;  %v16602_v7 = vld [vmem:[%s20968_s7 + $0x1120] ss:$16 sps:$4 sm:$0xff]  }
 0x6b3   : > { %9646 = vmatprep.subr.bf16.mxu0 %v16556_v25  ;;  %9687 = vmatprep.subr.bf16.mxu1 %v16559_v1  ;;  %v16607_v25 = vld [vmem:[%s20968_s7 + $0x112c] ss:$16 sps:$4 sm:$0xff]   ;;  %v16605_v1 = vld [vmem:[%s20968_s7 + $0x1128] ss:$16 sps:$4 sm:$0xff]  }
 0x6b4   : > { %v7059_v18 = vpop.f32.mrb[200].mxu0  ;;  %v7100_v37 = vpop.f32.mrb[248].mxu1  ;;  %9676 = vmatprep.mubr.bf16.mxu0 %v16974_v42  ;;  %9717 = vmatprep.mubr.bf16.mxu1 %v16974_v42 }
 0x6b5   : > { %v7107_v62 = vadd.f32 %v7059_v18, %v6920_v20  ;;  %v7109_v5 = vadd.f32 %v7100_v37, %v6922_v26  ;;  %v7061_v39 = vpop.f32.mrb[201].mxu0  ;;  %v7102_v27 = vpop.f32.mrb[249].mxu1 }
 0x6b6   : > { %v7108_v28 = vadd.f32 %v7061_v39, %v6921_v57  ;;  %v7110_v60 = vadd.f32 %v7102_v27, %v6923_v44  ;;  %v7063_v35 = vpop.f32.mrb[202].mxu0  ;;  %v7104_v31 = vpop.f32.mrb[250].mxu1  ;;  %9647 = vmatpush1.bf16.msra.mxu0 %v16554_v30  ;;  %9688 = vmatpush1.bf16.msra.mxu1 %v16557_v19  ;;  %v16610_v30 = vld [vmem:[%s20968_s7 + $0x1144] ss:$16 sps:$4 sm:$0xff]   ;;  %v16613_v19 = vld [vmem:[%s20968_s7 + $0x114c] ss:$16 sps:$4 sm:$0xff]  }
 0x6b7   : > { %v7064_v15 = vpop.f32.mrb[203].mxu0  ;;  %v7105_v59 = vpop.f32.mrb[251].mxu1  ;;  %9648 = vmatprep.subr.bf16.mxu0 %v16562_v8  ;;  %9689 = vmatprep.subr.bf16.mxu1 %v16565_v48  ;;  %v16608_v35 = vld [vmem:[%s20968_s7 + $0x1140] ss:$16 sps:$4 sm:$0xff]   ;;  %v16611_v31 = vld [vmem:[%s20968_s7 + $0x1148] ss:$16 sps:$4 sm:$0xff]  }
 0x6b8   : > { %v16616_v15 = vld [vmem:[%s20968_s7 + $0x1164] ss:$16 sps:$4 sm:$0xff]   ;;  %v16619_v59 = vld [vmem:[%s20968_s7 + $0x116c] ss:$16 sps:$4 sm:$0xff]  }
 0x6ba   : > { %9649 = vmatpush1.bf16.msra.mxu0 %v16560_v54  ;;  %9690 = vmatpush1.bf16.msra.mxu1 %v16563_v63 }
 0x6bb   : > { %9650 = vmatprep.subr.bf16.mxu0 %v16568_v34  ;;  %9691 = vmatprep.subr.bf16.mxu1 %v16571_v32  ;;  %v16614_v34 = vld [vmem:[%s20968_s7 + $0x1160] ss:$16 sps:$4 sm:$0xff]   ;;  %v16617_v32 = vld [vmem:[%s20968_s7 + $0x1168] ss:$16 sps:$4 sm:$0xff]  }
 0x6be   : > { %9651 = vmatpush1.bf16.msra.mxu0 %v16566_v10  ;;  %9692 = vmatpush1.bf16.msra.mxu1 %v16569_v53  ;;  %v16622_v10 = vld [vmem:[%s20968_s7 + $0x1184] ss:$16 sps:$4 sm:$0xff]   ;;  %v16625_v53 = vld [vmem:[%s20968_s7 + $0x118c] ss:$16 sps:$4 sm:$0xff]  }
 0x6bf   : > { %9831 = vmatprep.subr.bf16.mxu0 %v16574_v2  ;;  %9872 = vmatprep.subr.bf16.mxu1 %v16577_v4  ;;  %v16620_v2 = vld [vmem:[%s20968_s7 + $0x1180] ss:$16 sps:$4 sm:$0xff]   ;;  %v16623_v4 = vld [vmem:[%s20968_s7 + $0x1188] ss:$16 sps:$4 sm:$0xff]  }
 0x6c1   : > { %14259 = vmatmul.mubr.msk.bf16.vlgmr.msra.gmra.mrb[0].mxu0 %vm1452_vm1, %v9560_v3  ;;  %14260 = vmatmul.mubr.msk.bf16.vlgmr.msra.gmra.mrb[48].mxu1 %vm1452_vm1, %v9560_v3  ;;  %v16631_v3 = vld [vmem:[%s20968_s7 + $0x11ac] ss:$16 sps:$4 sm:$0xff]  }
 0x6c2   : > { %9832 = vmatpush1.bf16.msra.mxu0 %v16572_v43  ;;  %9873 = vmatpush1.bf16.msra.mxu1 %v16575_v45  ;;  %v9934_v43 = vrot.slane %v18431_v38, 7  ;;  %v16628_v45 = vld [vmem:[%s20968_s7 + $0x11a4] ss:$16 sps:$4 sm:$0xff]   ;;  %v16626_v38 = vld [vmem:[%s20968_s7 + $0x11a0] ss:$16 sps:$4 sm:$0xff]  }
 0x6c3   : > { %9833 = vmatprep.subr.bf16.mxu0 %v16580_v55  ;;  %9874 = vmatprep.subr.bf16.mxu1 %v16583_v29  ;;  %v16629_v55 = vld [vmem:[%s20968_s7 + $0x11a8] ss:$16 sps:$4 sm:$0xff]   ;;  %v16634_v29 = vld [vmem:[%s20968_s7 + $0x11c4] ss:$16 sps:$4 sm:$0xff]  }
 0x6c4   : > { %v7246_v13 = vpop.f32.mrb[204].mxu0  ;;  %v7287_v47 = vpop.f32.mrb[252].mxu1  ;;  %9863 = vmatprep.mubr.bf16.mxu0 %v16974_v42  ;;  %9904 = vmatprep.mubr.bf16.mxu1 %v16974_v42 }
 0x6c5   : > { %v7294_v36 = vadd.f32 %v7246_v13, %v7107_v62  ;;  %v7296_v20 = vadd.f32 %v7287_v47, %v7109_v5  ;;  %v7248_v26 = vpop.f32.mrb[205].mxu0  ;;  %v7289_v0 = vpop.f32.mrb[253].mxu1 }
 0x6c6   : > { %v7295_v6 = vadd.f32 %v7248_v26, %v7108_v28  ;;  %v7297_v57 = vadd.f32 %v7289_v0, %v7110_v60  ;;  %v7250_v44 = vpop.f32.mrb[206].mxu0  ;;  %v7291_v33 = vpop.f32.mrb[254].mxu1  ;;  %9834 = vmatpush1.bf16.msra.mxu0 %v16578_v51  ;;  %9875 = vmatpush1.bf16.msra.mxu1 %v16581_v41  ;;  %v16637_v51 = vld [vmem:[%s20968_s7 + $0x11cc] ss:$16 sps:$4 sm:$0xff]  }
 0x6c7   : > { %v7251_v58 = vpop.f32.mrb[207].mxu0  ;;  %v7292_v40 = vpop.f32.mrb[255].mxu1  ;;  %9835 = vmatprep.subr.bf16.mxu0 %v16586_v9  ;;  %9876 = vmatprep.subr.bf16.mxu1 %v16589_v16  ;;  %v16635_v44 = vld [vmem:[%s20968_s7 + $0x11c8] ss:$16 sps:$4 sm:$0xff]  }
 0x6c8   : > { %v16643_v58 = vld [vmem:[%s20968_s7 + $0x11ec] ss:$16 sps:$4 sm:$0xff]   ;;  %v16638_v40 = vld [vmem:[%s20968_s7 + $0x11e0] ss:$16 sps:$4 sm:$0xff]  }
 0x6ca   : > { %9836 = vmatpush1.bf16.msra.mxu0 %v16584_v56  ;;  %9877 = vmatpush1.bf16.msra.mxu1 %v16587_v49  ;;  %v16640_v49 = vld [vmem:[%s20968_s7 + $0x11e4] ss:$16 sps:$4 sm:$0xff]  }
 0x6cb   : > { %9837 = vmatprep.subr.bf16.mxu0 %v16592_v11  ;;  %9878 = vmatprep.subr.bf16.mxu1 %v16595_v24  ;;  %v16641_v11 = vld [vmem:[%s20968_s7 + $0x11e8] ss:$16 sps:$4 sm:$0xff]   ;;  %v16646_v24 = vld [vmem:[%s20968_s7 + $0x1204] ss:$16 sps:$4 sm:$0xff]  }
 0x6ce   : > { %9838 = vmatpush1.bf16.msra.mxu0 %v16590_v46  ;;  %9879 = vmatpush1.bf16.msra.mxu1 %v16593_v21  ;;  %v16649_v46 = vld [vmem:[%s20968_s7 + $0x120c] ss:$16 sps:$4 sm:$0xff]   ;;  %v16644_v21 = vld [vmem:[%s20968_s7 + $0x1200] ss:$16 sps:$4 sm:$0xff]  }
 0x6cf   : > { %10018 = vmatprep.subr.bf16.mxu0 %v16598_v52  ;;  %10059 = vmatprep.subr.bf16.mxu1 %v16601_v17  ;;  %v16647_v52 = vld [vmem:[%s20968_s7 + $0x1208] ss:$16 sps:$4 sm:$0xff]   ;;  %v10122_v17 = vrot.slane %v18467_v22, 1 }
 0x6d1   : > { %14293 = vmatmul.mubr.msk.bf16.vlgmr.msra.gmra.mrb[4].mxu0 %vm1452_vm1, %v9747_v14  ;;  %14294 = vmatmul.mubr.msk.bf16.vlgmr.msra.gmra.mrb[52].mxu1 %vm1452_vm1, %v9747_v14  ;;  %v16650_v14 = vld [vmem:[%s20968_s7 + $0x1220] ss:$16 sps:$4 sm:$0xff]  }
 0x6d2   : > { %10019 = vmatpush1.bf16.msra.mxu0 %v16596_v61  ;;  %10060 = vmatpush1.bf16.msra.mxu1 %v16599_v12  ;;  %v16652_v61 = vld [vmem:[%s20968_s7 + $0x1224] ss:$16 sps:$4 sm:$0xff]   ;;  %v16655_v12 = vld [vmem:[%s20968_s7 + $0x122c] ss:$16 sps:$4 sm:$0xff]  }
 0x6d3   : > { %10020 = vmatprep.subr.bf16.mxu0 %v16604_v23  ;;  %10061 = vmatprep.subr.bf16.mxu1 %v16607_v25  ;;  %v16653_v23 = vld [vmem:[%s20968_s7 + $0x1228] ss:$16 sps:$4 sm:$0xff]   ;;  %v16658_v25 = vld [vmem:[%s20968_s7 + $0x1244] ss:$16 sps:$4 sm:$0xff]  }
 0x6d4   : > { %v7433_v8 = vpop.f32.mrb[208].mxu0  ;;  %v7474_v48 = vpop.f32.mrb[0].mxu1  ;;  %10050 = vmatprep.mubr.bf16.mxu0 %v16974_v42  ;;  %10091 = vmatprep.mubr.bf16.mxu1 %v16974_v42 }
 0x6d5   : > { %v7481_v18 = vadd.f32 %v7433_v8, %v7294_v36  ;;  %v7483_v37 = vadd.f32 %v7474_v48, %v7296_v20  ;;  %v7435_v62 = vpop.f32.mrb[209].mxu0  ;;  %v7476_v5 = vpop.f32.mrb[1].mxu1 }
 0x6d6   : > { %v7482_v39 = vadd.f32 %v7435_v62, %v7295_v6  ;;  %v7484_v27 = vadd.f32 %v7476_v5, %v7297_v57  ;;  %v7437_v28 = vpop.f32.mrb[210].mxu0  ;;  %v7478_v60 = vpop.f32.mrb[2].mxu1  ;;  %10021 = vmatpush1.bf16.msra.mxu0 %v16602_v7  ;;  %10062 = vmatpush1.bf16.msra.mxu1 %v16605_v1  ;;  %v16632_v57 = vld [vmem:[%s20968_s7 + $0x11c0] ss:$16 sps:$4 sm:$0xff]   ;;  %v16661_v7 = vld [vmem:[%s20968_s7 + $0x124c] ss:$16 sps:$4 sm:$0xff]  }
 0x6d7   : > { %v7438_v54 = vpop.f32.mrb[211].mxu0  ;;  %v7479_v63 = vpop.f32.mrb[3].mxu1  ;;  %10022 = vmatprep.subr.bf16.mxu0 %v16610_v30  ;;  %10063 = vmatprep.subr.bf16.mxu1 %v16613_v19  ;;  %v16659_v28 = vld [vmem:[%s20968_s7 + $0x1248] ss:$16 sps:$4 sm:$0xff]  }
 0x6d8   : > { %v16667_v54 = vld [vmem:[%s20968_s7 + $0x126c] ss:$16 sps:$4 sm:$0xff]   ;;  %v16662_v63 = vld [vmem:[%s20968_s7 + $0x1260] ss:$16 sps:$4 sm:$0xff]  }
 0x6da   : > { %10023 = vmatpush1.bf16.msra.mxu0 %v16608_v35  ;;  %10064 = vmatpush1.bf16.msra.mxu1 %v16611_v31  ;;  %v16664_v31 = vld [vmem:[%s20968_s7 + $0x1264] ss:$16 sps:$4 sm:$0xff]  }
 0x6db   : > { %10024 = vmatprep.subr.bf16.mxu0 %v16616_v15  ;;  %10065 = vmatprep.subr.bf16.mxu1 %v16619_v59  ;;  %v16665_v15 = vld [vmem:[%s20968_s7 + $0x1268] ss:$16 sps:$4 sm:$0xff]   ;;  %v20303_v59 = vshrl.u32 %v18467_v22, 16 }
 0x6de   : > { %10025 = vmatpush1.bf16.msra.mxu0 %v16614_v34  ;;  %10066 = vmatpush1.bf16.msra.mxu1 %v16617_v32  ;;  %v16670_v34 = vld [vmem:[%s20968_s7 + $0x1284] ss:$16 sps:$4 sm:$0xff]   ;;  %v16673_v32 = vld [vmem:[%s20968_s7 + $0x128c] ss:$16 sps:$4 sm:$0xff]  }
 0x6df   : > { %10206 = vmatprep.subr.bf16.mxu0 %v16622_v10  ;;  %10247 = vmatprep.subr.bf16.mxu1 %v16625_v53  ;;  %v16668_v10 = vld [vmem:[%s20968_s7 + $0x1280] ss:$16 sps:$4 sm:$0xff]   ;;  %v16671_v53 = vld [vmem:[%s20968_s7 + $0x1288] ss:$16 sps:$4 sm:$0xff]  }
 0x6e1   : > { %14327 = vmatmul.mubr.msk.bf16.vlgmr.msra.gmra.mrb[8].mxu0 %vm1452_vm1, %v9934_v43  ;;  %14328 = vmatmul.mubr.msk.bf16.vlgmr.msra.gmra.mrb[56].mxu1 %vm1452_vm1, %v9934_v43  ;;  %v16679_v43 = vld [vmem:[%s20968_s7 + $0x12ac] ss:$16 sps:$4 sm:$0xff]  }
 0x6e2   : > { %10207 = vmatpush1.bf16.msra.mxu0 %v16620_v2  ;;  %10248 = vmatpush1.bf16.msra.mxu1 %v16623_v4  ;;  %v10312_v2 = vrot.slane %v20303_v59, 1  ;;  %v16676_v4 = vld [vmem:[%s20968_s7 + $0x12a4] ss:$16 sps:$4 sm:$0xff]  }
 0x6e3   : > { %10208 = vmatprep.subr.bf16.mxu0 %v16628_v45  ;;  %10249 = vmatprep.subr.bf16.mxu1 %v16631_v3  ;;  %v16674_v45 = vld [vmem:[%s20968_s7 + $0x12a0] ss:$16 sps:$4 sm:$0xff]   ;;  %v16677_v3 = vld [vmem:[%s20968_s7 + $0x12a8] ss:$16 sps:$4 sm:$0xff]  }
 0x6e4   : > { %v7620_v41 = vpop.f32.mrb[212].mxu0  ;;  %v7661_v9 = vpop.f32.mrb[4].mxu1  ;;  %10238 = vmatprep.mubr.bf16.mxu0 %v16974_v42  ;;  %10279 = vmatprep.mubr.bf16.mxu1 %v16974_v42 }
 0x6e5   : > { %v7668_v16 = vadd.f32 %v7620_v41, %v7481_v18  ;;  %v7670_v13 = vadd.f32 %v7661_v9, %v7483_v37  ;;  %v7622_v47 = vpop.f32.mrb[213].mxu0  ;;  %v7663_v36 = vpop.f32.mrb[5].mxu1 }
 0x6e6   : > { %v7669_v20 = vadd.f32 %v7622_v47, %v7482_v39  ;;  %v7671_v26 = vadd.f32 %v7663_v36, %v7484_v27  ;;  %v7624_v0 = vpop.f32.mrb[214].mxu0  ;;  %v7665_v6 = vpop.f32.mrb[6].mxu1  ;;  %10209 = vmatpush1.bf16.msra.mxu0 %v16626_v38  ;;  %10250 = vmatpush1.bf16.msra.mxu1 %v16629_v55  ;;  %v16656_v27 = vld [vmem:[%s20968_s7 + $0x1240] ss:$16 sps:$4 sm:$0xff]   ;;  %v16682_v38 = vld [vmem:[%s20968_s7 + $0x12c4] ss:$16 sps:$4 sm:$0xff]  }
 0x6e7   : > { %v7625_v33 = vpop.f32.mrb[215].mxu0  ;;  %v7666_v56 = vpop.f32.mrb[7].mxu1  ;;  %10210 = vmatprep.subr.bf16.mxu0 %v16634_v29  ;;  %10251 = vmatprep.subr.bf16.mxu1 %v16637_v51  ;;  %v16685_v55 = vld [vmem:[%s20968_s7 + $0x12cc] ss:$16 sps:$4 sm:$0xff]   ;;  %v16680_v0 = vld [vmem:[%s20968_s7 + $0x12c0] ss:$16 sps:$4 sm:$0xff]  }
 0x6e8   : > { %v16683_v6 = vld [vmem:[%s20968_s7 + $0x12c8] ss:$16 sps:$4 sm:$0xff]   ;;  %v16688_v33 = vld [vmem:[%s20968_s7 + $0x12e4] ss:$16 sps:$4 sm:$0xff]   ;;  %v16691_v56 = vld [vmem:[%s20968_s7 + $0x12ec] ss:$16 sps:$4 sm:$0xff]  }
 0x6ea   : > { %10211 = vmatpush1.bf16.msra.mxu0 %v16632_v57  ;;  %10252 = vmatpush1.bf16.msra.mxu1 %v16635_v44 }
 0x6eb   : > { %10212 = vmatprep.subr.bf16.mxu0 %v16640_v49  ;;  %10253 = vmatprep.subr.bf16.mxu1 %v16643_v58  ;;  %v16686_v49 = vld [vmem:[%s20968_s7 + $0x12e0] ss:$16 sps:$4 sm:$0xff]   ;;  %v16689_v58 = vld [vmem:[%s20968_s7 + $0x12e8] ss:$16 sps:$4 sm:$0xff]  }
 0x6ee   : > { %10213 = vmatpush1.bf16.msra.mxu0 %v16638_v40  ;;  %10254 = vmatpush1.bf16.msra.mxu1 %v16641_v11  ;;  %v16694_v40 = vld [vmem:[%s20968_s7 + $0x1304] ss:$16 sps:$4 sm:$0xff]   ;;  %v16697_v11 = vld [vmem:[%s20968_s7 + $0x130c] ss:$16 sps:$4 sm:$0xff]  }
 0x6ef   : > { %10396 = vmatprep.subr.bf16.mxu0 %v16646_v24  ;;  %10437 = vmatprep.subr.bf16.mxu1 %v16649_v46  ;;  %v16692_v24 = vld [vmem:[%s20968_s7 + $0x1300] ss:$16 sps:$4 sm:$0xff]   ;;  %v16695_v46 = vld [vmem:[%s20968_s7 + $0x1308] ss:$16 sps:$4 sm:$0xff]  }
 0x6f1   : > { %14361 = vmatmul.mubr.msk.bf16.vlgmr.msra.gmra.mrb[12].mxu0 %vm1452_vm1, %v10122_v17  ;;  %14362 = vmatmul.mubr.msk.bf16.vlgmr.msra.gmra.mrb[60].mxu1 %vm1452_vm1, %v10122_v17  ;;  %v16703_v17 = vld [vmem:[%s20968_s7 + $0x132c] ss:$16 sps:$4 sm:$0xff]  }
 0x6f2   : > { %10397 = vmatpush1.bf16.msra.mxu0 %v16644_v21  ;;  %10438 = vmatpush1.bf16.msra.mxu1 %v16647_v52  ;;  %v10499_v21 = vrot.slane %v18467_v22, 2  ;;  %v16700_v52 = vld [vmem:[%s20968_s7 + $0x1324] ss:$16 sps:$4 sm:$0xff]  }
 0x6f3   : > { %10398 = vmatprep.subr.bf16.mxu0 %v16652_v61  ;;  %10439 = vmatprep.subr.bf16.mxu1 %v16655_v12  ;;  %v16698_v61 = vld [vmem:[%s20968_s7 + $0x1320] ss:$16 sps:$4 sm:$0xff]   ;;  %v16701_v12 = vld [vmem:[%s20968_s7 + $0x1328] ss:$16 sps:$4 sm:$0xff]  }
 0x6f4   : > { %v7807_v1 = vpop.f32.mrb[216].mxu0  ;;  %v7848_v30 = vpop.f32.mrb[8].mxu1  ;;  %10428 = vmatprep.mubr.bf16.mxu0 %v16974_v42  ;;  %10469 = vmatprep.mubr.bf16.mxu1 %v16974_v42 }
 0x6f5   : > { %v7855_v19 = vadd.f32 %v7807_v1, %v7668_v16  ;;  %v7857_v8 = vadd.f32 %v7848_v30, %v7670_v13  ;;  %v7809_v48 = vpop.f32.mrb[217].mxu0  ;;  %v7850_v18 = vpop.f32.mrb[9].mxu1 }
 0x6f6   : > { %v7856_v37 = vadd.f32 %v7809_v48, %v7669_v20  ;;  %v7858_v62 = vadd.f32 %v7850_v18, %v7671_v26  ;;  %v7811_v5 = vpop.f32.mrb[218].mxu0  ;;  %v7852_v39 = vpop.f32.mrb[10].mxu1  ;;  %10399 = vmatpush1.bf16.msra.mxu0 %v16650_v14  ;;  %10440 = vmatpush1.bf16.msra.mxu1 %v16653_v23  ;;  %v16706_v14 = vld [vmem:[%s20968_s7 + $0x1344] ss:$16 sps:$4 sm:$0xff]   ;;  %v16709_v23 = vld [vmem:[%s20968_s7 + $0x134c] ss:$16 sps:$4 sm:$0xff]  }
 0x6f7   : > { %v7812_v60 = vpop.f32.mrb[219].mxu0  ;;  %v7853_v35 = vpop.f32.mrb[11].mxu1  ;;  %10400 = vmatprep.subr.bf16.mxu0 %v16658_v25  ;;  %10441 = vmatprep.subr.bf16.mxu1 %v16661_v7  ;;  %v16704_v5 = vld [vmem:[%s20968_s7 + $0x1340] ss:$16 sps:$4 sm:$0xff]   ;;  %v16707_v39 = vld [vmem:[%s20968_s7 + $0x1348] ss:$16 sps:$4 sm:$0xff]  }
 0x6f8   : > { %v16712_v60 = vld [vmem:[%s20968_s7 + $0x1364] ss:$16 sps:$4 sm:$0xff]   ;;  %v16715_v35 = vld [vmem:[%s20968_s7 + $0x136c] ss:$16 sps:$4 sm:$0xff]  }
 0x6fa   : > { %10401 = vmatpush1.bf16.msra.mxu0 %v16656_v27  ;;  %10442 = vmatpush1.bf16.msra.mxu1 %v16659_v28 }
 0x6fb   : > { %10402 = vmatprep.subr.bf16.mxu0 %v16664_v31  ;;  %10443 = vmatprep.subr.bf16.mxu1 %v16667_v54  ;;  %v16710_v31 = vld [vmem:[%s20968_s7 + $0x1360] ss:$16 sps:$4 sm:$0xff]   ;;  %v16713_v54 = vld [vmem:[%s20968_s7 + $0x1368] ss:$16 sps:$4 sm:$0xff]  }
 0x6fe   : > { %10403 = vmatpush1.bf16.msra.mxu0 %v16662_v63  ;;  %10444 = vmatpush1.bf16.msra.mxu1 %v16665_v15  ;;  %v16718_v63 = vld [vmem:[%s20968_s7 + $0x1384] ss:$16 sps:$4 sm:$0xff]   ;;  %v16721_v15 = vld [vmem:[%s20968_s7 + $0x138c] ss:$16 sps:$4 sm:$0xff]  }
 0x6ff   : > { %10583 = vmatprep.subr.bf16.mxu0 %v16670_v34  ;;  %10624 = vmatprep.subr.bf16.mxu1 %v16673_v32  ;;  %v16716_v34 = vld [vmem:[%s20968_s7 + $0x1380] ss:$16 sps:$4 sm:$0xff]   ;;  %v16719_v32 = vld [vmem:[%s20968_s7 + $0x1388] ss:$16 sps:$4 sm:$0xff]  }
 0x701   : > { %14395 = vmatmul.mubr.msk.bf16.vlgmr.msra.gmra.mrb[16].mxu0 %vm1452_vm1, %v10312_v2  ;;  %14396 = vmatmul.mubr.msk.bf16.vlgmr.msra.gmra.mrb[64].mxu1 %vm1452_vm1, %v10312_v2  ;;  %v16727_v2 = vld [vmem:[%s20968_s7 + $0x13ac] ss:$16 sps:$4 sm:$0xff]  }
 0x702   : > { %10584 = vmatpush1.bf16.msra.mxu0 %v16668_v10  ;;  %10625 = vmatpush1.bf16.msra.mxu1 %v16671_v53  ;;  %v10686_v10 = vrot.slane %v20303_v59, 2  ;;  %v16724_v53 = vld [vmem:[%s20968_s7 + $0x13a4] ss:$16 sps:$4 sm:$0xff]  }
 0x703   : > { %10585 = vmatprep.subr.bf16.mxu0 %v16676_v4  ;;  %10626 = vmatprep.subr.bf16.mxu1 %v16679_v43  ;;  %v16722_v4 = vld [vmem:[%s20968_s7 + $0x13a0] ss:$16 sps:$4 sm:$0xff]   ;;  %v16725_v43 = vld [vmem:[%s20968_s7 + $0x13a8] ss:$16 sps:$4 sm:$0xff]  }
 0x704   : > { %v7993_v29 = vpop.f32.mrb[220].mxu0  ;;  %v8034_v51 = vpop.f32.mrb[12].mxu1  ;;  %10615 = vmatprep.mubr.bf16.mxu0 %v16974_v42  ;;  %10656 = vmatprep.mubr.bf16.mxu1 %v16974_v42 }
 0x705   : > { %v8041_v41 = vadd.f32 %v7993_v29, %v7855_v19  ;;  %v8043_v9 = vadd.f32 %v8034_v51, %v7857_v8  ;;  %v7995_v16 = vpop.f32.mrb[221].mxu0  ;;  %v8036_v13 = vpop.f32.mrb[13].mxu1 }
 0x706   : > { %v8042_v47 = vadd.f32 %v7995_v16, %v7856_v37  ;;  %v8044_v36 = vadd.f32 %v8036_v13, %v7858_v62  ;;  %v7997_v20 = vpop.f32.mrb[222].mxu0  ;;  %v8038_v26 = vpop.f32.mrb[14].mxu1  ;;  %10586 = vmatpush1.bf16.msra.mxu0 %v16674_v45  ;;  %10627 = vmatpush1.bf16.msra.mxu1 %v16677_v3  ;;  %v16730_v45 = vld [vmem:[%s20968_s7 + $0x13c4] ss:$16 sps:$4 sm:$0xff]   ;;  %v16733_v3 = vld [vmem:[%s20968_s7 + $0x13cc] ss:$16 sps:$4 sm:$0xff]  }
 0x707   : > { %v7998_v57 = vpop.f32.mrb[223].mxu0  ;;  %v8039_v44 = vpop.f32.mrb[15].mxu1  ;;  %10587 = vmatprep.subr.bf16.mxu0 %v16682_v38  ;;  %10628 = vmatprep.subr.bf16.mxu1 %v16685_v55  ;;  %v16728_v20 = vld [vmem:[%s20968_s7 + $0x13c0] ss:$16 sps:$4 sm:$0xff]   ;;  %v16731_v26 = vld [vmem:[%s20968_s7 + $0x13c8] ss:$16 sps:$4 sm:$0xff]  }
 0x708   : > { %v16736_v57 = vld [vmem:[%s20968_s7 + $0x13e4] ss:$16 sps:$4 sm:$0xff]   ;;  %v16739_v44 = vld [vmem:[%s20968_s7 + $0x13ec] ss:$16 sps:$4 sm:$0xff]  }
 0x70a   : > { %10588 = vmatpush1.bf16.msra.mxu0 %v16680_v0  ;;  %10629 = vmatpush1.bf16.msra.mxu1 %v16683_v6 }
 0x70b   : > { %10589 = vmatprep.subr.bf16.mxu0 %v16688_v33  ;;  %10630 = vmatprep.subr.bf16.mxu1 %v16691_v56  ;;  %v16734_v33 = vld [vmem:[%s20968_s7 + $0x13e0] ss:$16 sps:$4 sm:$0xff]   ;;  %v16737_v56 = vld [vmem:[%s20968_s7 + $0x13e8] ss:$16 sps:$4 sm:$0xff]  }
 0x70e   : > { %10590 = vmatpush1.bf16.msra.mxu0 %v16686_v49  ;;  %10631 = vmatpush1.bf16.msra.mxu1 %v16689_v58  ;;  %v16742_v49 = vld [vmem:[%s20968_s7 + $0x1404] ss:$16 sps:$4 sm:$0xff]   ;;  %v16745_v58 = vld [vmem:[%s20968_s7 + $0x140c] ss:$16 sps:$4 sm:$0xff]  }
 0x70f   : > { %10770 = vmatprep.subr.bf16.mxu0 %v16694_v40  ;;  %10811 = vmatprep.subr.bf16.mxu1 %v16697_v11  ;;  %v16740_v40 = vld [vmem:[%s20968_s7 + $0x1400] ss:$16 sps:$4 sm:$0xff]   ;;  %v16743_v11 = vld [vmem:[%s20968_s7 + $0x1408] ss:$16 sps:$4 sm:$0xff]  }
 0x711   : > { %14429 = vmatmul.mubr.msk.bf16.vlgmr.msra.gmra.mrb[20].mxu0 %vm1452_vm1, %v10499_v21  ;;  %14430 = vmatmul.mubr.msk.bf16.vlgmr.msra.gmra.mrb[68].mxu1 %vm1452_vm1, %v10499_v21  ;;  %v16751_v21 = vld [vmem:[%s20968_s7 + $0x142c] ss:$16 sps:$4 sm:$0xff]  }
 0x712   : > { %10771 = vmatpush1.bf16.msra.mxu0 %v16692_v24  ;;  %10812 = vmatpush1.bf16.msra.mxu1 %v16695_v46  ;;  %v10873_v24 = vrot.slane %v18467_v22, 3  ;;  %v16748_v46 = vld [vmem:[%s20968_s7 + $0x1424] ss:$16 sps:$4 sm:$0xff]  }
 0x713   : > { %10772 = vmatprep.subr.bf16.mxu0 %v16700_v52  ;;  %10813 = vmatprep.subr.bf16.mxu1 %v16703_v17  ;;  %v16746_v52 = vld [vmem:[%s20968_s7 + $0x1420] ss:$16 sps:$4 sm:$0xff]   ;;  %v16749_v17 = vld [vmem:[%s20968_s7 + $0x1428] ss:$16 sps:$4 sm:$0xff]  }
 0x714   : > { %v8181_v25 = vpop.f32.mrb[224].mxu0  ;;  %v8222_v7 = vpop.f32.mrb[16].mxu1  ;;  %10802 = vmatprep.mubr.bf16.mxu0 %v16974_v42  ;;  %10843 = vmatprep.mubr.bf16.mxu1 %v16974_v42 }
 0x715   : > { %v8229_v1 = vadd.f32 %v8181_v25, %v8041_v41  ;;  %v8231_v30 = vadd.f32 %v8222_v7, %v8043_v9  ;;  %v8183_v19 = vpop.f32.mrb[225].mxu0  ;;  %v8224_v8 = vpop.f32.mrb[17].mxu1 }
 0x716   : > { %v8230_v48 = vadd.f32 %v8183_v19, %v8042_v47  ;;  %v8232_v18 = vadd.f32 %v8224_v8, %v8044_v36  ;;  %v8185_v37 = vpop.f32.mrb[226].mxu0  ;;  %v8226_v62 = vpop.f32.mrb[18].mxu1  ;;  %10773 = vmatpush1.bf16.msra.mxu0 %v16698_v61  ;;  %10814 = vmatpush1.bf16.msra.mxu1 %v16701_v12  ;;  %v16754_v61 = vld [vmem:[%s20968_s7 + $0x1444] ss:$16 sps:$4 sm:$0xff]   ;;  %v16757_v12 = vld [vmem:[%s20968_s7 + $0x144c] ss:$16 sps:$4 sm:$0xff]  }
 0x717   : > { %v8186_v27 = vpop.f32.mrb[227].mxu0  ;;  %v8227_v28 = vpop.f32.mrb[19].mxu1  ;;  %10774 = vmatprep.subr.bf16.mxu0 %v16706_v14  ;;  %10815 = vmatprep.subr.bf16.mxu1 %v16709_v23  ;;  %v16752_v37 = vld [vmem:[%s20968_s7 + $0x1440] ss:$16 sps:$4 sm:$0xff]   ;;  %v16755_v62 = vld [vmem:[%s20968_s7 + $0x1448] ss:$16 sps:$4 sm:$0xff]  }
 0x718   : > { %v16760_v27 = vld [vmem:[%s20968_s7 + $0x1464] ss:$16 sps:$4 sm:$0xff]   ;;  %v16763_v28 = vld [vmem:[%s20968_s7 + $0x146c] ss:$16 sps:$4 sm:$0xff]  }
 0x71a   : > { %10775 = vmatpush1.bf16.msra.mxu0 %v16704_v5  ;;  %10816 = vmatpush1.bf16.msra.mxu1 %v16707_v39 }
 0x71b   : > { %10776 = vmatprep.subr.bf16.mxu0 %v16712_v60  ;;  %10817 = vmatprep.subr.bf16.mxu1 %v16715_v35  ;;  %v16758_v60 = vld [vmem:[%s20968_s7 + $0x1460] ss:$16 sps:$4 sm:$0xff]   ;;  %v16761_v35 = vld [vmem:[%s20968_s7 + $0x1468] ss:$16 sps:$4 sm:$0xff]  }
 0x71e   : > { %10777 = vmatpush1.bf16.msra.mxu0 %v16710_v31  ;;  %10818 = vmatpush1.bf16.msra.mxu1 %v16713_v54  ;;  %v16766_v31 = vld [vmem:[%s20968_s7 + $0x1484] ss:$16 sps:$4 sm:$0xff]   ;;  %v16769_v54 = vld [vmem:[%s20968_s7 + $0x148c] ss:$16 sps:$4 sm:$0xff]  }
 0x71f   : > { %10957 = vmatprep.subr.bf16.mxu0 %v16718_v63  ;;  %10998 = vmatprep.subr.bf16.mxu1 %v16721_v15  ;;  %v16764_v63 = vld [vmem:[%s20968_s7 + $0x1480] ss:$16 sps:$4 sm:$0xff]   ;;  %v16767_v15 = vld [vmem:[%s20968_s7 + $0x1488] ss:$16 sps:$4 sm:$0xff]  }
 0x721   : > { %14463 = vmatmul.mubr.msk.bf16.vlgmr.msra.gmra.mrb[24].mxu0 %vm1452_vm1, %v10686_v10  ;;  %14464 = vmatmul.mubr.msk.bf16.vlgmr.msra.gmra.mrb[72].mxu1 %vm1452_vm1, %v10686_v10  ;;  %v16775_v10 = vld [vmem:[%s20968_s7 + $0x14ac] ss:$16 sps:$4 sm:$0xff]  }
 0x722   : > { %10958 = vmatpush1.bf16.msra.mxu0 %v16716_v34  ;;  %10999 = vmatpush1.bf16.msra.mxu1 %v16719_v32  ;;  %v11060_v34 = vrot.slane %v20303_v59, 3  ;;  %v16772_v32 = vld [vmem:[%s20968_s7 + $0x14a4] ss:$16 sps:$4 sm:$0xff]  }
 0x723   : > { %10959 = vmatprep.subr.bf16.mxu0 %v16724_v53  ;;  %11000 = vmatprep.subr.bf16.mxu1 %v16727_v2  ;;  %v16770_v53 = vld [vmem:[%s20968_s7 + $0x14a0] ss:$16 sps:$4 sm:$0xff]   ;;  %v16773_v2 = vld [vmem:[%s20968_s7 + $0x14a8] ss:$16 sps:$4 sm:$0xff]  }
 0x724   : > { %v8369_v38 = vpop.f32.mrb[228].mxu0  ;;  %v8410_v55 = vpop.f32.mrb[20].mxu1  ;;  %10989 = vmatprep.mubr.bf16.mxu0 %v16974_v42  ;;  %11030 = vmatprep.mubr.bf16.mxu1 %v16974_v42 }
 0x725   : > { %v8417_v29 = vadd.f32 %v8369_v38, %v8229_v1  ;;  %v8419_v51 = vadd.f32 %v8410_v55, %v8231_v30  ;;  %v8371_v41 = vpop.f32.mrb[229].mxu0  ;;  %v8412_v9 = vpop.f32.mrb[21].mxu1 }
 0x726   : > { %v8418_v16 = vadd.f32 %v8371_v41, %v8230_v48  ;;  %v8420_v13 = vadd.f32 %v8412_v9, %v8232_v18  ;;  %v8373_v47 = vpop.f32.mrb[230].mxu0  ;;  %v8414_v36 = vpop.f32.mrb[22].mxu1  ;;  %10960 = vmatpush1.bf16.msra.mxu0 %v16722_v4  ;;  %11001 = vmatpush1.bf16.msra.mxu1 %v16725_v43  ;;  %v16778_v4 = vld [vmem:[%s20968_s7 + $0x14c4] ss:$16 sps:$4 sm:$0xff]   ;;  %v16781_v43 = vld [vmem:[%s20968_s7 + $0x14cc] ss:$16 sps:$4 sm:$0xff]  }
 0x727   : > { %v8374_v0 = vpop.f32.mrb[231].mxu0  ;;  %v8415_v6 = vpop.f32.mrb[23].mxu1  ;;  %10961 = vmatprep.subr.bf16.mxu0 %v16730_v45  ;;  %11002 = vmatprep.subr.bf16.mxu1 %v16733_v3  ;;  %v16776_v47 = vld [vmem:[%s20968_s7 + $0x14c0] ss:$16 sps:$4 sm:$0xff]   ;;  %v16779_v36 = vld [vmem:[%s20968_s7 + $0x14c8] ss:$16 sps:$4 sm:$0xff]  }
 0x728   : > { %v16784_v0 = vld [vmem:[%s20968_s7 + $0x14e4] ss:$16 sps:$4 sm:$0xff]   ;;  %v16787_v6 = vld [vmem:[%s20968_s7 + $0x14ec] ss:$16 sps:$4 sm:$0xff]  }
 0x72a   : > { %10962 = vmatpush1.bf16.msra.mxu0 %v16728_v20  ;;  %11003 = vmatpush1.bf16.msra.mxu1 %v16731_v26 }
 0x72b   : > { %10963 = vmatprep.subr.bf16.mxu0 %v16736_v57  ;;  %11004 = vmatprep.subr.bf16.mxu1 %v16739_v44  ;;  %v16782_v57 = vld [vmem:[%s20968_s7 + $0x14e0] ss:$16 sps:$4 sm:$0xff]   ;;  %v16785_v44 = vld [vmem:[%s20968_s7 + $0x14e8] ss:$16 sps:$4 sm:$0xff]  }
 0x72e   : > { %10964 = vmatpush1.bf16.msra.mxu0 %v16734_v33  ;;  %11005 = vmatpush1.bf16.msra.mxu1 %v16737_v56  ;;  %v16790_v33 = vld [vmem:[%s20968_s7 + $0x1504] ss:$16 sps:$4 sm:$0xff]   ;;  %v16793_v56 = vld [vmem:[%s20968_s7 + $0x150c] ss:$16 sps:$4 sm:$0xff]  }
 0x72f   : > { %11144 = vmatprep.subr.bf16.mxu0 %v16742_v49  ;;  %11185 = vmatprep.subr.bf16.mxu1 %v16745_v58  ;;  %v16788_v49 = vld [vmem:[%s20968_s7 + $0x1500] ss:$16 sps:$4 sm:$0xff]   ;;  %v16791_v58 = vld [vmem:[%s20968_s7 + $0x1508] ss:$16 sps:$4 sm:$0xff]  }
 0x731   : > { %14497 = vmatmul.mubr.msk.bf16.vlgmr.msra.gmra.mrb[28].mxu0 %vm1452_vm1, %v10873_v24  ;;  %14498 = vmatmul.mubr.msk.bf16.vlgmr.msra.gmra.mrb[76].mxu1 %vm1452_vm1, %v10873_v24  ;;  %v16799_v24 = vld [vmem:[%s20968_s7 + $0x152c] ss:$16 sps:$4 sm:$0xff]  }
 0x732   : > { %11145 = vmatpush1.bf16.msra.mxu0 %v16740_v40  ;;  %11186 = vmatpush1.bf16.msra.mxu1 %v16743_v11  ;;  %v11247_v40 = vrot.slane %v18467_v22, 4  ;;  %v16796_v11 = vld [vmem:[%s20968_s7 + $0x1524] ss:$16 sps:$4 sm:$0xff]  }
 0x733   : > { %11146 = vmatprep.subr.bf16.mxu0 %v16748_v46  ;;  %11187 = vmatprep.subr.bf16.mxu1 %v16751_v21  ;;  %v16794_v46 = vld [vmem:[%s20968_s7 + $0x1520] ss:$16 sps:$4 sm:$0xff]   ;;  %v16797_v21 = vld [vmem:[%s20968_s7 + $0x1528] ss:$16 sps:$4 sm:$0xff]  }
 0x734   : > { %v8556_v14 = vpop.f32.mrb[232].mxu0  ;;  %v8597_v23 = vpop.f32.mrb[24].mxu1  ;;  %11176 = vmatprep.mubr.bf16.mxu0 %v16974_v42  ;;  %11217 = vmatprep.mubr.bf16.mxu1 %v16974_v42 }
 0x735   : > { %v8604_v25 = vadd.f32 %v8556_v14, %v8417_v29  ;;  %v8606_v7 = vadd.f32 %v8597_v23, %v8419_v51  ;;  %v8558_v1 = vpop.f32.mrb[233].mxu0  ;;  %v8599_v30 = vpop.f32.mrb[25].mxu1 }
 0x736   : > { %v8605_v19 = vadd.f32 %v8558_v1, %v8418_v16  ;;  %v8607_v8 = vadd.f32 %v8599_v30, %v8420_v13  ;;  %v8560_v48 = vpop.f32.mrb[234].mxu0  ;;  %v8601_v18 = vpop.f32.mrb[26].mxu1  ;;  %11147 = vmatpush1.bf16.msra.mxu0 %v16746_v52  ;;  %11188 = vmatpush1.bf16.msra.mxu1 %v16749_v17  ;;  %v16802_v52 = vld [vmem:[%s20968_s7 + $0x1544] ss:$16 sps:$4 sm:$0xff]   ;;  %v16805_v17 = vld [vmem:[%s20968_s7 + $0x154c] ss:$16 sps:$4 sm:$0xff]  }
 0x737   : > { %v8561_v5 = vpop.f32.mrb[235].mxu0  ;;  %v8602_v39 = vpop.f32.mrb[27].mxu1  ;;  %11148 = vmatprep.subr.bf16.mxu0 %v16754_v61  ;;  %11189 = vmatprep.subr.bf16.mxu1 %v16757_v12  ;;  %v16800_v48 = vld [vmem:[%s20968_s7 + $0x1540] ss:$16 sps:$4 sm:$0xff]   ;;  %v16803_v18 = vld [vmem:[%s20968_s7 + $0x1548] ss:$16 sps:$4 sm:$0xff]  }
 0x738   : > { %v16808_v5 = vld [vmem:[%s20968_s7 + $0x1564] ss:$16 sps:$4 sm:$0xff]   ;;  %v16811_v39 = vld [vmem:[%s20968_s7 + $0x156c] ss:$16 sps:$4 sm:$0xff]  }
 0x73a   : > { %11149 = vmatpush1.bf16.msra.mxu0 %v16752_v37  ;;  %11190 = vmatpush1.bf16.msra.mxu1 %v16755_v62 }
 0x73b   : > { %11150 = vmatprep.subr.bf16.mxu0 %v16760_v27  ;;  %11191 = vmatprep.subr.bf16.mxu1 %v16763_v28  ;;  %v16806_v27 = vld [vmem:[%s20968_s7 + $0x1560] ss:$16 sps:$4 sm:$0xff]   ;;  %v16809_v28 = vld [vmem:[%s20968_s7 + $0x1568] ss:$16 sps:$4 sm:$0xff]  }
 0x73e   : > { %11151 = vmatpush1.bf16.msra.mxu0 %v16758_v60  ;;  %11192 = vmatpush1.bf16.msra.mxu1 %v16761_v35  ;;  %v16814_v60 = vld [vmem:[%s20968_s7 + $0x1584] ss:$16 sps:$4 sm:$0xff]   ;;  %v16817_v35 = vld [vmem:[%s20968_s7 + $0x158c] ss:$16 sps:$4 sm:$0xff]  }
 0x73f   : > { %11331 = vmatprep.subr.bf16.mxu0 %v16766_v31  ;;  %11372 = vmatprep.subr.bf16.mxu1 %v16769_v54  ;;  %v16812_v31 = vld [vmem:[%s20968_s7 + $0x1580] ss:$16 sps:$4 sm:$0xff]   ;;  %v16815_v54 = vld [vmem:[%s20968_s7 + $0x1588] ss:$16 sps:$4 sm:$0xff]  }
 0x741   : > { %14531 = vmatmul.mubr.msk.bf16.vlgmr.msra.gmra.mrb[32].mxu0 %vm1452_vm1, %v11060_v34  ;;  %14532 = vmatmul.mubr.msk.bf16.vlgmr.msra.gmra.mrb[80].mxu1 %vm1452_vm1, %v11060_v34  ;;  %v16823_v34 = vld [vmem:[%s20968_s7 + $0x15ac] ss:$16 sps:$4 sm:$0xff]  }
 0x742   : > { %11332 = vmatpush1.bf16.msra.mxu0 %v16764_v63  ;;  %11373 = vmatpush1.bf16.msra.mxu1 %v16767_v15  ;;  %v11434_v63 = vrot.slane %v18467_v22, 6  ;;  %v16820_v15 = vld [vmem:[%s20968_s7 + $0x15a4] ss:$16 sps:$4 sm:$0xff]  }
 0x743   : > { %11333 = vmatprep.subr.bf16.mxu0 %v16772_v32  ;;  %11374 = vmatprep.subr.bf16.mxu1 %v16775_v10  ;;  %v16818_v32 = vld [vmem:[%s20968_s7 + $0x15a0] ss:$16 sps:$4 sm:$0xff]   ;;  %v16821_v10 = vld [vmem:[%s20968_s7 + $0x15a8] ss:$16 sps:$4 sm:$0xff]  }
 0x744   : > { %v8743_v45 = vpop.f32.mrb[236].mxu0  ;;  %v8784_v3 = vpop.f32.mrb[28].mxu1  ;;  %11363 = vmatprep.mubr.bf16.mxu0 %v16974_v42  ;;  %11404 = vmatprep.mubr.bf16.mxu1 %v16974_v42 }
 0x745   : > { %v8791_v38 = vadd.f32 %v8743_v45, %v8604_v25  ;;  %v8793_v55 = vadd.f32 %v8784_v3, %v8606_v7  ;;  %v8745_v29 = vpop.f32.mrb[237].mxu0  ;;  %v8786_v51 = vpop.f32.mrb[29].mxu1 }
 0x746   : > { %v8792_v41 = vadd.f32 %v8745_v29, %v8605_v19  ;;  %v8794_v9 = vadd.f32 %v8786_v51, %v8607_v8  ;;  %v8747_v16 = vpop.f32.mrb[238].mxu0  ;;  %v8788_v13 = vpop.f32.mrb[30].mxu1  ;;  %11334 = vmatpush1.bf16.msra.mxu0 %v16770_v53  ;;  %11375 = vmatpush1.bf16.msra.mxu1 %v16773_v2  ;;  %v16826_v53 = vld [vmem:[%s20968_s7 + $0x15c4] ss:$16 sps:$4 sm:$0xff]   ;;  %v16829_v2 = vld [vmem:[%s20968_s7 + $0x15cc] ss:$16 sps:$4 sm:$0xff]  }
 0x747   : > { %v8748_v20 = vpop.f32.mrb[239].mxu0  ;;  %v8789_v26 = vpop.f32.mrb[31].mxu1  ;;  %11335 = vmatprep.subr.bf16.mxu0 %v16778_v4  ;;  %11376 = vmatprep.subr.bf16.mxu1 %v16781_v43  ;;  %v16824_v16 = vld [vmem:[%s20968_s7 + $0x15c0] ss:$16 sps:$4 sm:$0xff]   ;;  %v16827_v13 = vld [vmem:[%s20968_s7 + $0x15c8] ss:$16 sps:$4 sm:$0xff]  }
 0x748   : > { %v16832_v20 = vld [vmem:[%s20968_s7 + $0x15e4] ss:$16 sps:$4 sm:$0xff]   ;;  %v16835_v26 = vld [vmem:[%s20968_s7 + $0x15ec] ss:$16 sps:$4 sm:$0xff]  }
 0x74a   : > { %11336 = vmatpush1.bf16.msra.mxu0 %v16776_v47  ;;  %11377 = vmatpush1.bf16.msra.mxu1 %v16779_v36 }
 0x74b   : > { %11337 = vmatprep.subr.bf16.mxu0 %v16784_v0  ;;  %11378 = vmatprep.subr.bf16.mxu1 %v16787_v6  ;;  %v16830_v0 = vld [vmem:[%s20968_s7 + $0x15e0] ss:$16 sps:$4 sm:$0xff]   ;;  %v16833_v6 = vld [vmem:[%s20968_s7 + $0x15e8] ss:$16 sps:$4 sm:$0xff]  }
 0x74e   : > { %11338 = vmatpush1.bf16.msra.mxu0 %v16782_v57  ;;  %11379 = vmatpush1.bf16.msra.mxu1 %v16785_v44  ;;  %v16838_v57 = vld [vmem:[%s20968_s7 + $0x1604] ss:$16 sps:$4 sm:$0xff]   ;;  %v16841_v44 = vld [vmem:[%s20968_s7 + $0x160c] ss:$16 sps:$4 sm:$0xff]  }
 0x74f   : > { %11518 = vmatprep.subr.bf16.mxu0 %v16790_v33  ;;  %11559 = vmatprep.subr.bf16.mxu1 %v16793_v56  ;;  %v16836_v33 = vld [vmem:[%s20968_s7 + $0x1600] ss:$16 sps:$4 sm:$0xff]   ;;  %v16839_v56 = vld [vmem:[%s20968_s7 + $0x1608] ss:$16 sps:$4 sm:$0xff]  }
 0x751   : > { %14565 = vmatmul.mubr.msk.bf16.vlgmr.msra.gmra.mrb[36].mxu0 %vm1452_vm1, %v11247_v40  ;;  %14566 = vmatmul.mubr.msk.bf16.vlgmr.msra.gmra.mrb[84].mxu1 %vm1452_vm1, %v11247_v40  ;;  %v16847_v40 = vld [vmem:[%s20968_s7 + $0x162c] ss:$16 sps:$4 sm:$0xff]  }
 0x752   : > { %11519 = vmatpush1.bf16.msra.mxu0 %v16788_v49  ;;  %11560 = vmatpush1.bf16.msra.mxu1 %v16791_v58  ;;  %v11621_v49 = vrot.slane %v20303_v59, 6  ;;  %v16844_v58 = vld [vmem:[%s20968_s7 + $0x1624] ss:$16 sps:$4 sm:$0xff]  }
 0x753   : > { %11520 = vmatprep.subr.bf16.mxu0 %v16796_v11  ;;  %11561 = vmatprep.subr.bf16.mxu1 %v16799_v24  ;;  %v16842_v11 = vld [vmem:[%s20968_s7 + $0x1620] ss:$16 sps:$4 sm:$0xff]   ;;  %v16845_v24 = vld [vmem:[%s20968_s7 + $0x1628] ss:$16 sps:$4 sm:$0xff]  }
 0x754   : > { %v8930_v61 = vpop.f32.mrb[240].mxu0  ;;  %v8971_v12 = vpop.f32.mrb[32].mxu1  ;;  %11550 = vmatprep.mubr.bf16.mxu0 %v16974_v42  ;;  %11591 = vmatprep.mubr.bf16.mxu1 %v16974_v42 }
 0x755   : > { %v8978_v14 = vadd.f32 %v8930_v61, %v8791_v38  ;;  %v8980_v23 = vadd.f32 %v8971_v12, %v8793_v55  ;;  %v8932_v25 = vpop.f32.mrb[241].mxu0  ;;  %v8973_v7 = vpop.f32.mrb[33].mxu1 }
 0x756   : > { %v8979_v1 = vadd.f32 %v8932_v25, %v8792_v41  ;;  %v8981_v30 = vadd.f32 %v8973_v7, %v8794_v9  ;;  %v8934_v19 = vpop.f32.mrb[242].mxu0  ;;  %v8975_v8 = vpop.f32.mrb[34].mxu1  ;;  %11521 = vmatpush1.bf16.msra.mxu0 %v16794_v46  ;;  %11562 = vmatpush1.bf16.msra.mxu1 %v16797_v21  ;;  %v16850_v46 = vld [vmem:[%s20968_s7 + $0x1644] ss:$16 sps:$4 sm:$0xff]   ;;  %v16853_v21 = vld [vmem:[%s20968_s7 + $0x164c] ss:$16 sps:$4 sm:$0xff]  }
 0x757   : > { %v8935_v37 = vpop.f32.mrb[243].mxu0  ;;  %v8976_v62 = vpop.f32.mrb[35].mxu1  ;;  %11522 = vmatprep.subr.bf16.mxu0 %v16802_v52  ;;  %11563 = vmatprep.subr.bf16.mxu1 %v16805_v17  ;;  %v16848_v19 = vld [vmem:[%s20968_s7 + $0x1640] ss:$16 sps:$4 sm:$0xff]   ;;  %v16851_v8 = vld [vmem:[%s20968_s7 + $0x1648] ss:$16 sps:$4 sm:$0xff]  }
 0x758   : > { %v16856_v37 = vld [vmem:[%s20968_s7 + $0x1664] ss:$16 sps:$4 sm:$0xff]   ;;  %v16859_v62 = vld [vmem:[%s20968_s7 + $0x166c] ss:$16 sps:$4 sm:$0xff]  }
 0x75a   : > { %11523 = vmatpush1.bf16.msra.mxu0 %v16800_v48  ;;  %11564 = vmatpush1.bf16.msra.mxu1 %v16803_v18 }
 0x75b   : > { %11524 = vmatprep.subr.bf16.mxu0 %v16808_v5  ;;  %11565 = vmatprep.subr.bf16.mxu1 %v16811_v39  ;;  %v16854_v5 = vld [vmem:[%s20968_s7 + $0x1660] ss:$16 sps:$4 sm:$0xff]   ;;  %v16857_v39 = vld [vmem:[%s20968_s7 + $0x1668] ss:$16 sps:$4 sm:$0xff]  }
 0x75e   : > { %11525 = vmatpush1.bf16.msra.mxu0 %v16806_v27  ;;  %11566 = vmatpush1.bf16.msra.mxu1 %v16809_v28  ;;  %v16862_v27 = vld [vmem:[%s20968_s7 + $0x1684] ss:$16 sps:$4 sm:$0xff]   ;;  %v16865_v28 = vld [vmem:[%s20968_s7 + $0x168c] ss:$16 sps:$4 sm:$0xff]  }
 0x75f   : > { %11705 = vmatprep.subr.bf16.mxu0 %v16814_v60  ;;  %11746 = vmatprep.subr.bf16.mxu1 %v16817_v35  ;;  %v16860_v60 = vld [vmem:[%s20968_s7 + $0x1680] ss:$16 sps:$4 sm:$0xff]   ;;  %v16863_v35 = vld [vmem:[%s20968_s7 + $0x1688] ss:$16 sps:$4 sm:$0xff]  }
 0x761   : > { %14599 = vmatmul.mubr.msk.bf16.vlgmr.msra.gmra.mrb[40].mxu0 %vm1452_vm1, %v11434_v63  ;;  %14600 = vmatmul.mubr.msk.bf16.vlgmr.msra.gmra.mrb[88].mxu1 %vm1452_vm1, %v11434_v63  ;;  %v16871_v63 = vld [vmem:[%s20968_s7 + $0x16ac] ss:$16 sps:$4 sm:$0xff]  }
 0x762   : > { %11706 = vmatpush1.bf16.msra.mxu0 %v16812_v31  ;;  %11747 = vmatpush1.bf16.msra.mxu1 %v16815_v54  ;;  %v11808_v31 = vrot.slane %v18467_v22, 7  ;;  %v16868_v54 = vld [vmem:[%s20968_s7 + $0x16a4] ss:$16 sps:$4 sm:$0xff]   ;;  %v16866_v22 = vld [vmem:[%s20968_s7 + $0x16a0] ss:$16 sps:$4 sm:$0xff]  }
 0x763   : > { %11707 = vmatprep.subr.bf16.mxu0 %v16820_v15  ;;  %11748 = vmatprep.subr.bf16.mxu1 %v16823_v34  ;;  %v16869_v15 = vld [vmem:[%s20968_s7 + $0x16a8] ss:$16 sps:$4 sm:$0xff]   ;;  %v16874_v34 = vld [vmem:[%s20968_s7 + $0x16c4] ss:$16 sps:$4 sm:$0xff]  }
 0x764   : > { %v9117_v4 = vpop.f32.mrb[244].mxu0  ;;  %v9158_v43 = vpop.f32.mrb[36].mxu1  ;;  %11737 = vmatprep.mubr.bf16.mxu0 %v16974_v42  ;;  %11778 = vmatprep.mubr.bf16.mxu1 %v16974_v42 }
 0x765   : > { %v9165_v45 = vadd.f32 %v9117_v4, %v8978_v14  ;;  %v9167_v3 = vadd.f32 %v9158_v43, %v8980_v23  ;;  %v9119_v38 = vpop.f32.mrb[245].mxu0  ;;  %v9160_v55 = vpop.f32.mrb[37].mxu1 }
 0x766   : > { %v9166_v29 = vadd.f32 %v9119_v38, %v8979_v1  ;;  %v9168_v51 = vadd.f32 %v9160_v55, %v8981_v30  ;;  %v9121_v41 = vpop.f32.mrb[246].mxu0  ;;  %v9162_v9 = vpop.f32.mrb[38].mxu1  ;;  %11708 = vmatpush1.bf16.msra.mxu0 %v16818_v32  ;;  %11749 = vmatpush1.bf16.msra.mxu1 %v16821_v10  ;;  %v16877_v32 = vld [vmem:[%s20968_s7 + $0x16cc] ss:$16 sps:$4 sm:$0xff]  }
 0x767   : > { %v9122_v47 = vpop.f32.mrb[247].mxu0  ;;  %v9163_v36 = vpop.f32.mrb[39].mxu1  ;;  %11709 = vmatprep.subr.bf16.mxu0 %v16826_v53  ;;  %11750 = vmatprep.subr.bf16.mxu1 %v16829_v2  ;;  %v16875_v41 = vld [vmem:[%s20968_s7 + $0x16c8] ss:$16 sps:$4 sm:$0xff]  }
 0x768   : > { %v16883_v47 = vld [vmem:[%s20968_s7 + $0x16ec] ss:$16 sps:$4 sm:$0xff]   ;;  %v16878_v36 = vld [vmem:[%s20968_s7 + $0x16e0] ss:$16 sps:$4 sm:$0xff]  }
 0x76a   : > { %11710 = vmatpush1.bf16.msra.mxu0 %v16824_v16  ;;  %11751 = vmatpush1.bf16.msra.mxu1 %v16827_v13  ;;  %v16880_v13 = vld [vmem:[%s20968_s7 + $0x16e4] ss:$16 sps:$4 sm:$0xff]  }
 0x76b   : > { %11711 = vmatprep.subr.bf16.mxu0 %v16832_v20  ;;  %11752 = vmatprep.subr.bf16.mxu1 %v16835_v26  ;;  %v16881_v20 = vld [vmem:[%s20968_s7 + $0x16e8] ss:$16 sps:$4 sm:$0xff]   ;;  %v16886_v26 = vld [vmem:[%s20968_s7 + $0x1704] ss:$16 sps:$4 sm:$0xff]  }
 0x76e   : > { %11712 = vmatpush1.bf16.msra.mxu0 %v16830_v0  ;;  %11753 = vmatpush1.bf16.msra.mxu1 %v16833_v6  ;;  %v16889_v0 = vld [vmem:[%s20968_s7 + $0x170c] ss:$16 sps:$4 sm:$0xff]   ;;  %v16884_v6 = vld [vmem:[%s20968_s7 + $0x1700] ss:$16 sps:$4 sm:$0xff]  }
 0x76f   : > { %11892 = vmatprep.subr.bf16.mxu0 %v16838_v57  ;;  %11933 = vmatprep.subr.bf16.mxu1 %v16841_v44  ;;  %v16887_v57 = vld [vmem:[%s20968_s7 + $0x1708] ss:$16 sps:$4 sm:$0xff]   ;;  %v11995_v44 = vrot.slane %v20303_v59, 7  ;;  %v16890_v59 = vld [vmem:[%s20968_s7 + $0x1720] ss:$16 sps:$4 sm:$0xff]  }
 0x771   : > { %14633 = vmatmul.mubr.msk.bf16.vlgmr.msra.gmra.mrb[44].mxu0 %vm1452_vm1, %v11621_v49  ;;  %14634 = vmatmul.mubr.msk.bf16.vlgmr.msra.gmra.mrb[92].mxu1 %vm1452_vm1, %v11621_v49  ;;  %v16893_v49 = vld [vmem:[%s20968_s7 + $0x1728] ss:$16 sps:$4 sm:$0xff]  }
 0x772   : > { %11893 = vmatpush1.bf16.msra.mxu0 %v16836_v33  ;;  %11934 = vmatpush1.bf16.msra.mxu1 %v16839_v56  ;;  %v16892_v33 = vld [vmem:[%s20968_s7 + $0x1724] ss:$16 sps:$4 sm:$0xff]   ;;  %v16895_v56 = vld [vmem:[%s20968_s7 + $0x172c] ss:$16 sps:$4 sm:$0xff]  }
 0x773   : > { %11894 = vmatprep.subr.bf16.mxu0 %v16844_v58  ;;  %11935 = vmatprep.subr.bf16.mxu1 %v16847_v40  ;;  %v16898_v58 = vld [vmem:[%s20968_s7 + $0x1744] ss:$16 sps:$4 sm:$0xff]   ;;  %v16901_v40 = vld [vmem:[%s20968_s7 + $0x174c] ss:$16 sps:$4 sm:$0xff]  }
 0x774   : > { %v9304_v52 = vpop.f32.mrb[248].mxu0  ;;  %v9345_v17 = vpop.f32.mrb[40].mxu1  ;;  %11924 = vmatprep.mubr.bf16.mxu0 %v16974_v42  ;;  %11965 = vmatprep.mubr.bf16.mxu1 %v16974_v42 }
 0x775   : > { %v9352_v61 = vadd.f32 %v9304_v52, %v9165_v45  ;;  %v9354_v12 = vadd.f32 %v9345_v17, %v9167_v3  ;;  %v9306_v14 = vpop.f32.mrb[249].mxu0  ;;  %v9347_v23 = vpop.f32.mrb[41].mxu1 }
 0x776   : > { %v9353_v25 = vadd.f32 %v9306_v14, %v9166_v29  ;;  %v9355_v7 = vadd.f32 %v9347_v23, %v9168_v51  ;;  %v9308_v1 = vpop.f32.mrb[250].mxu0  ;;  %v9349_v30 = vpop.f32.mrb[42].mxu1  ;;  %11895 = vmatpush1.bf16.msra.mxu0 %v16842_v11  ;;  %11936 = vmatpush1.bf16.msra.mxu1 %v16845_v24  ;;  %v16872_v51 = vld [vmem:[%s20968_s7 + $0x16c0] ss:$16 sps:$4 sm:$0xff]  }
 0x777   : > { %v9309_v48 = vpop.f32.mrb[251].mxu0  ;;  %v9350_v18 = vpop.f32.mrb[43].mxu1  ;;  %11896 = vmatprep.subr.bf16.mxu0 %v16850_v46  ;;  %11937 = vmatprep.subr.bf16.mxu1 %v16853_v21 }
 0x778   : > { %v16902_v48 = vld [vmem:[%s20968_s7 + $0x1760] ss:$16 sps:$4 sm:$0xff]   ;;  %v16905_v18 = vld [vmem:[%s20968_s7 + $0x1768] ss:$16 sps:$4 sm:$0xff]  }
 0x77a   : > { %11897 = vmatpush1.bf16.msra.mxu0 %v16848_v19  ;;  %11938 = vmatpush1.bf16.msra.mxu1 %v16851_v8  ;;  %v16904_v19 = vld [vmem:[%s20968_s7 + $0x1764] ss:$16 sps:$4 sm:$0xff]   ;;  %v16907_v8 = vld [vmem:[%s20968_s7 + $0x176c] ss:$16 sps:$4 sm:$0xff]  }
 0x77b   : > { %11898 = vmatprep.subr.bf16.mxu0 %v16856_v37  ;;  %11939 = vmatprep.subr.bf16.mxu1 %v16859_v62  ;;  %v3558_v37 = vmax.f32 %v18483_v50, 0.0  ;;  %v16910_v62 = vld [vmem:[%s20968_s7 + $0x1784] ss:$16 sps:$4 sm:$0xff]   ;;  %v16911_v50 = vld [vmem:[%s20968_s7 + $0x1788] ss:$16 sps:$4 sm:$0xff]  }
 0x77e   : > { %11899 = vmatpush1.bf16.msra.mxu0 %v16854_v5  ;;  %11940 = vmatpush1.bf16.msra.mxu1 %v16857_v39  ;;  %v16913_v5 = vld [vmem:[%s20968_s7 + $0x178c] ss:$16 sps:$4 sm:$0xff]   ;;  %v16908_v39 = vld [vmem:[%s20968_s7 + $0x1780] ss:$16 sps:$4 sm:$0xff]  }
 0x77f   : > { %12079 = vmatprep.subr.bf16.mxu0 %v16862_v27  ;;  %12120 = vmatprep.subr.bf16.mxu1 %v16865_v28  ;;  %v20848_v27 = vpack.c.bf16 %v3558_v37, %v3558_v37  ;;  %v16916_v28 = vld [vmem:[%s20968_s7 + $0x17a4] ss:$16 sps:$4 sm:$0xff]  }
 0x781   : > { %14667 = vmatmul.mubr.msk.bf16.vlgmr.msra.gmra.mrb[48].mxu0 %vm1452_vm1, %v11808_v31  ;;  %14668 = vmatmul.mubr.msk.bf16.vlgmr.msra.gmra.mrb[96].mxu1 %vm1452_vm1, %v11808_v31  ;;  %v16917_v31 = vld [vmem:[%s20968_s7 + $0x17a8] ss:$16 sps:$4 sm:$0xff]  }
 0x782   : > { %12080 = vmatpush1.bf16.msra.mxu0 %v16860_v60  ;;  %12121 = vmatpush1.bf16.msra.mxu1 %v16863_v35  ;;  %v16919_v60 = vld [vmem:[%s20968_s7 + $0x17ac] ss:$16 sps:$4 sm:$0xff]   ;;  %v16914_v35 = vld [vmem:[%s20968_s7 + $0x17a0] ss:$16 sps:$4 sm:$0xff]  }
 0x783   : > { %12081 = vmatprep.subr.bf16.mxu0 %v16868_v54  ;;  %12122 = vmatprep.subr.bf16.mxu1 %v16871_v63  ;;  %v16922_v54 = vld [vmem:[%s20968_s7 + $0x17c4] ss:$16 sps:$4 sm:$0xff]   ;;  %v16925_v63 = vld [vmem:[%s20968_s7 + $0x17cc] ss:$16 sps:$4 sm:$0xff]  }
 0x784   : > { %v9491_v10 = vpop.f32.mrb[252].mxu0  ;;  %v9532_v53 = vpop.f32.mrb[44].mxu1  ;;  %12111 = vmatprep.mubr.bf16.mxu0 %v16974_v42  ;;  %12152 = vmatprep.mubr.bf16.mxu1 %v16974_v42 }
 0x785   : > { %v9539_v2 = vadd.f32 %v9491_v10, %v9352_v61  ;;  %v9541_v4 = vadd.f32 %v9532_v53, %v9354_v12  ;;  %v9493_v43 = vpop.f32.mrb[253].mxu0  ;;  %v9534_v45 = vpop.f32.mrb[45].mxu1 }
 0x786   : > { %v9540_v3 = vadd.f32 %v9493_v43, %v9353_v25  ;;  %v9542_v38 = vadd.f32 %v9534_v45, %v9355_v7  ;;  %v9495_v55 = vpop.f32.mrb[254].mxu0  ;;  %v9536_v29 = vpop.f32.mrb[46].mxu1  ;;  %12082 = vmatpush1.bf16.msra.mxu0 %v16866_v22  ;;  %12123 = vmatpush1.bf16.msra.mxu1 %v16869_v15  ;;  %v16896_v25 = vld [vmem:[%s20968_s7 + $0x1740] ss:$16 sps:$4 sm:$0xff]   ;;  %v16899_v7 = vld [vmem:[%s20968_s7 + $0x1748] ss:$16 sps:$4 sm:$0xff]  }
 0x787   : > { %v9496_v9 = vpop.f32.mrb[255].mxu0  ;;  %v9537_v16 = vpop.f32.mrb[47].mxu1  ;;  %12083 = vmatprep.subr.bf16.mxu0 %v16874_v34  ;;  %12124 = vmatprep.subr.bf16.mxu1 %v16877_v32 }
 0x788   : > { %v16926_v9 = vld [vmem:[%s20968_s7 + $0x17e0] ss:$16 sps:$4 sm:$0xff]   ;;  %v16929_v16 = vld [vmem:[%s20968_s7 + $0x17e8] ss:$16 sps:$4 sm:$0xff]  }
 0x78a   : > { %12084 = vmatpush1.bf16.msra.mxu0 %v16872_v51  ;;  %12125 = vmatpush1.bf16.msra.mxu1 %v16875_v41  ;;  %v16928_v51 = vld [vmem:[%s20968_s7 + $0x17e4] ss:$16 sps:$4 sm:$0xff]   ;;  %v16931_v41 = vld [vmem:[%s20968_s7 + $0x17ec] ss:$16 sps:$4 sm:$0xff]  }
 0x78b   : > { %12085 = vmatprep.subr.bf16.mxu0 %v16880_v13  ;;  %12126 = vmatprep.subr.bf16.mxu1 %v16883_v47  ;;  %v16934_v13 = vld [vmem:[%s20968_s7 + $0x1804] ss:$16 sps:$4 sm:$0xff]   ;;  %v16937_v47 = vld [vmem:[%s20968_s7 + $0x180c] ss:$16 sps:$4 sm:$0xff]  }
 0x78e   : > { %12086 = vmatpush1.bf16.msra.mxu0 %v16878_v36  ;;  %12127 = vmatpush1.bf16.msra.mxu1 %v16881_v20  ;;  %v16932_v36 = vld [vmem:[%s20968_s7 + $0x1800] ss:$16 sps:$4 sm:$0xff]   ;;  %v16935_v20 = vld [vmem:[%s20968_s7 + $0x1808] ss:$16 sps:$4 sm:$0xff]  }
 0x78f   : > { %12265 = vmatprep.subr.bf16.mxu0 %v16886_v26  ;;  %12306 = vmatprep.subr.bf16.mxu1 %v16889_v0  ;;  %v12368_v26 = vshrl.u32 %v20848_v27, 16  ;;  %v16940_v0 = vld [vmem:[%s20968_s7 + $0x1824] ss:$16 sps:$4 sm:$0xff]  }
 0x791   : > { %14701 = vmatmul.mubr.msk.bf16.vlgmr.msra.gmra.mrb[52].mxu0 %vm1452_vm1, %v11995_v44  ;;  %14702 = vmatmul.mubr.msk.bf16.vlgmr.msra.gmra.mrb[100].mxu1 %vm1452_vm1, %v11995_v44  ;;  %v16941_v44 = vld [vmem:[%s20968_s7 + $0x1828] ss:$16 sps:$4 sm:$0xff]  }
 0x792   : > { %12266 = vmatpush1.bf16.msra.mxu0 %v16884_v6  ;;  %12307 = vmatpush1.bf16.msra.mxu1 %v16887_v57  ;;  %v16943_v6 = vld [vmem:[%s20968_s7 + $0x182c] ss:$16 sps:$4 sm:$0xff]   ;;  %v16938_v57 = vld [vmem:[%s20968_s7 + $0x1820] ss:$16 sps:$4 sm:$0xff]  }
 0x793   : > { %12267 = vmatprep.subr.bf16.mxu0 %v16892_v33  ;;  %12308 = vmatprep.subr.bf16.mxu1 %v16895_v56  ;;  %v16946_v33 = vld [vmem:[%s20968_s7 + $0x1844] ss:$16 sps:$4 sm:$0xff]   ;;  %v16949_v56 = vld [vmem:[%s20968_s7 + $0x184c] ss:$16 sps:$4 sm:$0xff]  }
 0x794   : > { %v9678_v11 = vpop.f32.mrb[0].mxu0  ;;  %v9719_v24 = vpop.f32.mrb[48].mxu1  ;;  %12297 = vmatprep.mubr.bf16.mxu0 %v16974_v42  ;;  %12338 = vmatprep.mubr.bf16.mxu1 %v16974_v42 }
 0x795   : > { %v9726_v46 = vadd.f32 %v9678_v11, %v9539_v2  ;;  %v9728_v21 = vadd.f32 %v9719_v24, %v9541_v4  ;;  %v9680_v52 = vpop.f32.mrb[1].mxu0  ;;  %v9721_v17 = vpop.f32.mrb[49].mxu1 }
 0x796   : > { %v9727_v61 = vadd.f32 %v9680_v52, %v9540_v3  ;;  %v9729_v12 = vadd.f32 %v9721_v17, %v9542_v38  ;;  %v9682_v14 = vpop.f32.mrb[2].mxu0  ;;  %v9723_v23 = vpop.f32.mrb[50].mxu1  ;;  %12268 = vmatpush1.bf16.msra.mxu0 %v16890_v59  ;;  %12309 = vmatpush1.bf16.msra.mxu1 %v16893_v49  ;;  %v16920_v3 = vld [vmem:[%s20968_s7 + $0x17c0] ss:$16 sps:$4 sm:$0xff]   ;;  %v16923_v38 = vld [vmem:[%s20968_s7 + $0x17c8] ss:$16 sps:$4 sm:$0xff]  }
 0x797   : > { %v9683_v1 = vpop.f32.mrb[3].mxu0  ;;  %v9724_v30 = vpop.f32.mrb[51].mxu1  ;;  %12269 = vmatprep.subr.bf16.mxu0 %v16898_v58  ;;  %12310 = vmatprep.subr.bf16.mxu1 %v16901_v40  ;;  %v16952_v23 = vld [vmem:[%s20968_s7 + $0x1864] ss:$16 sps:$4 sm:$0xff]  }
 0x798   : > { %v16953_v1 = vld [vmem:[%s20968_s7 + $0x1868] ss:$16 sps:$4 sm:$0xff]   ;;  %v12557_v30 = vrot.slane %v20848_v27, 1 }
 0x79a   : > { %12270 = vmatpush1.bf16.msra.mxu0 %v16896_v25  ;;  %12311 = vmatpush1.bf16.msra.mxu1 %v16899_v7  ;;  %v16955_v25 = vld [vmem:[%s20968_s7 + $0x186c] ss:$16 sps:$4 sm:$0xff]   ;;  %v16950_v7 = vld [vmem:[%s20968_s7 + $0x1860] ss:$16 sps:$4 sm:$0xff]  }
 0x79b   : > { %12271 = vmatprep.subr.bf16.mxu0 %v16904_v19  ;;  %12312 = vmatprep.subr.bf16.mxu1 %v16907_v8 }
 0x79e   : > { %12272 = vmatpush1.bf16.msra.mxu0 %v16902_v48  ;;  %12313 = vmatpush1.bf16.msra.mxu1 %v16905_v18 }
 0x79f   : > { %12453 = vmatprep.subr.bf16.mxu0 %v16910_v62  ;;  %12494 = vmatprep.subr.bf16.mxu1 %v16913_v5 }
 0x7a1   : > { %14735 = vmatmul.mubr.msk.bf16.vlgmr.msra.gmra.mrb[56].mxu0 %vm1452_vm1, %v20848_v27  ;;  %14736 = vmatmul.mubr.msk.bf16.vlgmr.msra.gmra.mrb[104].mxu1 %vm1452_vm1, %v20848_v27 }
 0x7a2   : > { %12454 = vmatpush1.bf16.msra.mxu0 %v16908_v39  ;;  %12495 = vmatpush1.bf16.msra.mxu1 %v16911_v50 }
 0x7a3   : > { %12455 = vmatprep.subr.bf16.mxu0 %v16916_v28  ;;  %12496 = vmatprep.subr.bf16.mxu1 %v16919_v60 }
 0x7a4   : > { %v9865_v22 = vpop.f32.mrb[4].mxu0  ;;  %v9906_v15 = vpop.f32.mrb[52].mxu1  ;;  %12485 = vmatprep.mubr.bf16.mxu0 %v16974_v42  ;;  %12526 = vmatprep.mubr.bf16.mxu1 %v16974_v42 }
 0x7a5   : > { %v9913_v34 = vadd.f32 %v9865_v22, %v9726_v46  ;;  %v9915_v32 = vadd.f32 %v9906_v15, %v9728_v21  ;;  %v9867_v10 = vpop.f32.mrb[5].mxu0  ;;  %v9908_v53 = vpop.f32.mrb[53].mxu1 }
 0x7a6   : > { %v9914_v2 = vadd.f32 %v9867_v10, %v9727_v61  ;;  %v9916_v4 = vadd.f32 %v9908_v53, %v9729_v12  ;;  %v9869_v43 = vpop.f32.mrb[6].mxu0  ;;  %v9910_v45 = vpop.f32.mrb[54].mxu1  ;;  %12456 = vmatpush1.bf16.msra.mxu0 %v16914_v35  ;;  %12497 = vmatpush1.bf16.msra.mxu1 %v16917_v31  ;;  %v16944_v61 = vld [vmem:[%s20968_s7 + $0x1840] ss:$16 sps:$4 sm:$0xff]   ;;  %v16947_v12 = vld [vmem:[%s20968_s7 + $0x1848] ss:$16 sps:$4 sm:$0xff]  }
 0x7a7   : > { %v9870_v55 = vpop.f32.mrb[7].mxu0  ;;  %v9911_v29 = vpop.f32.mrb[55].mxu1  ;;  %12457 = vmatprep.subr.bf16.mxu0 %v16922_v54  ;;  %12498 = vmatprep.subr.bf16.mxu1 %v16925_v63 }
 0x7aa   : > { %12458 = vmatpush1.bf16.msra.mxu0 %v16920_v3  ;;  %12499 = vmatpush1.bf16.msra.mxu1 %v16923_v38 }
 0x7ab   : > { %12459 = vmatprep.subr.bf16.mxu0 %v16928_v51  ;;  %12500 = vmatprep.subr.bf16.mxu1 %v16931_v41 }
 0x7ae   : > { %12460 = vmatpush1.bf16.msra.mxu0 %v16926_v9  ;;  %12501 = vmatpush1.bf16.msra.mxu1 %v16929_v16 }
 0x7af   : > { %12641 = vmatprep.subr.bf16.mxu0 %v16934_v13  ;;  %12682 = vmatprep.subr.bf16.mxu1 %v16937_v47 }
 0x7b1   : > { %14769 = vmatmul.mubr.msk.bf16.vlgmr.msra.gmra.mrb[60].mxu0 %vm1452_vm1, %v12368_v26  ;;  %14770 = vmatmul.mubr.msk.bf16.vlgmr.msra.gmra.mrb[108].mxu1 %vm1452_vm1, %v12368_v26 }
 0x7b2   : > { %12642 = vmatpush1.bf16.msra.mxu0 %v16932_v36  ;;  %12683 = vmatpush1.bf16.msra.mxu1 %v16935_v20 }
 0x7b3   : > { %12643 = vmatprep.subr.bf16.mxu0 %v16940_v0  ;;  %12684 = vmatprep.subr.bf16.mxu1 %v16943_v6 }
 0x7b4   : > { %v10052_v59 = vpop.f32.mrb[8].mxu0  ;;  %v10093_v49 = vpop.f32.mrb[56].mxu1  ;;  %12673 = vmatprep.mubr.bf16.mxu0 %v16974_v42  ;;  %12714 = vmatprep.mubr.bf16.mxu1 %v16974_v42 }
 0x7b5   : > { %v10100_v58 = vadd.f32 %v10052_v59, %v9913_v34  ;;  %v10102_v40 = vadd.f32 %v10093_v49, %v9915_v32  ;;  %v10054_v11 = vpop.f32.mrb[9].mxu0  ;;  %v10095_v24 = vpop.f32.mrb[57].mxu1 }
 0x7b6   : > { %v10101_v46 = vadd.f32 %v10054_v11, %v9914_v2  ;;  %v10103_v21 = vadd.f32 %v10095_v24, %v9916_v4  ;;  %v10056_v52 = vpop.f32.mrb[10].mxu0  ;;  %v10097_v17 = vpop.f32.mrb[58].mxu1  ;;  %12644 = vmatpush1.bf16.msra.mxu0 %v16938_v57  ;;  %12685 = vmatpush1.bf16.msra.mxu1 %v16941_v44 }
 0x7b7   : > { %v10057_v14 = vpop.f32.mrb[11].mxu0  ;;  %v10098_v42 = vpop.f32.mrb[59].mxu1  ;;  %12645 = vmatprep.subr.bf16.mxu0 %v16946_v33  ;;  %12686 = vmatprep.subr.bf16.mxu1 %v16949_v56 }
 0x7ba   : > { %12646 = vmatpush1.bf16.msra.mxu0 %v16944_v61  ;;  %12687 = vmatpush1.bf16.msra.mxu1 %v16947_v12 }
 0x7bb   : > { %12647 = vmatprep.subr.bf16.mxu0 %v16952_v23  ;;  %12688 = vmatprep.subr.bf16.mxu1 %v16955_v25 }
 0x7be   : > { %12648 = vmatpush1.bf16.msra.mxu0 %v16950_v7  ;;  %12689 = vmatpush1.bf16.msra.mxu1 %v16953_v1 }
 0x7c1   : > { %14803 = vmatmul.mubr.msk.bf16.vlgmr.msra.gmra.mrb[64].mxu0 %vm1452_vm1, %v12557_v30  ;;  %14804 = vmatmul.mubr.msk.bf16.vlgmr.msra.gmra.mrb[112].mxu1 %vm1452_vm1, %v12557_v30 }
 0x7c4   : > { %v10240_v19 = vpop.f32.mrb[12].mxu0  ;;  %v10281_v8 = vpop.f32.mrb[60].mxu1 }
 0x7c5   : > { %v10288_v48 = vadd.f32 %v10240_v19, %v10100_v58  ;;  %v10290_v18 = vadd.f32 %v10281_v8, %v10102_v40  ;;  %v10242_v37 = vpop.f32.mrb[13].mxu0  ;;  %v10283_v62 = vpop.f32.mrb[61].mxu1 }
 0x7c6   : > { %v10289_v5 = vadd.f32 %v10242_v37, %v10101_v46  ;;  %v10291_v39 = vadd.f32 %v10283_v62, %v10103_v21  ;;  %v10244_v50 = vpop.f32.mrb[14].mxu0  ;;  %v10285_v28 = vpop.f32.mrb[62].mxu1 }
 0x7c7   : > { %v10245_v60 = vpop.f32.mrb[15].mxu0  ;;  %v10286_v35 = vpop.f32.mrb[63].mxu1 }
 0x7d4   : > { %v10430_v31 = vpop.f32.mrb[16].mxu0  ;;  %v10471_v54 = vpop.f32.mrb[64].mxu1 }
 0x7d5   : > { %v10478_v63 = vadd.f32 %v10430_v31, %v10288_v48  ;;  %v10480_v27 = vadd.f32 %v10471_v54, %v10290_v18  ;;  %v10432_v22 = vpop.f32.mrb[17].mxu0  ;;  %v10473_v15 = vpop.f32.mrb[65].mxu1 }
 0x7d6   : > { %v10479_v34 = vadd.f32 %v10432_v22, %v10289_v5  ;;  %v10481_v32 = vadd.f32 %v10473_v15, %v10291_v39  ;;  %v10434_v10 = vpop.f32.mrb[18].mxu0  ;;  %v10475_v53 = vpop.f32.mrb[66].mxu1 }
 0x7d7   : > { %v10435_v2 = vpop.f32.mrb[19].mxu0  ;;  %v10476_v4 = vpop.f32.mrb[67].mxu1 }
 0x7e4   : > { %v10617_v43 = vpop.f32.mrb[20].mxu0  ;;  %v10658_v45 = vpop.f32.mrb[68].mxu1 }
 0x7e5   : > { %v10665_v3 = vadd.f32 %v10617_v43, %v10478_v63  ;;  %v10667_v38 = vadd.f32 %v10658_v45, %v10480_v27  ;;  %v10619_v55 = vpop.f32.mrb[21].mxu0  ;;  %v10660_v29 = vpop.f32.mrb[69].mxu1 }
 0x7e6   : > { %v10666_v51 = vadd.f32 %v10619_v55, %v10479_v34  ;;  %v10668_v41 = vadd.f32 %v10660_v29, %v10481_v32  ;;  %v10621_v9 = vpop.f32.mrb[22].mxu0  ;;  %v10662_v16 = vpop.f32.mrb[70].mxu1 }
 0x7e7   : > { %v10622_v13 = vpop.f32.mrb[23].mxu0  ;;  %v10663_v47 = vpop.f32.mrb[71].mxu1 }
 0x7f4   : > { %v10804_v36 = vpop.f32.mrb[24].mxu0  ;;  %v10845_v20 = vpop.f32.mrb[72].mxu1 }
 0x7f5   : > { %v10852_v26 = vadd.f32 %v10804_v36, %v10665_v3  ;;  %v10854_v0 = vadd.f32 %v10845_v20, %v10667_v38  ;;  %v10806_v6 = vpop.f32.mrb[25].mxu0  ;;  %v10847_v57 = vpop.f32.mrb[73].mxu1 }
 0x7f6   : > { %v10853_v44 = vadd.f32 %v10806_v6, %v10666_v51  ;;  %v10855_v33 = vadd.f32 %v10847_v57, %v10668_v41  ;;  %v10808_v56 = vpop.f32.mrb[26].mxu0  ;;  %v10849_v59 = vpop.f32.mrb[74].mxu1 }
 0x7f7   : > { %v10809_v49 = vpop.f32.mrb[27].mxu0  ;;  %v10850_v58 = vpop.f32.mrb[75].mxu1 }
 0x804   : > { %v10991_v40 = vpop.f32.mrb[28].mxu0  ;;  %v11032_v11 = vpop.f32.mrb[76].mxu1 }
 0x805   : > { %v11039_v24 = vadd.f32 %v10991_v40, %v10852_v26  ;;  %v11041_v46 = vadd.f32 %v11032_v11, %v10854_v0  ;;  %v10993_v21 = vpop.f32.mrb[29].mxu0  ;;  %v11034_v52 = vpop.f32.mrb[77].mxu1 }
 0x806   : > { %v11040_v17 = vadd.f32 %v10993_v21, %v10853_v44  ;;  %v11042_v61 = vadd.f32 %v11034_v52, %v10855_v33  ;;  %v10995_v12 = vpop.f32.mrb[30].mxu0  ;;  %v11036_v14 = vpop.f32.mrb[78].mxu1 }
 0x807   : > { %v10996_v42 = vpop.f32.mrb[31].mxu0  ;;  %v11037_v23 = vpop.f32.mrb[79].mxu1 }
 0x814   : > { %v11178_v25 = vpop.f32.mrb[32].mxu0  ;;  %v11219_v7 = vpop.f32.mrb[80].mxu1 }
 0x815   : > { %v11226_v1 = vadd.f32 %v11178_v25, %v11039_v24  ;;  %v11228_v30 = vadd.f32 %v11219_v7, %v11041_v46  ;;  %v11180_v19 = vpop.f32.mrb[33].mxu0  ;;  %v11221_v8 = vpop.f32.mrb[81].mxu1 }
 0x816   : > { %v11227_v48 = vadd.f32 %v11180_v19, %v11040_v17  ;;  %v11229_v18 = vadd.f32 %v11221_v8, %v11042_v61  ;;  %v11182_v37 = vpop.f32.mrb[34].mxu0  ;;  %v11223_v62 = vpop.f32.mrb[82].mxu1 }
 0x817   : > { %v11183_v5 = vpop.f32.mrb[35].mxu0  ;;  %v11224_v39 = vpop.f32.mrb[83].mxu1 }
 0x824   : > { %v11365_v50 = vpop.f32.mrb[36].mxu0  ;;  %v11406_v28 = vpop.f32.mrb[84].mxu1 }
 0x825   : > { %v11413_v60 = vadd.f32 %v11365_v50, %v11226_v1  ;;  %v11415_v35 = vadd.f32 %v11406_v28, %v11228_v30  ;;  %v11367_v31 = vpop.f32.mrb[37].mxu0  ;;  %v11408_v54 = vpop.f32.mrb[85].mxu1 }
 0x826   : > { %v11414_v63 = vadd.f32 %v11367_v31, %v11227_v48  ;;  %v11416_v27 = vadd.f32 %v11408_v54, %v11229_v18  ;;  %v11369_v22 = vpop.f32.mrb[38].mxu0  ;;  %v11410_v15 = vpop.f32.mrb[86].mxu1 }
 0x827   : > { %v11370_v34 = vpop.f32.mrb[39].mxu0  ;;  %v11411_v32 = vpop.f32.mrb[87].mxu1 }
 0x834   : > { %v11552_v10 = vpop.f32.mrb[40].mxu0  ;;  %v11593_v53 = vpop.f32.mrb[88].mxu1 }
 0x835   : > { %v11600_v2 = vadd.f32 %v11552_v10, %v11413_v60  ;;  %v11602_v4 = vadd.f32 %v11593_v53, %v11415_v35  ;;  %v11554_v43 = vpop.f32.mrb[41].mxu0  ;;  %v11595_v45 = vpop.f32.mrb[89].mxu1 }
 0x836   : > { %v11601_v3 = vadd.f32 %v11554_v43, %v11414_v63  ;;  %v11603_v38 = vadd.f32 %v11595_v45, %v11416_v27  ;;  %v11556_v55 = vpop.f32.mrb[42].mxu0  ;;  %v11597_v29 = vpop.f32.mrb[90].mxu1 }
 0x837   : > { %v11557_v51 = vpop.f32.mrb[43].mxu0  ;;  %v11598_v41 = vpop.f32.mrb[91].mxu1  ;;  %v12729_v55 = vlaneseq }
 0x839   : > { %v12730_v29 = vshrl.u32 %v12729_v55, 7 }
 0x83b   : > { %v12731_v51 = vsub.s32 0, %v12730_v29  ;;  %v12739_v41 = vsub.s32 2, %v12730_v29 }
 0x844   : > { %v11739_v9 = vpop.f32.mrb[44].mxu0  ;;  %v11780_v16 = vpop.f32.mrb[92].mxu1 }
 0x845   : > { %v11787_v13 = vadd.f32 %v11739_v9, %v11600_v2  ;;  %v11789_v47 = vadd.f32 %v11780_v16, %v11602_v4  ;;  %v11741_v36 = vpop.f32.mrb[45].mxu0  ;;  %v11782_v20 = vpop.f32.mrb[93].mxu1  ;;  %v12727_v9 = vld [vmem:[%s20969_s8] sm:$0xf]  ;;  %v12735_v16 = vsub.s32 1, %v12730_v29 }
 0x846   : > { %v11788_v26 = vadd.f32 %v11741_v36, %v11601_v3  ;;  %v11790_v0 = vadd.f32 %v11782_v20, %v11603_v38  ;;  %v11743_v6 = vpop.f32.mrb[46].mxu0  ;;  %v11784_v57 = vpop.f32.mrb[94].mxu1  ;;  %v12740_v36 = vrot.slane %v12727_v9, %v12739_v41 }
 0x847   : > { %v11744_v44 = vpop.f32.mrb[47].mxu0  ;;  %v11785_v33 = vpop.f32.mrb[95].mxu1  ;;  %v12736_v6 = vrot.slane %v12727_v9, %v12735_v16 }
 0x854   : > { %v11926_v56 = vpop.f32.mrb[48].mxu0  ;;  %v11967_v59 = vpop.f32.mrb[96].mxu1 }
 0x855   : > { %v11974_v49 = vadd.f32 %v11926_v56, %v11787_v13  ;;  %v11976_v58 = vadd.f32 %v11967_v59, %v11789_v47  ;;  %v11928_v40 = vpop.f32.mrb[49].mxu0  ;;  %v11969_v11 = vpop.f32.mrb[97].mxu1  ;;  %v12743_v13 = vsub.s32 3, %v12730_v29  ;;  %v12732_v47 = vrot.slane %v12727_v9, %v12731_v51 }
 0x856   : > { %v11975_v24 = vadd.f32 %v11928_v40, %v11788_v26  ;;  %v11977_v46 = vadd.f32 %v11969_v11, %v11790_v0  ;;  %v11930_v21 = vpop.f32.mrb[50].mxu0  ;;  %v11971_v52 = vpop.f32.mrb[98].mxu1  ;;  %v12757_v26 = vld [vmem:[%s20970_s9] sm:$0xf] }
 0x857   : > { %v11931_v17 = vpop.f32.mrb[51].mxu0  ;;  %v11972_v61 = vpop.f32.mrb[99].mxu1  ;;  %v12744_v57 = vrot.slane %v12727_v9, %v12743_v13 }
 0x858   : > { %v12770_v61 = vrot.slane %v12757_v26, %v12739_v41 }
 0x864   : > { %v12113_v12 = vpop.f32.mrb[52].mxu0  ;;  %v12154_v14 = vpop.f32.mrb[100].mxu1 }
 0x865   : > { %v12161_v42 = vadd.f32 %v12113_v12, %v11974_v49  ;;  %v12163_v23 = vadd.f32 %v12154_v14, %v11976_v58  ;;  %v12115_v25 = vpop.f32.mrb[53].mxu0  ;;  %v12156_v7 = vpop.f32.mrb[101].mxu1  ;;  %v12766_v14 = vrot.slane %v12757_v26, %v12735_v16 }
 0x866   : > { %v12162_v1 = vadd.f32 %v12115_v25, %v11975_v24  ;;  %v12164_v30 = vadd.f32 %v12156_v7, %v11977_v46  ;;  %v12117_v19 = vpop.f32.mrb[54].mxu0  ;;  %v12158_v8 = vpop.f32.mrb[102].mxu1  ;;  %v12762_v46 = vrot.slane %v12757_v26, %v12731_v51 }
 0x867   : > { %v12118_v48 = vpop.f32.mrb[55].mxu0  ;;  %v12159_v18 = vpop.f32.mrb[103].mxu1 }
 0x874   : > { %v12299_v37 = vpop.f32.mrb[56].mxu0  ;;  %v12340_v62 = vpop.f32.mrb[104].mxu1 }
 0x875   : > { %v12347_v5 = vadd.f32 %v12299_v37, %v12161_v42  ;;  %v12349_v39 = vadd.f32 %v12340_v62, %v12163_v23  ;;  %v12301_v50 = vpop.f32.mrb[57].mxu0  ;;  %v12342_v28 = vpop.f32.mrb[105].mxu1 }
 0x876   : > { %v12348_v60 = vadd.f32 %v12301_v50, %v12162_v1  ;;  %v12350_v35 = vadd.f32 %v12342_v28, %v12164_v30  ;;  %v12303_v31 = vpop.f32.mrb[58].mxu0  ;;  %v12344_v54 = vpop.f32.mrb[106].mxu1  ;;  %v12774_v30 = vrot.slane %v12757_v26, %v12743_v13 }
 0x877   : > { %v12304_v63 = vpop.f32.mrb[59].mxu0  ;;  %v12345_v27 = vpop.f32.mrb[107].mxu1 }
 0x884   : > { %v12487_v22 = vpop.f32.mrb[60].mxu0  ;;  %v12528_v15 = vpop.f32.mrb[108].mxu1 }
 0x885   : > { %v12535_v34 = vadd.f32 %v12487_v22, %v12347_v5  ;;  %v12537_v32 = vadd.f32 %v12528_v15, %v12349_v39  ;;  %v12489_v10 = vpop.f32.mrb[61].mxu0  ;;  %v12530_v53 = vpop.f32.mrb[109].mxu1 }
 0x886   : > { %v12536_v2 = vadd.f32 %v12489_v10, %v12348_v60  ;;  %v12538_v4 = vadd.f32 %v12530_v53, %v12350_v35  ;;  %v12491_v43 = vpop.f32.mrb[62].mxu0  ;;  %v12532_v45 = vpop.f32.mrb[110].mxu1  ;;  %v12793_v35 = vld [vmem:[#allocation2] sm:$0x1] }
 0x887   : > { %v12492_v3 = vpop.f32.mrb[63].mxu0  ;;  %v12533_v38 = vpop.f32.mrb[111].mxu1 }
 0x894   : > { %v12675_v20 = vpop.f32.mrb[64].mxu0  ;;  %v12716_v0 = vpop.f32.mrb[112].mxu1 }
 0x895   : > { %v12723_v44 = vadd.f32 %v12675_v20, %v12535_v34  ;;  %v12725_v33 = vadd.f32 %v12716_v0, %v12537_v32  ;;  %v12677_v56 = vpop.f32.mrb[65].mxu0  ;;  %v12718_v59 = vpop.f32.mrb[113].mxu1 }
 0x896   : > { %v12724_v49 = vadd.f32 %v12677_v56, %v12536_v2  ;;  %v12726_v58 = vadd.f32 %v12718_v59, %v12538_v4  ;;  %v12679_v40 = vpop.f32.mrb[66].mxu0  ;;  %v12720_v11 = vpop.f32.mrb[114].mxu1 }
 0x897   : > { %v12749_v24 = vadd.f32 %v12732_v47, %v12723_v44  ;;  %v12751_v21 = vadd.f32 %v12740_v36, %v12725_v33  ;;  %v12680_v52 = vpop.f32.mrb[67].mxu0  ;;  %v12721_v17 = vpop.f32.mrb[115].mxu1 }
 0x898   : > { %v12750_v12 = vadd.f32 %v12736_v6, %v12724_v49  ;;  %v12752_v42 = vadd.f32 %v12744_v57, %v12726_v58 }
 0x899   : > { %v12753_v23 = vmax.f32 %v12749_v24, 0.0  ;;  %v12755_v25 = vmax.f32 %v12751_v21, 0.0 }
 0x89a   : > { %v12754_v7 = vmax.f32 %v12750_v12, 0.0  ;;  %v12756_v1 = vmax.f32 %v12752_v42, 0.0 }
 0x89b   : > { %v12779_v19 = vmul.f32 %v12762_v46, %v12753_v23  ;;  %v12781_v8 = vmul.f32 %v12770_v61, %v12755_v25 }
 0x89c   : > { %v12780_v48 = vmul.f32 %v12766_v14, %v12754_v7  ;;  %v12782_v37 = vmul.f32 %v12774_v30, %v12756_v1 }
 0x89d   : > { %v12784_v18 = vsel %vm12783_vm12, %v12779_v19, 0.0  ;;  %v12787_v39 = vsel %vm12783_vm12, %v12781_v8, 0.0 }
 0x89e   : > { %v12785_v62 = vsel %vm12783_vm12, %v12780_v48, 0.0  ;;  %v12789_v28 = vsel %vm12783_vm12, %v12782_v37, 0.0 }
 0x89f   : > { %v12786_v5 = vadd.f32 %v12785_v62, %v12784_v18 }
 0x8a1   : > { %v12788_v50 = vadd.f32 %v12787_v39, %v12786_v5 }
 0x8a3   : > { %v12790_v60 = vadd.f32 %v12789_v28, %v12788_v50 }
 0x8a5   : > { %12791 = vadd.xlane.f32.xlu1 %v12790_v60 }
 0x932   : > { %v12792_v31 = vpop.xlane.xlu1 %12791 }
 0x933   : > { %v12794_v54 = vadd.f32 %v12793_v35, %v12792_v31 }
 0x935   : > { %v12795_v63 = vsub.f32 0.0, %v12794_v54 }
 0x937   : > { %v12796_v27 = vmul.f32 1.442695, %v12795_v63 }
 0x939   : > { %16956 = vpow2.f32 %v12796_v27 }
 0x943   : > { %v16957_v22 = vpop.eup %16956 }
 0x944   : > { %v12798_v15 = vadd.f32 1.0, %v16957_v22 }
 0x946   : > { %16958 = vrcp.f32 %v12798_v15 }
 0x950   : > { %v16959_v34 = vpop.eup %16958 }
 0x951   : > { %12801 = vst.msk [vmem:[%s384_s12] sm:$0x1] %vm12800_vm13, %v16959_v34 }
 0x952 PF: > { %s23_s19 = sadd.s32 1, %s16967_s19  }
 0x953   : > { %p20_p4 = scmp.ge.s32.totalorder %s23_s19, 4  }
 0x955   :  { %22 = sbr.rel (!%p20_p4) target bundleno = 3 (0x3), region = 153 }

</bundles_post_ra>
